<compile_context>
chip_gen: v6e
topology: v6e:2x2x1
jax: 0.10.0
libtpu: 0.0.40
codegen_flags: <defaults>
</compile_context>

<pallas_src>
import numpy as np
import jax
import jax.numpy as jnp
from jax.experimental import pallas as pl
from jax.experimental.pallas import tpu as pltpu


def _round_up(x, m):
    return (x + m - 1) // m * m


# ---------------------------------------------------------------------------
# Parameters (in_channels repaired to match the dataflow - see header TODO).
# ---------------------------------------------------------------------------
def _init_conv(key, cin, cout, kh, kw):
    k1, k2 = jax.random.split(key)
    bound = 1.0 / (cin * kh * kw) ** 0.5
    w = jax.random.uniform(k1, (cout, cin, kh, kw), jnp.float32, -bound, bound)
    b = jax.random.uniform(k2, (cout,), jnp.float32, -bound, bound)
    return w, b


def init_params(key):
    keys = jax.random.split(key, 7)
    return {
        "conv1":  _init_conv(keys[0], 32, 64, 3, 3),    # declared Conv2d(32, 64, 3, s=2)
        "conv1b": _init_conv(keys[1], 64, 64, 3, 3),    # conv1 re-applied to 64-ch v1
        "conv3":  _init_conv(keys[2], 64, 2, 2, 2),     # declared Conv2d(128, 2, 2)
        "conv4":  _init_conv(keys[3], 2, 2, 12, 12),    # declared Conv2d(32, 2, 12, s=4, p=(1,0))
        "conv2":  _init_conv(keys[4], 2, 128, 1, 1),    # declared Conv2d(64, 128, 1)
        "conv5":  _init_conv(keys[5], 128, 2, 1, 2),    # declared Conv2d(2, 2, (1,2), s=5, p=(0,3))
        "conv6":  _init_conv(keys[6], 2, 2, 3, 3),      # declared Conv2d(2, 2, 3, p=1)
    }


# ---------------------------------------------------------------------------
# Pure-XLA reference of the repaired dataflow (for a correctness check only).
# ---------------------------------------------------------------------------
def reference_forward(raw, x_nchw):
    x = jnp.transpose(x_nchw, (0, 2, 3, 1))

    def conv(h, wb, stride, padding):
        w, b = wb
        out = jax.lax.conv_general_dilated(
            h, w, window_strides=stride,
            padding=[(padding[0], padding[0]), (padding[1], padding[1])],
            dimension_numbers=("NHWC", "OIHW", "NHWC"))
        return out + b.reshape(1, 1, 1, -1)

    v1 = conv(x, raw["conv1"], (2, 2), (0, 0))
    v2 = conv(v1, raw["conv1b"], (2, 2), (0, 0))
    v3 = conv(v2, raw["conv3"], (1, 1), (0, 0))
    v9 = jax.nn.sigmoid(jax.nn.sigmoid(jax.nn.sigmoid(v3)))
    v11 = conv(v9, raw["conv4"], (4, 4), (1, 0))
    v13 = conv(v11, raw["conv2"], (1, 1), (0, 0))
    v14 = conv(v13, raw["conv5"], (5, 5), (0, 3))
    v16 = conv(v14, raw["conv6"], (1, 1), (1, 1))
    return jnp.transpose(jax.nn.sigmoid(v16), (0, 3, 1, 2))


# ---------------------------------------------------------------------------
# Fused Pallas model builder.
# ---------------------------------------------------------------------------
def build_model(raw, x_shape):
    N, CIN, H, W = x_shape
    assert N == 1

    # ---- static geometry ---------------------------------------------------
    H1, W1 = (H - 3) // 2 + 1, (W - 3) // 2 + 1            # conv1 out
    H2, W2 = (H1 - 3) // 2 + 1, (W1 - 3) // 2 + 1          # conv1b out
    H3, W3 = H2 - 1, W2 - 1                                # conv3 out
    H4, W4 = (H3 + 2 - 12) // 4 + 1, (W3 - 12) // 4 + 1    # conv4 out (pad (1,0), s=4)
    H5, W5 = (H4 - 1) // 5 + 1, (W4 + 6 - 2) // 5 + 1      # conv5 out (pad (0,3), s=5)
    H6, W6 = H5, W5                                        # conv6 out (pad 1, k 3, s 1)
    assert H4 >= 1 and W4 >= 1, "input too small for conv4"

    # padded 2-D layouts (sublane-friendly: widths are multiples of 8)
    V2H = H2 + 1                                   # conv1b output rows computed
    V2W = _round_up(W2 + 1, 8)                     # conv1b output row stride
    HP = max((H1 + 1) // 2, V2H) + 1               # v1 phase height (with tap overhang)
    WQ = _round_up(max((W1 + 1) // 2 + 1, V2W + 1), 8)   # v1 phase width
    M1 = 4 * HP * WQ                               # conv1 GEMM rows (phase-ordered)
    K1 = 9 * CIN                                   # conv1 GEMM depth
    assert V2W + 1 <= WQ and V2H + 1 <= HP

    # ---- kernel-ready constants (built once, outside jit) -------------------
    w1, b1 = raw["conv1"]
    w2, b2 = raw["conv1b"]
    w3, b3 = raw["conv3"]
    w4, b4 = raw["conv4"]
    wc2, bc2 = raw["conv2"]
    w5, b5 = raw["conv5"]
    w6, b6 = raw["conv6"]

    # conv4 as a dense "unrolled conv matrix" per input channel:
    #   v11[m*2 + d] = b4[d] + sum_c sum_r T4[c, m*2+d, r] * v9_2d[r, c]
    w4n = np.asarray(w4)                                       # (2, 2, 12, 12) OIHW
    t4 = np.zeros((2, H4 * W4 * 2, H3 * V2W), np.float32)
    for p4 in range(H4):
        for q4 in range(W4):
            m = p4 * W4 + q4
            for d in range(2):
                for c in range(2):
                    for i in range(12):
                        for j in range(12):
                            p3 = p4 * 4 + i - 1                # pad_h = 1
                            q = q4 * 4 + j                     # pad_w = 0
                            if 0 <= p3 < H3 and 0 <= q < W3:
                                t4[c, m * 2 + d, p3 * V2W + q] = w4n[d, c, i, j]

    prep = {
        "w1": jnp.asarray(np.transpose(np.asarray(w1), (2, 3, 1, 0)).reshape(K1, 64),
                          dtype=jnp.bfloat16),
        "b1": jnp.asarray(np.asarray(b1).reshape(1, 64), dtype=jnp.float32),
        "w2": jnp.asarray(np.transpose(np.asarray(w2), (2, 3, 1, 0)).reshape(9, 64, 64),
                          dtype=jnp.float32),
        "b2": jnp.asarray(np.asarray(b2).reshape(1, 64), dtype=jnp.float32),
        "w3": jnp.asarray(np.transpose(np.asarray(w3), (2, 3, 1, 0)).reshape(4, 64, 2),
                          dtype=jnp.float32),
        "b3": jnp.asarray(np.asarray(b3).reshape(1, 2), dtype=jnp.float32),
        "t4": jnp.asarray(t4),
        "b4": jnp.asarray(np.tile(np.asarray(b4), H4 * W4).reshape(-1, 1), dtype=jnp.float32),
        "wc2": jnp.asarray(np.asarray(wc2)[:, :, 0, 0], dtype=jnp.float32),       # (128, 2)
        "bc2": jnp.asarray(np.asarray(bc2).reshape(128, 1), dtype=jnp.float32),
        "w5": jnp.asarray(np.transpose(np.asarray(w5), (2, 3, 0, 1)), dtype=jnp.float32),  # (1,2,2,128)
        "b5": jnp.asarray(np.asarray(b5).reshape(2, 1), dtype=jnp.float32),
        "w6": jnp.asarray(np.transpose(np.asarray(w6), (2, 3, 0, 1)), dtype=jnp.float32),  # (3,3,2,2)
        "b6": jnp.asarray(np.asarray(b6).reshape(2, 1), dtype=jnp.float32),
    }
    arg_order = ["w1", "b1", "w2", "b2", "w3", "b3", "t4", "b4",
                 "wc2", "bc2", "w5", "b5", "w6", "b6"]

    # ---- the fused kernel ----------------------------------------------------
    def kernel(p_ref, w1_ref, b1_ref, w2_ref, b2_ref, w3_ref, b3_ref,
               t4_ref, b4_ref, wc2_ref, bc2_ref, w5_ref, b5_ref,
               w6_ref, b6_ref, o_ref):
        f32 = jnp.float32

        # conv1: one MXU GEMM over the phase-ordered im2col patches (bf16 in, f32 acc).
        v1 = jnp.dot(p_ref[...], w1_ref[...], preferred_element_type=f32) + b1_ref[...]
        v1 = v1.reshape(4, HP, WQ, 64)            # tile-preserving: WQ % 8 == 0

        # conv1b (second conv1): 9 taps, each a contiguous slice of the phase-split v1.
        acc2 = jnp.zeros((V2H * V2W, 64), f32)
        for i in range(3):
            for j in range(3):
                ph = (i % 2) * 2 + (j % 2)
                slab = v1[ph, i // 2:i // 2 + V2H, j // 2:j // 2 + V2W, :]
                acc2 = acc2 + jnp.dot(slab.reshape(V2H * V2W, 64), w2_ref[i * 3 + j],
                                      preferred_element_type=f32)
        v2 = acc2 + b2_ref[...]                   # (V2H*V2W, 64), V2W-strided rows

        # conv3 (2x2, s=1) directly on the 2-D row layout, then sigmoid^3.
        acc3 = jnp.zeros((H3 * V2W, 2), f32)
        for i in range(2):
            for j in range(2):
                off = i * V2W + j
                acc3 = acc3 + jnp.dot(v2[off:off + H3 * V2W, :], w3_ref[i * 2 + j],
                                      preferred_element_type=f32)
        v9 = acc3 + b3_ref[...]
        v9 = jax.nn.sigmoid(jax.nn.sigmoid(jax.nn.sigmoid(v9)))   # (H3*V2W, 2)

        # conv4 (12x12, s=4, pad (1,0)) via the per-channel unrolled conv matrices.
        v11 = (jnp.dot(t4_ref[0], v9[:, 0:1], preferred_element_type=f32)
               + jnp.dot(t4_ref[1], v9[:, 1:2], preferred_element_type=f32)
               + b4_ref[...])                     # (H4*W4*2, 1), rows = m*2 + d

        # conv2 (1x1, 2 -> 128): one channel column per spatial position.
        wc2 = wc2_ref[...]
        bc2 = bc2_ref[...]
        v13 = [jnp.dot(wc2, v11[2 * m:2 * m + 2, :], preferred_element_type=f32) + bc2
               for m in range(H4 * W4)]           # each (128, 1)

        # conv5 ((1,2), s=5, pad (0,3)).
        v14 = []
        for p5 in range(H5):
            for q5 in range(W5):
                acc = b5_ref[...]
                for j in range(2):                # kh = 1
                    hi, wi = p5 * 5, q5 * 5 + j - 3
                    if 0 <= hi < H4 and 0 <= wi < W4:
                        acc = acc + jnp.dot(w5_ref[0, j], v13[hi * W4 + wi],
                                            preferred_element_type=f32)
                v14.append(acc)                   # (2, 1)

        # conv6 (3x3, s=1, pad 1) + final sigmoid.
        outs = []
        for p6 in range(H6):
            for q6 in range(W6):
                acc = b6_ref[...]
                for i in range(3):
                    for j in range(3):
                        hi, wi = p6 + i - 1, q6 + j - 1
                        if 0 <= hi < H5 and 0 <= wi < W5:
                            acc = acc + jnp.dot(w6_ref[i, j], v14[hi * W5 + wi],
                                                preferred_element_type=f32)
                outs.append(jax.nn.sigmoid(acc))  # (2, 1)
        o_ref[...] = jnp.concatenate(outs, axis=1)   # (C=2, H6*W6)

    # ---- pallas_call wiring --------------------------------------------------
    def _full(shape):
        return pl.BlockSpec(tuple(shape), lambda i, _s=tuple(shape): (0,) * len(_s))

    in_specs = [_full((M1, K1))] + [_full(prep[k].shape) for k in arg_order]

    flops = 2 * (M1 * K1 * 64 + 9 * V2H * V2W * 64 * 64 + 4 * H3 * V2W * 64 * 2
                 + 2 * (H4 * W4 * 2) * (H3 * V2W) + H4 * W4 * 2 * 128)
    cost = pl.CostEstimate(flops=int(flops),
                           transcendentals=int(3 * H3 * V2W * 2 + 2 * H6 * W6),
                           bytes_accessed=int(M1 * K1 * 2 + 4 * 10 ** 5))

    fused = pl.pallas_call(
        kernel,
        out_shape=jax.ShapeDtypeStruct((2, H6 * W6), jnp.float32),
        grid=(1,),
        in_specs=in_specs,
        out_specs=_full((2, H6 * W6)),
        compiler_params=pltpu.CompilerParams(dimension_semantics=("arbitrary",)),
        cost_estimate=cost,
    )

    # ---- wrapper: phase-ordered im2col for conv1 (one fused XLA op) ----------
    def make_patches(x_nchw):
        x = jnp.transpose(x_nchw, (0, 2, 3, 1))[0].astype(jnp.bfloat16)   # (H, W, CIN)
        cols = [x[i:i + 2 * (H1 - 1) + 1:2, j:j + 2 * (W1 - 1) + 1:2, :]
                for i in range(3) for j in range(3)]
        pf = jnp.concatenate(cols, axis=-1)                                # (H1, W1, K1)
        pf = jnp.pad(pf, ((0, 2 * HP - H1), (0, 2 * WQ - W1), (0, 0)))
        pf = pf.reshape(HP, 2, WQ, 2, K1).transpose(1, 3, 0, 2, 4)         # (a, b, pp, qq, k)
        return pf.reshape(M1, K1)

    def forward(prep_args, x_nchw):
        patches = make_patches(x_nchw)
        out = fused(patches, *[prep_args[k] for k in arg_order])
        return out.reshape(1, 2, H6, W6)                                   # NCHW

    return prep, jax.jit(forward)


if __name__ == "__main__":
    key = jax.random.PRNGKey(0)
    pkey, xkey = jax.random.split(key)
    raw = init_params(pkey)

    # Small input consistent with the module (original was (1, 32, 152, 212)).
    x1 = jax.random.normal(xkey, (1, 32, 64, 96), dtype=jnp.float32)

    prep, forward = build_model(raw, x1.shape)
    out = jax.block_until_ready(forward(prep, x1))

    ref = jax.block_until_ready(jax.jit(reference_forward)(raw, x1))
    assert out.shape == ref.shape == (1, 2, 1, 2), (out.shape, ref.shape)
    err = float(jnp.max(jnp.abs(out.astype(jnp.float32) - ref)))
    assert err < 5e-2, f"max |pallas - reference| = {err}"
    assert bool(jnp.all((out >= 0.0) & (out <= 1.0)))
    print("KERNEL_OK")
</pallas_src>

<mosaic_0001>
module attributes {stable_mosaic.version = 11 : i64} {
  func.func @kernel(%arg0: i32, %arg1: memref<2176x288xbf16, #tpu.memory_space<vmem>>, %arg2: memref<288x64xbf16, #tpu.memory_space<vmem>>, %arg3: memref<1x64xf32, #tpu.memory_space<vmem>>, %arg4: memref<9x64x64xf32, #tpu.memory_space<vmem>>, %arg5: memref<1x64xf32, #tpu.memory_space<vmem>>, %arg6: memref<4x64x2xf32, #tpu.memory_space<vmem>>, %arg7: memref<1x2xf32, #tpu.memory_space<vmem>>, %arg8: memref<2x12x336xf32, #tpu.memory_space<vmem>>, %arg9: memref<12x1xf32, #tpu.memory_space<vmem>>, %arg10: memref<128x2xf32, #tpu.memory_space<vmem>>, %arg11: memref<128x1xf32, #tpu.memory_space<vmem>>, %arg12: memref<1x2x2x128xf32, #tpu.memory_space<vmem>>, %arg13: memref<2x1xf32, #tpu.memory_space<vmem>>, %arg14: memref<3x3x2x2xf32, #tpu.memory_space<vmem>>, %arg15: memref<2x1xf32, #tpu.memory_space<vmem>>, %arg16: memref<2x2xf32, #tpu.memory_space<vmem>>) attributes {dimension_semantics = [#tpu.dimension_semantics<arbitrary>], iteration_bounds = array<i64: 1>, scalar_prefetch = 0 : i64, scratch_operands = 0 : i64, tpu.core_type = #tpu.core_type<tc>, window_params = [{pipeline_mode = #tpu.pipeline_mode<synchronous>, transform_indices = @transform_0, window_bounds = array<i64: 2176, 288>}, {pipeline_mode = #tpu.pipeline_mode<synchronous>, transform_indices = @transform_1, window_bounds = array<i64: 288, 64>}, {pipeline_mode = #tpu.pipeline_mode<synchronous>, transform_indices = @transform_2, window_bounds = array<i64: 1, 64>}, {pipeline_mode = #tpu.pipeline_mode<synchronous>, transform_indices = @transform_3, window_bounds = array<i64: 9, 64, 64>}, {pipeline_mode = #tpu.pipeline_mode<synchronous>, transform_indices = @transform_4, window_bounds = array<i64: 1, 64>}, {pipeline_mode = #tpu.pipeline_mode<synchronous>, transform_indices = @transform_5, window_bounds = array<i64: 4, 64, 2>}, {pipeline_mode = #tpu.pipeline_mode<synchronous>, transform_indices = @transform_6, window_bounds = array<i64: 1, 2>}, {pipeline_mode = #tpu.pipeline_mode<synchronous>, transform_indices = @transform_7, window_bounds = array<i64: 2, 12, 336>}, {pipeline_mode = #tpu.pipeline_mode<synchronous>, transform_indices = @transform_8, window_bounds = array<i64: 12, 1>}, {pipeline_mode = #tpu.pipeline_mode<synchronous>, transform_indices = @transform_9, window_bounds = array<i64: 128, 2>}, {pipeline_mode = #tpu.pipeline_mode<synchronous>, transform_indices = @transform_10, window_bounds = array<i64: 128, 1>}, {pipeline_mode = #tpu.pipeline_mode<synchronous>, transform_indices = @transform_11, window_bounds = array<i64: 1, 2, 2, 128>}, {pipeline_mode = #tpu.pipeline_mode<synchronous>, transform_indices = @transform_12, window_bounds = array<i64: 2, 1>}, {pipeline_mode = #tpu.pipeline_mode<synchronous>, transform_indices = @transform_13, window_bounds = array<i64: 3, 3, 2, 2>}, {pipeline_mode = #tpu.pipeline_mode<synchronous>, transform_indices = @transform_14, window_bounds = array<i64: 2, 1>}, {pipeline_mode = #tpu.pipeline_mode<synchronous>, transform_indices = @transform_15, window_bounds = array<i64: 2, 2>}]} {
    %c0 = arith.constant 0 : index
    %c0_0 = arith.constant 0 : index
    %0 = vector.load %arg1[%c0, %c0_0] : memref<2176x288xbf16, #tpu.memory_space<vmem>>, vector<2176x288xbf16>
    %c0_1 = arith.constant 0 : index
    %c0_2 = arith.constant 0 : index
    %1 = vector.load %arg2[%c0_1, %c0_2] : memref<288x64xbf16, #tpu.memory_space<vmem>>, vector<288x64xbf16>
    %cst = arith.constant dense<0.000000e+00> : vector<2176x64xf32>
    %2 = tpu.matmul %0, %1, %cst {dimension_numbers = #tpu.dot_dimension_numbers<[1], [0], [0], [1], [0, 0, 1, 1], [], []>} : vector<2176x288xbf16>, vector<288x64xbf16>, vector<2176x64xf32> -> vector<2176x64xf32>
    %c0_3 = arith.constant 0 : index
    %c0_4 = arith.constant 0 : index
    %3 = vector.load %arg3[%c0_3, %c0_4] : memref<1x64xf32, #tpu.memory_space<vmem>>, vector<1x64xf32>
    %4 = vector.broadcast %3 : vector<1x64xf32> to vector<2176x64xf32>
    %5 = arith.addf %2, %4 : vector<2176x64xf32>
    %6 = vector.shape_cast %5 : vector<2176x64xf32> to vector<4x17x32x64xf32>
    %cst_5 = arith.constant 0.000000e+00 : f32
    %7 = vector.broadcast %cst_5 : f32 to vector<384x64xf32>
    %8 = vector.extract_strided_slice %6 {offsets = [0, 0, 0, 0], sizes = [1, 16, 24, 64], strides = [1, 1, 1, 1]} : vector<4x17x32x64xf32> to vector<1x16x24x64xf32>
    %9 = vector.shape_cast %8 : vector<1x16x24x64xf32> to vector<16x24x64xf32>
    %10 = vector.shape_cast %9 : vector<16x24x64xf32> to vector<384x64xf32>
    %c0_6 = arith.constant 0 : index
    %c0_7 = arith.constant 0 : index
    %c0_8 = arith.constant 0 : index
    %11 = vector.load %arg4[%c0_6, %c0_7, %c0_8] : memref<9x64x64xf32, #tpu.memory_space<vmem>>, vector<1x64x64xf32>
    %12 = vector.shape_cast %11 : vector<1x64x64xf32> to vector<64x64xf32>
    %cst_9 = arith.constant dense<0.000000e+00> : vector<384x64xf32>
    %13 = tpu.matmul %10, %12, %cst_9 {dimension_numbers = #tpu.dot_dimension_numbers<[1], [0], [0], [1], [0, 0, 1, 1], [], []>} : vector<384x64xf32>, vector<64x64xf32>, vector<384x64xf32> -> vector<384x64xf32>
    %14 = arith.addf %7, %13 : vector<384x64xf32>
    %15 = vector.extract_strided_slice %6 {offsets = [1, 0, 0, 0], sizes = [1, 16, 24, 64], strides = [1, 1, 1, 1]} : vector<4x17x32x64xf32> to vector<1x16x24x64xf32>
    %16 = vector.shape_cast %15 : vector<1x16x24x64xf32> to vector<16x24x64xf32>
    %17 = vector.shape_cast %16 : vector<16x24x64xf32> to vector<384x64xf32>
    %c1 = arith.constant 1 : index
    %c0_10 = arith.constant 0 : index
    %c0_11 = arith.constant 0 : index
    %18 = vector.load %arg4[%c1, %c0_10, %c0_11] : memref<9x64x64xf32, #tpu.memory_space<vmem>>, vector<1x64x64xf32>
    %19 = vector.shape_cast %18 : vector<1x64x64xf32> to vector<64x64xf32>
    %cst_12 = arith.constant dense<0.000000e+00> : vector<384x64xf32>
    %20 = tpu.matmul %17, %19, %cst_12 {dimension_numbers = #tpu.dot_dimension_numbers<[1], [0], [0], [1], [0, 0, 1, 1], [], []>} : vector<384x64xf32>, vector<64x64xf32>, vector<384x64xf32> -> vector<384x64xf32>
    %21 = arith.addf %14, %20 : vector<384x64xf32>
    %22 = vector.extract_strided_slice %6 {offsets = [0, 0, 1, 0], sizes = [1, 16, 24, 64], strides = [1, 1, 1, 1]} : vector<4x17x32x64xf32> to vector<1x16x24x64xf32>
    %23 = vector.shape_cast %22 : vector<1x16x24x64xf32> to vector<16x24x64xf32>
    %24 = vector.shape_cast %23 : vector<16x24x64xf32> to vector<384x64xf32>
    %c2 = arith.constant 2 : index
    %c0_13 = arith.constant 0 : index
    %c0_14 = arith.constant 0 : index
    %25 = vector.load %arg4[%c2, %c0_13, %c0_14] : memref<9x64x64xf32, #tpu.memory_space<vmem>>, vector<1x64x64xf32>
    %26 = vector.shape_cast %25 : vector<1x64x64xf32> to vector<64x64xf32>
    %cst_15 = arith.constant dense<0.000000e+00> : vector<384x64xf32>
    %27 = tpu.matmul %24, %26, %cst_15 {dimension_numbers = #tpu.dot_dimension_numbers<[1], [0], [0], [1], [0, 0, 1, 1], [], []>} : vector<384x64xf32>, vector<64x64xf32>, vector<384x64xf32> -> vector<384x64xf32>
    %28 = arith.addf %21, %27 : vector<384x64xf32>
    %29 = vector.extract_strided_slice %6 {offsets = [2, 0, 0, 0], sizes = [1, 16, 24, 64], strides = [1, 1, 1, 1]} : vector<4x17x32x64xf32> to vector<1x16x24x64xf32>
    %30 = vector.shape_cast %29 : vector<1x16x24x64xf32> to vector<16x24x64xf32>
    %31 = vector.shape_cast %30 : vector<16x24x64xf32> to vector<384x64xf32>
    %c3 = arith.constant 3 : index
    %c0_16 = arith.constant 0 : index
    %c0_17 = arith.constant 0 : index
    %32 = vector.load %arg4[%c3, %c0_16, %c0_17] : memref<9x64x64xf32, #tpu.memory_space<vmem>>, vector<1x64x64xf32>
    %33 = vector.shape_cast %32 : vector<1x64x64xf32> to vector<64x64xf32>
    %cst_18 = arith.constant dense<0.000000e+00> : vector<384x64xf32>
    %34 = tpu.matmul %31, %33, %cst_18 {dimension_numbers = #tpu.dot_dimension_numbers<[1], [0], [0], [1], [0, 0, 1, 1], [], []>} : vector<384x64xf32>, vector<64x64xf32>, vector<384x64xf32> -> vector<384x64xf32>
    %35 = arith.addf %28, %34 : vector<384x64xf32>
    %36 = vector.extract_strided_slice %6 {offsets = [3, 0, 0, 0], sizes = [1, 16, 24, 64], strides = [1, 1, 1, 1]} : vector<4x17x32x64xf32> to vector<1x16x24x64xf32>
    %37 = vector.shape_cast %36 : vector<1x16x24x64xf32> to vector<16x24x64xf32>
    %38 = vector.shape_cast %37 : vector<16x24x64xf32> to vector<384x64xf32>
    %c4 = arith.constant 4 : index
    %c0_19 = arith.constant 0 : index
    %c0_20 = arith.constant 0 : index
    %39 = vector.load %arg4[%c4, %c0_19, %c0_20] : memref<9x64x64xf32, #tpu.memory_space<vmem>>, vector<1x64x64xf32>
    %40 = vector.shape_cast %39 : vector<1x64x64xf32> to vector<64x64xf32>
    %cst_21 = arith.constant dense<0.000000e+00> : vector<384x64xf32>
    %41 = tpu.matmul %38, %40, %cst_21 {dimension_numbers = #tpu.dot_dimension_numbers<[1], [0], [0], [1], [0, 0, 1, 1], [], []>} : vector<384x64xf32>, vector<64x64xf32>, vector<384x64xf32> -> vector<384x64xf32>
    %42 = arith.addf %35, %41 : vector<384x64xf32>
    %43 = vector.extract_strided_slice %6 {offsets = [2, 0, 1, 0], sizes = [1, 16, 24, 64], strides = [1, 1, 1, 1]} : vector<4x17x32x64xf32> to vector<1x16x24x64xf32>
    %44 = vector.shape_cast %43 : vector<1x16x24x64xf32> to vector<16x24x64xf32>
    %45 = vector.shape_cast %44 : vector<16x24x64xf32> to vector<384x64xf32>
    %c5 = arith.constant 5 : index
    %c0_22 = arith.constant 0 : index
    %c0_23 = arith.constant 0 : index
    %46 = vector.load %arg4[%c5, %c0_22, %c0_23] : memref<9x64x64xf32, #tpu.memory_space<vmem>>, vector<1x64x64xf32>
    %47 = vector.shape_cast %46 : vector<1x64x64xf32> to vector<64x64xf32>
    %cst_24 = arith.constant dense<0.000000e+00> : vector<384x64xf32>
    %48 = tpu.matmul %45, %47, %cst_24 {dimension_numbers = #tpu.dot_dimension_numbers<[1], [0], [0], [1], [0, 0, 1, 1], [], []>} : vector<384x64xf32>, vector<64x64xf32>, vector<384x64xf32> -> vector<384x64xf32>
    %49 = arith.addf %42, %48 : vector<384x64xf32>
    %50 = vector.extract_strided_slice %6 {offsets = [0, 1, 0, 0], sizes = [1, 16, 24, 64], strides = [1, 1, 1, 1]} : vector<4x17x32x64xf32> to vector<1x16x24x64xf32>
    %51 = vector.shape_cast %50 : vector<1x16x24x64xf32> to vector<16x24x64xf32>
    %52 = vector.shape_cast %51 : vector<16x24x64xf32> to vector<384x64xf32>
    %c6 = arith.constant 6 : index
    %c0_25 = arith.constant 0 : index
    %c0_26 = arith.constant 0 : index
    %53 = vector.load %arg4[%c6, %c0_25, %c0_26] : memref<9x64x64xf32, #tpu.memory_space<vmem>>, vector<1x64x64xf32>
    %54 = vector.shape_cast %53 : vector<1x64x64xf32> to vector<64x64xf32>
    %cst_27 = arith.constant dense<0.000000e+00> : vector<384x64xf32>
    %55 = tpu.matmul %52, %54, %cst_27 {dimension_numbers = #tpu.dot_dimension_numbers<[1], [0], [0], [1], [0, 0, 1, 1], [], []>} : vector<384x64xf32>, vector<64x64xf32>, vector<384x64xf32> -> vector<384x64xf32>
    %56 = arith.addf %49, %55 : vector<384x64xf32>
    %57 = vector.extract_strided_slice %6 {offsets = [1, 1, 0, 0], sizes = [1, 16, 24, 64], strides = [1, 1, 1, 1]} : vector<4x17x32x64xf32> to vector<1x16x24x64xf32>
    %58 = vector.shape_cast %57 : vector<1x16x24x64xf32> to vector<16x24x64xf32>
    %59 = vector.shape_cast %58 : vector<16x24x64xf32> to vector<384x64xf32>
    %c7 = arith.constant 7 : index
    %c0_28 = arith.constant 0 : index
    %c0_29 = arith.constant 0 : index
    %60 = vector.load %arg4[%c7, %c0_28, %c0_29] : memref<9x64x64xf32, #tpu.memory_space<vmem>>, vector<1x64x64xf32>
    %61 = vector.shape_cast %60 : vector<1x64x64xf32> to vector<64x64xf32>
    %cst_30 = arith.constant dense<0.000000e+00> : vector<384x64xf32>
    %62 = tpu.matmul %59, %61, %cst_30 {dimension_numbers = #tpu.dot_dimension_numbers<[1], [0], [0], [1], [0, 0, 1, 1], [], []>} : vector<384x64xf32>, vector<64x64xf32>, vector<384x64xf32> -> vector<384x64xf32>
    %63 = arith.addf %56, %62 : vector<384x64xf32>
    %64 = vector.extract_strided_slice %6 {offsets = [0, 1, 1, 0], sizes = [1, 16, 24, 64], strides = [1, 1, 1, 1]} : vector<4x17x32x64xf32> to vector<1x16x24x64xf32>
    %65 = vector.shape_cast %64 : vector<1x16x24x64xf32> to vector<16x24x64xf32>
    %66 = vector.shape_cast %65 : vector<16x24x64xf32> to vector<384x64xf32>
    %c8 = arith.constant 8 : index
    %c0_31 = arith.constant 0 : index
    %c0_32 = arith.constant 0 : index
    %67 = vector.load %arg4[%c8, %c0_31, %c0_32] : memref<9x64x64xf32, #tpu.memory_space<vmem>>, vector<1x64x64xf32>
    %68 = vector.shape_cast %67 : vector<1x64x64xf32> to vector<64x64xf32>
    %cst_33 = arith.constant dense<0.000000e+00> : vector<384x64xf32>
    %69 = tpu.matmul %66, %68, %cst_33 {dimension_numbers = #tpu.dot_dimension_numbers<[1], [0], [0], [1], [0, 0, 1, 1], [], []>} : vector<384x64xf32>, vector<64x64xf32>, vector<384x64xf32> -> vector<384x64xf32>
    %70 = arith.addf %63, %69 : vector<384x64xf32>
    %c0_34 = arith.constant 0 : index
    %c0_35 = arith.constant 0 : index
    %71 = vector.load %arg5[%c0_34, %c0_35] : memref<1x64xf32, #tpu.memory_space<vmem>>, vector<1x64xf32>
    %72 = vector.broadcast %71 : vector<1x64xf32> to vector<384x64xf32>
    %73 = arith.addf %70, %72 : vector<384x64xf32>
    %cst_36 = arith.constant 0.000000e+00 : f32
    %74 = vector.broadcast %cst_36 : f32 to vector<336x2xf32>
    %75 = vector.extract_strided_slice %73 {offsets = [0, 0], sizes = [336, 64], strides = [1, 1]} : vector<384x64xf32> to vector<336x64xf32>
    %c0_37 = arith.constant 0 : index
    %c0_38 = arith.constant 0 : index
    %c0_39 = arith.constant 0 : index
    %76 = vector.load %arg6[%c0_37, %c0_38, %c0_39] : memref<4x64x2xf32, #tpu.memory_space<vmem>>, vector<1x64x2xf32>
    %77 = vector.shape_cast %76 : vector<1x64x2xf32> to vector<64x2xf32>
    %cst_40 = arith.constant dense<0.000000e+00> : vector<336x2xf32>
    %78 = tpu.matmul %75, %77, %cst_40 {dimension_numbers = #tpu.dot_dimension_numbers<[1], [0], [0], [1], [0, 0, 1, 1], [], []>} : vector<336x64xf32>, vector<64x2xf32>, vector<336x2xf32> -> vector<336x2xf32>
    %79 = arith.addf %74, %78 : vector<336x2xf32>
    %80 = vector.extract_strided_slice %73 {offsets = [1, 0], sizes = [336, 64], strides = [1, 1]} : vector<384x64xf32> to vector<336x64xf32>
    %c1_41 = arith.constant 1 : index
    %c0_42 = arith.constant 0 : index
    %c0_43 = arith.constant 0 : index
    %81 = vector.load %arg6[%c1_41, %c0_42, %c0_43] : memref<4x64x2xf32, #tpu.memory_space<vmem>>, vector<1x64x2xf32>
    %82 = vector.shape_cast %81 : vector<1x64x2xf32> to vector<64x2xf32>
    %cst_44 = arith.constant dense<0.000000e+00> : vector<336x2xf32>
    %83 = tpu.matmul %80, %82, %cst_44 {dimension_numbers = #tpu.dot_dimension_numbers<[1], [0], [0], [1], [0, 0, 1, 1], [], []>} : vector<336x64xf32>, vector<64x2xf32>, vector<336x2xf32> -> vector<336x2xf32>
    %84 = arith.addf %79, %83 : vector<336x2xf32>
    %85 = vector.extract_strided_slice %73 {offsets = [24, 0], sizes = [336, 64], strides = [1, 1]} : vector<384x64xf32> to vector<336x64xf32>
    %c2_45 = arith.constant 2 : index
    %c0_46 = arith.constant 0 : index
    %c0_47 = arith.constant 0 : index
    %86 = vector.load %arg6[%c2_45, %c0_46, %c0_47] : memref<4x64x2xf32, #tpu.memory_space<vmem>>, vector<1x64x2xf32>
    %87 = vector.shape_cast %86 : vector<1x64x2xf32> to vector<64x2xf32>
    %cst_48 = arith.constant dense<0.000000e+00> : vector<336x2xf32>
    %88 = tpu.matmul %85, %87, %cst_48 {dimension_numbers = #tpu.dot_dimension_numbers<[1], [0], [0], [1], [0, 0, 1, 1], [], []>} : vector<336x64xf32>, vector<64x2xf32>, vector<336x2xf32> -> vector<336x2xf32>
    %89 = arith.addf %84, %88 : vector<336x2xf32>
    %90 = vector.extract_strided_slice %73 {offsets = [25, 0], sizes = [336, 64], strides = [1, 1]} : vector<384x64xf32> to vector<336x64xf32>
    %c3_49 = arith.constant 3 : index
    %c0_50 = arith.constant 0 : index
    %c0_51 = arith.constant 0 : index
    %91 = vector.load %arg6[%c3_49, %c0_50, %c0_51] : memref<4x64x2xf32, #tpu.memory_space<vmem>>, vector<1x64x2xf32>
    %92 = vector.shape_cast %91 : vector<1x64x2xf32> to vector<64x2xf32>
    %cst_52 = arith.constant dense<0.000000e+00> : vector<336x2xf32>
    %93 = tpu.matmul %90, %92, %cst_52 {dimension_numbers = #tpu.dot_dimension_numbers<[1], [0], [0], [1], [0, 0, 1, 1], [], []>} : vector<336x64xf32>, vector<64x2xf32>, vector<336x2xf32> -> vector<336x2xf32>
    %94 = arith.addf %89, %93 : vector<336x2xf32>
    %c0_53 = arith.constant 0 : index
    %c0_54 = arith.constant 0 : index
    %95 = vector.load %arg7[%c0_53, %c0_54] : memref<1x2xf32, #tpu.memory_space<vmem>>, vector<1x2xf32>
    %96 = vector.broadcast %95 : vector<1x2xf32> to vector<336x2xf32>
    %97 = arith.addf %94, %96 : vector<336x2xf32>
    %98 = arith.negf %97 : vector<336x2xf32>
    %99 = math.exp %98 : vector<336x2xf32>
    %cst_55 = arith.constant 1.000000e+00 : f32
    %100 = vector.broadcast %cst_55 : f32 to vector<336x2xf32>
    %101 = arith.addf %100, %99 : vector<336x2xf32>
    %102 = arith.divf %100, %101 : vector<336x2xf32>
    %103 = arith.negf %102 : vector<336x2xf32>
    %104 = math.exp %103 : vector<336x2xf32>
    %cst_56 = arith.constant 1.000000e+00 : f32
    %105 = vector.broadcast %cst_56 : f32 to vector<336x2xf32>
    %106 = arith.addf %105, %104 : vector<336x2xf32>
    %107 = arith.divf %105, %106 : vector<336x2xf32>
    %108 = arith.negf %107 : vector<336x2xf32>
    %109 = math.exp %108 : vector<336x2xf32>
    %cst_57 = arith.constant 1.000000e+00 : f32
    %110 = vector.broadcast %cst_57 : f32 to vector<336x2xf32>
    %111 = arith.addf %110, %109 : vector<336x2xf32>
    %112 = arith.divf %110, %111 : vector<336x2xf32>
    %c0_58 = arith.constant 0 : index
    %c0_59 = arith.constant 0 : index
    %c0_60 = arith.constant 0 : index
    %113 = vector.load %arg8[%c0_58, %c0_59, %c0_60] : memref<2x12x336xf32, #tpu.memory_space<vmem>>, vector<1x12x336xf32>
    %114 = vector.shape_cast %113 : vector<1x12x336xf32> to vector<12x336xf32>
    %115 = vector.extract_strided_slice %112 {offsets = [0, 0], sizes = [336, 1], strides = [1, 1]} : vector<336x2xf32> to vector<336x1xf32>
    %cst_61 = arith.constant dense<0.000000e+00> : vector<12x1xf32>
    %116 = tpu.matmul %114, %115, %cst_61 {dimension_numbers = #tpu.dot_dimension_numbers<[1], [0], [0], [1], [0, 0, 1, 1], [], []>} : vector<12x336xf32>, vector<336x1xf32>, vector<12x1xf32> -> vector<12x1xf32>
    %c1_62 = arith.constant 1 : index
    %c0_63 = arith.constant 0 : index
    %c0_64 = arith.constant 0 : index
    %117 = vector.load %arg8[%c1_62, %c0_63, %c0_64] : memref<2x12x336xf32, #tpu.memory_space<vmem>>, vector<1x12x336xf32>
    %118 = vector.shape_cast %117 : vector<1x12x336xf32> to vector<12x336xf32>
    %119 = vector.extract_strided_slice %112 {offsets = [0, 1], sizes = [336, 1], strides = [1, 1]} : vector<336x2xf32> to vector<336x1xf32>
    %cst_65 = arith.constant dense<0.000000e+00> : vector<12x1xf32>
    %120 = tpu.matmul %118, %119, %cst_65 {dimension_numbers = #tpu.dot_dimension_numbers<[1], [0], [0], [1], [0, 0, 1, 1], [], []>} : vector<12x336xf32>, vector<336x1xf32>, vector<12x1xf32> -> vector<12x1xf32>
    %121 = arith.addf %116, %120 : vector<12x1xf32>
    %c0_66 = arith.constant 0 : index
    %c0_67 = arith.constant 0 : index
    %122 = vector.load %arg9[%c0_66, %c0_67] : memref<12x1xf32, #tpu.memory_space<vmem>>, vector<12x1xf32>
    %123 = arith.addf %121, %122 : vector<12x1xf32>
    %c0_68 = arith.constant 0 : index
    %c0_69 = arith.constant 0 : index
    %124 = vector.load %arg10[%c0_68, %c0_69] : memref<128x2xf32, #tpu.memory_space<vmem>>, vector<128x2xf32>
    %c0_70 = arith.constant 0 : index
    %c0_71 = arith.constant 0 : index
    %125 = vector.load %arg11[%c0_70, %c0_71] : memref<128x1xf32, #tpu.memory_space<vmem>>, vector<128x1xf32>
    %126 = vector.extract_strided_slice %123 {offsets = [4, 0], sizes = [2, 1], strides = [1, 1]} : vector<12x1xf32> to vector<2x1xf32>
    %cst_72 = arith.constant dense<0.000000e+00> : vector<128x1xf32>
    %127 = tpu.matmul %124, %126, %cst_72 {dimension_numbers = #tpu.dot_dimension_numbers<[1], [0], [0], [1], [0, 0, 1, 1], [], []>} : vector<128x2xf32>, vector<2x1xf32>, vector<128x1xf32> -> vector<128x1xf32>
    %128 = arith.addf %127, %125 : vector<128x1xf32>
    %c0_73 = arith.constant 0 : index
    %c0_74 = arith.constant 0 : index
    %129 = vector.load %arg13[%c0_73, %c0_74] : memref<2x1xf32, #tpu.memory_space<vmem>>, vector<2x1xf32>
    %c0_75 = arith.constant 0 : index
    %c0_76 = arith.constant 0 : index
    %130 = vector.load %arg13[%c0_75, %c0_76] : memref<2x1xf32, #tpu.memory_space<vmem>>, vector<2x1xf32>
    %c0_77 = arith.constant 0 : index
    %c0_78 = arith.constant 0 : index
    %c0_79 = arith.constant 0 : index
    %c0_80 = arith.constant 0 : index
    %131 = vector.load %arg12[%c0_77, %c0_78, %c0_79, %c0_80] : memref<1x2x2x128xf32, #tpu.memory_space<vmem>>, vector<1x1x2x128xf32>
    %132 = vector.shape_cast %131 : vector<1x1x2x128xf32> to vector<2x128xf32>
    %cst_81 = arith.constant dense<0.000000e+00> : vector<2x1xf32>
    %133 = tpu.matmul %132, %128, %cst_81 {dimension_numbers = #tpu.dot_dimension_numbers<[1], [0], [0], [1], [0, 0, 1, 1], [], []>} : vector<2x128xf32>, vector<128x1xf32>, vector<2x1xf32> -> vector<2x1xf32>
    %134 = arith.addf %130, %133 : vector<2x1xf32>
    %c0_82 = arith.constant 0 : index
    %c0_83 = arith.constant 0 : index
    %135 = vector.load %arg15[%c0_82, %c0_83] : memref<2x1xf32, #tpu.memory_space<vmem>>, vector<2x1xf32>
    %c1_84 = arith.constant 1 : index
    %c1_85 = arith.constant 1 : index
    %c0_86 = arith.constant 0 : index
    %c0_87 = arith.constant 0 : index
    %136 = vector.load %arg14[%c1_84, %c1_85, %c0_86, %c0_87] : memref<3x3x2x2xf32, #tpu.memory_space<vmem>>, vector<1x1x2x2xf32>
    %137 = vector.shape_cast %136 : vector<1x1x2x2xf32> to vector<2x2xf32>
    %cst_88 = arith.constant dense<0.000000e+00> : vector<2x1xf32>
    %138 = tpu.matmul %137, %129, %cst_88 {dimension_numbers = #tpu.dot_dimension_numbers<[1], [0], [0], [1], [0, 0, 1, 1], [], []>} : vector<2x2xf32>, vector<2x1xf32>, vector<2x1xf32> -> vector<2x1xf32>
    %139 = arith.addf %135, %138 : vector<2x1xf32>
    %c1_89 = arith.constant 1 : index
    %c2_90 = arith.constant 2 : index
    %c0_91 = arith.constant 0 : index
    %c0_92 = arith.constant 0 : index
    %140 = vector.load %arg14[%c1_89, %c2_90, %c0_91, %c0_92] : memref<3x3x2x2xf32, #tpu.memory_space<vmem>>, vector<1x1x2x2xf32>
    %141 = vector.shape_cast %140 : vector<1x1x2x2xf32> to vector<2x2xf32>
    %cst_93 = arith.constant dense<0.000000e+00> : vector<2x1xf32>
    %142 = tpu.matmul %141, %134, %cst_93 {dimension_numbers = #tpu.dot_dimension_numbers<[1], [0], [0], [1], [0, 0, 1, 1], [], []>} : vector<2x2xf32>, vector<2x1xf32>, vector<2x1xf32> -> vector<2x1xf32>
    %143 = arith.addf %139, %142 : vector<2x1xf32>
    %144 = arith.negf %143 : vector<2x1xf32>
    %145 = math.exp %144 : vector<2x1xf32>
    %cst_94 = arith.constant 1.000000e+00 : f32
    %146 = vector.broadcast %cst_94 : f32 to vector<2x1xf32>
    %147 = arith.addf %146, %145 : vector<2x1xf32>
    %148 = arith.divf %146, %147 : vector<2x1xf32>
    %c0_95 = arith.constant 0 : index
    %c0_96 = arith.constant 0 : index
    %149 = vector.load %arg15[%c0_95, %c0_96] : memref<2x1xf32, #tpu.memory_space<vmem>>, vector<2x1xf32>
    %c1_97 = arith.constant 1 : index
    %c0_98 = arith.constant 0 : index
    %c0_99 = arith.constant 0 : index
    %c0_100 = arith.constant 0 : index
    %150 = vector.load %arg14[%c1_97, %c0_98, %c0_99, %c0_100] : memref<3x3x2x2xf32, #tpu.memory_space<vmem>>, vector<1x1x2x2xf32>
    %151 = vector.shape_cast %150 : vector<1x1x2x2xf32> to vector<2x2xf32>
    %cst_101 = arith.constant dense<0.000000e+00> : vector<2x1xf32>
    %152 = tpu.matmul %151, %129, %cst_101 {dimension_numbers = #tpu.dot_dimension_numbers<[1], [0], [0], [1], [0, 0, 1, 1], [], []>} : vector<2x2xf32>, vector<2x1xf32>, vector<2x1xf32> -> vector<2x1xf32>
    %153 = arith.addf %149, %152 : vector<2x1xf32>
    %c1_102 = arith.constant 1 : index
    %c1_103 = arith.constant 1 : index
    %c0_104 = arith.constant 0 : index
    %c0_105 = arith.constant 0 : index
    %154 = vector.load %arg14[%c1_102, %c1_103, %c0_104, %c0_105] : memref<3x3x2x2xf32, #tpu.memory_space<vmem>>, vector<1x1x2x2xf32>
    %155 = vector.shape_cast %154 : vector<1x1x2x2xf32> to vector<2x2xf32>
    %cst_106 = arith.constant dense<0.000000e+00> : vector<2x1xf32>
    %156 = tpu.matmul %155, %134, %cst_106 {dimension_numbers = #tpu.dot_dimension_numbers<[1], [0], [0], [1], [0, 0, 1, 1], [], []>} : vector<2x2xf32>, vector<2x1xf32>, vector<2x1xf32> -> vector<2x1xf32>
    %157 = arith.addf %153, %156 : vector<2x1xf32>
    %158 = arith.negf %157 : vector<2x1xf32>
    %159 = math.exp %158 : vector<2x1xf32>
    %cst_107 = arith.constant 1.000000e+00 : f32
    %160 = vector.broadcast %cst_107 : f32 to vector<2x1xf32>
    %161 = arith.addf %160, %159 : vector<2x1xf32>
    %162 = arith.divf %160, %161 : vector<2x1xf32>
    %163 = tpu.concatenate %148, %162 in 1 : vector<2x1xf32>, vector<2x1xf32> -> vector<2x2xf32>
    %c0_108 = arith.constant 0 : index
    %c0_109 = arith.constant 0 : index
    %164 = vector.load %arg16[%c0_108, %c0_109] : memref<2x2xf32, #tpu.memory_space<vmem>>, vector<2x2xf32>
    tpu.vector_store %arg16[%c0_108, %c0_109], %163 {strides = array<i32>} : memref<2x2xf32, #tpu.memory_space<vmem>>, vector<2x2xf32>,
    return
  }
  func.func @transform_0(%arg0: i32) -> (i32, i32) {
    %c0_i32 = arith.constant 0 : i32
    %c0_i32_0 = arith.constant 0 : i32
    %c0_i32_1 = arith.constant 0 : i32
    return %c0_i32, %c0_i32_0 : i32, i32
  }
  func.func @transform_1(%arg0: i32) -> (i32, i32) {
    %c0_i32 = arith.constant 0 : i32
    %c0_i32_0 = arith.constant 0 : i32
    %c0_i32_1 = arith.constant 0 : i32
    return %c0_i32, %c0_i32_0 : i32, i32
  }
  func.func @transform_2(%arg0: i32) -> (i32, i32) {
    %c0_i32 = arith.constant 0 : i32
    %c0_i32_0 = arith.constant 0 : i32
    %c0_i32_1 = arith.constant 0 : i32
    return %c0_i32, %c0_i32_0 : i32, i32
  }
  func.func @transform_3(%arg0: i32) -> (i32, i32, i32) {
    %c0_i32 = arith.constant 0 : i32
    %c0_i32_0 = arith.constant 0 : i32
    %c0_i32_1 = arith.constant 0 : i32
    %c0_i32_2 = arith.constant 0 : i32
    return %c0_i32, %c0_i32_0, %c0_i32_1 : i32, i32, i32
  }
  func.func @transform_4(%arg0: i32) -> (i32, i32) {
    %c0_i32 = arith.constant 0 : i32
    %c0_i32_0 = arith.constant 0 : i32
    %c0_i32_1 = arith.constant 0 : i32
    return %c0_i32, %c0_i32_0 : i32, i32
  }
  func.func @transform_5(%arg0: i32) -> (i32, i32, i32) {
    %c0_i32 = arith.constant 0 : i32
    %c0_i32_0 = arith.constant 0 : i32
    %c0_i32_1 = arith.constant 0 : i32
    %c0_i32_2 = arith.constant 0 : i32
    return %c0_i32, %c0_i32_0, %c0_i32_1 : i32, i32, i32
  }
  func.func @transform_6(%arg0: i32) -> (i32, i32) {
    %c0_i32 = arith.constant 0 : i32
    %c0_i32_0 = arith.constant 0 : i32
    %c0_i32_1 = arith.constant 0 : i32
    return %c0_i32, %c0_i32_0 : i32, i32
  }
  func.func @transform_7(%arg0: i32) -> (i32, i32, i32) {
    %c0_i32 = arith.constant 0 : i32
    %c0_i32_0 = arith.constant 0 : i32
    %c0_i32_1 = arith.constant 0 : i32
    %c0_i32_2 = arith.constant 0 : i32
    return %c0_i32, %c0_i32_0, %c0_i32_1 : i32, i32, i32
  }
  func.func @transform_8(%arg0: i32) -> (i32, i32) {
    %c0_i32 = arith.constant 0 : i32
    %c0_i32_0 = arith.constant 0 : i32
    %c0_i32_1 = arith.constant 0 : i32
    return %c0_i32, %c0_i32_0 : i32, i32
  }
  func.func @transform_9(%arg0: i32) -> (i32, i32) {
    %c0_i32 = arith.constant 0 : i32
    %c0_i32_0 = arith.constant 0 : i32
    %c0_i32_1 = arith.constant 0 : i32
    return %c0_i32, %c0_i32_0 : i32, i32
  }
  func.func @transform_10(%arg0: i32) -> (i32, i32) {
    %c0_i32 = arith.constant 0 : i32
    %c0_i32_0 = arith.constant 0 : i32
    %c0_i32_1 = arith.constant 0 : i32
    return %c0_i32, %c0_i32_0 : i32, i32
  }
  func.func @transform_11(%arg0: i32) -> (i32, i32, i32, i32) {
    %c0_i32 = arith.constant 0 : i32
    %c0_i32_0 = arith.constant 0 : i32
    %c0_i32_1 = arith.constant 0 : i32
    %c0_i32_2 = arith.constant 0 : i32
    %c0_i32_3 = arith.constant 0 : i32
    return %c0_i32, %c0_i32_0, %c0_i32_1, %c0_i32_2 : i32, i32, i32, i32
  }
  func.func @transform_12(%arg0: i32) -> (i32, i32) {
    %c0_i32 = arith.constant 0 : i32
    %c0_i32_0 = arith.constant 0 : i32
    %c0_i32_1 = arith.constant 0 : i32
    return %c0_i32, %c0_i32_0 : i32, i32
  }
  func.func @transform_13(%arg0: i32) -> (i32, i32, i32, i32) {
    %c0_i32 = arith.constant 0 : i32
    %c0_i32_0 = arith.constant 0 : i32
    %c0_i32_1 = arith.constant 0 : i32
    %c0_i32_2 = arith.constant 0 : i32
    %c0_i32_3 = arith.constant 0 : i32
    return %c0_i32, %c0_i32_0, %c0_i32_1, %c0_i32_2 : i32, i32, i32, i32
  }
  func.func @transform_14(%arg0: i32) -> (i32, i32) {
    %c0_i32 = arith.constant 0 : i32
    %c0_i32_0 = arith.constant 0 : i32
    %c0_i32_1 = arith.constant 0 : i32
    return %c0_i32, %c0_i32_0 : i32, i32
  }
  func.func @transform_15(%arg0: i32) -> (i32, i32) {
    %c0_i32 = arith.constant 0 : i32
    %c0_i32_0 = arith.constant 0 : i32
    %c0_i32_1 = arith.constant 0 : i32
    return %c0_i32, %c0_i32_0 : i32, i32
  }
}

</mosaic_0001>

<bundles_post_ra>
// kernel: forward.1
= control target key start
LH: loop header
LB: loop body
LE: loop exit
PB: predicated region body
PF: predicated region fallthrough
CT: control target
= control target key end

     0   :  { %v18096_v1 = vmov 0   ;;  %vm2787_vm0 = vcmask 261120   ;;  %s25092_s0 = inlined_call_operand.vmem [shape: bf16[2176,288], index: 0, kind: input, shape index: {}]   ;;  %s25093_s1 = inlined_call_operand.vmem [shape: bf16[288,64], index: 1, kind: input, shape index: {}]   ;;  %s25094_s2 = inlined_call_operand.vmem [shape: f32[1,64], index: 2, kind: input, shape index: {}]   ;;  %s25095_s3 = inlined_call_operand.vmem [shape: f32[9,64,64], index: 3, kind: input, shape index: {}]   ;;  %s25096_s4 = inlined_call_operand.vmem [shape: f32[1,64], index: 4, kind: input, shape index: {}]   ;;  %s25097_s5 = inlined_call_operand.vmem [shape: f32[4,64,2], index: 5, kind: input, shape index: {}]   ;;  %s25098_s6 = inlined_call_operand.vmem [shape: f32[1,2], index: 6, kind: input, shape index: {}]   ;;  %s25099_s7 = inlined_call_operand.vmem [shape: f32[2,12,336], index: 7, kind: input, shape index: {}]   ;;  %s25100_s8 = inlined_call_operand.vmem [shape: f32[12,1], index: 8, kind: input, shape index: {}]   ;;  %s25101_s9 = inlined_call_operand.vmem [shape: f32[128,2], index: 9, kind: input, shape index: {}]   ;;  %s25102_s10 = inlined_call_operand.vmem [shape: f32[128,1], index: 10, kind: input, shape index: {}]   ;;  %s25103_s11 = inlined_call_operand.vmem [shape: f32[1,2,2,128], index: 11, kind: input, shape index: {}]   ;;  %s25104_s12 = inlined_call_operand.vmem [shape: f32[2,1], index: 12, kind: input, shape index: {}]   ;;  %s25105_s13 = inlined_call_operand.vmem [shape: f32[3,3,2,2], index: 13, kind: input, shape index: {}]   ;;  %s25106_s14 = inlined_call_operand.vmem [shape: f32[2,1], index: 14, kind: input, shape index: {}]   ;;  %s25107_s15 = inlined_call_operand.hbm [shape: f32[2,2], index: 15, kind: output, shape index: {}]  }
   0x1   :  { %v16993_v0 = vld [vmem:[%s25093_s1 + $0x38] sm:$0xff]   ;;  %3196 = vmatprep.subr.bf16.mxu0 %v18096_v1  ;;  %v16994_v2 = vld [vmem:[%s25093_s1 + $0x88] sm:$0xff]   ;;  %v16995_v3 = vld [vmem:[%s25093_s1 + $0x30] sm:$0xff]  }
   0x2   :  { %3197 = vmatpush1.bf16.msra.mxu0 %v16993_v0  ;;  %15476 = vmatprep.subr.bf16.mxu1 %v16994_v2  ;;  %v16996_v4 = vld [vmem:[%s25093_s1 + $0x80] sm:$0xff]   ;;  %v16997_v5 = vld [vmem:[%s25092_s0 + $0x8] ss:$12 sps:$4 sm:$0xff]   ;;  %v17002_v10 = vld [vmem:[%s25093_s1 + $0x18] sm:$0xff]  }
   0x3   :  { %3198 = vmatprep.subr.bf16.mxu0 %v18096_v1  ;;  %15477 = vmatpush3.bf16.msra.mxu1 %v16994_v2  ;;  %v16998_v6 = vld [vmem:[%s25093_s1 + $0x28] sm:$0xff]   ;;  %v17001_v8 = vld [vmem:[%s25092_s0 + $0x38] ss:$12 sps:$4 sm:$0xff]   ;;  %v17003_v11 = vld [vmem:[%s25092_s0 + $0x50] ss:$12 sps:$4 sm:$0xff]  }
   0x4   :  { %15478 = vmatprep.subr.bf16.mxu1 %v16996_v4  ;;  %15480 = vmatprep.mubr.msk.bf16.mxu1 %vm2787_vm0, %v16997_v5  ;;  %v16999_v7 = vld [vmem:[%s25092_s0 + $0x20] ss:$12 sps:$4 sm:$0xff]   ;;  %v17005_v12 = vld [vmem:[%s25092_s0 + $0x68] ss:$12 sps:$4 sm:$0xff]   ;;  %v17009_v16 = vld [vmem:[%s25092_s0 + $0x98] ss:$12 sps:$4 sm:$0xff]  }
   0x5   :  { %v17000_v9 = vld [vmem:[%s25093_s1 + $0x20] sm:$0xff]   ;;  %v17004_v13 = vld [vmem:[%s25093_s1 + $0x10] sm:$0xff]   ;;  %v17006_v14 = vld [vmem:[%s25093_s1 + $0x8] sm:$0xff]  }
   0x6   :  { %3199 = vmatpush1.bf16.msra.mxu0 %v16995_v3  ;;  %v17007_v15 = vld [vmem:[%s25092_s0 + $0x80] ss:$12 sps:$4 sm:$0xff]   ;;  %v17010_v18 = vld [vmem:[%s25093_s1 + $0x78] sm:$0xff]   ;;  %v17013_v20 = vld [vmem:[%s25092_s0 + $0xc8] ss:$12 sps:$4 sm:$0xff]  }
   0x7   :  { %3200 = vmatprep.subr.bf16.mxu0 %v18096_v1  ;;  %15479 = vmatpush3.bf16.msra.mxu1 %v16996_v4  ;;  %v17008_v17 = vld [vmem:[%s25093_s1] sm:$0xff]   ;;  %v17011_v19 = vld [vmem:[%s25092_s0 + $0xb0] ss:$12 sps:$4 sm:$0xff]   ;;  %v17014_v23 = vld [vmem:[%s25093_s1 + $0x68] sm:$0xff]  }
   0x8   :  { %v17027_v21 = vld [vmem:[%s25092_s0 + $0x4] ss:$12 sps:$4 sm:$0xff]   ;;  %v17015_v24 = vld [vmem:[%s25092_s0 + $0xe0] ss:$12 sps:$4 sm:$0xff]   ;;  %v17018_v27 = vld [vmem:[%s25093_s1 + $0x58] sm:$0xff]  }
   0x9   :  { %v17012_v22 = vld [vmem:[%s25093_s1 + $0x70] sm:$0xff]   ;;  %3228 = vmatprep.mubr.bf16.mxu0 %v17027_v21  ;;  %v17017_v25 = vld [vmem:[%s25092_s0 + $0xf8] ss:$12 sps:$4 sm:$0xff]   ;;  %v17022_v31 = vld [vmem:[%s25093_s1 + $0x48] sm:$0xff]  }
   0xa   :  { %3201 = vmatpush1.bf16.msra.mxu0 %v16998_v6  ;;  %15481 = vmatmul.mubr.msk.bf16.vlgmr.msra.gmra.mxu1 %vm2787_vm0, %v16999_v7  ;;  %v17016_v26 = vld [vmem:[%s25093_s1 + $0x60] sm:$0xff]   ;;  %v17019_v28 = vld [vmem:[%s25092_s0 + $0x110] ss:$12 sps:$4 sm:$0xff]   ;;  %v17021_v29 = vld [vmem:[%s25092_s0 + $0x128] ss:$12 sps:$4 sm:$0xff]  }
   0xb   :  { %3202 = vmatprep.subr.bf16.mxu0 %v18096_v1  ;;  %15484 = vmatprep.mubr.msk.bf16.mxu1 %vm2787_vm0, %v17001_v8  ;;  %v17020_v30 = vld [vmem:[%s25093_s1 + $0x50] sm:$0xff]   ;;  %v17023_v32 = vld [vmem:[%s25092_s0 + $0x140] ss:$12 sps:$4 sm:$0xff]   ;;  %v17028_v33 = vld [vmem:[%s25092_s0 + $0x158] ss:$12 sps:$4 sm:$0xff]  }
   0xc   :  { %v17024_v34 = vld [vmem:[%s25093_s1 + $0x40] sm:$0xff]   ;;  %v17030_v36 = vld [vmem:[%s25092_s0 + $0x1c] ss:$12 sps:$4 sm:$0xff]   ;;  %v17040_v44 = vld [vmem:[%s25092_s0 + $0x4c] ss:$12 sps:$4 sm:$0xff]  }
   0xd   :  { %v17025_v35 = vld [vmem:[%s25092_s0] ss:$12 sps:$4 sm:$0xff]   ;;  %v17029_v37 = vld [vmem:[%s25092_s0 + $0x170] ss:$12 sps:$4 sm:$0xff]   ;;  %v17033_v38 = vld [vmem:[%s25092_s0 + $0x188] ss:$12 sps:$4 sm:$0xff]  }
   0xe   :  { %3203 = vmatpush1.bf16.msra.mxu0 %v17000_v9  ;;  %v17032_v39 = vld [vmem:[%s25092_s0 + $0x18] ss:$12 sps:$4 sm:$0xff]   ;;  %v17035_v40 = vld [vmem:[%s25092_s0 + $0x34] ss:$12 sps:$4 sm:$0xff]   ;;  %v17037_v43 = vld [vmem:[%s25092_s0 + $0x30] ss:$12 sps:$4 sm:$0xff]  }
   0xf   :  { %3204 = vmatprep.subr.bf16.mxu0 %v18096_v1  ;;  %v17034_v41 = vld [vmem:[%s25092_s0 + $0x1a0] ss:$12 sps:$4 sm:$0xff]   ;;  %v17038_v42 = vld [vmem:[%s25092_s0 + $0x1b8] ss:$12 sps:$4 sm:$0xff]   ;;  %v17039_v45 = vld [vmem:[%s25092_s0 + $0x1d0] ss:$12 sps:$4 sm:$0xff]  }
  0x10   :  { %v17043_v46 = vld [vmem:[%s25092_s0 + $0x1e8] ss:$12 sps:$4 sm:$0xff]   ;;  %v17045_v48 = vld [vmem:[%s25092_s0 + $0x64] ss:$12 sps:$4 sm:$0xff]   ;;  %v17044_v49 = vld [vmem:[%s25092_s0 + $0x200] ss:$12 sps:$4 sm:$0xff]  }
  0x11   :  { %v17042_v47 = vld [vmem:[%s25092_s0 + $0x48] ss:$12 sps:$4 sm:$0xff]   ;;  %v17048_v50 = vld [vmem:[%s25092_s0 + $0x218] ss:$12 sps:$4 sm:$0xff]   ;;  %v17047_v51 = vld [vmem:[%s25092_s0 + $0x60] ss:$12 sps:$4 sm:$0xff]  }
  0x12   :  { %3205 = vmatpush1.bf16.msra.mxu0 %v17002_v10  ;;  %15485 = vmatmul.mubr.msk.bf16.gmra.mxu1 %vm2787_vm0, %v17003_v11  ;;  %v17050_v52 = vld [vmem:[%s25092_s0 + $0x7c] ss:$12 sps:$4 sm:$0xff]   ;;  %v17052_v55 = vld [vmem:[%s25092_s0 + $0x78] ss:$12 sps:$4 sm:$0xff]   ;;  %v17055_v56 = vld [vmem:[%s25092_s0 + $0x94] ss:$12 sps:$4 sm:$0xff]  }
  0x13   :  { %3206 = vmatprep.subr.bf16.mxu0 %v18096_v1  ;;  %15488 = vmatprep.mubr.msk.bf16.mxu1 %vm2787_vm0, %v17005_v12  ;;  %v17049_v53 = vld [vmem:[%s25092_s0 + $0x230] ss:$12 sps:$4 sm:$0xff]   ;;  %v17053_v54 = vld [vmem:[%s25092_s0 + $0x248] ss:$12 sps:$4 sm:$0xff]   ;;  %v17054_v57 = vld [vmem:[%s25092_s0 + $0x260] ss:$12 sps:$4 sm:$0xff]  }
  0x14   :  { %v17058_v58 = vld [vmem:[%s25092_s0 + $0x278] ss:$12 sps:$4 sm:$0xff]   ;;  %v17057_v59 = vld [vmem:[%s25092_s0 + $0x90] ss:$12 sps:$4 sm:$0xff]   ;;  %v17063_v62 = vld [vmem:[%s25092_s0 + $0x2a8] ss:$12 sps:$4 sm:$0xff]  }
  0x15   :  { %v17060_v60 = vld [vmem:[%s25092_s0 + $0xac] ss:$12 sps:$4 sm:$0xff]   ;;  %v17059_v61 = vld [vmem:[%s25092_s0 + $0x290] ss:$12 sps:$4 sm:$0xff]   ;;  %v17062_v63 = vld [vmem:[%s25092_s0 + $0xa8] ss:$12 sps:$4 sm:$0xff]  }
  0x16   :  { %3207 = vmatpush1.bf16.msra.mxu0 %v17004_v13  ;;  %v17065_v0 = vld [vmem:[%s25092_s0 + $0xc4] ss:$12 sps:$4 sm:$0xff]   ;;  %v17067_v3 = vld [vmem:[%s25092_s0 + $0xc0] ss:$12 sps:$4 sm:$0xff]   ;;  %v17070_v4 = vld [vmem:[%s25092_s0 + $0xdc] ss:$12 sps:$4 sm:$0xff]  }
  0x17   :  { %3208 = vmatprep.subr.bf16.mxu0 %v18096_v1  ;;  %v17068_v2 = vld [vmem:[%s25092_s0 + $0x2d8] ss:$12 sps:$4 sm:$0xff]   ;;  %v17069_v5 = vld [vmem:[%s25092_s0 + $0x2f0] ss:$12 sps:$4 sm:$0xff]   ;;  %v17073_v6 = vld [vmem:[%s25092_s0 + $0x308] ss:$12 sps:$4 sm:$0xff]  }
  0x18   :  { %v17072_v7 = vld [vmem:[%s25092_s0 + $0xd8] ss:$12 sps:$4 sm:$0xff]   ;;  %v17075_v8 = vld [vmem:[%s25092_s0 + $0xf4] ss:$12 sps:$4 sm:$0xff]   ;;  %v17077_v11 = vld [vmem:[%s25092_s0 + $0xf0] ss:$12 sps:$4 sm:$0xff]  }
  0x19   :  { %v17074_v9 = vld [vmem:[%s25092_s0 + $0x320] ss:$12 sps:$4 sm:$0xff]   ;;  %v17078_v10 = vld [vmem:[%s25092_s0 + $0x338] ss:$12 sps:$4 sm:$0xff]   ;;  %v17079_v13 = vld [vmem:[%s25092_s0 + $0x350] ss:$12 sps:$4 sm:$0xff]  }
  0x1a   :  { %3209 = vmatpush1.bf16.msra.mxu0 %v17006_v14  ;;  %15489 = vmatmul.mubr.msk.bf16.gmra.mxu1 %vm2787_vm0, %v17007_v15  ;;  %v17080_v12 = vld [vmem:[%s25092_s0 + $0x10c] ss:$12 sps:$4 sm:$0xff]   ;;  %v17083_v14 = vld [vmem:[%s25092_s0 + $0x368] ss:$12 sps:$4 sm:$0xff]   ;;  %v17089_v21 = vld [vmem:[%s25092_s0 + $0x3b0] ss:$12 sps:$4 sm:$0xff]  }
  0x1b   :  { %3210 = vmatprep.subr.bf16.mxu0 %v18096_v1  ;;  %15492 = vmatprep.mubr.msk.bf16.mxu1 %vm2787_vm0, %v17009_v16  ;;  %v17082_v15 = vld [vmem:[%s25092_s0 + $0x108] ss:$12 sps:$4 sm:$0xff]   ;;  %v17085_v16 = vld [vmem:[%s25092_s0 + $0x124] ss:$12 sps:$4 sm:$0xff]  }
  0x1e   :  { %3211 = vmatpush1.bf16.msra.mxu0 %v17008_v17  ;;  %v17084_v17 = vld [vmem:[%s25092_s0 + $0x380] ss:$12 sps:$4 sm:$0xff]  }
  0x1f   :  { %3212 = vmatprep.subr.bf16.mxu0 %v18096_v1 }
  0x22   :  { %3213 = vmatpush2.bf16.msra.mxu0 %v17010_v18  ;;  %15493 = vmatmul.mubr.msk.bf16.gmra.mxu1 %vm2787_vm0, %v17011_v19  ;;  %v17088_v18 = vld [vmem:[%s25092_s0 + $0x398] ss:$12 sps:$4 sm:$0xff]   ;;  %v17087_v19 = vld [vmem:[%s25092_s0 + $0x120] ss:$12 sps:$4 sm:$0xff]  }
  0x23   :  { %3214 = vmatprep.subr.bf16.mxu0 %v18096_v1  ;;  %15496 = vmatprep.mubr.msk.bf16.mxu1 %vm2787_vm0, %v17013_v20  ;;  %v17090_v20 = vld [vmem:[%s25092_s0 + $0x13c] ss:$12 sps:$4 sm:$0xff]  }
  0x26   :  { %3215 = vmatpush2.bf16.msra.mxu0 %v17012_v22  ;;  %v17093_v22 = vld [vmem:[%s25092_s0 + $0x3c8] ss:$12 sps:$4 sm:$0xff]  }
  0x27   :  { %3216 = vmatprep.subr.bf16.mxu0 %v18096_v1 }
  0x2a   :  { %3217 = vmatpush2.bf16.msra.mxu0 %v17014_v23  ;;  %15497 = vmatmul.mubr.msk.bf16.gmra.mxu1 %vm2787_vm0, %v17015_v24  ;;  %v17092_v23 = vld [vmem:[%s25092_s0 + $0x138] ss:$12 sps:$4 sm:$0xff]   ;;  %v17095_v24 = vld [vmem:[%s25092_s0 + $0x154] ss:$12 sps:$4 sm:$0xff]  }
  0x2b   :  { %3218 = vmatprep.subr.bf16.mxu0 %v18096_v1  ;;  %15500 = vmatprep.mubr.msk.bf16.mxu1 %vm2787_vm0, %v17017_v25  ;;  %v17094_v25 = vld [vmem:[%s25092_s0 + $0x3e0] ss:$12 sps:$4 sm:$0xff]  }
  0x2e   :  { %3219 = vmatpush2.bf16.msra.mxu0 %v17016_v26  ;;  %v17098_v26 = vld [vmem:[%s25092_s0 + $0x3f8] ss:$12 sps:$4 sm:$0xff]  }
  0x2f   :  { %3220 = vmatprep.subr.bf16.mxu0 %v18096_v1 }
  0x32   :  { %3221 = vmatpush2.bf16.msra.mxu0 %v17018_v27  ;;  %15501 = vmatmul.mubr.msk.bf16.gmra.mxu1 %vm2787_vm0, %v17019_v28  ;;  %v17097_v27 = vld [vmem:[%s25092_s0 + $0x150] ss:$12 sps:$4 sm:$0xff]   ;;  %v17100_v28 = vld [vmem:[%s25092_s0 + $0x16c] ss:$12 sps:$4 sm:$0xff]  }
  0x33   :  { %3222 = vmatprep.subr.bf16.mxu0 %v18096_v1  ;;  %15504 = vmatprep.mubr.msk.bf16.mxu1 %vm2787_vm0, %v17021_v29  ;;  %v17099_v29 = vld [vmem:[%s25092_s0 + $0x410] ss:$12 sps:$4 sm:$0xff]  }
  0x36   :  { %3223 = vmatpush2.bf16.msra.mxu0 %v17020_v30  ;;  %v17103_v30 = vld [vmem:[%s25092_s0 + $0x428] ss:$12 sps:$4 sm:$0xff]  }
  0x37   :  { %3224 = vmatprep.subr.bf16.mxu0 %v18096_v1 }
  0x3a   :  { %3225 = vmatpush2.bf16.msra.mxu0 %v17022_v31  ;;  %15505 = vmatmul.mubr.msk.bf16.gmra.mxu1 %vm2787_vm0, %v17023_v32  ;;  %v17102_v31 = vld [vmem:[%s25092_s0 + $0x168] ss:$12 sps:$4 sm:$0xff]   ;;  %v17105_v32 = vld [vmem:[%s25092_s0 + $0x184] ss:$12 sps:$4 sm:$0xff]  }
  0x3b   :  { %3226 = vmatprep.subr.bf16.mxu0 %v18096_v1  ;;  %15508 = vmatprep.mubr.msk.bf16.mxu1 %vm2787_vm0, %v17028_v33  ;;  %v17064_v1 = vld [vmem:[%s25092_s0 + $0x2c0] ss:$12 sps:$4 sm:$0xff]  }
  0x3c   :  { %v17104_v33 = vld [vmem:[%s25092_s0 + $0x440] ss:$12 sps:$4 sm:$0xff]  }
  0x3e   :  { %3227 = vmatpush2.bf16.msra.mxu0 %v17024_v34  ;;  %v17108_v34 = vld [vmem:[%s25092_s0 + $0x458] ss:$12 sps:$4 sm:$0xff]  }
  0x41   :  { %3229 = vmatmul.mubr.bf16.vlgmr.msra.gmra.mxu0 %v17025_v35  ;;  %v17107_v35 = vld [vmem:[%s25092_s0 + $0x180] ss:$12 sps:$4 sm:$0xff]  }
  0x42   :  { %3236 = vmatprep.mubr.bf16.mxu0 %v17030_v36  ;;  %15509 = vmatmul.mubr.msk.bf16.gmra.mxu1 %vm2787_vm0, %v17029_v37  ;;  %v17110_v36 = vld [vmem:[%s25092_s0 + $0x19c] ss:$12 sps:$4 sm:$0xff]  }
  0x43   :  { %15512 = vmatprep.mubr.msk.bf16.mxu1 %vm2787_vm0, %v17033_v38  ;;  %v17109_v37 = vld [vmem:[%s25092_s0 + $0x470] ss:$12 sps:$4 sm:$0xff]   ;;  %v17113_v38 = vld [vmem:[%s25092_s0 + $0x488] ss:$12 sps:$4 sm:$0xff]  }
  0x49   :  { %3237 = vmatmul.mubr.bf16.gmra.mxu0 %v17032_v39  ;;  %v17112_v39 = vld [vmem:[%s25092_s0 + $0x198] ss:$12 sps:$4 sm:$0xff]  }
  0x4a   :  { %3244 = vmatprep.mubr.bf16.mxu0 %v17035_v40  ;;  %15513 = vmatmul.mubr.msk.bf16.gmra.mxu1 %vm2787_vm0, %v17034_v41  ;;  %v17115_v40 = vld [vmem:[%s25092_s0 + $0x1b4] ss:$12 sps:$4 sm:$0xff]  }
  0x4b   :  { %15516 = vmatprep.mubr.msk.bf16.mxu1 %vm2787_vm0, %v17038_v42  ;;  %v17114_v41 = vld [vmem:[%s25092_s0 + $0x4a0] ss:$12 sps:$4 sm:$0xff]   ;;  %v17118_v42 = vld [vmem:[%s25092_s0 + $0x4b8] ss:$12 sps:$4 sm:$0xff]  }
  0x51   :  { %3245 = vmatmul.mubr.bf16.gmra.mxu0 %v17037_v43 }
  0x52   :  { %3252 = vmatprep.mubr.bf16.mxu0 %v17040_v44  ;;  %15517 = vmatmul.mubr.msk.bf16.gmra.mxu1 %vm2787_vm0, %v17039_v45  ;;  %v17117_v44 = vld [vmem:[%s25092_s0 + $0x1b0] ss:$12 sps:$4 sm:$0xff]   ;;  %v17120_v45 = vld [vmem:[%s25092_s0 + $0x1cc] ss:$12 sps:$4 sm:$0xff]  }
  0x53   :  { %15520 = vmatprep.mubr.msk.bf16.mxu1 %vm2787_vm0, %v17043_v46 }
  0x59   :  { %3253 = vmatmul.mubr.bf16.gmra.mxu0 %v17042_v47 }
  0x5a   :  { %3260 = vmatprep.mubr.bf16.mxu0 %v17045_v48  ;;  %15521 = vmatmul.mubr.msk.bf16.gmra.mxu1 %vm2787_vm0, %v17044_v49  ;;  %v17119_v48 = vld [vmem:[%s25092_s0 + $0x4d0] ss:$12 sps:$4 sm:$0xff]   ;;  %v17123_v49 = vld [vmem:[%s25092_s0 + $0x4e8] ss:$12 sps:$4 sm:$0xff]  }
  0x5b   :  { %15524 = vmatprep.mubr.msk.bf16.mxu1 %vm2787_vm0, %v17048_v50 }
  0x61   :  { %3261 = vmatmul.mubr.bf16.gmra.mxu0 %v17047_v51 }
  0x62   :  { %3268 = vmatprep.mubr.bf16.mxu0 %v17050_v52  ;;  %15525 = vmatmul.mubr.msk.bf16.gmra.mxu1 %vm2787_vm0, %v17049_v53  ;;  %v17122_v52 = vld [vmem:[%s25092_s0 + $0x1c8] ss:$12 sps:$4 sm:$0xff]   ;;  %v17125_v53 = vld [vmem:[%s25092_s0 + $0x1e4] ss:$12 sps:$4 sm:$0xff]  }
  0x63   :  { %15528 = vmatprep.mubr.msk.bf16.mxu1 %vm2787_vm0, %v17053_v54 }
  0x69   :  { %3269 = vmatmul.mubr.bf16.gmra.mxu0 %v17052_v55 }
  0x6a   :  { %3276 = vmatprep.mubr.bf16.mxu0 %v17055_v56  ;;  %15529 = vmatmul.mubr.msk.bf16.gmra.mxu1 %vm2787_vm0, %v17054_v57  ;;  %v17124_v56 = vld [vmem:[%s25092_s0 + $0x500] ss:$12 sps:$4 sm:$0xff]   ;;  %v17128_v57 = vld [vmem:[%s25092_s0 + $0x518] ss:$12 sps:$4 sm:$0xff]  }
  0x6b   :  { %15532 = vmatprep.mubr.msk.bf16.mxu1 %vm2787_vm0, %v17058_v58 }
  0x71   :  { %3277 = vmatmul.mubr.bf16.gmra.mxu0 %v17057_v59 }
  0x72   :  { %3284 = vmatprep.mubr.bf16.mxu0 %v17060_v60  ;;  %15533 = vmatmul.mubr.msk.bf16.gmra.mxu1 %vm2787_vm0, %v17059_v61  ;;  %v17127_v60 = vld [vmem:[%s25092_s0 + $0x1e0] ss:$12 sps:$4 sm:$0xff]   ;;  %v17130_v61 = vld [vmem:[%s25092_s0 + $0x1fc] ss:$12 sps:$4 sm:$0xff]  }
  0x73   :  { %15536 = vmatprep.mubr.msk.bf16.mxu1 %vm2787_vm0, %v17063_v62 }
  0x79   :  { %3285 = vmatmul.mubr.bf16.gmra.mxu0 %v17062_v63 }
  0x7a   :  { %3292 = vmatprep.mubr.bf16.mxu0 %v17065_v0  ;;  %15537 = vmatmul.mubr.msk.bf16.gmra.mxu1 %vm2787_vm0, %v17064_v1  ;;  %v17129_v0 = vld [vmem:[%s25092_s0 + $0x530] ss:$12 sps:$4 sm:$0xff]   ;;  %v17133_v1 = vld [vmem:[%s25092_s0 + $0x548] ss:$12 sps:$4 sm:$0xff]  }
  0x7b   :  { %15540 = vmatprep.mubr.msk.bf16.mxu1 %vm2787_vm0, %v17068_v2 }
  0x81   :  { %3293 = vmatmul.mubr.bf16.gmra.mxu0 %v17067_v3 }
  0x82   :  { %3300 = vmatprep.mubr.bf16.mxu0 %v17070_v4  ;;  %15541 = vmatmul.mubr.msk.bf16.gmra.mxu1 %vm2787_vm0, %v17069_v5  ;;  %v17132_v4 = vld [vmem:[%s25092_s0 + $0x1f8] ss:$12 sps:$4 sm:$0xff]   ;;  %v17135_v5 = vld [vmem:[%s25092_s0 + $0x214] ss:$12 sps:$4 sm:$0xff]  }
  0x83   :  { %15544 = vmatprep.mubr.msk.bf16.mxu1 %vm2787_vm0, %v17073_v6 }
  0x89   :  { %3301 = vmatmul.mubr.bf16.gmra.mxu0 %v17072_v7 }
  0x8a   :  { %3308 = vmatprep.mubr.bf16.mxu0 %v17075_v8  ;;  %15545 = vmatmul.mubr.msk.bf16.gmra.mxu1 %vm2787_vm0, %v17074_v9  ;;  %v17134_v8 = vld [vmem:[%s25092_s0 + $0x560] ss:$12 sps:$4 sm:$0xff]   ;;  %v17138_v9 = vld [vmem:[%s25092_s0 + $0x578] ss:$12 sps:$4 sm:$0xff]  }
  0x8b   :  { %15548 = vmatprep.mubr.msk.bf16.mxu1 %vm2787_vm0, %v17078_v10 }
  0x91   :  { %3309 = vmatmul.mubr.bf16.gmra.mxu0 %v17077_v11 }
  0x92   :  { %3316 = vmatprep.mubr.bf16.mxu0 %v17080_v12  ;;  %15549 = vmatmul.mubr.msk.bf16.gmra.mxu1 %vm2787_vm0, %v17079_v13  ;;  %v17137_v12 = vld [vmem:[%s25092_s0 + $0x210] ss:$12 sps:$4 sm:$0xff]   ;;  %v17140_v13 = vld [vmem:[%s25092_s0 + $0x22c] ss:$12 sps:$4 sm:$0xff]  }
  0x93   :  { %15552 = vmatprep.mubr.msk.bf16.mxu1 %vm2787_vm0, %v17083_v14 }
  0x99   :  { %3317 = vmatmul.mubr.bf16.gmra.mxu0 %v17082_v15 }
  0x9a   :  { %3324 = vmatprep.mubr.bf16.mxu0 %v17085_v16  ;;  %15553 = vmatmul.mubr.msk.bf16.gmra.mxu1 %vm2787_vm0, %v17084_v17  ;;  %v17139_v16 = vld [vmem:[%s25092_s0 + $0x590] ss:$12 sps:$4 sm:$0xff]   ;;  %v17143_v17 = vld [vmem:[%s25092_s0 + $0x5a8] ss:$12 sps:$4 sm:$0xff]  }
  0x9b   :  { %15556 = vmatprep.mubr.msk.bf16.mxu1 %vm2787_vm0, %v17088_v18 }
  0xa1   :  { %3325 = vmatmul.mubr.bf16.gmra.mxu0 %v17087_v19 }
  0xa2   :  { %3332 = vmatprep.mubr.bf16.mxu0 %v17090_v20  ;;  %15557 = vmatmul.mubr.msk.bf16.gmra.mxu1 %vm2787_vm0, %v17089_v21  ;;  %v17142_v20 = vld [vmem:[%s25092_s0 + $0x228] ss:$12 sps:$4 sm:$0xff]   ;;  %v17145_v21 = vld [vmem:[%s25092_s0 + $0x244] ss:$12 sps:$4 sm:$0xff]  }
  0xa3   :  { %15560 = vmatprep.mubr.msk.bf16.mxu1 %vm2787_vm0, %v17093_v22 }
  0xa9   :  { %3333 = vmatmul.mubr.bf16.gmra.mxu0 %v17092_v23 }
  0xaa   :  { %3340 = vmatprep.mubr.bf16.mxu0 %v17095_v24  ;;  %15561 = vmatmul.mubr.msk.bf16.gmra.mxu1 %vm2787_vm0, %v17094_v25  ;;  %v17144_v24 = vld [vmem:[%s25092_s0 + $0x5c0] ss:$12 sps:$4 sm:$0xff]   ;;  %v17148_v25 = vld [vmem:[%s25092_s0 + $0x5d8] ss:$12 sps:$4 sm:$0xff]  }
  0xab   :  { %15564 = vmatprep.mubr.msk.bf16.mxu1 %vm2787_vm0, %v17098_v26 }
  0xb1   :  { %3341 = vmatmul.mubr.bf16.gmra.mxu0 %v17097_v27 }
  0xb2   :  { %3348 = vmatprep.mubr.bf16.mxu0 %v17100_v28  ;;  %15565 = vmatmul.mubr.msk.bf16.gmra.mxu1 %vm2787_vm0, %v17099_v29  ;;  %v17147_v28 = vld [vmem:[%s25092_s0 + $0x240] ss:$12 sps:$4 sm:$0xff]   ;;  %v17150_v29 = vld [vmem:[%s25092_s0 + $0x25c] ss:$12 sps:$4 sm:$0xff]  }
  0xb3   :  { %15568 = vmatprep.mubr.msk.bf16.mxu1 %vm2787_vm0, %v17103_v30 }
  0xb9   :  { %3349 = vmatmul.mubr.bf16.gmra.mxu0 %v17102_v31  ;;  %v13073_v31 = vld [vmem:[%s25094_s2] ss:$0 sm:$0xff] }
  0xba   :  { %3356 = vmatprep.mubr.bf16.mxu0 %v17105_v32  ;;  %15569 = vmatmul.mubr.msk.bf16.gmra.mxu1 %vm2787_vm0, %v17104_v33  ;;  %v17149_v33 = vld [vmem:[%s25092_s0 + $0x5f0] ss:$12 sps:$4 sm:$0xff]  }
  0xbb   :  { %15572 = vmatprep.mubr.msk.bf16.mxu1 %vm2787_vm0, %v17108_v34  ;;  %v17153_v34 = vld [vmem:[%s25092_s0 + $0x608] ss:$12 sps:$4 sm:$0xff]  }
  0xc1   :  { %3357 = vmatmul.mubr.bf16.gmra.mxu0 %v17107_v35 }
  0xc2   :  { %3364 = vmatprep.mubr.bf16.mxu0 %v17110_v36  ;;  %15573 = vmatmul.mubr.msk.bf16.gmra.mxu1 %vm2787_vm0, %v17109_v37 }
  0xc3   :  { %15576 = vmatprep.mubr.msk.bf16.mxu1 %vm2787_vm0, %v17113_v38 }
  0xc9   :  { %3365 = vmatmul.mubr.bf16.gmra.mxu0 %v17112_v39 }
  0xca   :  { %3372 = vmatprep.mubr.bf16.mxu0 %v17115_v40  ;;  %v18565_v43 = vpop.f32.mrf.mxu1  ;;  %15577 = vmatmul.mubr.msk.bf16.gmra.mxu1 %vm2787_vm0, %v17114_v41 }
  0xcb   :  { %15580 = vmatprep.mubr.msk.bf16.mxu1 %vm2787_vm0, %v17118_v42 }
  0xcc   :  { %v18575_v46 = vpop.f32.mrf.mxu1 }
  0xce   :  { %v18577_v47 = vpop.f32.mrf.mxu1 }
  0xd0   :  { %v18585_v50 = vpop.f32.mrf.mxu1 }
  0xd1   :  { %3373 = vmatmul.mubr.bf16.gmra.mxu0 %v17117_v44 }
  0xd2   :  { %3380 = vmatprep.mubr.bf16.mxu0 %v17120_v45  ;;  %v18587_v51 = vpop.f32.mrf.mxu1  ;;  %15581 = vmatmul.mubr.msk.bf16.gmra.mxu1 %vm2787_vm0, %v17119_v48 }
  0xd3   :  { %25309 = vst [vmem:[#allocation5_spill] sm:$0xff] %v18587_v51  ;;  %15584 = vmatprep.mubr.msk.bf16.mxu1 %vm2787_vm0, %v17123_v49 }
  0xd4   :  { %v18597_v54 = vpop.f32.mrf.mxu1 }
  0xd6   :  { %v18599_v55 = vpop.f32.mrf.mxu1 }
  0xd7   :  { %25310 = vst [vmem:[#allocation6_spill] sm:$0xff] %v18599_v55 }
  0xd8   :  { %v18607_v58 = vpop.f32.mrf.mxu1 }
  0xd9   :  { %3381 = vmatmul.mubr.bf16.gmra.mxu0 %v17122_v52 }
  0xda   :  { %3388 = vmatprep.mubr.bf16.mxu0 %v17125_v53  ;;  %v18609_v59 = vpop.f32.mrf.mxu1  ;;  %15585 = vmatmul.mubr.msk.bf16.gmra.mxu1 %vm2787_vm0, %v17124_v56 }
  0xdb   :  { %25311 = vst [vmem:[#allocation7_spill] sm:$0xff] %v18609_v59  ;;  %15588 = vmatprep.mubr.msk.bf16.mxu1 %vm2787_vm0, %v17128_v57 }
  0xdc   :  { %v18619_v62 = vpop.f32.mrf.mxu1 }
  0xdd   :  { %25312 = vst [vmem:[#allocation8_spill] sm:$0xff] %v18619_v62 }
  0xde   :  { %v18621_v63 = vpop.f32.mrf.mxu1 }
  0xdf   :  { %25313 = vst [vmem:[#allocation9_spill] sm:$0xff] %v18621_v63 }
  0xe0   :  { %v18629_v2 = vpop.f32.mrf.mxu1 }
  0xe1   :  { %25314 = vst [vmem:[#allocation10_spill] sm:$0xff] %v18629_v2  ;;  %3389 = vmatmul.mubr.bf16.gmra.mxu0 %v17127_v60 }
  0xe2   :  { %3396 = vmatprep.mubr.bf16.mxu0 %v17130_v61  ;;  %v18631_v3 = vpop.f32.mrf.mxu1  ;;  %15589 = vmatmul.mubr.msk.bf16.gmra.mxu1 %vm2787_vm0, %v17129_v0 }
  0xe3   :  { %25315 = vst [vmem:[#allocation11_spill] sm:$0xff] %v18631_v3  ;;  %15592 = vmatprep.mubr.msk.bf16.mxu1 %vm2787_vm0, %v17133_v1 }
  0xe4   :  { %v18641_v6 = vpop.f32.mrf.mxu1 }
  0xe5   :  { %25316 = vst [vmem:[#allocation12_spill] sm:$0xff] %v18641_v6 }
  0xe6   :  { %v18643_v7 = vpop.f32.mrf.mxu1 }
  0xe7   :  { %25317 = vst [vmem:[#allocation13_spill] sm:$0xff] %v18643_v7 }
  0xe8   :  { %v18651_v10 = vpop.f32.mrf.mxu1 }
  0xe9   :  { %25318 = vst [vmem:[#allocation14_spill] sm:$0xff] %v18651_v10  ;;  %3397 = vmatmul.mubr.bf16.gmra.mxu0 %v17132_v4 }
  0xea   :  { %3404 = vmatprep.mubr.bf16.mxu0 %v17135_v5  ;;  %v18653_v11 = vpop.f32.mrf.mxu1  ;;  %15593 = vmatmul.mubr.msk.bf16.gmra.mxu1 %vm2787_vm0, %v17134_v8 }
  0xeb   :  { %25319 = vst [vmem:[#allocation15_spill] sm:$0xff] %v18653_v11  ;;  %15596 = vmatprep.mubr.msk.bf16.mxu1 %vm2787_vm0, %v17138_v9 }
  0xec   :  { %v18663_v14 = vpop.f32.mrf.mxu1 }
  0xed   :  { %25320 = vst [vmem:[#allocation16_spill] sm:$0xff] %v18663_v14 }
  0xee   :  { %v18665_v15 = vpop.f32.mrf.mxu1 }
  0xef   :  { %25321 = vst [vmem:[#allocation17_spill] sm:$0xff] %v18665_v15 }
  0xf0   :  { %v18673_v18 = vpop.f32.mrf.mxu1 }
  0xf1   :  { %25322 = vst [vmem:[#allocation18_spill] sm:$0xff] %v18673_v18  ;;  %3405 = vmatmul.mubr.bf16.gmra.mxu0 %v17137_v12 }
  0xf2   :  { %3412 = vmatprep.mubr.bf16.mxu0 %v17140_v13  ;;  %v18675_v19 = vpop.f32.mrf.mxu1  ;;  %15597 = vmatmul.mubr.msk.bf16.gmra.mxu1 %vm2787_vm0, %v17139_v16 }
  0xf3   :  { %25323 = vst [vmem:[#allocation19_spill] sm:$0xff] %v18675_v19  ;;  %15600 = vmatprep.mubr.msk.bf16.mxu1 %vm2787_vm0, %v17143_v17 }
  0xf4   :  { %v18685_v22 = vpop.f32.mrf.mxu1 }
  0xf5   :  { %25324 = vst [vmem:[#allocation20_spill] sm:$0xff] %v18685_v22 }
  0xf6   :  { %v18687_v23 = vpop.f32.mrf.mxu1 }
  0xf7   :  { %25325 = vst [vmem:[#allocation21_spill] sm:$0xff] %v18687_v23 }
  0xf8   :  { %v18695_v26 = vpop.f32.mrf.mxu1 }
  0xf9   :  { %25326 = vst [vmem:[#allocation22_spill] sm:$0xff] %v18695_v26  ;;  %3413 = vmatmul.mubr.bf16.gmra.mxu0 %v17142_v20 }
  0xfa   :  { %3420 = vmatprep.mubr.bf16.mxu0 %v17145_v21  ;;  %v18697_v27 = vpop.f32.mrf.mxu1  ;;  %15601 = vmatmul.mubr.msk.bf16.gmra.mxu1 %vm2787_vm0, %v17144_v24 }
  0xfb   :  { %25327 = vst [vmem:[#allocation23_spill] sm:$0xff] %v18697_v27  ;;  %15604 = vmatprep.mubr.msk.bf16.mxu1 %vm2787_vm0, %v17148_v25 }
  0xfc   :  { %v18707_v30 = vpop.f32.mrf.mxu1 }
  0xfd   :  { %25328 = vst [vmem:[#allocation24_spill] sm:$0xff] %v18707_v30 }
  0xfe   :  { %v18712_v32 = vpop.f32.mrf.mxu1 }
  0xff   :  { %25329 = vst [vmem:[#allocation25_spill] sm:$0xff] %v18712_v32 }
 0x100   :  { %v18720_v35 = vpop.f32.mrf.mxu1 }
 0x101   :  { %25330 = vst [vmem:[#allocation26_spill] sm:$0xff] %v18720_v35  ;;  %v3230_v36 = vpop.f32.mrf.mxu0  ;;  %3421 = vmatmul.mubr.bf16.gmra.mxu0 %v17147_v28 }
 0x102   :  { %v3231_v37 = vadd.f32 %v13073_v31, %v3230_v36  ;;  %3428 = vmatprep.mubr.bf16.mxu0 %v17150_v29  ;;  %v18722_v38 = vpop.f32.mrf.mxu1  ;;  %15605 = vmatmul.mubr.msk.bf16.gmra.mxu1 %vm2787_vm0, %v17149_v33 }
 0x103   :  { %25331 = vst [vmem:[#allocation27_spill] sm:$0xff] %v18722_v38  ;;  %v3232_v39 = vpop.f32.mrf.mxu0 }
 0x104   :  { %20 = vsyncpa [#allocation3], 0  ;;  %v18726_v40 = vadd.f32 %v18575_v46, %v3231_v37  ;;  %15608 = vmatprep.mubr.msk.bf16.mxu1 %vm2787_vm0, %v17153_v34  ;;  %v18729_v41 = vpop.f32.mrf.mxu1  ;;  %v17152_v44 = vld [vmem:[%s25092_s0 + $0x258] ss:$12 sps:$4 sm:$0xff]   ;;  %v17155_v48 = vld [vmem:[%s25092_s0 + $0x274] ss:$12 sps:$4 sm:$0xff]  }
 0x105   :  { %25333 = vst [vmem:[#allocation29_spill] sm:$0xff] %v18729_v41  ;;  %v3233_v42 = vpop.f32.mrf.mxu0  ;;  %v13643_v49 = vld [vmem:[%s25095_s3 + $0x78] sm:$0xff]  ;;  %v17154_v53 = vld [vmem:[%s25092_s0 + $0x620] ss:$12 sps:$4 sm:$0xff]   ;;  %v17163_v21 = vld [vmem:[%s25092_s0 + $0x668] ss:$12 sps:$4 sm:$0xff]  }
 0x106   :  { %25332 = vst [vmem:[#allocation28_spill] sm:$0xff] %v18726_v40  ;;  %v3234_v45 = vadd.f32 %v13073_v31, %v3233_v42  ;;  %v18740_v46 = vpop.f32.mrf.mxu1  ;;  %15752 = vmatprep.subr.mxu1 %v13643_v49  ;;  %v17158_v57 = vld [vmem:[%s25092_s0 + $0x638] ss:$12 sps:$4 sm:$0xff]   ;;  %v17157_v9 = vld [vmem:[%s25092_s0 + $0x270] ss:$12 sps:$4 sm:$0xff]   ;;  %vm5373_vm1 = vcmask 523264  }
 0x107   :  { %25334 = vst [vmem:[#allocation30_spill] sm:$0xff] %v18740_v46  ;;  %v3235_v52 = vpop.f32.mrf.mxu0  ;;  %15753 = vmatpush3.msra.mxu1 %v13643_v49  ;;  %v17160_v13 = vld [vmem:[%s25092_s0 + $0x28c] ss:$12 sps:$4 sm:$0xff]   ;;  %v17162_v37 = vld [vmem:[%s25092_s0 + $0x288] ss:$12 sps:$4 sm:$0xff]   ;;  %vm6284_vm2 = vcmask 1046528  }
 0x108   :  { %v18746_v56 = vadd.f32 %v18585_v50, %v3234_v45  ;;  %v18751_v60 = vpop.f32.mrf.mxu1  ;;  %v17167_v42 = vld [vmem:[%s25092_s0 + $0x2a4] ss:$12 sps:$4 sm:$0xff]   ;;  %v17185_v15 = vld [vmem:[%s25092_s0 + $0x300] ss:$12 sps:$4 sm:$0xff]   ;;  %vm12118_vm3 = vcmask 654336   ;;  %vm12463_vm4 = vcmask 15360  }
 0x109   :  { %25336 = vst [vmem:[#allocation32_spill] sm:$0xff] %v18751_v60  ;;  %v3238_v61 = vpop.f32.mrf.mxu0  ;;  %3429 = vmatmul.mubr.bf16.gmra.mxu0 %v17152_v44  ;;  %v17168_v49 = vld [vmem:[%s25092_s0 + $0x698] ss:$12 sps:$4 sm:$0xff]   ;;  %v17225_v41 = vld [vmem:[%s25092_s0 + $0x3c0] ss:$12 sps:$4 sm:$0xff]   ;;  %vm12512_vm5 = vcmask 1041408  }
 0x10a   :  { %25335 = vst [vmem:[#allocation31_spill] sm:$0xff] %v18746_v56  ;;  %v3239_v0 = vadd.f32 %v13073_v31, %v3238_v61  ;;  %3436 = vmatprep.mubr.bf16.mxu0 %v17155_v48  ;;  %v18753_v1 = vpop.f32.mrf.mxu1  ;;  %15609 = vmatmul.mubr.msk.bf16.gmra.mxu1 %vm2787_vm0, %v17154_v53  ;;  %v17190_v55 = vld [vmem:[%s25092_s0 + $0x318] ss:$12 sps:$4 sm:$0xff]   ;;  %v17245_v22 = vld [vmem:[%s25092_s0 + $0x420] ss:$12 sps:$4 sm:$0xff]   ;;  %vm18099_vm6 = vmmov 0  }
 0x10b   :  { %25337 = vst [vmem:[#allocation33_spill] sm:$0xff] %v18753_v1  ;;  %v3240_v4 = vpop.f32.mrf.mxu0  ;;  %15612 = vmatprep.mubr.msk.bf16.mxu1 %vm2787_vm0, %v17158_v57  ;;  %v17220_v1 = vld [vmem:[%s25092_s0 + $0x3a8] ss:$12 sps:$4 sm:$0xff]   ;;  %v17265_v6 = vld [vmem:[%s25092_s0 + $0x480] ss:$12 sps:$4 sm:$0xff]   ;;  %vm13055_vm7 = vcmask 7168  }
 0x10c   :  { %v18757_v5 = vadd.f32 %v18565_v43, %v3239_v0  ;;  %v18760_v50 = vpop.f32.mrf.mxu1  ;;  %v17159_v43 = vld [vmem:[%s25092_s0 + $0x650] ss:$12 sps:$4 sm:$0xff]   ;;  %v17165_v0 = vld [vmem:[%s25092_s0 + $0x2a0] ss:$12 sps:$4 sm:$0xff]   ;;  %vm13057_vm8 = vcmask 9216  }
 0x10d   :  { %25339 = vst [vmem:[#allocation35_spill] sm:$0xff] %v18760_v50  ;;  %v3241_v8 = vpop.f32.mrf.mxu0  ;;  %v17172_v4 = vld [vmem:[%s25092_s0 + $0x2bc] ss:$12 sps:$4 sm:$0xff]  }
 0x10e   :  { %25338 = vst [vmem:[#allocation34_spill] sm:$0xff] %v18757_v5  ;;  %v3242_v12 = vadd.f32 %v13073_v31, %v3241_v8  ;;  %v18768_v16 = vpop.f32.mrf.mxu1  ;;  %v17275_v62 = vld [vmem:[%s25092_s0 + $0x4b0] ss:$12 sps:$4 sm:$0xff]  }
 0x10f   :  { %25340 = vst [vmem:[#allocation36_spill] sm:$0xff] %v18768_v16  ;;  %v3243_v17 = vpop.f32.mrf.mxu0 }
 0x110   :  { %v18774_v20 = vadd.f32 %v18577_v47, %v3242_v12  ;;  %v18779_v24 = vpop.f32.mrf.mxu1  ;;  %v17169_v12 = vld [vmem:[%s25092_s0 + $0x6b0] ss:$12 sps:$4 sm:$0xff]  }
 0x111   :  { %25342 = vst [vmem:[#allocation38_spill] sm:$0xff] %v18779_v24  ;;  %v3246_v25 = vpop.f32.mrf.mxu0  ;;  %3437 = vmatmul.mubr.bf16.gmra.mxu0 %v17157_v9 }
 0x112   :  { %25341 = vst [vmem:[#allocation37_spill] sm:$0xff] %v18774_v20  ;;  %v3247_v28 = vadd.f32 %v13073_v31, %v3246_v25  ;;  %3444 = vmatprep.mubr.bf16.mxu0 %v17160_v13  ;;  %v18781_v29 = vpop.f32.mrf.mxu1  ;;  %15613 = vmatmul.mubr.msk.bf16.gmra.mxu1 %vm2787_vm0, %v17159_v43  ;;  %v17173_v13 = vld [vmem:[%s25092_s0 + $0x6c8] ss:$12 sps:$4 sm:$0xff]  }
 0x113   :  { %25343 = vst [vmem:[#allocation39_spill] sm:$0xff] %v18781_v29  ;;  %v3248_v33 = vpop.f32.mrf.mxu0  ;;  %15616 = vmatprep.mubr.msk.bf16.mxu1 %vm2787_vm0, %v17163_v21 }
 0x114   :  { %v18785_v34 = vadd.f32 %v18597_v54, %v3247_v28  ;;  %v18788_v47 = vpop.f32.mrf.mxu1  ;;  %v17164_v54 = vld [vmem:[%s25092_s0 + $0x680] ss:$12 sps:$4 sm:$0xff]  }
 0x115   :  { %25345 = vst [vmem:[#allocation41_spill] sm:$0xff] %v18788_v47  ;;  %v3249_v36 = vpop.f32.mrf.mxu0 }
 0x116   :  { %25344 = vst [vmem:[#allocation40_spill] sm:$0xff] %v18785_v34  ;;  %v3250_v39 = vadd.f32 %v13073_v31, %v3249_v36  ;;  %v18796_v44 = vpop.f32.mrf.mxu1  ;;  %v17170_v36 = vld [vmem:[%s25092_s0 + $0x2b8] ss:$12 sps:$4 sm:$0xff]   ;;  %v17285_v34 = vld [vmem:[%s25092_s0 + $0x4e0] ss:$12 sps:$4 sm:$0xff]  }
 0x117   :  { %25346 = vst [vmem:[#allocation42_spill] sm:$0xff] %v18796_v44  ;;  %v3251_v45 = vpop.f32.mrf.mxu0  ;;  %v17180_v44 = vld [vmem:[%s25092_s0 + $0x2e8] ss:$12 sps:$4 sm:$0xff]  }
 0x118   :  { %v18802_v48 = vadd.f32 %v18607_v58, %v3250_v39  ;;  %v18807_v52 = vpop.f32.mrf.mxu1  ;;  %v17174_v45 = vld [vmem:[%s25092_s0 + $0x6e0] ss:$12 sps:$4 sm:$0xff]  }
 0x119   :  { %25348 = vst [vmem:[#allocation44_spill] sm:$0xff] %v18807_v52  ;;  %v18809_v31 = vpop.f32.mrf.mxu0  ;;  %3445 = vmatmul.mubr.bf16.gmra.mxu0 %v17162_v37  ;;  %v17177_v37 = vld [vmem:[%s25092_s0 + $0x2d4] ss:$12 sps:$4 sm:$0xff]  }
 0x11a   :  { %25347 = vst [vmem:[#allocation43_spill] sm:$0xff] %v18802_v48  ;;  %25349 = vst [vmem:[#allocation45_spill] sm:$0xff] %v18809_v31  ;;  %3452 = vmatprep.mubr.bf16.mxu0 %v17167_v42  ;;  %v18811_v53 = vpop.f32.mrf.mxu1  ;;  %15617 = vmatmul.mubr.msk.bf16.gmra.mxu1 %vm2787_vm0, %v17164_v54  ;;  %v17178_v54 = vld [vmem:[%s25092_s0 + $0x6f8] ss:$12 sps:$4 sm:$0xff]   ;;  %v17280_v48 = vld [vmem:[%s25092_s0 + $0x4c8] ss:$12 sps:$4 sm:$0xff]  }
 0x11b   :  { %25350 = vst [vmem:[#allocation46_spill] sm:$0xff] %v18811_v53  ;;  %v3256_v57 = vpop.f32.mrf.mxu0  ;;  %15620 = vmatprep.mubr.msk.bf16.mxu1 %vm2787_vm0, %v17168_v49  ;;  %v17325_v31 = vld [vmem:[%s25092_s0 + $0x5a0] ss:$12 sps:$4 sm:$0xff]  }
 0x11c   :  { %v18815_v61 = vpop.f32.mrf.mxu1 }
 0x11d   :  { %25351 = vst [vmem:[#allocation47_spill] sm:$0xff] %v18815_v61  ;;  %v18817_v58 = vpop.f32.mrf.mxu0  ;;  %v17215_v61 = vld [vmem:[%s25092_s0 + $0x390] ss:$12 sps:$4 sm:$0xff]  }
 0x11e   :  { %25352 = vst [vmem:[#allocation48_spill] sm:$0xff] %v18817_v58  ;;  %v18825_v8 = vpop.f32.mrf.mxu1 }
 0x11f   :  { %25353 = vst [vmem:[#allocation49_spill] sm:$0xff] %v18825_v8  ;;  %v3259_v9 = vpop.f32.mrf.mxu0 }
 0x120   :  { %v18833_v17 = vpop.f32.mrf.mxu1 }
 0x121   :  { %25354 = vst [vmem:[#allocation50_spill] sm:$0xff] %v18833_v17  ;;  %v18835_v43 = vpop.f32.mrf.mxu0  ;;  %3453 = vmatmul.mubr.bf16.gmra.mxu0 %v17165_v0 }
 0x122   :  { %25355 = vst [vmem:[#allocation51_spill] sm:$0xff] %v18835_v43  ;;  %3460 = vmatprep.mubr.bf16.mxu0 %v17172_v4  ;;  %v18837_v21 = vpop.f32.mrf.mxu1  ;;  %15621 = vmatmul.mubr.msk.bf16.gmra.mxu1 %vm2787_vm0, %v17169_v12 }
 0x123   :  { %25356 = vst [vmem:[#allocation52_spill] sm:$0xff] %v18837_v21  ;;  %v3264_v25 = vpop.f32.mrf.mxu0  ;;  %15624 = vmatprep.mubr.msk.bf16.mxu1 %vm2787_vm0, %v17173_v13  ;;  %v17175_v13 = vld [vmem:[%s25092_s0 + $0x2d0] ss:$12 sps:$4 sm:$0xff]   ;;  %v17210_v21 = vld [vmem:[%s25092_s0 + $0x378] ss:$12 sps:$4 sm:$0xff]  }
 0x124   :  { %v18841_v28 = vpop.f32.mrf.mxu1  ;;  %v17182_v25 = vld [vmem:[%s25092_s0 + $0x2ec] ss:$12 sps:$4 sm:$0xff]  }
 0x125   :  { %25357 = vst [vmem:[#allocation53_spill] sm:$0xff] %v18841_v28  ;;  %v18843_v33 = vpop.f32.mrf.mxu0 }
 0x126   :  { %25358 = vst [vmem:[#allocation54_spill] sm:$0xff] %v18843_v33  ;;  %v18851_v39 = vpop.f32.mrf.mxu1 }
 0x127   :  { %25359 = vst [vmem:[#allocation55_spill] sm:$0xff] %v18851_v39  ;;  %v3267_v42 = vpop.f32.mrf.mxu0 }
 0x128   :  { %v18859_v49 = vpop.f32.mrf.mxu1  ;;  %v17179_v42 = vld [vmem:[%s25092_s0 + $0x710] ss:$12 sps:$4 sm:$0xff]  }
 0x129   :  { %25360 = vst [vmem:[#allocation56_spill] sm:$0xff] %v18859_v49  ;;  %v18861_v57 = vpop.f32.mrf.mxu0  ;;  %3461 = vmatmul.mubr.bf16.gmra.mxu0 %v17170_v36 }
 0x12a   :  { %25361 = vst [vmem:[#allocation57_spill] sm:$0xff] %v18861_v57  ;;  %3468 = vmatprep.mubr.bf16.mxu0 %v17177_v37  ;;  %v18863_v0 = vpop.f32.mrf.mxu1  ;;  %15625 = vmatmul.mubr.msk.bf16.gmra.mxu1 %vm2787_vm0, %v17174_v45  ;;  %v17183_v45 = vld [vmem:[%s25092_s0 + $0x728] ss:$12 sps:$4 sm:$0xff]  }
 0x12b   :  { %25362 = vst [vmem:[#allocation58_spill] sm:$0xff] %v18863_v0  ;;  %v3272_v4 = vpop.f32.mrf.mxu0  ;;  %15628 = vmatprep.mubr.msk.bf16.mxu1 %vm2787_vm0, %v17178_v54 }
 0x12c   :  { %v18867_v9 = vpop.f32.mrf.mxu1 }
 0x12d   :  { %25363 = vst [vmem:[#allocation59_spill] sm:$0xff] %v18867_v9  ;;  %v18869_v12 = vpop.f32.mrf.mxu0 }
 0x12e   :  { %25364 = vst [vmem:[#allocation60_spill] sm:$0xff] %v18869_v12  ;;  %v18877_v36 = vpop.f32.mrf.mxu1 }
 0x12f   :  { %25365 = vst [vmem:[#allocation61_spill] sm:$0xff] %v18877_v36  ;;  %v3275_v37 = vpop.f32.mrf.mxu0 }
 0x130   :  { %v18885_v54 = vpop.f32.mrf.mxu1 }
 0x131   :  { %25366 = vst [vmem:[#allocation62_spill] sm:$0xff] %v18885_v54  ;;  %v18887_v4 = vpop.f32.mrf.mxu0  ;;  %3469 = vmatmul.mubr.bf16.gmra.mxu0 %v17175_v13  ;;  %v17187_v13 = vld [vmem:[%s25092_s0 + $0x304] ss:$12 sps:$4 sm:$0xff]  }
 0x132   :  { %25367 = vst [vmem:[#allocation63_spill] sm:$0xff] %v18887_v4  ;;  %3476 = vmatprep.mubr.bf16.mxu0 %v17182_v25  ;;  %v18889_v39 = vpop.f32.mrf.mxu1  ;;  %15629 = vmatmul.mubr.msk.bf16.gmra.mxu1 %vm2787_vm0, %v17179_v42  ;;  %v17188_v42 = vld [vmem:[%s25092_s0 + $0x758] ss:$12 sps:$4 sm:$0xff]  }
 0x133   :  { %25368 = vst [vmem:[#allocation64_spill] sm:$0xff] %v18889_v39  ;;  %v3280_v36 = vpop.f32.mrf.mxu0  ;;  %15632 = vmatprep.mubr.msk.bf16.mxu1 %vm2787_vm0, %v17183_v45  ;;  %v17270_v4 = vld [vmem:[%s25092_s0 + $0x498] ss:$12 sps:$4 sm:$0xff]  }
 0x134   :  { %v18893_v37 = vpop.f32.mrf.mxu1  ;;  %v17184_v36 = vld [vmem:[%s25092_s0 + $0x740] ss:$12 sps:$4 sm:$0xff]  }
 0x135   :  { %25369 = vst [vmem:[#allocation65_spill] sm:$0xff] %v18893_v37  ;;  %v18895_v8 = vpop.f32.mrf.mxu0  ;;  %v17205_v37 = vld [vmem:[%s25092_s0 + $0x360] ss:$12 sps:$4 sm:$0xff]  }
 0x136   :  { %25370 = vst [vmem:[#allocation66_spill] sm:$0xff] %v18895_v8  ;;  %v18903_v25 = vpop.f32.mrf.mxu1 }
 0x137   :  { %25371 = vst [vmem:[#allocation67_spill] sm:$0xff] %v18903_v25  ;;  %v3283_v16 = vpop.f32.mrf.mxu0 }
 0x138   :  { %v18911_v45 = vpop.f32.mrf.mxu1 }
 0x139   :  { %25372 = vst [vmem:[#allocation68_spill] sm:$0xff] %v18911_v45  ;;  %v18913_v46 = vpop.f32.mrf.mxu0  ;;  %3477 = vmatmul.mubr.bf16.gmra.mxu0 %v17180_v44  ;;  %v17192_v44 = vld [vmem:[%s25092_s0 + $0x31c] ss:$12 sps:$4 sm:$0xff]  }
 0x13a   :  { %25373 = vst [vmem:[#allocation69_spill] sm:$0xff] %v18913_v46  ;;  %3484 = vmatprep.mubr.bf16.mxu0 %v17187_v13  ;;  %v18915_v32 = vpop.f32.mrf.mxu1  ;;  %15633 = vmatmul.mubr.msk.bf16.gmra.mxu1 %vm2787_vm0, %v17184_v36  ;;  %v17193_v36 = vld [vmem:[%s25092_s0 + $0x788] ss:$12 sps:$4 sm:$0xff]  }
 0x13b   :  { %25374 = vst [vmem:[#allocation70_spill] sm:$0xff] %v18915_v32  ;;  %v3288_v25 = vpop.f32.mrf.mxu0  ;;  %15636 = vmatprep.mubr.msk.bf16.mxu1 %vm2787_vm0, %v17188_v42 }
 0x13c   :  { %v18919_v16 = vpop.f32.mrf.mxu1  ;;  %v17189_v25 = vld [vmem:[%s25092_s0 + $0x770] ss:$12 sps:$4 sm:$0xff]  }
 0x13d   :  { %25375 = vst [vmem:[#allocation71_spill] sm:$0xff] %v18919_v16  ;;  %v18921_v23 = vpop.f32.mrf.mxu0 }
 0x13e   :  { %25376 = vst [vmem:[#allocation72_spill] sm:$0xff] %v18921_v23  ;;  %v18929_v13 = vpop.f32.mrf.mxu1 }
 0x13f   :  { %25377 = vst [vmem:[#allocation73_spill] sm:$0xff] %v18929_v13  ;;  %v3291_v7 = vpop.f32.mrf.mxu0 }
 0x140   :  { %v18937_v42 = vpop.f32.mrf.mxu1 }
 0x141   :  { %25378 = vst [vmem:[#allocation74_spill] sm:$0xff] %v18937_v42  ;;  %v18939_v23 = vpop.f32.mrf.mxu0  ;;  %3485 = vmatmul.mubr.bf16.gmra.mxu0 %v17185_v15  ;;  %v17197_v15 = vld [vmem:[%s25092_s0 + $0x334] ss:$12 sps:$4 sm:$0xff]  }
 0x142   :  { %25379 = vst [vmem:[#allocation75_spill] sm:$0xff] %v18939_v23  ;;  %3492 = vmatprep.mubr.bf16.mxu0 %v17192_v44  ;;  %v18941_v63 = vpop.f32.mrf.mxu1  ;;  %15637 = vmatmul.mubr.msk.bf16.gmra.mxu1 %vm2787_vm0, %v17189_v25  ;;  %v17198_v25 = vld [vmem:[%s25092_s0 + $0x7b8] ss:$12 sps:$4 sm:$0xff]   ;;  %v17200_v42 = vld [vmem:[%s25092_s0 + $0x348] ss:$12 sps:$4 sm:$0xff]  }
 0x143   :  { %25380 = vst [vmem:[#allocation76_spill] sm:$0xff] %v18941_v63  ;;  %v3296_v13 = vpop.f32.mrf.mxu0  ;;  %15640 = vmatprep.mubr.msk.bf16.mxu1 %vm2787_vm0, %v17193_v36  ;;  %v13642_v63 = vld [vmem:[%s25095_s3 + $0x70] sm:$0xff] }
 0x144   :  { %v18945_v7 = vpop.f32.mrf.mxu1  ;;  %v17194_v13 = vld [vmem:[%s25092_s0 + $0x7a0] ss:$12 sps:$4 sm:$0xff]   ;;  %15754 = vmatprep.subr.mxu1 %v13642_v63  ;;  %v17260_v23 = vld [vmem:[%s25092_s0 + $0x468] ss:$12 sps:$4 sm:$0xff]  }
 0x145   :  { %25381 = vst [vmem:[#allocation77_spill] sm:$0xff] %v18945_v7  ;;  %v18947_v12 = vpop.f32.mrf.mxu0  ;;  %15755 = vmatpush3.msra.mxu1 %v13642_v63  ;;  %v17203_v63 = vld [vmem:[%s25092_s0 + $0x7e8] ss:$12 sps:$4 sm:$0xff]  }
 0x146   :  { %25382 = vst [vmem:[#allocation78_spill] sm:$0xff] %v18947_v12  ;;  %v18955_v44 = vpop.f32.mrf.mxu1  ;;  %v17255_v12 = vld [vmem:[%s25092_s0 + $0x450] ss:$12 sps:$4 sm:$0xff]  }
 0x147   :  { %25383 = vst [vmem:[#allocation79_spill] sm:$0xff] %v18955_v44  ;;  %v3299_v20 = vpop.f32.mrf.mxu0 }
 0x148   :  { %v18963_v36 = vpop.f32.mrf.mxu1 }
 0x149   :  { %25384 = vst [vmem:[#allocation80_spill] sm:$0xff] %v18963_v36  ;;  %v18965_v58 = vpop.f32.mrf.mxu0  ;;  %3493 = vmatmul.mubr.bf16.gmra.mxu0 %v17190_v55  ;;  %v17195_v55 = vld [vmem:[%s25092_s0 + $0x330] ss:$12 sps:$4 sm:$0xff]  }
 0x14a   :  { %25385 = vst [vmem:[#allocation81_spill] sm:$0xff] %v18965_v58  ;;  %3500 = vmatprep.mubr.bf16.mxu0 %v17197_v15  ;;  %v18970_v44 = vpop.f32.mrf.mxu1  ;;  %15641 = vmatmul.mubr.msk.bf16.gmra.mxu1 %vm2787_vm0, %v17194_v13  ;;  %v17202_v15 = vld [vmem:[%s25092_s0 + $0x34c] ss:$12 sps:$4 sm:$0xff]  }
 0x14b   :  { %25386 = vst [vmem:[#allocation82_spill] sm:$0xff] %v18970_v44  ;;  %v3304_v20 = vpop.f32.mrf.mxu0  ;;  %15644 = vmatprep.mubr.msk.bf16.mxu1 %vm2787_vm0, %v17198_v25  ;;  %v17199_v25 = vld [vmem:[%s25092_s0 + $0x7d0] ss:$12 sps:$4 sm:$0xff]  }
 0x14c   :  { %v18974_v7 = vpop.f32.mrf.mxu1 }
 0x14d   :  { %25387 = vst [vmem:[#allocation83_spill] sm:$0xff] %v18974_v7  ;;  %v18976_v36 = vpop.f32.mrf.mxu0 }
 0x14e   :  { %25388 = vst [vmem:[#allocation84_spill] sm:$0xff] %v18976_v36  ;;  %v18984_v44 = vpop.f32.mrf.mxu1 }
 0x14f   :  { %25389 = vst [vmem:[#allocation85_spill] sm:$0xff] %v18984_v44  ;;  %v3307_v13 = vpop.f32.mrf.mxu0 }
 0x150   :  { %v18992_v20 = vpop.f32.mrf.mxu1 }
 0x151   :  { %25390 = vst [vmem:[#allocation86_spill] sm:$0xff] %v18992_v20  ;;  %v18994_v7 = vpop.f32.mrf.mxu0  ;;  %3501 = vmatmul.mubr.bf16.gmra.mxu0 %v17195_v55  ;;  %v17207_v55 = vld [vmem:[%s25092_s0 + $0x364] ss:$12 sps:$4 sm:$0xff]  }
 0x152   :  { %25391 = vst [vmem:[#allocation87_spill] sm:$0xff] %v18994_v7  ;;  %3508 = vmatprep.mubr.bf16.mxu0 %v17202_v15  ;;  %v18996_v36 = vpop.f32.mrf.mxu1  ;;  %15645 = vmatmul.mubr.msk.bf16.gmra.mxu1 %vm2787_vm0, %v17199_v25  ;;  %v17208_v25 = vld [vmem:[%s25092_s0 + $0x818] ss:$12 sps:$4 sm:$0xff]  }
 0x153   :  { %v3312_v44 = vpop.f32.mrf.mxu0  ;;  %15648 = vmatprep.mubr.msk.bf16.mxu1 %vm2787_vm0, %v17203_v63  ;;  %v17258_v7 = vld [vmem:[%s25092_s0 + $0x9f8] ss:$12 sps:$4 sm:$0xff]  }
 0x154   :  { %v19000_v13 = vpop.f32.mrf.mxu1  ;;  %v17204_v44 = vld [vmem:[%s25092_s0 + $0x800] ss:$12 sps:$4 sm:$0xff]  }
 0x155   :  { %v19002_v32 = vpop.f32.mrf.mxu0 }
 0x156   :  { %25392 = vst [vmem:[#allocation88_spill] sm:$0xff] %v19002_v32  ;;  %v15551_v15 = vpop.f32.mrf.mxu1 }
 0x157   :  { %v3315_v20 = vpop.f32.mrf.mxu0 }
 0x158   :  { %v19016_v63 = vpop.f32.mrf.mxu1 }
 0x159   :  { %v19018_v16 = vpop.f32.mrf.mxu0  ;;  %3509 = vmatmul.mubr.bf16.gmra.mxu0 %v17200_v42  ;;  %v17212_v42 = vld [vmem:[%s25092_s0 + $0x37c] ss:$12 sps:$4 sm:$0xff]  }
 0x15a   :  { %25393 = vst [vmem:[#allocation89_spill] sm:$0xff] %v19018_v16  ;;  %3515 = vmatprep.mubr.bf16.mxu0 %v17207_v55  ;;  %v19020_v39 = vpop.f32.mrf.mxu1  ;;  %15649 = vmatmul.mubr.msk.bf16.gmra.mxu1 %vm2787_vm0, %v17204_v44  ;;  %v17209_v44 = vld [vmem:[%s25092_s0 + $0x830] ss:$12 sps:$4 sm:$0xff]  }
 0x15b   :  { %v3320_v15 = vpop.f32.mrf.mxu0  ;;  %15652 = vmatprep.mubr.msk.bf16.mxu1 %vm2787_vm0, %v17208_v25  ;;  %v17213_v25 = vld [vmem:[%s25092_s0 + $0x848] ss:$12 sps:$4 sm:$0xff]  }
 0x15c   :  { %v19024_v20 = vpop.f32.mrf.mxu1 }
 0x15d   :  { %v19026_v45 = vpop.f32.mrf.mxu0 }
 0x15e   :  { %25394 = vst [vmem:[#allocation90_spill] sm:$0xff] %v19026_v45  ;;  %v15555_v55 = vpop.f32.mrf.mxu1 }
 0x15f   :  { %v3323_v0 = vpop.f32.mrf.mxu0 }
 0x160   :  { %v19040_v15 = vpop.f32.mrf.mxu1 }
 0x161   :  { %v19042_v45 = vpop.f32.mrf.mxu0  ;;  %3516 = vmatmul.mubr.bf16.gmra.mxu0 %v17205_v37  ;;  %v17217_v37 = vld [vmem:[%s25092_s0 + $0x394] ss:$12 sps:$4 sm:$0xff]  }
 0x162   :  { %25395 = vst [vmem:[#allocation91_spill] sm:$0xff] %v19042_v45  ;;  %3523 = vmatprep.mubr.bf16.mxu0 %v17212_v42  ;;  %v19044_v54 = vpop.f32.mrf.mxu1  ;;  %15653 = vmatmul.mubr.msk.bf16.gmra.mxu1 %vm2787_vm0, %v17209_v44  ;;  %v17214_v44 = vld [vmem:[%s25092_s0 + $0x860] ss:$12 sps:$4 sm:$0xff]  }
 0x163   :  { %v3328_v55 = vpop.f32.mrf.mxu0  ;;  %15656 = vmatprep.mubr.msk.bf16.mxu1 %vm2787_vm0, %v17213_v25  ;;  %v17218_v25 = vld [vmem:[%s25092_s0 + $0x878] ss:$12 sps:$4 sm:$0xff]  }
 0x164   :  { %v19048_v0 = vpop.f32.mrf.mxu1 }
 0x165   :  { %v19050_v9 = vpop.f32.mrf.mxu0 }
 0x166   :  { %25396 = vst [vmem:[#allocation92_spill] sm:$0xff] %v19050_v9  ;;  %v15559_v42 = vpop.f32.mrf.mxu1 }
 0x167   :  { %v3331_v49 = vpop.f32.mrf.mxu0 }
 0x168   :  { %v19064_v55 = vpop.f32.mrf.mxu1 }
 0x169   :  { %v19066_v28 = vpop.f32.mrf.mxu0  ;;  %3524 = vmatmul.mubr.bf16.gmra.mxu0 %v17210_v21  ;;  %v17222_v21 = vld [vmem:[%s25092_s0 + $0x3ac] ss:$12 sps:$4 sm:$0xff]  }
 0x16a   :  { %25397 = vst [vmem:[#allocation93_spill] sm:$0xff] %v19066_v28  ;;  %3530 = vmatprep.mubr.bf16.mxu0 %v17217_v37  ;;  %v19068_v53 = vpop.f32.mrf.mxu1  ;;  %15657 = vmatmul.mubr.msk.bf16.gmra.mxu1 %vm2787_vm0, %v17214_v44  ;;  %v17219_v44 = vld [vmem:[%s25092_s0 + $0x890] ss:$12 sps:$4 sm:$0xff]  }
 0x16b   :  { %v3336_v42 = vpop.f32.mrf.mxu0  ;;  %15660 = vmatprep.mubr.msk.bf16.mxu1 %vm2787_vm0, %v17218_v25  ;;  %v17223_v25 = vld [vmem:[%s25092_s0 + $0x8a8] ss:$12 sps:$4 sm:$0xff]  }
 0x16c   :  { %v19072_v49 = vpop.f32.mrf.mxu1 }
 0x16d   :  { %v19074_v17 = vpop.f32.mrf.mxu0 }
 0x16e   :  { %25398 = vst [vmem:[#allocation94_spill] sm:$0xff] %v19074_v17  ;;  %v15563_v37 = vpop.f32.mrf.mxu1 }
 0x16f   :  { %v3339_v29 = vpop.f32.mrf.mxu0 }
 0x170   :  { %v19088_v42 = vpop.f32.mrf.mxu1 }
 0x171   :  { %v19090_v17 = vpop.f32.mrf.mxu0  ;;  %3531 = vmatmul.mubr.bf16.gmra.mxu0 %v17215_v61  ;;  %v17227_v61 = vld [vmem:[%s25092_s0 + $0x3c4] ss:$12 sps:$4 sm:$0xff]  }
 0x172   :  { %25399 = vst [vmem:[#allocation95_spill] sm:$0xff] %v19090_v17  ;;  %3538 = vmatprep.mubr.bf16.mxu0 %v17222_v21  ;;  %v19092_v52 = vpop.f32.mrf.mxu1  ;;  %15661 = vmatmul.mubr.msk.bf16.gmra.mxu1 %vm2787_vm0, %v17219_v44  ;;  %v17224_v44 = vld [vmem:[%s25092_s0 + $0x8c0] ss:$12 sps:$4 sm:$0xff]   ;;  %v17230_v17 = vld [vmem:[%s25092_s0 + $0x3d8] ss:$12 sps:$4 sm:$0xff]  }
 0x173   :  { %v3344_v37 = vpop.f32.mrf.mxu0  ;;  %15664 = vmatprep.mubr.msk.bf16.mxu1 %vm2787_vm0, %v17223_v25  ;;  %v17228_v25 = vld [vmem:[%s25092_s0 + $0x8d8] ss:$12 sps:$4 sm:$0xff]  }
 0x174   :  { %v19096_v29 = vpop.f32.mrf.mxu1 }
 0x175   :  { %v19098_v47 = vpop.f32.mrf.mxu0 }
 0x176   :  { %25400 = vst [vmem:[#allocation96_spill] sm:$0xff] %v19098_v47  ;;  %v15567_v21 = vpop.f32.mrf.mxu1 }
 0x177   :  { %v3347_v24 = vpop.f32.mrf.mxu0 }
 0x178   :  { %v19112_v37 = vpop.f32.mrf.mxu1 }
 0x179   :  { %v19114_v50 = vpop.f32.mrf.mxu0  ;;  %3539 = vmatmul.mubr.bf16.gmra.mxu0 %v17220_v1  ;;  %v17232_v1 = vld [vmem:[%s25092_s0 + $0x3dc] ss:$12 sps:$4 sm:$0xff]  }
 0x17a   :  { %25401 = vst [vmem:[#allocation97_spill] sm:$0xff] %v19114_v50  ;;  %3545 = vmatprep.mubr.bf16.mxu0 %v17227_v61  ;;  %v19116_v38 = vpop.f32.mrf.mxu1  ;;  %15665 = vmatmul.mubr.msk.bf16.gmra.mxu1 %vm2787_vm0, %v17224_v44  ;;  %v17229_v44 = vld [vmem:[%s25092_s0 + $0x8f0] ss:$12 sps:$4 sm:$0xff]  }
 0x17b   :  { %v3352_v21 = vpop.f32.mrf.mxu0  ;;  %15668 = vmatprep.mubr.msk.bf16.mxu1 %vm2787_vm0, %v17228_v25  ;;  %v17233_v25 = vld [vmem:[%s25092_s0 + $0x908] ss:$12 sps:$4 sm:$0xff]  }
 0x17c   :  { %v19120_v24 = vpop.f32.mrf.mxu1 }
 0x17d   :  { %v19122_v60 = vpop.f32.mrf.mxu0 }
 0x17e   :  { %25402 = vst [vmem:[#allocation98_spill] sm:$0xff] %v19122_v60  ;;  %v15571_v61 = vpop.f32.mrf.mxu1 }
 0x17f   :  { %v3355_v50 = vpop.f32.mrf.mxu0 }
 0x180   :  { %v19136_v21 = vpop.f32.mrf.mxu1 }
 0x181   :  { %v19138_v60 = vpop.f32.mrf.mxu0  ;;  %3546 = vmatmul.mubr.bf16.gmra.mxu0 %v17225_v41  ;;  %v17237_v41 = vld [vmem:[%s25092_s0 + $0x3f4] ss:$12 sps:$4 sm:$0xff]  }
 0x182   :  { %25403 = vst [vmem:[#allocation99_spill] sm:$0xff] %v19138_v60  ;;  %3553 = vmatprep.mubr.bf16.mxu0 %v17232_v1  ;;  %v19140_v47 = vpop.f32.mrf.mxu1  ;;  %15669 = vmatmul.mubr.msk.bf16.gmra.mxu1 %vm2787_vm0, %v17229_v44  ;;  %v14027_v1 = vld [vmem:[%s25095_s3 + $0x1f8] sm:$0xff] }
 0x183   :  { %v3360_v61 = vpop.f32.mrf.mxu0  ;;  %15672 = vmatprep.mubr.msk.bf16.mxu1 %vm2787_vm0, %v17233_v25  ;;  %v17234_v25 = vld [vmem:[%s25092_s0 + $0x920] ss:$12 sps:$4 sm:$0xff]   ;;  %16368 = vmatprep.subr.mxu0 %v14027_v1 }
 0x184   :  { %v19144_v50 = vpop.f32.mrf.mxu1  ;;  %16369 = vmatpush3.msra.mxu0 %v14027_v1  ;;  %v17235_v1 = vld [vmem:[%s25092_s0 + $0x3f0] ss:$12 sps:$4 sm:$0xff]  }
 0x185   :  { %v19146_v27 = vpop.f32.mrf.mxu0 }
 0x186   :  { %25404 = vst [vmem:[#allocation100_spill] sm:$0xff] %v19146_v27  ;;  %v15575_v44 = vpop.f32.mrf.mxu1  ;;  %v17238_v27 = vld [vmem:[%s25092_s0 + $0x938] ss:$12 sps:$4 sm:$0xff]  }
 0x187   :  { %v3363_v61 = vpop.f32.mrf.mxu0 }
 0x188   :  { %v19163_v60 = vpop.f32.mrf.mxu1 }
 0x189   :  { %v19165_v35 = vpop.f32.mrf.mxu0  ;;  %3554 = vmatmul.mubr.bf16.gmra.mxu0 %v17230_v17  ;;  %v17242_v17 = vld [vmem:[%s25092_s0 + $0x40c] ss:$12 sps:$4 sm:$0xff]  }
 0x18a   :  { %25405 = vst [vmem:[#allocation101_spill] sm:$0xff] %v19165_v35  ;;  %3560 = vmatprep.mubr.bf16.mxu0 %v17237_v41  ;;  %v19167_v28 = vpop.f32.mrf.mxu1  ;;  %15673 = vmatmul.mubr.msk.bf16.gmra.mxu1 %vm2787_vm0, %v17234_v25  ;;  %v13641_v41 = vld [vmem:[%s25095_s3 + $0x68] sm:$0xff] }
 0x18b   :  { %v3368_v44 = vpop.f32.mrf.mxu0  ;;  %15676 = vmatprep.mubr.msk.bf16.mxu1 %vm2787_vm0, %v17238_v27  ;;  %v17239_v27 = vld [vmem:[%s25092_s0 + $0x950] ss:$12 sps:$4 sm:$0xff]   ;;  %15756 = vmatprep.subr.mxu1 %v13641_v41 }
 0x18c   :  { %v19171_v61 = vpop.f32.mrf.mxu1  ;;  %15757 = vmatpush3.msra.mxu1 %v13641_v41  ;;  %v17240_v41 = vld [vmem:[%s25092_s0 + $0x408] ss:$12 sps:$4 sm:$0xff]  }
 0x18d   :  { %v19173_v30 = vpop.f32.mrf.mxu0 }
 0x18e   :  { %25406 = vst [vmem:[#allocation102_spill] sm:$0xff] %v19173_v30  ;;  %v15579_v25 = vpop.f32.mrf.mxu1  ;;  %v17243_v30 = vld [vmem:[%s25092_s0 + $0x968] ss:$12 sps:$4 sm:$0xff]  }
 0x18f   :  { %v3371_v44 = vpop.f32.mrf.mxu0 }
 0x190   :  { %v19190_v35 = vpop.f32.mrf.mxu1 }
 0x191   :  { %v19192_v9 = vpop.f32.mrf.mxu0  ;;  %3561 = vmatmul.mubr.bf16.gmra.mxu0 %v17235_v1  ;;  %v17247_v1 = vld [vmem:[%s25092_s0 + $0x424] ss:$12 sps:$4 sm:$0xff]  }
 0x192   :  { %25407 = vst [vmem:[#allocation103_spill] sm:$0xff] %v19192_v9  ;;  %3568 = vmatprep.mubr.bf16.mxu0 %v17242_v17  ;;  %v19194_v19 = vpop.f32.mrf.mxu1  ;;  %15677 = vmatmul.mubr.msk.bf16.gmra.mxu1 %vm2787_vm0, %v17239_v27  ;;  %v17244_v27 = vld [vmem:[%s25092_s0 + $0x980] ss:$12 sps:$4 sm:$0xff]  }
 0x193   :  { %v3376_v25 = vpop.f32.mrf.mxu0  ;;  %15680 = vmatprep.mubr.msk.bf16.mxu1 %vm2787_vm0, %v17243_v30  ;;  %v17248_v30 = vld [vmem:[%s25092_s0 + $0x998] ss:$12 sps:$4 sm:$0xff]  }
 0x194   :  { %v19198_v44 = vpop.f32.mrf.mxu1 }
 0x195   :  { %v19200_v45 = vpop.f32.mrf.mxu0 }
 0x196   :  { %25408 = vst [vmem:[#allocation104_spill] sm:$0xff] %v19200_v45  ;;  %v15583_v17 = vpop.f32.mrf.mxu1 }
 0x197   :  { %v3379_v9 = vpop.f32.mrf.mxu0 }
 0x198   :  { %v19214_v25 = vpop.f32.mrf.mxu1 }
 0x199   :  { %v19216_v45 = vpop.f32.mrf.mxu0  ;;  %3569 = vmatmul.mubr.bf16.gmra.mxu0 %v17240_v41  ;;  %v17252_v41 = vld [vmem:[%s25092_s0 + $0x43c] ss:$12 sps:$4 sm:$0xff]  }
 0x19a   :  { %25409 = vst [vmem:[#allocation105_spill] sm:$0xff] %v19216_v45  ;;  %3575 = vmatprep.mubr.bf16.mxu0 %v17247_v1  ;;  %v19218_v26 = vpop.f32.mrf.mxu1  ;;  %15681 = vmatmul.mubr.msk.bf16.gmra.mxu1 %vm2787_vm0, %v17244_v27  ;;  %v17249_v27 = vld [vmem:[%s25092_s0 + $0x9b0] ss:$12 sps:$4 sm:$0xff]  }
 0x19b   :  { %v3384_v17 = vpop.f32.mrf.mxu0  ;;  %15684 = vmatprep.mubr.msk.bf16.mxu1 %vm2787_vm0, %v17248_v30  ;;  %v17253_v30 = vld [vmem:[%s25092_s0 + $0x9c8] ss:$12 sps:$4 sm:$0xff]  }
 0x19c   :  { %v19222_v9 = vpop.f32.mrf.mxu1  ;;  %v13640_v17 = vld [vmem:[%s25095_s3 + $0x60] sm:$0xff] }
 0x19d   :  { %v19224_v16 = vpop.f32.mrf.mxu0  ;;  %15758 = vmatprep.subr.mxu1 %v13640_v17 }
 0x19e   :  { %25410 = vst [vmem:[#allocation106_spill] sm:$0xff] %v19224_v16  ;;  %v15587_v1 = vpop.f32.mrf.mxu1  ;;  %15759 = vmatpush3.msra.mxu1 %v13640_v17  ;;  %v17250_v17 = vld [vmem:[%s25092_s0 + $0x438] ss:$12 sps:$4 sm:$0xff]  }
 0x19f   :  { %v3387_v45 = vpop.f32.mrf.mxu0 }
 0x1a0   :  { %v19241_v16 = vpop.f32.mrf.mxu1  ;;  %v13639_v45 = vld [vmem:[%s25095_s3 + $0x58] sm:$0xff] }
 0x1a1   :  { %v19243_v32 = vpop.f32.mrf.mxu0  ;;  %3576 = vmatmul.mubr.bf16.gmra.mxu0 %v17245_v22  ;;  %15760 = vmatprep.subr.mxu1 %v13639_v45  ;;  %v13638_v22 = vld [vmem:[%s25095_s3 + $0x50] sm:$0xff] }
 0x1a2   :  { %25411 = vst [vmem:[#allocation107_spill] sm:$0xff] %v19243_v32  ;;  %3583 = vmatprep.mubr.bf16.mxu0 %v17252_v41  ;;  %v19248_v1 = vpop.f32.mrf.mxu1  ;;  %15685 = vmatmul.mubr.msk.bf16.gmra.mxu1 %vm2787_vm0, %v17249_v27  ;;  %v13637_v27 = vld [vmem:[%s25095_s3 + $0x48] sm:$0xff] }
 0x1a3   :  { %v3392_v11 = vpop.f32.mrf.mxu0  ;;  %15688 = vmatprep.mubr.msk.bf16.mxu1 %vm2787_vm0, %v17253_v30  ;;  %15761 = vmatpush3.msra.mxu1 %v13639_v45 }
 0x1a4   :  { %v19255_v32 = vpop.f32.mrf.mxu1  ;;  %15762 = vmatprep.subr.mxu1 %v13638_v22  ;;  %v17257_v11 = vld [vmem:[%s25092_s0 + $0x454] ss:$12 sps:$4 sm:$0xff]  }
 0x1a5   :  { %v19257_v41 = vpop.f32.mrf.mxu0  ;;  %15763 = vmatpush3.msra.mxu1 %v13638_v22  ;;  %v13636_v22 = vld [vmem:[%s25095_s3 + $0x40] sm:$0xff] }
 0x1a6   :  { %25412 = vst [vmem:[#allocation108_spill] sm:$0xff] %v19257_v41  ;;  %v15591_v30 = vpop.f32.mrf.mxu1  ;;  %v17254_v41 = vld [vmem:[%s25092_s0 + $0x9e0] ss:$12 sps:$4 sm:$0xff]   ;;  %15764 = vmatprep.subr.mxu1 %v13637_v27 }
 0x1a7   :  { %v3395_v45 = vpop.f32.mrf.mxu0  ;;  %15765 = vmatpush3.msra.mxu1 %v13637_v27 }
 0x1a8   :  { %v19277_v18 = vpop.f32.mrf.mxu1  ;;  %15766 = vmatprep.subr.mxu1 %v13636_v22 }
 0x1a9   :  { %v19279_v58 = vpop.f32.mrf.mxu0  ;;  %3584 = vmatmul.mubr.bf16.gmra.mxu0 %v17250_v17  ;;  %15767 = vmatpush3.msra.mxu1 %v13636_v22  ;;  %v17262_v17 = vld [vmem:[%s25092_s0 + $0x46c] ss:$12 sps:$4 sm:$0xff]  }
 0x1aa   :  { %25413 = vst [vmem:[#allocation109_spill] sm:$0xff] %v19279_v58  ;;  %3590 = vmatprep.mubr.bf16.mxu0 %v17257_v11  ;;  %v19281_v30 = vpop.f32.mrf.mxu1  ;;  %15689 = vmatmul.mubr.msk.bf16.gmra.mxu1 %vm2787_vm0, %v17254_v41  ;;  %v17259_v41 = vld [vmem:[%s25092_s0 + $0xa10] ss:$12 sps:$4 sm:$0xff]  }
 0x1ab   :  { %v3400_v45 = vpop.f32.mrf.mxu0  ;;  %15692 = vmatprep.mubr.msk.bf16.mxu1 %vm2787_vm0, %v17258_v7  ;;  %v17263_v7 = vld [vmem:[%s25092_s0 + $0xa28] ss:$12 sps:$4 sm:$0xff]  }
 0x1ac   :  { %v19285_v27 = vpop.f32.mrf.mxu1 }
 0x1ad   :  { %v19287_v14 = vpop.f32.mrf.mxu0 }
 0x1ae   :  { %25414 = vst [vmem:[#allocation110_spill] sm:$0xff] %v19287_v14  ;;  %v15595_v11 = vpop.f32.mrf.mxu1 }
 0x1af   :  { %v3403_v22 = vpop.f32.mrf.mxu0 }
 0x1b0   :  { %v19301_v45 = vpop.f32.mrf.mxu1 }
 0x1b1   :  { %v19303_v14 = vpop.f32.mrf.mxu0  ;;  %3591 = vmatmul.mubr.bf16.gmra.mxu0 %v17255_v12  ;;  %v17267_v12 = vld [vmem:[%s25092_s0 + $0x484] ss:$12 sps:$4 sm:$0xff]  }
 0x1b2   :  { %25415 = vst [vmem:[#allocation111_spill] sm:$0xff] %v19303_v14  ;;  %3598 = vmatprep.mubr.bf16.mxu0 %v17262_v17  ;;  %v19305_v58 = vpop.f32.mrf.mxu1  ;;  %15693 = vmatmul.mubr.msk.bf16.gmra.mxu1 %vm2787_vm0, %v17259_v41  ;;  %v17264_v41 = vld [vmem:[%s25092_s0 + $0xa40] ss:$12 sps:$4 sm:$0xff]  }
 0x1b3   :  { %v3408_v11 = vpop.f32.mrf.mxu0  ;;  %15696 = vmatprep.mubr.msk.bf16.mxu1 %vm2787_vm0, %v17263_v7  ;;  %v17268_v7 = vld [vmem:[%s25092_s0 + $0xa58] ss:$12 sps:$4 sm:$0xff]  }
 0x1b4   :  { %v19309_v22 = vpop.f32.mrf.mxu1 }
 0x1b5   :  { %v19311_v3 = vpop.f32.mrf.mxu0 }
 0x1b6   :  { %25416 = vst [vmem:[#allocation112_spill] sm:$0xff] %v19311_v3  ;;  %v15599_v17 = vpop.f32.mrf.mxu1 }
 0x1b7   :  { %v3411_v14 = vpop.f32.mrf.mxu0 }
 0x1b8   :  { %v19325_v11 = vpop.f32.mrf.mxu1 }
 0x1b9   :  { %v19327_v3 = vpop.f32.mrf.mxu0  ;;  %3599 = vmatmul.mubr.bf16.gmra.mxu0 %v17260_v23  ;;  %v17272_v23 = vld [vmem:[%s25092_s0 + $0x49c] ss:$12 sps:$4 sm:$0xff]  }
 0x1ba   :  { %25417 = vst [vmem:[#allocation113_spill] sm:$0xff] %v19327_v3  ;;  %3605 = vmatprep.mubr.bf16.mxu0 %v17267_v12  ;;  %v19329_v10 = vpop.f32.mrf.mxu1  ;;  %15697 = vmatmul.mubr.msk.bf16.gmra.mxu1 %vm2787_vm0, %v17264_v41  ;;  %v17269_v41 = vld [vmem:[%s25092_s0 + $0xa70] ss:$12 sps:$4 sm:$0xff]  }
 0x1bb   :  { %v3416_v17 = vpop.f32.mrf.mxu0  ;;  %15700 = vmatprep.mubr.msk.bf16.mxu1 %vm2787_vm0, %v17268_v7  ;;  %v17273_v7 = vld [vmem:[%s25092_s0 + $0xa88] ss:$12 sps:$4 sm:$0xff]  }
 0x1bc   :  { %v19333_v14 = vpop.f32.mrf.mxu1 }
 0x1bd   :  { %v19335_v46 = vpop.f32.mrf.mxu0 }
 0x1be   :  { %25418 = vst [vmem:[#allocation114_spill] sm:$0xff] %v19335_v46  ;;  %v15603_v12 = vpop.f32.mrf.mxu1 }
 0x1bf   :  { %v3419_v3 = vpop.f32.mrf.mxu0 }
 0x1c0   :  { %v19349_v17 = vpop.f32.mrf.mxu1 }
 0x1c1   :  { %v19351_v46 = vpop.f32.mrf.mxu0  ;;  %3606 = vmatmul.mubr.bf16.gmra.mxu0 %v17265_v6  ;;  %v17277_v6 = vld [vmem:[%s25092_s0 + $0x4b4] ss:$12 sps:$4 sm:$0xff]  }
 0x1c2   :  { %25419 = vst [vmem:[#allocation115_spill] sm:$0xff] %v19351_v46  ;;  %3613 = vmatprep.mubr.bf16.mxu0 %v17272_v23  ;;  %v19353_v8 = vpop.f32.mrf.mxu1  ;;  %15701 = vmatmul.mubr.msk.bf16.gmra.mxu1 %vm2787_vm0, %v17269_v41  ;;  %v17274_v41 = vld [vmem:[%s25092_s0 + $0xaa0] ss:$12 sps:$4 sm:$0xff]  }
 0x1c3   :  { %v3424_v12 = vpop.f32.mrf.mxu0  ;;  %15704 = vmatprep.mubr.msk.bf16.mxu1 %vm2787_vm0, %v17273_v7  ;;  %v17278_v7 = vld [vmem:[%s25092_s0 + $0xab8] ss:$12 sps:$4 sm:$0xff]  }
 0x1c4   :  { %v19357_v3 = vpop.f32.mrf.mxu1 }
 0x1c5   :  { %v19359_v59 = vpop.f32.mrf.mxu0 }
 0x1c6   :  { %25420 = vst [vmem:[#allocation116_spill] sm:$0xff] %v19359_v59  ;;  %v15607_v23 = vpop.f32.mrf.mxu1 }
 0x1c7   :  { %v3427_v46 = vpop.f32.mrf.mxu0 }
 0x1c8   :  { %v19373_v12 = vpop.f32.mrf.mxu1 }
 0x1c9   :  { %v19375_v59 = vpop.f32.mrf.mxu0  ;;  %3614 = vmatmul.mubr.bf16.gmra.mxu0 %v17270_v4  ;;  %v17282_v4 = vld [vmem:[%s25092_s0 + $0x4cc] ss:$12 sps:$4 sm:$0xff]  }
 0x1ca   :  { %25421 = vst [vmem:[#allocation117_spill] sm:$0xff] %v19375_v59  ;;  %3620 = vmatprep.mubr.bf16.mxu0 %v17277_v6  ;;  %v19377_v2 = vpop.f32.mrf.mxu1  ;;  %15705 = vmatmul.mubr.msk.bf16.gmra.mxu1 %vm2787_vm0, %v17274_v41  ;;  %v17279_v41 = vld [vmem:[%s25092_s0 + $0xad0] ss:$12 sps:$4 sm:$0xff]  }
 0x1cb   :  { %v3432_v23 = vpop.f32.mrf.mxu0  ;;  %15708 = vmatprep.mubr.msk.bf16.mxu1 %vm2787_vm0, %v17278_v7  ;;  %v17283_v7 = vld [vmem:[%s25092_s0 + $0xae8] ss:$12 sps:$4 sm:$0xff]  }
 0x1cc   :  { %v19381_v46 = vpop.f32.mrf.mxu1 }
 0x1cd   :  { %v19383_v57 = vpop.f32.mrf.mxu0 }
 0x1ce   :  { %25422 = vst [vmem:[#allocation118_spill] sm:$0xff] %v19383_v57  ;;  %v15611_v6 = vpop.f32.mrf.mxu1 }
 0x1cf   :  { %v3435_v59 = vpop.f32.mrf.mxu0 }
 0x1d0   :  { %v19397_v23 = vpop.f32.mrf.mxu1 }
 0x1d1   :  { %v19399_v57 = vpop.f32.mrf.mxu0  ;;  %3621 = vmatmul.mubr.bf16.gmra.mxu0 %v17275_v62  ;;  %v17287_v62 = vld [vmem:[%s25092_s0 + $0x4e4] ss:$12 sps:$4 sm:$0xff]  }
 0x1d2   :  { %25423 = vst [vmem:[#allocation119_spill] sm:$0xff] %v19399_v57  ;;  %3628 = vmatprep.mubr.bf16.mxu0 %v17282_v4  ;;  %v19401_v33 = vpop.f32.mrf.mxu1  ;;  %15709 = vmatmul.mubr.msk.bf16.gmra.mxu1 %vm2787_vm0, %v17279_v41  ;;  %v17284_v41 = vld [vmem:[%s25092_s0 + $0xb00] ss:$12 sps:$4 sm:$0xff]  }
 0x1d3   :  { %25424 = vst [vmem:[#allocation120_spill] sm:$0xff] %v19401_v33  ;;  %v3440_v6 = vpop.f32.mrf.mxu0  ;;  %15712 = vmatprep.mubr.msk.bf16.mxu1 %vm2787_vm0, %v17283_v7  ;;  %v17288_v7 = vld [vmem:[%s25092_s0 + $0xb18] ss:$12 sps:$4 sm:$0xff]  }
 0x1d4   :  { %v19405_v59 = vpop.f32.mrf.mxu1 }
 0x1d5   :  { %25425 = vst [vmem:[#allocation121_spill] sm:$0xff] %v19405_v59  ;;  %v19407_v51 = vpop.f32.mrf.mxu0 }
 0x1d6   :  { %25426 = vst [vmem:[#allocation122_spill] sm:$0xff] %v19407_v51  ;;  %v15615_v4 = vpop.f32.mrf.mxu1 }
 0x1d7   :  { %v3443_v57 = vpop.f32.mrf.mxu0 }
 0x1d8   :  { %v19421_v6 = vpop.f32.mrf.mxu1 }
 0x1d9   :  { %25427 = vst [vmem:[#allocation123_spill] sm:$0xff] %v19421_v6  ;;  %v19423_v33 = vpop.f32.mrf.mxu0  ;;  %3629 = vmatmul.mubr.bf16.gmra.mxu0 %v17280_v48  ;;  %v17292_v48 = vld [vmem:[%s25092_s0 + $0x4fc] ss:$12 sps:$4 sm:$0xff]  }
 0x1da   :  { %25428 = vst [vmem:[#allocation124_spill] sm:$0xff] %v19423_v33  ;;  %3635 = vmatprep.mubr.bf16.mxu0 %v17287_v62  ;;  %v19425_v59 = vpop.f32.mrf.mxu1  ;;  %15713 = vmatmul.mubr.msk.bf16.gmra.mxu1 %vm2787_vm0, %v17284_v41  ;;  %v17289_v41 = vld [vmem:[%s25092_s0 + $0xb30] ss:$12 sps:$4 sm:$0xff]   ;;  %v17290_v33 = vld [vmem:[%s25092_s0 + $0x4f8] ss:$12 sps:$4 sm:$0xff]  }
 0x1db   :  { %25429 = vst [vmem:[#allocation125_spill] sm:$0xff] %v19425_v59  ;;  %v3448_v4 = vpop.f32.mrf.mxu0  ;;  %15716 = vmatprep.mubr.msk.bf16.mxu1 %vm2787_vm0, %v17288_v7  ;;  %v17293_v7 = vld [vmem:[%s25092_s0 + $0xb48] ss:$12 sps:$4 sm:$0xff]  }
 0x1dc   :  { %v19429_v57 = vpop.f32.mrf.mxu1 }
 0x1dd   :  { %25430 = vst [vmem:[#allocation126_spill] sm:$0xff] %v19429_v57  ;;  %v19431_v51 = vpop.f32.mrf.mxu0 }
 0x1de   :  { %25431 = vst [vmem:[#allocation127_spill] sm:$0xff] %v19431_v51  ;;  %v19439_v62 = vpop.f32.mrf.mxu1 }
 0x1df   :  { %25432 = vst [vmem:[#allocation128_spill] sm:$0xff] %v19439_v62  ;;  %v3451_v6 = vpop.f32.mrf.mxu0 }
 0x1e0   :  { %v19447_v4 = vpop.f32.mrf.mxu1 }
 0x1e1   :  { %25433 = vst [vmem:[#allocation129_spill] sm:$0xff] %v19447_v4  ;;  %v19449_v59 = vpop.f32.mrf.mxu0  ;;  %3636 = vmatmul.mubr.bf16.gmra.mxu0 %v17285_v34  ;;  %v17297_v34 = vld [vmem:[%s25092_s0 + $0x514] ss:$12 sps:$4 sm:$0xff]  }
 0x1e2   :  { %25434 = vst [vmem:[#allocation130_spill] sm:$0xff] %v19449_v59  ;;  %3643 = vmatprep.mubr.bf16.mxu0 %v17292_v48  ;;  %v19451_v57 = vpop.f32.mrf.mxu1  ;;  %15717 = vmatmul.mubr.msk.bf16.gmra.mxu1 %vm2787_vm0, %v17289_v41  ;;  %v17298_v41 = vld [vmem:[%s25092_s0 + $0xb78] ss:$12 sps:$4 sm:$0xff]   ;;  %v17295_v59 = vld [vmem:[%s25092_s0 + $0x510] ss:$12 sps:$4 sm:$0xff]  }
 0x1e3   :  { %25435 = vst [vmem:[#allocation131_spill] sm:$0xff] %v19451_v57  ;;  %v3456_v62 = vpop.f32.mrf.mxu0  ;;  %15720 = vmatprep.mubr.msk.bf16.mxu1 %vm2787_vm0, %v17293_v7 }
 0x1e4   :  { %v19455_v6 = vpop.f32.mrf.mxu1  ;;  %v17294_v62 = vld [vmem:[%s25092_s0 + $0xb60] ss:$12 sps:$4 sm:$0xff]  }
 0x1e5   :  { %25436 = vst [vmem:[#allocation132_spill] sm:$0xff] %v19455_v6  ;;  %v19457_v51 = vpop.f32.mrf.mxu0 }
 0x1e6   :  { %25437 = vst [vmem:[#allocation133_spill] sm:$0xff] %v19457_v51  ;;  %v19465_v48 = vpop.f32.mrf.mxu1 }
 0x1e7   :  { %25438 = vst [vmem:[#allocation134_spill] sm:$0xff] %v19465_v48  ;;  %v3459_v57 = vpop.f32.mrf.mxu0 }
 0x1e8   :  { %v19473_v7 = vpop.f32.mrf.mxu1 }
 0x1e9   :  { %25439 = vst [vmem:[#allocation135_spill] sm:$0xff] %v19473_v7  ;;  %v19475_v6 = vpop.f32.mrf.mxu0  ;;  %3644 = vmatmul.mubr.bf16.gmra.mxu0 %v17290_v33  ;;  %v17302_v33 = vld [vmem:[%s25092_s0 + $0x52c] ss:$12 sps:$4 sm:$0xff]  }
 0x1ea   :  { %25440 = vst [vmem:[#allocation136_spill] sm:$0xff] %v19475_v6  ;;  %3650 = vmatprep.mubr.bf16.mxu0 %v17297_v34  ;;  %v19477_v4 = vpop.f32.mrf.mxu1  ;;  %15721 = vmatmul.mubr.msk.bf16.gmra.mxu1 %vm2787_vm0, %v17294_v62  ;;  %v17303_v62 = vld [vmem:[%s25092_s0 + $0xba8] ss:$12 sps:$4 sm:$0xff]  }
 0x1eb   :  { %25441 = vst [vmem:[#allocation137_spill] sm:$0xff] %v19477_v4  ;;  %v3464_v48 = vpop.f32.mrf.mxu0  ;;  %15724 = vmatprep.mubr.msk.bf16.mxu1 %vm2787_vm0, %v17298_v41  ;;  %v17300_v6 = vld [vmem:[%s25092_s0 + $0x528] ss:$12 sps:$4 sm:$0xff]  }
 0x1ec   :  { %v19481_v57 = vpop.f32.mrf.mxu1  ;;  %v17299_v48 = vld [vmem:[%s25092_s0 + $0xb90] ss:$12 sps:$4 sm:$0xff]  }
 0x1ed   :  { %25442 = vst [vmem:[#allocation138_spill] sm:$0xff] %v19481_v57  ;;  %v19483_v51 = vpop.f32.mrf.mxu0 }
 0x1ee   :  { %25443 = vst [vmem:[#allocation139_spill] sm:$0xff] %v19483_v51  ;;  %v19491_v34 = vpop.f32.mrf.mxu1 }
 0x1ef   :  { %25444 = vst [vmem:[#allocation140_spill] sm:$0xff] %v19491_v34  ;;  %v3467_v4 = vpop.f32.mrf.mxu0 }
 0x1f0   :  { %v19499_v41 = vpop.f32.mrf.mxu1 }
 0x1f1   :  { %25445 = vst [vmem:[#allocation141_spill] sm:$0xff] %v19499_v41  ;;  %v19501_v57 = vpop.f32.mrf.mxu0  ;;  %3651 = vmatmul.mubr.bf16.gmra.mxu0 %v17295_v59  ;;  %v17307_v59 = vld [vmem:[%s25092_s0 + $0x544] ss:$12 sps:$4 sm:$0xff]  }
 0x1f2   :  { %25446 = vst [vmem:[#allocation142_spill] sm:$0xff] %v19501_v57  ;;  %3658 = vmatprep.mubr.bf16.mxu0 %v17302_v33  ;;  %v19503_v7 = vpop.f32.mrf.mxu1  ;;  %15725 = vmatmul.mubr.msk.bf16.gmra.mxu1 %vm2787_vm0, %v17299_v48  ;;  %v17308_v48 = vld [vmem:[%s25092_s0 + $0xbd8] ss:$12 sps:$4 sm:$0xff]   ;;  %v17305_v57 = vld [vmem:[%s25092_s0 + $0x540] ss:$12 sps:$4 sm:$0xff]  }
 0x1f3   :  { %25447 = vst [vmem:[#allocation143_spill] sm:$0xff] %v19503_v7  ;;  %v3472_v34 = vpop.f32.mrf.mxu0  ;;  %15728 = vmatprep.mubr.msk.bf16.mxu1 %vm2787_vm0, %v17303_v62 }
 0x1f4   :  { %v19507_v4 = vpop.f32.mrf.mxu1  ;;  %v17304_v34 = vld [vmem:[%s25092_s0 + $0xbc0] ss:$12 sps:$4 sm:$0xff]  }
 0x1f5   :  { %25448 = vst [vmem:[#allocation144_spill] sm:$0xff] %v19507_v4  ;;  %v19509_v51 = vpop.f32.mrf.mxu0 }
 0x1f6   :  { %25449 = vst [vmem:[#allocation145_spill] sm:$0xff] %v19509_v51  ;;  %v19517_v33 = vpop.f32.mrf.mxu1 }
 0x1f7   :  { %25450 = vst [vmem:[#allocation146_spill] sm:$0xff] %v19517_v33  ;;  %v3475_v7 = vpop.f32.mrf.mxu0 }
 0x1f8   :  { %v19525_v62 = vpop.f32.mrf.mxu1 }
 0x1f9   :  { %25451 = vst [vmem:[#allocation147_spill] sm:$0xff] %v19525_v62  ;;  %v19527_v4 = vpop.f32.mrf.mxu0  ;;  %3659 = vmatmul.mubr.bf16.gmra.mxu0 %v17300_v6  ;;  %v17312_v6 = vld [vmem:[%s25092_s0 + $0x55c] ss:$12 sps:$4 sm:$0xff]  }
 0x1fa   :  { %25452 = vst [vmem:[#allocation148_spill] sm:$0xff] %v19527_v4  ;;  %3665 = vmatprep.mubr.bf16.mxu0 %v17307_v59  ;;  %v19529_v41 = vpop.f32.mrf.mxu1  ;;  %15729 = vmatmul.mubr.msk.bf16.gmra.mxu1 %vm2787_vm0, %v17304_v34  ;;  %v17313_v34 = vld [vmem:[%s25092_s0 + $0xc08] ss:$12 sps:$4 sm:$0xff]   ;;  %v17310_v4 = vld [vmem:[%s25092_s0 + $0x558] ss:$12 sps:$4 sm:$0xff]  }
 0x1fb   :  { %25453 = vst [vmem:[#allocation149_spill] sm:$0xff] %v19529_v41  ;;  %v3480_v33 = vpop.f32.mrf.mxu0  ;;  %15732 = vmatprep.mubr.msk.bf16.mxu1 %vm2787_vm0, %v17308_v48 }
 0x1fc   :  { %v19533_v7 = vpop.f32.mrf.mxu1  ;;  %v17309_v33 = vld [vmem:[%s25092_s0 + $0xbf0] ss:$12 sps:$4 sm:$0xff]  }
 0x1fd   :  { %25454 = vst [vmem:[#allocation150_spill] sm:$0xff] %v19533_v7  ;;  %v19535_v51 = vpop.f32.mrf.mxu0 }
 0x1fe   :  { %25455 = vst [vmem:[#allocation151_spill] sm:$0xff] %v19535_v51  ;;  %v19543_v59 = vpop.f32.mrf.mxu1 }
 0x1ff   :  { %25456 = vst [vmem:[#allocation152_spill] sm:$0xff] %v19543_v59  ;;  %v3483_v41 = vpop.f32.mrf.mxu0 }
 0x200   :  { %v19551_v48 = vpop.f32.mrf.mxu1 }
 0x201   :  { %25457 = vst [vmem:[#allocation153_spill] sm:$0xff] %v19551_v48  ;;  %v19553_v7 = vpop.f32.mrf.mxu0  ;;  %3666 = vmatmul.mubr.bf16.gmra.mxu0 %v17305_v57  ;;  %v17317_v57 = vld [vmem:[%s25092_s0 + $0x574] ss:$12 sps:$4 sm:$0xff]  }
 0x202   :  { %25458 = vst [vmem:[#allocation154_spill] sm:$0xff] %v19553_v7  ;;  %3673 = vmatprep.mubr.bf16.mxu0 %v17312_v6  ;;  %v19555_v62 = vpop.f32.mrf.mxu1  ;;  %15733 = vmatmul.mubr.msk.bf16.gmra.mxu1 %vm2787_vm0, %v17309_v33  ;;  %v17318_v33 = vld [vmem:[%s25092_s0 + $0xc38] ss:$12 sps:$4 sm:$0xff]  }
 0x203   :  { %25459 = vst [vmem:[#allocation155_spill] sm:$0xff] %v19555_v62  ;;  %v3488_v59 = vpop.f32.mrf.mxu0  ;;  %15736 = vmatprep.mubr.msk.bf16.mxu1 %vm2787_vm0, %v17313_v34 }
 0x204   :  { %v19559_v41 = vpop.f32.mrf.mxu1  ;;  %v17314_v59 = vld [vmem:[%s25092_s0 + $0xc20] ss:$12 sps:$4 sm:$0xff]  }
 0x205   :  { %25460 = vst [vmem:[#allocation156_spill] sm:$0xff] %v19559_v41  ;;  %v19561_v51 = vpop.f32.mrf.mxu0 }
 0x206   :  { %25461 = vst [vmem:[#allocation157_spill] sm:$0xff] %v19561_v51  ;;  %v19569_v6 = vpop.f32.mrf.mxu1 }
 0x207   :  { %25462 = vst [vmem:[#allocation158_spill] sm:$0xff] %v19569_v6  ;;  %v3491_v7 = vpop.f32.mrf.mxu0 }
 0x208   :  { %v19577_v34 = vpop.f32.mrf.mxu1  ;;  %v14026_v7 = vld [vmem:[%s25095_s3 + $0x1f0] sm:$0xff] }
 0x209   :  { %25463 = vst [vmem:[#allocation159_spill] sm:$0xff] %v19577_v34  ;;  %v19579_v51 = vpop.f32.mrf.mxu0  ;;  %3674 = vmatmul.mubr.bf16.gmra.mxu0 %v17310_v4  ;;  %v17315_v4 = vld [vmem:[%s25092_s0 + $0x570] ss:$12 sps:$4 sm:$0xff]   ;;  %16370 = vmatprep.subr.mxu0 %v14026_v7  ;;  %v17320_v34 = vld [vmem:[%s25092_s0 + $0x588] ss:$12 sps:$4 sm:$0xff]  }
 0x20a   :  { %25464 = vst [vmem:[#allocation160_spill] sm:$0xff] %v19579_v51  ;;  %3680 = vmatprep.mubr.bf16.mxu0 %v17317_v57  ;;  %v19581_v62 = vpop.f32.mrf.mxu1  ;;  %15737 = vmatmul.mubr.msk.bf16.gmra.mxu1 %vm2787_vm0, %v17314_v59  ;;  %v17322_v57 = vld [vmem:[%s25092_s0 + $0x58c] ss:$12 sps:$4 sm:$0xff]  }
 0x20b   :  { %25465 = vst [vmem:[#allocation161_spill] sm:$0xff] %v19581_v62  ;;  %v3496_v6 = vpop.f32.mrf.mxu0  ;;  %15740 = vmatprep.mubr.msk.bf16.mxu1 %vm2787_vm0, %v17318_v33  ;;  %16371 = vmatpush3.msra.mxu0 %v14026_v7  ;;  %v17319_v33 = vld [vmem:[%s25092_s0 + $0xc50] ss:$12 sps:$4 sm:$0xff]  }
 0x20c   :  { %v19588_v41 = vpop.f32.mrf.mxu1 }
 0x20d   :  { %25466 = vst [vmem:[#allocation162_spill] sm:$0xff] %v19588_v41  ;;  %v19590_v48 = vpop.f32.mrf.mxu0 }
 0x20e   :  { %25467 = vst [vmem:[#allocation163_spill] sm:$0xff] %v19590_v48  ;;  %v19598_v6 = vpop.f32.mrf.mxu1  ;;  %v17323_v48 = vld [vmem:[%s25092_s0 + $0xc68] ss:$12 sps:$4 sm:$0xff]  }
 0x20f   :  { %25468 = vst [vmem:[#allocation164_spill] sm:$0xff] %v19598_v6  ;;  %v3499_v59 = vpop.f32.mrf.mxu0 }
 0x210   :  { %v19606_v51 = vpop.f32.mrf.mxu1 }
 0x211   :  { %25469 = vst [vmem:[#allocation165_spill] sm:$0xff] %v19606_v51  ;;  %v3502_v62 = vpop.f32.mrf.mxu0  ;;  %3681 = vmatmul.mubr.bf16.gmra.mxu0 %v17315_v4  ;;  %v17327_v51 = vld [vmem:[%s25092_s0 + $0x5a4] ss:$12 sps:$4 sm:$0xff]  }
 0x212   :  { %3688 = vmatprep.mubr.bf16.mxu0 %v17322_v57  ;;  %v19608_v41 = vpop.f32.mrf.mxu1  ;;  %15741 = vmatmul.mubr.msk.bf16.gmra.mxu1 %vm2787_vm0, %v17319_v33  ;;  %v17324_v33 = vld [vmem:[%s25092_s0 + $0xc80] ss:$12 sps:$4 sm:$0xff]  }
 0x213   :  { %25470 = vst [vmem:[#allocation166_spill] sm:$0xff] %v19608_v41  ;;  %v3504_v7 = vpop.f32.mrf.mxu0  ;;  %15744 = vmatprep.mubr.msk.bf16.mxu1 %vm2787_vm0, %v17323_v48  ;;  %v17328_v48 = vld [vmem:[%s25092_s0 + $0xc98] ss:$12 sps:$4 sm:$0xff]  }
 0x214   :  { %v19612_v59 = vpop.f32.mrf.mxu1 }
 0x215   :  { %25471 = vst [vmem:[#allocation167_spill] sm:$0xff] %v19612_v59  ;;  %v3505_v6 = vpop.f32.mrf.mxu0 }
 0x216   :  { %v19620_v4 = vpop.f32.mrf.mxu1 }
 0x217   :  { %25472 = vst [vmem:[#allocation168_spill] sm:$0xff] %v19620_v4  ;;  %v3507_v57 = vpop.f32.mrf.mxu0 }
 0x218   :  { %v19628_v7 = vpop.f32.mrf.mxu1 }
 0x219   :  { %25473 = vst [vmem:[#allocation169_spill] sm:$0xff] %v19628_v7  ;;  %v3510_v41 = vpop.f32.mrf.mxu0  ;;  %3689 = vmatmul.mubr.bf16.gmra.mxu0 %v17320_v34  ;;  %v19642_v7 = vld [vmem:[%s25094_s2] ss:$0 sm:$0xff] }
 0x21a   :  { %3695 = vmatprep.mubr.bf16.mxu0 %v17327_v51  ;;  %v19630_v59 = vpop.f32.mrf.mxu1  ;;  %15745 = vmatmul.mubr.msk.bf16.gmra.mxu1 %vm2787_vm0, %v17324_v33  ;;  %v3503_v51 = vadd.f32 %v19642_v7, %v3502_v62 }
 0x21b   :  { %25474 = vst [vmem:[#allocation170_spill] sm:$0xff] %v19630_v59  ;;  %v3512_v43 = vpop.f32.mrf.mxu0  ;;  %15748 = vmatprep.mubr.msk.bf16.mxu1 %vm2787_vm0, %v17328_v48 }
 0x21c   :  { %v19634_v57 = vpop.f32.mrf.mxu1  ;;  %v17332_v43 = vld [vmem:[%s25092_s0 + $0x5bc] ss:$12 sps:$4 sm:$0xff]  }
 0x21d   :  { %25475 = vst [vmem:[#allocation171_spill] sm:$0xff] %v19634_v57  ;;  %v3513_v4 = vpop.f32.mrf.mxu0  ;;  %v4583_v57 = vadd.f32 %v19000_v13, %v3503_v51  ;;  %v17335_v13 = vld [vmem:[%s25092_s0 + $0x5d4] ss:$12 sps:$4 sm:$0xff]  }
 0x21e   :  { %v19648_v34 = vpop.f32.mrf.mxu1  ;;  %v17329_v4 = vld [vmem:[%s25092_s0 + $0xcb0] ss:$12 sps:$4 sm:$0xff]  }
 0x21f   :  { %25476 = vst [vmem:[#allocation172_spill] sm:$0xff] %v19648_v34  ;;  %v3514_v33 = vpop.f32.mrf.mxu0 }
 0x220   :  { %v19653_v48 = vpop.f32.mrf.mxu1  ;;  %v3506_v33 = vadd.f32 %v19642_v7, %v3505_v6 }
 0x221   :  { %25477 = vst [vmem:[#allocation173_spill] sm:$0xff] %v19653_v48  ;;  %v3517_v59 = vpop.f32.mrf.mxu0  ;;  %3696 = vmatmul.mubr.bf16.gmra.mxu0 %v17325_v31  ;;  %v17330_v31 = vld [vmem:[%s25092_s0 + $0x5b8] ss:$12 sps:$4 sm:$0xff]   ;;  %v3511_v48 = vadd.f32 %v19642_v7, %v3510_v41 }
 0x222   :  { %3703 = vmatprep.mubr.bf16.mxu0 %v17332_v43  ;;  %v19656_v62 = vpop.f32.mrf.mxu1  ;;  %15749 = vmatmul.mubr.msk.bf16.gmra.mxu1 %vm2787_vm0, %v17329_v4  ;;  %v3518_v6 = vadd.f32 %v19642_v7, %v3517_v59 }
 0x223   :  { %25478 = vst [vmem:[#allocation174_spill] sm:$0xff] %v19656_v62  ;;  %v3519_v5 = vpop.f32.mrf.mxu0  ;;  %15768 = vmatprep.mubr.msk.f32.mxu1 %vm5373_vm1, %v4583_v57  ;;  %v4586_v57 = vadd.f32 %v19016_v63, %v3506_v33  ;;  %v4591_v62 = vadd.f32 %v18996_v36, %v3511_v48 }
 0x224   :  { %v19661_v34 = vpop.f32.mrf.mxu1  ;;  %v19683_v63 = vadd.f32 %v19024_v20, %v3518_v6 }
 0x225   :  { %25479 = vst [vmem:[#allocation175_spill] sm:$0xff] %v19661_v34  ;;  %v3520_v56 = vpop.f32.mrf.mxu0 }
 0x226   :  { %v19670_v51 = vpop.f32.mrf.mxu1  ;;  %v3521_v34 = vadd.f32 %v19642_v7, %v3520_v56  ;;  %25483 = vst [vmem:[#allocation179_spill] sm:$0xff] %v19683_v63  ;;  %v17333_v56 = vld [vmem:[%s25092_s0 + $0x5d0] ss:$12 sps:$4 sm:$0xff]  }
 0x227   :  { %25480 = vst [vmem:[#allocation176_spill] sm:$0xff] %v19670_v51  ;;  %v3522_v5 = vpop.f32.mrf.mxu0 }
 0x228   :  { %v19674_v43 = vpop.f32.mrf.mxu1  ;;  %v19692_v36 = vadd.f32 %v19040_v15, %v3521_v34 }
 0x229   :  { %25481 = vst [vmem:[#allocation177_spill] sm:$0xff] %v19674_v43  ;;  %v3525_v4 = vpop.f32.mrf.mxu0  ;;  %3704 = vmatmul.mubr.bf16.gmra.mxu0 %v17330_v31  ;;  %v25699_v43 = vld [vmem:[#allocation109_spill] sm:$0xff] }
 0x22a   :  { %3710 = vmatprep.mubr.bf16.mxu0 %v17335_v13  ;;  %v19678_v41 = vpop.f32.mrf.mxu1  ;;  %15769 = vmatmul.mubr.msk.f32.vlgmr.msra.gmra.mxu1 %vm5373_vm1, %v4586_v57  ;;  %v3526_v59 = vadd.f32 %v19642_v7, %v3525_v4  ;;  %25485 = vst [vmem:[#allocation181_spill] sm:$0xff] %v19692_v36 }
 0x22b   :  { %25482 = vst [vmem:[#allocation178_spill] sm:$0xff] %v19678_v41  ;;  %v3527_v40 = vpop.f32.mrf.mxu0  ;;  %15771 = vmatprep.mubr.msk.f32.mxu1 %vm5373_vm1, %v4591_v62 }
 0x22c   :  { %v19686_v33 = vpop.f32.mrf.mxu1  ;;  %v17338_v40 = vld [vmem:[%s25092_s0 + $0x5ec] ss:$12 sps:$4 sm:$0xff]   ;;  %v19704_v62 = vadd.f32 %v19020_v39, %v3526_v59  ;;  %v17336_v59 = vld [vmem:[%s25092_s0 + $0x5e8] ss:$12 sps:$4 sm:$0xff]  }
 0x22d   :  { %25484 = vst [vmem:[#allocation180_spill] sm:$0xff] %v19686_v33  ;;  %v3528_v31 = vpop.f32.mrf.mxu0  ;;  %v17438_v33 = vld [vmem:[%s25092_s0 + $0x918] ss:$12 sps:$4 sm:$0xff]  }
 0x22e   :  { %v19697_v48 = vpop.f32.mrf.mxu1  ;;  %15772 = vmatmul.mubr.msk.f32.gmra.mxu1 %vm5373_vm1, %v19683_v63  ;;  %25487 = vst [vmem:[#allocation183_spill] sm:$0xff] %v19704_v62 }
 0x22f   :  { %25486 = vst [vmem:[#allocation182_spill] sm:$0xff] %v19697_v48  ;;  %v3529_v20 = vpop.f32.mrf.mxu0  ;;  %15774 = vmatprep.mubr.msk.f32.mxu1 %vm5373_vm1, %v19692_v36 }
 0x230   :  { %v19706_v13 = vpop.f32.mrf.mxu1 }
 0x231   :  { %25488 = vst [vmem:[#allocation184_spill] sm:$0xff] %v19706_v13  ;;  %v3532_v15 = vpop.f32.mrf.mxu0  ;;  %3711 = vmatmul.mubr.bf16.gmra.mxu0 %v17333_v56  ;;  %v17341_v56 = vld [vmem:[%s25092_s0 + $0x604] ss:$12 sps:$4 sm:$0xff]  }
 0x232   :  { %v3533_v34 = vadd.f32 %v19642_v7, %v3532_v15  ;;  %3718 = vmatprep.mubr.bf16.mxu0 %v17338_v40  ;;  %v19709_v5 = vpop.f32.mrf.mxu1  ;;  %15775 = vmatmul.mubr.msk.f32.gmra.mxu1 %vm5373_vm1, %v19704_v62 }
 0x233   :  { %25489 = vst [vmem:[#allocation185_spill] sm:$0xff] %v19709_v5  ;;  %v3534_v57 = vpop.f32.mrf.mxu0 }
 0x234   :  { %v19714_v6 = vadd.f32 %v19048_v0, %v3533_v34  ;;  %v19716_v4 = vpop.f32.mrf.mxu1 }
 0x235   :  { %25491 = vst [vmem:[#allocation187_spill] sm:$0xff] %v19716_v4  ;;  %v3535_v39 = vpop.f32.mrf.mxu0 }
 0x236   :  { %25490 = vst [vmem:[#allocation186_spill] sm:$0xff] %v19714_v6  ;;  %v3536_v31 = vadd.f32 %v19642_v7, %v3535_v39  ;;  %15777 = vmatprep.mubr.msk.f32.mxu1 %vm5373_vm1, %v19714_v6  ;;  %v19727_v40 = vpop.f32.mrf.mxu1 }
 0x237   :  { %25492 = vst [vmem:[#allocation188_spill] sm:$0xff] %v19727_v40  ;;  %v3537_v0 = vpop.f32.mrf.mxu0 }
 0x238   :  { %v19730_v20 = vadd.f32 %v19064_v55, %v3536_v31  ;;  %v19732_v15 = vpop.f32.mrf.mxu1  ;;  %v17339_v31 = vld [vmem:[%s25092_s0 + $0x600] ss:$12 sps:$4 sm:$0xff]  }
 0x239   :  { %25494 = vst [vmem:[#allocation190_spill] sm:$0xff] %v19732_v15  ;;  %v3540_v34 = vpop.f32.mrf.mxu0  ;;  %3719 = vmatmul.mubr.bf16.gmra.mxu0 %v17336_v59  ;;  %v17344_v59 = vld [vmem:[%s25092_s0 + $0x61c] ss:$12 sps:$4 sm:$0xff]  }
 0x23a   :  { %25493 = vst [vmem:[#allocation189_spill] sm:$0xff] %v19730_v20  ;;  %v3541_v57 = vadd.f32 %v19642_v7, %v3540_v34  ;;  %15778 = vmatmul.mubr.msk.f32.gmra.mxu1 %vm5373_vm1, %v19730_v20  ;;  %3725 = vmatprep.mubr.bf16.mxu0 %v17341_v56  ;;  %v19737_v39 = vpop.f32.mrf.mxu1 }
 0x23b   :  { %25495 = vst [vmem:[#allocation191_spill] sm:$0xff] %v19737_v39  ;;  %v3542_v48 = vpop.f32.mrf.mxu0 }
 0x23c   :  { %v19740_v51 = vadd.f32 %v19044_v54, %v3541_v57  ;;  %v19742_v0 = vpop.f32.mrf.mxu1 }
 0x23d   :  { %25497 = vst [vmem:[#allocation193_spill] sm:$0xff] %v19742_v0  ;;  %v3543_v55 = vpop.f32.mrf.mxu0 }
 0x23e   :  { %25496 = vst [vmem:[#allocation192_spill] sm:$0xff] %v19740_v51  ;;  %15780 = vmatprep.mubr.msk.f32.mxu1 %vm5373_vm1, %v19740_v51  ;;  %v19752_v56 = vpop.f32.mrf.mxu1 }
 0x23f   :  { %25498 = vst [vmem:[#allocation194_spill] sm:$0xff] %v19752_v56  ;;  %v3544_v48 = vpop.f32.mrf.mxu0  ;;  %v25715_v56 = vld [vmem:[#allocation115_spill] sm:$0xff] }
 0x240   :  { %v19754_v34 = vpop.f32.mrf.mxu1  ;;  %v17342_v48 = vld [vmem:[%s25092_s0 + $0x618] ss:$12 sps:$4 sm:$0xff]  }
 0x241   :  { %25499 = vst [vmem:[#allocation195_spill] sm:$0xff] %v19754_v34  ;;  %v3547_v54 = vpop.f32.mrf.mxu0  ;;  %3726 = vmatmul.mubr.bf16.gmra.mxu0 %v17339_v31  ;;  %v17347_v31 = vld [vmem:[%s25092_s0 + $0x634] ss:$12 sps:$4 sm:$0xff]  }
 0x242   :  { %v3548_v57 = vadd.f32 %v19642_v7, %v3547_v54  ;;  %3733 = vmatprep.mubr.bf16.mxu0 %v17344_v59  ;;  %v19757_v55 = vpop.f32.mrf.mxu1 }
 0x243   :  { %25500 = vst [vmem:[#allocation196_spill] sm:$0xff] %v19757_v55  ;;  %v3549_v20 = vpop.f32.mrf.mxu0 }
 0x244   :  { %v19760_v6 = vadd.f32 %v19072_v49, %v3548_v57  ;;  %v19762_v51 = vpop.f32.mrf.mxu1 }
 0x245   :  { %25502 = vst [vmem:[#allocation198_spill] sm:$0xff] %v19762_v51  ;;  %v3550_v62 = vpop.f32.mrf.mxu0 }
 0x246   :  { %25501 = vst [vmem:[#allocation197_spill] sm:$0xff] %v19760_v6  ;;  %v3551_v36 = vadd.f32 %v19642_v7, %v3550_v62  ;;  %15781 = vmatmul.mubr.msk.f32.gmra.mxu1 %vm5373_vm1, %v19760_v6  ;;  %v19773_v20 = vpop.f32.mrf.mxu1 }
 0x247   :  { %25503 = vst [vmem:[#allocation199_spill] sm:$0xff] %v19773_v20  ;;  %v3552_v49 = vpop.f32.mrf.mxu0 }
 0x248   :  { %v19776_v59 = vadd.f32 %v19088_v42, %v3551_v36  ;;  %v19778_v54 = vpop.f32.mrf.mxu1  ;;  %v17345_v36 = vld [vmem:[%s25092_s0 + $0x630] ss:$12 sps:$4 sm:$0xff]  }
 0x249   :  { %25505 = vst [vmem:[#allocation201_spill] sm:$0xff] %v19778_v54  ;;  %v3555_v57 = vpop.f32.mrf.mxu0  ;;  %3734 = vmatmul.mubr.bf16.gmra.mxu0 %v17342_v48  ;;  %v17350_v48 = vld [vmem:[%s25092_s0 + $0x64c] ss:$12 sps:$4 sm:$0xff]  }
 0x24a   :  { %25504 = vst [vmem:[#allocation200_spill] sm:$0xff] %v19776_v59  ;;  %v3556_v63 = vadd.f32 %v19642_v7, %v3555_v57  ;;  %15783 = vmatprep.mubr.msk.f32.mxu1 %vm5373_vm1, %v19776_v59  ;;  %3740 = vmatprep.mubr.bf16.mxu0 %v17347_v31  ;;  %v19783_v62 = vpop.f32.mrf.mxu1 }
 0x24b   :  { %25506 = vst [vmem:[#allocation202_spill] sm:$0xff] %v19783_v62  ;;  %v3557_v6 = vpop.f32.mrf.mxu0 }
 0x24c   :  { %v19786_v41 = vadd.f32 %v19068_v53, %v3556_v63  ;;  %v19788_v49 = vpop.f32.mrf.mxu1 }
 0x24d   :  { %25508 = vst [vmem:[#allocation204_spill] sm:$0xff] %v19788_v49  ;;  %v3558_v42 = vpop.f32.mrf.mxu0 }
 0x24e   :  { %25507 = vst [vmem:[#allocation203_spill] sm:$0xff] %v19786_v41  ;;  %15784 = vmatmul.mubr.msk.f32.gmra.mxu1 %vm5373_vm1, %v19786_v41  ;;  %v19798_v31 = vpop.f32.mrf.mxu1 }
 0x24f   :  { %25509 = vst [vmem:[#allocation205_spill] sm:$0xff] %v19798_v31  ;;  %v3559_v6 = vpop.f32.mrf.mxu0 }
 0x250   :  { %v19800_v57 = vpop.f32.mrf.mxu1  ;;  %v17348_v6 = vld [vmem:[%s25092_s0 + $0x648] ss:$12 sps:$4 sm:$0xff]  }
 0x251   :  { %25510 = vst [vmem:[#allocation206_spill] sm:$0xff] %v19800_v57  ;;  %v3562_v53 = vpop.f32.mrf.mxu0  ;;  %3741 = vmatmul.mubr.bf16.gmra.mxu0 %v17345_v36  ;;  %v17353_v36 = vld [vmem:[%s25092_s0 + $0x664] ss:$12 sps:$4 sm:$0xff]  }
 0x252   :  { %v3563_v63 = vadd.f32 %v19642_v7, %v3562_v53  ;;  %3748 = vmatprep.mubr.bf16.mxu0 %v17350_v48  ;;  %v19803_v42 = vpop.f32.mrf.mxu1  ;;  %v25697_v57 = vld [vmem:[#allocation47_spill] sm:$0xff] }
 0x253   :  { %25511 = vst [vmem:[#allocation207_spill] sm:$0xff] %v19803_v42  ;;  %v3564_v59 = vpop.f32.mrf.mxu0 }
 0x254   :  { %v19806_v62 = vadd.f32 %v19096_v29, %v3563_v63  ;;  %v19808_v41 = vpop.f32.mrf.mxu1 }
 0x255   :  { %25513 = vst [vmem:[#allocation209_spill] sm:$0xff] %v19808_v41  ;;  %v3565_v13 = vpop.f32.mrf.mxu0 }
 0x256   :  { %25512 = vst [vmem:[#allocation208_spill] sm:$0xff] %v19806_v62  ;;  %v3566_v31 = vadd.f32 %v19642_v7, %v3565_v13  ;;  %15786 = vmatprep.mubr.msk.f32.mxu1 %vm5373_vm1, %v19806_v62  ;;  %v19819_v59 = vpop.f32.mrf.mxu1 }
 0x257   :  { %25514 = vst [vmem:[#allocation210_spill] sm:$0xff] %v19819_v59  ;;  %v3567_v29 = vpop.f32.mrf.mxu0 }
 0x258   :  { %v19822_v48 = vadd.f32 %v19112_v37, %v3566_v31  ;;  %v19824_v53 = vpop.f32.mrf.mxu1  ;;  %v17351_v37 = vld [vmem:[%s25092_s0 + $0x660] ss:$12 sps:$4 sm:$0xff]   ;;  %v17356_v31 = vld [vmem:[%s25092_s0 + $0x67c] ss:$12 sps:$4 sm:$0xff]  }
 0x259   :  { %25516 = vst [vmem:[#allocation212_spill] sm:$0xff] %v19824_v53  ;;  %v3570_v63 = vpop.f32.mrf.mxu0  ;;  %3749 = vmatmul.mubr.bf16.gmra.mxu0 %v17348_v6 }
 0x25a   :  { %25515 = vst [vmem:[#allocation211_spill] sm:$0xff] %v19822_v48  ;;  %v3571_v42 = vadd.f32 %v19642_v7, %v3570_v63  ;;  %15787 = vmatmul.mubr.msk.f32.gmra.mxu1 %vm5373_vm1, %v19822_v48  ;;  %3755 = vmatprep.mubr.bf16.mxu0 %v17353_v36  ;;  %v15682_v13 = vpop.f32.mrf.mxu1 }
 0x25b   :  { %v3572_v62 = vpop.f32.mrf.mxu0 }
 0x25c   :  { %v19830_v41 = vadd.f32 %v19092_v52, %v3571_v42  ;;  %v5093_v59 = vpop.f32.mrf.mxu1 }
 0x25d   :  { %v3573_v29 = vpop.f32.mrf.mxu0 }
 0x25e   :  { %25517 = vst [vmem:[#allocation213_spill] sm:$0xff] %v19830_v41  ;;  %15789 = vmatprep.mubr.msk.f32.mxu1 %vm5373_vm1, %v19830_v41  ;;  %v15683_v6 = vpop.f32.mrf.mxu1 }
 0x25f   :  { %v3574_v36 = vpop.f32.mrf.mxu0  ;;  %v17354_v6 = vld [vmem:[%s25092_s0 + $0x678] ss:$12 sps:$4 sm:$0xff]  }
 0x260   :  { %v5095_v63 = vpop.f32.mrf.mxu1 }
 0x261   :  { %v3577_v62 = vpop.f32.mrf.mxu0  ;;  %3756 = vmatmul.mubr.bf16.gmra.mxu0 %v17351_v37  ;;  %v17359_v37 = vld [vmem:[%s25092_s0 + $0x694] ss:$12 sps:$4 sm:$0xff]  }
 0x262   :  { %v3578_v52 = vadd.f32 %v19642_v7, %v3577_v62  ;;  %3763 = vmatprep.mubr.bf16.mxu0 %v17356_v31  ;;  %v19841_v42 = vpop.f32.mrf.mxu1 }
 0x263   :  { %25518 = vst [vmem:[#allocation214_spill] sm:$0xff] %v19841_v42  ;;  %v3579_v59 = vpop.f32.mrf.mxu0  ;;  %v25683_v42 = vld [vmem:[#allocation104_spill] sm:$0xff] }
 0x264   :  { %v19844_v13 = vadd.f32 %v19120_v24, %v3578_v52  ;;  %v19846_v29 = vpop.f32.mrf.mxu1 }
 0x265   :  { %25520 = vst [vmem:[#allocation216_spill] sm:$0xff] %v19846_v29  ;;  %v3580_v41 = vpop.f32.mrf.mxu0 }
 0x266   :  { %25519 = vst [vmem:[#allocation215_spill] sm:$0xff] %v19844_v13  ;;  %v3581_v36 = vadd.f32 %v19642_v7, %v3580_v41  ;;  %15790 = vmatmul.mubr.msk.f32.gmra.mxu1 %vm5373_vm1, %v19844_v13  ;;  %v15687_v31 = vpop.f32.mrf.mxu1 }
 0x267   :  { %v3582_v63 = vpop.f32.mrf.mxu0 }
 0x268   :  { %v19858_v24 = vadd.f32 %v19136_v21, %v3581_v36  ;;  %v19860_v62 = vpop.f32.mrf.mxu1  ;;  %v17357_v36 = vld [vmem:[%s25092_s0 + $0x690] ss:$12 sps:$4 sm:$0xff]  }
 0x269   :  { %25522 = vst [vmem:[#allocation218_spill] sm:$0xff] %v19860_v62  ;;  %v3585_v52 = vpop.f32.mrf.mxu0  ;;  %3764 = vmatmul.mubr.bf16.gmra.mxu0 %v17354_v6  ;;  %v17362_v6 = vld [vmem:[%s25092_s0 + $0x6ac] ss:$12 sps:$4 sm:$0xff]  }
 0x26a   :  { %25521 = vst [vmem:[#allocation217_spill] sm:$0xff] %v19858_v24  ;;  %v3586_v59 = vadd.f32 %v19642_v7, %v3585_v52  ;;  %15792 = vmatprep.mubr.msk.f32.mxu1 %vm5373_vm1, %v19858_v24  ;;  %3771 = vmatprep.mubr.bf16.mxu0 %v17359_v37  ;;  %v19865_v41 = vpop.f32.mrf.mxu1 }
 0x26b   :  { %25523 = vst [vmem:[#allocation219_spill] sm:$0xff] %v19865_v41  ;;  %v3587_v13 = vpop.f32.mrf.mxu0 }
 0x26c   :  { %v19868_v48 = vadd.f32 %v19116_v38, %v3586_v59  ;;  %v19870_v31 = vpop.f32.mrf.mxu1 }
 0x26d   :  { %25525 = vst [vmem:[#allocation221_spill] sm:$0xff] %v19870_v31  ;;  %v3588_v21 = vpop.f32.mrf.mxu0 }
 0x26e   :  { %25524 = vst [vmem:[#allocation220_spill] sm:$0xff] %v19868_v48  ;;  %15793 = vmatmul.mubr.msk.f32.gmra.mxu1 %vm5373_vm1, %v19868_v48  ;;  %v15691_v37 = vpop.f32.mrf.mxu1 }
 0x26f   :  { %v3589_v63 = vpop.f32.mrf.mxu0  ;;  %v17360_v37 = vld [vmem:[%s25092_s0 + $0x6a8] ss:$12 sps:$4 sm:$0xff]  }
 0x270   :  { %v19880_v13 = vpop.f32.mrf.mxu1 }
 0x271   :  { %25526 = vst [vmem:[#allocation222_spill] sm:$0xff] %v19880_v13  ;;  %v3592_v38 = vpop.f32.mrf.mxu0  ;;  %3772 = vmatmul.mubr.bf16.gmra.mxu0 %v17357_v36  ;;  %v17365_v36 = vld [vmem:[%s25092_s0 + $0x6c4] ss:$12 sps:$4 sm:$0xff]  }
 0x272   :  { %v3593_v52 = vadd.f32 %v19642_v7, %v3592_v38  ;;  %3779 = vmatprep.mubr.bf16.mxu0 %v17362_v6  ;;  %v19883_v59 = vpop.f32.mrf.mxu1 }
 0x273   :  { %25527 = vst [vmem:[#allocation223_spill] sm:$0xff] %v19883_v59  ;;  %v3594_v21 = vpop.f32.mrf.mxu0 }
 0x274   :  { %v19886_v24 = vadd.f32 %v19144_v50, %v3593_v52  ;;  %v19888_v48 = vpop.f32.mrf.mxu1 }
 0x275   :  { %25529 = vst [vmem:[#allocation225_spill] sm:$0xff] %v19888_v48  ;;  %v3595_v41 = vpop.f32.mrf.mxu0 }
 0x276   :  { %25528 = vst [vmem:[#allocation224_spill] sm:$0xff] %v19886_v24  ;;  %v3596_v63 = vadd.f32 %v19642_v7, %v3595_v41  ;;  %15795 = vmatprep.mubr.msk.f32.mxu1 %vm5373_vm1, %v19886_v24  ;;  %v15695_v6 = vpop.f32.mrf.mxu1 }
 0x277   :  { %v3597_v38 = vpop.f32.mrf.mxu0 }
 0x278   :  { %v19900_v50 = vadd.f32 %v19163_v60, %v3596_v63  ;;  %v19902_v52 = vpop.f32.mrf.mxu1  ;;  %v17363_v63 = vld [vmem:[%s25092_s0 + $0x6c0] ss:$12 sps:$4 sm:$0xff]  }
 0x279   :  { %25531 = vst [vmem:[#allocation227_spill] sm:$0xff] %v19902_v52  ;;  %v3600_v21 = vpop.f32.mrf.mxu0  ;;  %3780 = vmatmul.mubr.bf16.gmra.mxu0 %v17360_v37  ;;  %v17368_v37 = vld [vmem:[%s25092_s0 + $0x6dc] ss:$12 sps:$4 sm:$0xff]  }
 0x27a   :  { %25530 = vst [vmem:[#allocation226_spill] sm:$0xff] %v19900_v50  ;;  %v3601_v59 = vadd.f32 %v19642_v7, %v3600_v21  ;;  %15796 = vmatmul.mubr.msk.f32.gmra.mxu1 %vm5373_vm1, %v19900_v50  ;;  %3787 = vmatprep.mubr.bf16.mxu0 %v17365_v36  ;;  %v19907_v41 = vpop.f32.mrf.mxu1  ;;  %v5363_v21 = vld [vmem:[%s25095_s3 + $0x38] sm:$0xff] }
 0x27b   :  { %25532 = vst [vmem:[#allocation228_spill] sm:$0xff] %v19907_v41  ;;  %v3602_v24 = vpop.f32.mrf.mxu0  ;;  %15840 = vmatprep.subr.mxu1 %v5363_v21 }
 0x27c   :  { %v19910_v48 = vadd.f32 %v19140_v47, %v3601_v59  ;;  %v19912_v6 = vpop.f32.mrf.mxu1  ;;  %15841 = vmatpush3.msra.mxu1 %v5363_v21 }
 0x27d   :  { %25534 = vst [vmem:[#allocation230_spill] sm:$0xff] %v19912_v6  ;;  %v3603_v60 = vpop.f32.mrf.mxu0 }
 0x27e   :  { %25533 = vst [vmem:[#allocation229_spill] sm:$0xff] %v19910_v48  ;;  %15798 = vmatprep.mubr.msk.f32.mxu1 %vm5373_vm1, %v19910_v48  ;;  %v15699_v36 = vpop.f32.mrf.mxu1 }
 0x27f   :  { %v3604_v38 = vpop.f32.mrf.mxu0  ;;  %v5362_v36 = vld [vmem:[%s25095_s3 + $0x30] sm:$0xff] }
 0x280   :  { %v19922_v24 = vpop.f32.mrf.mxu1  ;;  %15842 = vmatprep.subr.mxu1 %v5362_v36 }
 0x281   :  { %25535 = vst [vmem:[#allocation231_spill] sm:$0xff] %v19922_v24  ;;  %v3607_v47 = vpop.f32.mrf.mxu0  ;;  %3788 = vmatmul.mubr.bf16.gmra.mxu0 %v17363_v63  ;;  %15843 = vmatpush3.msra.mxu1 %v5362_v36 }
 0x282   :  { %v3608_v59 = vadd.f32 %v19642_v7, %v3607_v47  ;;  %3795 = vmatprep.mubr.bf16.mxu0 %v17368_v37  ;;  %v19928_v60 = vpop.f32.mrf.mxu1  ;;  %v17366_v37 = vld [vmem:[%s25092_s0 + $0x6d8] ss:$12 sps:$4 sm:$0xff]  }
 0x283   :  { %25536 = vst [vmem:[#allocation232_spill] sm:$0xff] %v19928_v60  ;;  %v3609_v48 = vpop.f32.mrf.mxu0 }
 0x284   :  { %v19931_v50 = vadd.f32 %v19171_v61, %v3608_v59  ;;  %v19936_v63 = vpop.f32.mrf.mxu1  ;;  %v17371_v61 = vld [vmem:[%s25092_s0 + $0x6f4] ss:$12 sps:$4 sm:$0xff]   ;;  %v5361_v48 = vld [vmem:[%s25095_s3 + $0x28] sm:$0xff] }
 0x285   :  { %25538 = vst [vmem:[#allocation234_spill] sm:$0xff] %v19936_v63  ;;  %v3610_v38 = vpop.f32.mrf.mxu0  ;;  %15844 = vmatprep.subr.mxu1 %v5361_v48 }
 0x286   :  { %25537 = vst [vmem:[#allocation233_spill] sm:$0xff] %v19931_v50  ;;  %v3611_v47 = vadd.f32 %v19642_v7, %v3610_v38  ;;  %15799 = vmatmul.mubr.msk.f32.gmra.mxu1 %vm5373_vm1, %v19931_v50  ;;  %v15703_v59 = vpop.f32.mrf.mxu1  ;;  %v5360_v38 = vld [vmem:[%s25095_s3 + $0x20] sm:$0xff] }
 0x287   :  { %v3612_v21 = vpop.f32.mrf.mxu0  ;;  %15845 = vmatpush3.msra.mxu1 %v5361_v48 }
 0x288   :  { %v19951_v60 = vadd.f32 %v19190_v35, %v3611_v47  ;;  %v19956_v50 = vpop.f32.mrf.mxu1  ;;  %v5359_v35 = vld [vmem:[%s25095_s3 + $0x18] sm:$0xff]  ;;  %15846 = vmatprep.subr.mxu1 %v5360_v38 }
 0x289   :  { %25540 = vst [vmem:[#allocation236_spill] sm:$0xff] %v19956_v50  ;;  %v3615_v63 = vpop.f32.mrf.mxu0  ;;  %3796 = vmatmul.mubr.bf16.gmra.mxu0 %v17366_v37  ;;  %15847 = vmatpush3.msra.mxu1 %v5360_v38  ;;  %v5357_v38 = vld [vmem:[%s25095_s3 + $0x8] sm:$0xff]  ;;  %v25668_v50 = vld [vmem:[#allocation99_spill] sm:$0xff] }
 0x28a   :  { %25539 = vst [vmem:[#allocation235_spill] sm:$0xff] %v19951_v60  ;;  %v3616_v41 = vadd.f32 %v19642_v7, %v3615_v63  ;;  %15801 = vmatprep.mubr.msk.f32.mxu1 %vm5373_vm1, %v19951_v60  ;;  %3803 = vmatprep.mubr.bf16.mxu0 %v17371_v61  ;;  %v19964_v36 = vpop.f32.mrf.mxu1  ;;  %v17369_v63 = vld [vmem:[%s25092_s0 + $0x6f0] ss:$12 sps:$4 sm:$0xff]  }
 0x28b   :  { %25541 = vst [vmem:[#allocation237_spill] sm:$0xff] %v19964_v36  ;;  %v3617_v47 = vpop.f32.mrf.mxu0  ;;  %15848 = vmatprep.subr.mxu1 %v5359_v35  ;;  %v5358_v61 = vld [vmem:[%s25095_s3 + $0x10] sm:$0xff] }
 0x28c   :  { %v19967_v59 = vadd.f32 %v19167_v28, %v3616_v41  ;;  %v19969_v37 = vpop.f32.mrf.mxu1  ;;  %v17374_v28 = vld [vmem:[%s25092_s0 + $0x70c] ss:$12 sps:$4 sm:$0xff]   ;;  %15849 = vmatpush3.msra.mxu1 %v5359_v35 }
 0x28d   :  { %25543 = vst [vmem:[#allocation239_spill] sm:$0xff] %v19969_v37  ;;  %v3618_v48 = vpop.f32.mrf.mxu0  ;;  %15850 = vmatprep.subr.mxu1 %v5358_v61 }
 0x28e   :  { %25542 = vst [vmem:[#allocation238_spill] sm:$0xff] %v19967_v59  ;;  %15802 = vmatmul.mubr.msk.f32.gmra.mxu1 %vm5373_vm1, %v19967_v59  ;;  %v15707_v41 = vpop.f32.mrf.mxu1  ;;  %v5356_v59 = vld [vmem:[%s25095_s3] sm:$0xff] }
 0x28f   :  { %v3619_v21 = vpop.f32.mrf.mxu0  ;;  %15851 = vmatpush3.msra.mxu1 %v5358_v61 }
 0x290   :  { %v19985_v47 = vpop.f32.mrf.mxu1  ;;  %15852 = vmatprep.subr.mxu1 %v5357_v38 }
 0x291   :  { %25544 = vst [vmem:[#allocation240_spill] sm:$0xff] %v19985_v47  ;;  %v3622_v48 = vpop.f32.mrf.mxu0  ;;  %3804 = vmatmul.mubr.bf16.gmra.mxu0 %v17369_v63  ;;  %15853 = vmatpush3.msra.mxu1 %v5357_v38  ;;  %v14025_v63 = vld [vmem:[%s25095_s3 + $0x1e8] sm:$0xff] }
 0x292   :  { %v3623_v60 = vadd.f32 %v19642_v7, %v3622_v48  ;;  %3811 = vmatprep.mubr.bf16.mxu0 %v17374_v28  ;;  %v19991_v41 = vpop.f32.mrf.mxu1  ;;  %15854 = vmatprep.subr.mxu1 %v5356_v59  ;;  %v17372_v28 = vld [vmem:[%s25092_s0 + $0x708] ss:$12 sps:$4 sm:$0xff]  }
 0x293   :  { %25545 = vst [vmem:[#allocation241_spill] sm:$0xff] %v19991_v41  ;;  %v3624_v35 = vpop.f32.mrf.mxu0  ;;  %15855 = vmatpush3.msra.mxu1 %v5356_v59  ;;  %16372 = vmatprep.subr.mxu0 %v14025_v63 }
 0x294   :  { %v19994_v21 = vadd.f32 %v19198_v44, %v3623_v60  ;;  %v19999_v61 = vpop.f32.mrf.mxu1  ;;  %v17377_v44 = vld [vmem:[%s25092_s0 + $0x724] ss:$12 sps:$4 sm:$0xff]   ;;  %16373 = vmatpush3.msra.mxu0 %v14025_v63 }
 0x295   :  { %25547 = vst [vmem:[#allocation243_spill] sm:$0xff] %v19999_v61  ;;  %v3625_v36 = vpop.f32.mrf.mxu0 }
 0x296   :  { %25546 = vst [vmem:[#allocation242_spill] sm:$0xff] %v19994_v21  ;;  %v3626_v48 = vadd.f32 %v19642_v7, %v3625_v36  ;;  %15804 = vmatprep.mubr.msk.f32.mxu1 %vm5373_vm1, %v19994_v21  ;;  %v15711_v60 = vpop.f32.mrf.mxu1 }
 0x297   :  { %v3627_v38 = vpop.f32.mrf.mxu0 }
 0x298   :  { %v20011_v35 = vadd.f32 %v19214_v25, %v3626_v48  ;;  %v20013_v41 = vpop.f32.mrf.mxu1  ;;  %v17375_v48 = vld [vmem:[%s25092_s0 + $0x720] ss:$12 sps:$4 sm:$0xff]  }
 0x299   :  { %25549 = vst [vmem:[#allocation245_spill] sm:$0xff] %v20013_v41  ;;  %v3630_v61 = vpop.f32.mrf.mxu0  ;;  %3812 = vmatmul.mubr.bf16.gmra.mxu0 %v17372_v28 }
 0x29a   :  { %25548 = vst [vmem:[#allocation244_spill] sm:$0xff] %v20011_v35  ;;  %v3631_v59 = vadd.f32 %v19642_v7, %v3630_v61  ;;  %15805 = vmatmul.mubr.msk.f32.gmra.mxu1 %vm5373_vm1, %v20011_v35  ;;  %3819 = vmatprep.mubr.bf16.mxu0 %v17377_v44  ;;  %v20018_v36 = vpop.f32.mrf.mxu1  ;;  %v17380_v61 = vld [vmem:[%s25092_s0 + $0x73c] ss:$12 sps:$4 sm:$0xff]  }
 0x29b   :  { %25550 = vst [vmem:[#allocation246_spill] sm:$0xff] %v20018_v36  ;;  %v3632_v21 = vpop.f32.mrf.mxu0 }
 0x29c   :  { %v20021_v63 = vadd.f32 %v19194_v19, %v3631_v59  ;;  %v20023_v60 = vpop.f32.mrf.mxu1 }
 0x29d   :  { %25552 = vst [vmem:[#allocation248_spill] sm:$0xff] %v20023_v60  ;;  %v3633_v25 = vpop.f32.mrf.mxu0 }
 0x29e   :  { %25551 = vst [vmem:[#allocation247_spill] sm:$0xff] %v20021_v63  ;;  %15807 = vmatprep.mubr.msk.f32.mxu1 %vm5373_vm1, %v20021_v63  ;;  %v15715_v28 = vpop.f32.mrf.mxu1 }
 0x29f   :  { %v3634_v44 = vpop.f32.mrf.mxu0  ;;  %v17378_v28 = vld [vmem:[%s25092_s0 + $0x738] ss:$12 sps:$4 sm:$0xff]  }
 0x2a0   :  { %v20033_v21 = vpop.f32.mrf.mxu1 }
 0x2a1   :  { %25553 = vst [vmem:[#allocation249_spill] sm:$0xff] %v20033_v21  ;;  %v3637_v19 = vpop.f32.mrf.mxu0  ;;  %3820 = vmatmul.mubr.bf16.gmra.mxu0 %v17375_v48  ;;  %v17383_v48 = vld [vmem:[%s25092_s0 + $0x754] ss:$12 sps:$4 sm:$0xff]  }
 0x2a2   :  { %v3638_v38 = vadd.f32 %v19642_v7, %v3637_v19  ;;  %3827 = vmatprep.mubr.bf16.mxu0 %v17380_v61  ;;  %v20036_v59 = vpop.f32.mrf.mxu1 }
 0x2a3   :  { %25554 = vst [vmem:[#allocation250_spill] sm:$0xff] %v20036_v59  ;;  %v3639_v25 = vpop.f32.mrf.mxu0 }
 0x2a4   :  { %v20039_v36 = vadd.f32 %v19222_v9, %v3638_v38  ;;  %v20041_v63 = vpop.f32.mrf.mxu1 }
 0x2a5   :  { %25556 = vst [vmem:[#allocation252_spill] sm:$0xff] %v20041_v63  ;;  %v3640_v35 = vpop.f32.mrf.mxu0 }
 0x2a6   :  { %25555 = vst [vmem:[#allocation251_spill] sm:$0xff] %v20039_v36  ;;  %v3641_v44 = vadd.f32 %v19642_v7, %v3640_v35  ;;  %15808 = vmatmul.mubr.msk.f32.gmra.mxu1 %vm5373_vm1, %v20039_v36  ;;  %v15719_v61 = vpop.f32.mrf.mxu1 }
 0x2a7   :  { %v3642_v19 = vpop.f32.mrf.mxu0 }
 0x2a8   :  { %v20053_v9 = vadd.f32 %v19241_v16, %v3641_v44  ;;  %v20055_v38 = vpop.f32.mrf.mxu1  ;;  %v17381_v44 = vld [vmem:[%s25092_s0 + $0x750] ss:$12 sps:$4 sm:$0xff]  }
 0x2a9   :  { %25558 = vst [vmem:[#allocation254_spill] sm:$0xff] %v20055_v38  ;;  %v3645_v25 = vpop.f32.mrf.mxu0  ;;  %3828 = vmatmul.mubr.bf16.gmra.mxu0 %v17378_v28  ;;  %v17386_v28 = vld [vmem:[%s25092_s0 + $0x76c] ss:$12 sps:$4 sm:$0xff]  }
 0x2aa   :  { %25557 = vst [vmem:[#allocation253_spill] sm:$0xff] %v20053_v9  ;;  %v3646_v59 = vadd.f32 %v19642_v7, %v3645_v25  ;;  %15810 = vmatprep.mubr.msk.f32.mxu1 %vm5373_vm1, %v20053_v9  ;;  %3835 = vmatprep.mubr.bf16.mxu0 %v17383_v48  ;;  %v20060_v35 = vpop.f32.mrf.mxu1  ;;  %v25654_v9 = vld [vmem:[#allocation93_spill] sm:$0xff] }
 0x2ab   :  { %25559 = vst [vmem:[#allocation255_spill] sm:$0xff] %v20060_v35  ;;  %v3647_v63 = vpop.f32.mrf.mxu0 }
 0x2ac   :  { %v20063_v36 = vadd.f32 %v19218_v26, %v3646_v59  ;;  %v20065_v61 = vpop.f32.mrf.mxu1 }
 0x2ad   :  { %25561 = vst [vmem:[#allocation257_spill] sm:$0xff] %v20065_v61  ;;  %v3648_v16 = vpop.f32.mrf.mxu0 }
 0x2ae   :  { %25560 = vst [vmem:[#allocation256_spill] sm:$0xff] %v20063_v36  ;;  %15811 = vmatmul.mubr.msk.f32.gmra.mxu1 %vm5373_vm1, %v20063_v36  ;;  %v15723_v48 = vpop.f32.mrf.mxu1 }
 0x2af   :  { %v3649_v19 = vpop.f32.mrf.mxu0  ;;  %v17384_v48 = vld [vmem:[%s25092_s0 + $0x768] ss:$12 sps:$4 sm:$0xff]  }
 0x2b0   :  { %v20075_v63 = vpop.f32.mrf.mxu1 }
 0x2b1   :  { %25562 = vst [vmem:[#allocation258_spill] sm:$0xff] %v20075_v63  ;;  %v3652_v26 = vpop.f32.mrf.mxu0  ;;  %3836 = vmatmul.mubr.bf16.gmra.mxu0 %v17381_v44  ;;  %v17389_v44 = vld [vmem:[%s25092_s0 + $0x784] ss:$12 sps:$4 sm:$0xff]  }
 0x2b2   :  { %v3653_v59 = vadd.f32 %v19642_v7, %v3652_v26  ;;  %3843 = vmatprep.mubr.bf16.mxu0 %v17386_v28  ;;  %v20078_v25 = vpop.f32.mrf.mxu1 }
 0x2b3   :  { %25563 = vst [vmem:[#allocation259_spill] sm:$0xff] %v20078_v25  ;;  %v3654_v16 = vpop.f32.mrf.mxu0 }
 0x2b4   :  { %v20081_v35 = vadd.f32 %v19255_v32, %v3653_v59  ;;  %v20083_v61 = vpop.f32.mrf.mxu1 }
 0x2b5   :  { %25565 = vst [vmem:[#allocation261_spill] sm:$0xff] %v20083_v61  ;;  %v3655_v38 = vpop.f32.mrf.mxu0 }
 0x2b6   :  { %25564 = vst [vmem:[#allocation260_spill] sm:$0xff] %v20081_v35  ;;  %v3656_v19 = vadd.f32 %v19642_v7, %v3655_v38  ;;  %15813 = vmatprep.mubr.msk.f32.mxu1 %vm5373_vm1, %v20081_v35  ;;  %v15727_v28 = vpop.f32.mrf.mxu1 }
 0x2b7   :  { %v3657_v26 = vpop.f32.mrf.mxu0 }
 0x2b8   :  { %v20095_v32 = vadd.f32 %v19277_v18, %v3656_v19  ;;  %v20097_v59 = vpop.f32.mrf.mxu1  ;;  %v17387_v19 = vld [vmem:[%s25092_s0 + $0x780] ss:$12 sps:$4 sm:$0xff]  }
 0x2b9   :  { %25567 = vst [vmem:[#allocation263_spill] sm:$0xff] %v20097_v59  ;;  %v3660_v16 = vpop.f32.mrf.mxu0  ;;  %3844 = vmatmul.mubr.bf16.gmra.mxu0 %v17384_v48  ;;  %v17392_v48 = vld [vmem:[%s25092_s0 + $0x79c] ss:$12 sps:$4 sm:$0xff]  }
 0x2ba   :  { %25566 = vst [vmem:[#allocation262_spill] sm:$0xff] %v20095_v32  ;;  %v3661_v25 = vadd.f32 %v19642_v7, %v3660_v16  ;;  %15814 = vmatmul.mubr.msk.f32.gmra.mxu1 %vm5373_vm1, %v20095_v32  ;;  %3851 = vmatprep.mubr.bf16.mxu0 %v17389_v44  ;;  %v20102_v38 = vpop.f32.mrf.mxu1 }
 0x2bb   :  { %25568 = vst [vmem:[#allocation264_spill] sm:$0xff] %v20102_v38  ;;  %v3662_v61 = vpop.f32.mrf.mxu0 }
 0x2bc   :  { %v20105_v63 = vadd.f32 %v19248_v1, %v3661_v25  ;;  %v20107_v28 = vpop.f32.mrf.mxu1 }
 0x2bd   :  { %25570 = vst [vmem:[#allocation266_spill] sm:$0xff] %v20107_v28  ;;  %v3663_v18 = vpop.f32.mrf.mxu0 }
 0x2be   :  { %25569 = vst [vmem:[#allocation265_spill] sm:$0xff] %v20105_v63  ;;  %15816 = vmatprep.mubr.msk.f32.mxu1 %vm5373_vm1, %v20105_v63  ;;  %v15731_v44 = vpop.f32.mrf.mxu1 }
 0x2bf   :  { %v3664_v26 = vpop.f32.mrf.mxu0  ;;  %v17390_v44 = vld [vmem:[%s25092_s0 + $0x798] ss:$12 sps:$4 sm:$0xff]  }
 0x2c0   :  { %v20117_v61 = vpop.f32.mrf.mxu1 }
 0x2c1   :  { %25571 = vst [vmem:[#allocation267_spill] sm:$0xff] %v20117_v61  ;;  %v3667_v1 = vpop.f32.mrf.mxu0  ;;  %3852 = vmatmul.mubr.bf16.gmra.mxu0 %v17387_v19  ;;  %v17395_v19 = vld [vmem:[%s25092_s0 + $0x7b4] ss:$12 sps:$4 sm:$0xff]  }
 0x2c2   :  { %v3668_v25 = vadd.f32 %v19642_v7, %v3667_v1  ;;  %3859 = vmatprep.mubr.bf16.mxu0 %v17392_v48  ;;  %v20120_v16 = vpop.f32.mrf.mxu1 }
 0x2c3   :  { %25572 = vst [vmem:[#allocation268_spill] sm:$0xff] %v20120_v16  ;;  %v3669_v18 = vpop.f32.mrf.mxu0 }
 0x2c4   :  { %v20123_v38 = vadd.f32 %v19285_v27, %v3668_v25  ;;  %v20125_v28 = vpop.f32.mrf.mxu1 }
 0x2c5   :  { %25574 = vst [vmem:[#allocation270_spill] sm:$0xff] %v20125_v28  ;;  %v3670_v59 = vpop.f32.mrf.mxu0 }
 0x2c6   :  { %25573 = vst [vmem:[#allocation269_spill] sm:$0xff] %v20123_v38  ;;  %v3671_v26 = vadd.f32 %v19642_v7, %v3670_v59  ;;  %15817 = vmatmul.mubr.msk.f32.gmra.mxu1 %vm5373_vm1, %v20123_v38  ;;  %v15735_v48 = vpop.f32.mrf.mxu1  ;;  %v25640_v38 = vld [vmem:[#allocation88_spill] sm:$0xff] }
 0x2c7   :  { %v3672_v1 = vpop.f32.mrf.mxu0 }
 0x2c8   :  { %v20137_v27 = vadd.f32 %v19301_v45, %v3671_v26  ;;  %v20139_v25 = vpop.f32.mrf.mxu1  ;;  %v17393_v26 = vld [vmem:[%s25092_s0 + $0x7b0] ss:$12 sps:$4 sm:$0xff]  }
 0x2c9   :  { %25576 = vst [vmem:[#allocation272_spill] sm:$0xff] %v20139_v25  ;;  %v3675_v18 = vpop.f32.mrf.mxu0  ;;  %3860 = vmatmul.mubr.bf16.gmra.mxu0 %v17390_v44  ;;  %v17398_v44 = vld [vmem:[%s25092_s0 + $0x7cc] ss:$12 sps:$4 sm:$0xff]  }
 0x2ca   :  { %25575 = vst [vmem:[#allocation271_spill] sm:$0xff] %v20137_v27  ;;  %v3676_v16 = vadd.f32 %v19642_v7, %v3675_v18  ;;  %15819 = vmatprep.mubr.msk.f32.mxu1 %vm5373_vm1, %v20137_v27  ;;  %3867 = vmatprep.mubr.bf16.mxu0 %v17395_v19  ;;  %v20144_v59 = vpop.f32.mrf.mxu1 }
 0x2cb   :  { %25577 = vst [vmem:[#allocation273_spill] sm:$0xff] %v20144_v59  ;;  %v3677_v28 = vpop.f32.mrf.mxu0 }
 0x2cc   :  { %v20147_v61 = vadd.f32 %v19281_v30, %v3676_v16  ;;  %v20149_v48 = vpop.f32.mrf.mxu1 }
 0x2cd   :  { %25579 = vst [vmem:[#allocation275_spill] sm:$0xff] %v20149_v48  ;;  %v3678_v45 = vpop.f32.mrf.mxu0 }
 0x2ce   :  { %25578 = vst [vmem:[#allocation274_spill] sm:$0xff] %v20147_v61  ;;  %15820 = vmatmul.mubr.msk.f32.gmra.mxu1 %vm5373_vm1, %v20147_v61  ;;  %v15739_v19 = vpop.f32.mrf.mxu1 }
 0x2cf   :  { %v3679_v1 = vpop.f32.mrf.mxu0  ;;  %v17396_v19 = vld [vmem:[%s25092_s0 + $0x7c8] ss:$12 sps:$4 sm:$0xff]  }
 0x2d0   :  { %v20159_v28 = vpop.f32.mrf.mxu1 }
 0x2d1   :  { %25580 = vst [vmem:[#allocation276_spill] sm:$0xff] %v20159_v28  ;;  %v3682_v30 = vpop.f32.mrf.mxu0  ;;  %3868 = vmatmul.mubr.bf16.gmra.mxu0 %v17393_v26  ;;  %v17401_v26 = vld [vmem:[%s25092_s0 + $0x7e4] ss:$12 sps:$4 sm:$0xff]  }
 0x2d2   :  { %v3683_v16 = vadd.f32 %v19642_v7, %v3682_v30  ;;  %3875 = vmatprep.mubr.bf16.mxu0 %v17398_v44  ;;  %v20162_v18 = vpop.f32.mrf.mxu1 }
 0x2d3   :  { %25581 = vst [vmem:[#allocation277_spill] sm:$0xff] %v20162_v18  ;;  %v3684_v45 = vpop.f32.mrf.mxu0 }
 0x2d4   :  { %v20165_v59 = vadd.f32 %v19309_v22, %v3683_v16  ;;  %v20167_v48 = vpop.f32.mrf.mxu1 }
 0x2d5   :  { %25583 = vst [vmem:[#allocation279_spill] sm:$0xff] %v20167_v48  ;;  %v3685_v25 = vpop.f32.mrf.mxu0 }
 0x2d6   :  { %25582 = vst [vmem:[#allocation278_spill] sm:$0xff] %v20165_v59  ;;  %v3686_v1 = vadd.f32 %v19642_v7, %v3685_v25  ;;  %15822 = vmatprep.mubr.msk.f32.mxu1 %vm5373_vm1, %v20165_v59  ;;  %v15743_v44 = vpop.f32.mrf.mxu1 }
 0x2d7   :  { %v3687_v30 = vpop.f32.mrf.mxu0 }
 0x2d8   :  { %v20179_v22 = vadd.f32 %v19325_v11, %v3686_v1  ;;  %v20181_v16 = vpop.f32.mrf.mxu1  ;;  %v17399_v1 = vld [vmem:[%s25092_s0 + $0x7e0] ss:$12 sps:$4 sm:$0xff]  }
 0x2d9   :  { %25585 = vst [vmem:[#allocation281_spill] sm:$0xff] %v20181_v16  ;;  %v3690_v45 = vpop.f32.mrf.mxu0  ;;  %3876 = vmatmul.mubr.bf16.gmra.mxu0 %v17396_v19  ;;  %v17404_v19 = vld [vmem:[%s25092_s0 + $0x7fc] ss:$12 sps:$4 sm:$0xff]  }
 0x2da   :  { %25584 = vst [vmem:[#allocation280_spill] sm:$0xff] %v20179_v22  ;;  %v3691_v18 = vadd.f32 %v19642_v7, %v3690_v45  ;;  %15823 = vmatmul.mubr.msk.f32.gmra.mxu1 %vm5373_vm1, %v20179_v22  ;;  %3883 = vmatprep.mubr.bf16.mxu0 %v17401_v26  ;;  %v20186_v25 = vpop.f32.mrf.mxu1  ;;  %v20207_v45 = vld [vmem:[%s25095_s3 + $0xb8] sm:$0xff]  ;;  %v25624_v22 = vld [vmem:[#allocation14_spill] sm:$0xff] }
 0x2db   :  { %25586 = vst [vmem:[#allocation282_spill] sm:$0xff] %v20186_v25  ;;  %v3692_v48 = vpop.f32.mrf.mxu0  ;;  %15928 = vmatprep.subr.mxu1 %v20207_v45 }
 0x2dc   :  { %v20189_v28 = vadd.f32 %v19305_v58, %v3691_v18  ;;  %v20191_v44 = vpop.f32.mrf.mxu1 }
 0x2dd   :  { %25588 = vst [vmem:[#allocation284_spill] sm:$0xff] %v20191_v44  ;;  %v3693_v11 = vpop.f32.mrf.mxu0 }
 0x2de   :  { %25587 = vst [vmem:[#allocation283_spill] sm:$0xff] %v20189_v28  ;;  %15825 = vmatprep.mubr.msk.f32.mxu1 %vm5373_vm1, %v20189_v28  ;;  %v15747_v26 = vpop.f32.mrf.mxu1  ;;  %v13740_v28 = vld [vmem:[%s25095_s3 + $0x80] sm:$0xff] }
 0x2df   :  { %v3694_v30 = vpop.f32.mrf.mxu0 }
 0x2e0   :  { %v20201_v48 = vpop.f32.mrf.mxu1 }
 0x2e1   :  { %25589 = vst [vmem:[#allocation285_spill] sm:$0xff] %v20201_v48  ;;  %v3697_v58 = vpop.f32.mrf.mxu0  ;;  %3884 = vmatmul.mubr.bf16.gmra.mxu0 %v17399_v1  ;;  %v17402_v1 = vld [vmem:[%s25092_s0 + $0x7f8] ss:$12 sps:$4 sm:$0xff]  }
 0x2e2   :  { %v3698_v18 = vadd.f32 %v19642_v7, %v3697_v58  ;;  %3891 = vmatprep.mubr.bf16.mxu0 %v17404_v19  ;;  %v15750_v11 = vpop.f32.mrf.mxu1 }
 0x2e3   :  { %v3699_v25 = vpop.f32.mrf.mxu0 }
 0x2e4   :  { %v20211_v44 = vadd.f32 %v19333_v14, %v3698_v18  ;;  %v5345_v26 = vpop.f32.mrf.mxu1  ;;  %v17407_v25 = vld [vmem:[%s25092_s0 + $0x814] ss:$12 sps:$4 sm:$0xff]  }
 0x2e5   :  { %v3700_v30 = vpop.f32.mrf.mxu0 }
 0x2e6   :  { %25590 = vst [vmem:[#allocation286_spill] sm:$0xff] %v20211_v44  ;;  %v3701_v19 = vadd.f32 %v19642_v7, %v3700_v30  ;;  %15826 = vmatmul.mubr.msk.f32.gmra.mxu1 %vm5373_vm1, %v20211_v44  ;;  %v15751_v58 = vpop.f32.mrf.mxu1 }
 0x2e7   :  { %v3702_v11 = vpop.f32.mrf.mxu0  ;;  %v17405_v58 = vld [vmem:[%s25092_s0 + $0x810] ss:$12 sps:$4 sm:$0xff]  }
 0x2e8   :  { %v20223_v14 = vadd.f32 %v19349_v17, %v3701_v19  ;;  %v5347_v18 = vpop.f32.mrf.mxu1  ;;  %v17410_v17 = vld [vmem:[%s25092_s0 + $0x82c] ss:$12 sps:$4 sm:$0xff]   ;;  %v17408_v11 = vld [vmem:[%s25092_s0 + $0x828] ss:$12 sps:$4 sm:$0xff]  }
 0x2e9   :  { %v3705_v26 = vpop.f32.mrf.mxu0  ;;  %3892 = vmatmul.mubr.bf16.gmra.mxu0 %v17402_v1 }
 0x2ea   :  { %25591 = vst [vmem:[#allocation287_spill] sm:$0xff] %v20223_v14  ;;  %v3706_v48 = vadd.f32 %v19642_v7, %v3705_v26  ;;  %15828 = vmatprep.mubr.msk.f32.mxu1 %vm5373_vm1, %v20223_v14  ;;  %3899 = vmatprep.mubr.bf16.mxu0 %v17407_v25  ;;  %v17413_v26 = vld [vmem:[%s25092_s0 + $0x844] ss:$12 sps:$4 sm:$0xff]  }
 0x2eb   :  { %v3707_v30 = vpop.f32.mrf.mxu0 }
 0x2ec   :  { %v20229_v16 = vadd.f32 %v19329_v10, %v3706_v48 }
 0x2ed   :  { %v3708_v44 = vpop.f32.mrf.mxu0 }
 0x2ee   :  { %25592 = vst [vmem:[#allocation288_spill] sm:$0xff] %v20229_v16  ;;  %15829 = vmatmul.mubr.msk.f32.gmra.mxu1 %vm5373_vm1, %v20229_v16  ;;  %v25613_v16 = vld [vmem:[#allocation57_spill] sm:$0xff] }
 0x2ef   :  { %v3709_v1 = vpop.f32.mrf.mxu0 }
 0x2f1   :  { %v3712_v19 = vpop.f32.mrf.mxu0  ;;  %3900 = vmatmul.mubr.bf16.gmra.mxu0 %v17405_v58 }
 0x2f2   :  { %v3713_v25 = vadd.f32 %v19642_v7, %v3712_v19  ;;  %3907 = vmatprep.mubr.bf16.mxu0 %v17410_v17 }
 0x2f3   :  { %v3714_v10 = vpop.f32.mrf.mxu0 }
 0x2f4   :  { %v20241_v44 = vadd.f32 %v19357_v3, %v3713_v25  ;;  %v17411_v10 = vld [vmem:[%s25092_s0 + $0x840] ss:$12 sps:$4 sm:$0xff]  }
 0x2f5   :  { %v3715_v48 = vpop.f32.mrf.mxu0 }
 0x2f6   :  { %25593 = vst [vmem:[#allocation289_spill] sm:$0xff] %v20241_v44  ;;  %v3716_v18 = vadd.f32 %v19642_v7, %v3715_v48  ;;  %15831 = vmatprep.mubr.msk.f32.mxu1 %vm5373_vm1, %v20241_v44 }
 0x2f7   :  { %v3717_v30 = vpop.f32.mrf.mxu0 }
 0x2f8   :  { %v20253_v58 = vadd.f32 %v19373_v12, %v3716_v18  ;;  %v17416_v12 = vld [vmem:[%s25092_s0 + $0x85c] ss:$12 sps:$4 sm:$0xff]  }
 0x2f9   :  { %v3720_v3 = vpop.f32.mrf.mxu0  ;;  %3908 = vmatmul.mubr.bf16.gmra.mxu0 %v17408_v11 }
 0x2fa   :  { %25594 = vst [vmem:[#allocation290_spill] sm:$0xff] %v20253_v58  ;;  %v3721_v17 = vadd.f32 %v19642_v7, %v3720_v3  ;;  %15832 = vmatmul.mubr.msk.f32.gmra.mxu1 %vm5373_vm1, %v20253_v58  ;;  %3915 = vmatprep.mubr.bf16.mxu0 %v17413_v26  ;;  %v17414_v3 = vld [vmem:[%s25092_s0 + $0x858] ss:$12 sps:$4 sm:$0xff]  }
 0x2fb   :  { %v3722_v1 = vpop.f32.mrf.mxu0  ;;  %v25611_v58 = vld [vmem:[#allocation8_spill] sm:$0xff] }
 0x2fc   :  { %v20259_v19 = vadd.f32 %v19353_v8, %v3721_v17  ;;  %v17419_v1 = vld [vmem:[%s25092_s0 + $0x874] ss:$12 sps:$4 sm:$0xff]  }
 0x2fd   :  { %v3723_v25 = vpop.f32.mrf.mxu0 }
 0x2fe   :  { %25595 = vst [vmem:[#allocation291_spill] sm:$0xff] %v20259_v19  ;;  %15834 = vmatprep.mubr.msk.f32.mxu1 %vm5373_vm1, %v20259_v19  ;;  %v13743_v19 = vld [vmem:[%s25095_s3 + $0x98] sm:$0xff] }
 0x2ff   :  { %v3724_v48 = vpop.f32.mrf.mxu0 }
 0x301   :  { %v3727_v11 = vpop.f32.mrf.mxu0  ;;  %3916 = vmatmul.mubr.bf16.gmra.mxu0 %v17411_v10 }
 0x302   :  { %v3728_v18 = vadd.f32 %v19642_v7, %v3727_v11  ;;  %3923 = vmatprep.mubr.bf16.mxu0 %v17416_v12 }
 0x303   :  { %v3729_v8 = vpop.f32.mrf.mxu0 }
 0x304   :  { %v20271_v26 = vadd.f32 %v19381_v46, %v3728_v18  ;;  %v17417_v8 = vld [vmem:[%s25092_s0 + $0x870] ss:$12 sps:$4 sm:$0xff]  }
 0x305   :  { %v3730_v30 = vpop.f32.mrf.mxu0 }
 0x306   :  { %25596 = vst [vmem:[#allocation292_spill] sm:$0xff] %v20271_v26  ;;  %v3731_v17 = vadd.f32 %v19642_v7, %v3730_v30  ;;  %15835 = vmatmul.mubr.msk.f32.gmra.mxu1 %vm5373_vm1, %v20271_v26  ;;  %v25599_v30 = vld [vmem:[#allocation28_spill] sm:$0xff] }
 0x307   :  { %v3732_v25 = vpop.f32.mrf.mxu0 }
 0x308   :  { %v20283_v10 = vadd.f32 %v19397_v23, %v3731_v17  ;;  %v17422_v23 = vld [vmem:[%s25092_s0 + $0x88c] ss:$12 sps:$4 sm:$0xff]  }
 0x309   :  { %v3735_v46 = vpop.f32.mrf.mxu0  ;;  %3924 = vmatmul.mubr.bf16.gmra.mxu0 %v17414_v3  ;;  %v25601_v17 = vld [vmem:[#allocation31_spill] sm:$0xff]  ;;  %v25602_v25 = vld [vmem:[#allocation34_spill] sm:$0xff] }
 0x30a   :  { %25597 = vst [vmem:[#allocation293_spill] sm:$0xff] %v20283_v10  ;;  %v3736_v12 = vadd.f32 %v19642_v7, %v3735_v46  ;;  %15837 = vmatprep.mubr.msk.f32.mxu1 %vm5373_vm1, %v20283_v10  ;;  %3931 = vmatprep.mubr.bf16.mxu0 %v17419_v1  ;;  %v13745_v46 = vld [vmem:[%s25095_s3 + $0xa8] sm:$0xff]  ;;  %v25607_v10 = vld [vmem:[#allocation43_spill] sm:$0xff] }
 0x30b   :  { %v3737_v48 = vpop.f32.mrf.mxu0 }
 0x30c   :  { %v20289_v11 = vadd.f32 %v19377_v2, %v3736_v12  ;;  %v13746_v2 = vld [vmem:[%s25095_s3 + $0xb0] sm:$0xff]  ;;  %v20317_v12 = vld [vmem:[%s25094_s2] ss:$0 sm:$0xff]  ;;  %v25603_v48 = vld [vmem:[#allocation45_spill] sm:$0xff] }
 0x30d   :  { %v3738_v18 = vpop.f32.mrf.mxu0  ;;  %v3314_v63 = vadd.f32 %v20317_v12, %v25640_v38  ;;  %v25647_v38 = vld [vmem:[#allocation91_spill] sm:$0xff]  ;;  %v3335_v21 = vadd.f32 %v20317_v12, %v25654_v9  ;;  %v25661_v9 = vld [vmem:[#allocation96_spill] sm:$0xff]  ;;  %v3359_v24 = vadd.f32 %v20317_v12, %v25668_v50  ;;  %v25675_v50 = vld [vmem:[#allocation101_spill] sm:$0xff]  ;;  %v3378_v62 = vadd.f32 %v20317_v12, %v25683_v42 }
 0x30e   :  { %25598 = vst [vmem:[#allocation294_spill] sm:$0xff] %v20289_v11  ;;  %15838 = vmatmul.mubr.msk.f32.gmra.mxu1 %vm5373_vm1, %v20289_v11  ;;  %v3255_v18 = vadd.f32 %v20317_v12, %v25603_v48  ;;  %v25606_v11 = vld [vmem:[#allocation40_spill] sm:$0xff]  ;;  %v17425_v48 = vld [vmem:[%s25092_s0 + $0x8a4] ss:$12 sps:$4 sm:$0xff]   ;;  %v3399_v20 = vadd.f32 %v20317_v12, %v25699_v43  ;;  %v3423_v39 = vadd.f32 %v20317_v12, %v25715_v56 }
 0x30f   :  { %v3739_v7 = vpop.f32.mrf.mxu0  ;;  %15856 = vmatprep.mubr.msk.f32.mxu1 %vm5373_vm1, %v25599_v30  ;;  %v25705_v43 = vld [vmem:[#allocation46_spill] sm:$0xff]  ;;  %v25721_v56 = vld [vmem:[#allocation59_spill] sm:$0xff] }
 0x311   :  { %v20301_v3 = vpop.f32.mrf.mxu0  ;;  %3932 = vmatmul.mubr.bf16.gmra.mxu0 %v17417_v8  ;;  %v25604_v8 = vld [vmem:[#allocation51_spill] sm:$0xff] }
 0x312   :  { %25600 = vst [vmem:[#allocation28_spill] sm:$0xff] %v20301_v3  ;;  %15857 = vmatmul.mubr.msk.f32.vlgmr.msra.gmra.mxu1 %vm5373_vm1, %v25601_v17  ;;  %3939 = vmatprep.mubr.bf16.mxu0 %v17422_v23  ;;  %v3263_v23 = vadd.f32 %v20317_v12, %v25604_v8 }
 0x313   :  { %v3744_v1 = vpop.f32.mrf.mxu0  ;;  %15859 = vmatprep.mubr.msk.f32.mxu1 %vm5373_vm1, %v25602_v25  ;;  %15929 = vmatpush3.msra.mxu1 %v20207_v45  ;;  %v17420_v45 = vld [vmem:[%s25092_s0 + $0x888] ss:$12 sps:$4 sm:$0xff]  }
 0x314   :  { %15930 = vmatprep.subr.mxu1 %v13746_v2  ;;  %v13744_v1 = vld [vmem:[%s25095_s3 + $0xa0] sm:$0xff]  ;;  %v20347_v44 = vadd.f32 %v25611_v58, %v3263_v23  ;;  %v25615_v58 = vld [vmem:[#allocation10_spill] sm:$0xff] }
 0x315   :  { %v20323_v7 = vpop.f32.mrf.mxu0  ;;  %15931 = vmatpush3.msra.mxu1 %v13746_v2  ;;  %v25610_v2 = vld [vmem:[#allocation54_spill] sm:$0xff] }
 0x316   :  { %25605 = vst [vmem:[#allocation31_spill] sm:$0xff] %v20323_v7  ;;  %15860 = vmatmul.mubr.msk.f32.gmra.mxu1 %vm5373_vm1, %v25606_v11  ;;  %15932 = vmatprep.subr.mxu1 %v13745_v46  ;;  %v25608_v7 = vld [vmem:[#allocation5_spill] sm:$0xff]  ;;  %v3266_v26 = vadd.f32 %v20317_v12, %v25610_v2  ;;  %25612 = vst [vmem:[#allocation45_spill] sm:$0xff] %v20347_v44 }
 0x317   :  { %v3747_v8 = vpop.f32.mrf.mxu0  ;;  %15862 = vmatprep.mubr.msk.f32.mxu1 %vm5373_vm1, %v25607_v10  ;;  %15933 = vmatpush3.msra.mxu1 %v13745_v46  ;;  %v20339_v3 = vadd.f32 %v25608_v7, %v3255_v18  ;;  %v13742_v46 = vld [vmem:[%s25095_s3 + $0x90] sm:$0xff] }
 0x318   :  { %15934 = vmatprep.subr.mxu1 %v13744_v1  ;;  %v3271_v8 = vadd.f32 %v20317_v12, %v25613_v16  ;;  %v20361_v23 = vadd.f32 %v25615_v58, %v3266_v26  ;;  %v25617_v16 = vld [vmem:[#allocation63_spill] sm:$0xff]  ;;  %v13741_v26 = vld [vmem:[%s25095_s3 + $0x88] sm:$0xff]  ;;  %v25621_v58 = vld [vmem:[#allocation12_spill] sm:$0xff] }
 0x319   :  { %25609 = vst [vmem:[#allocation34_spill] sm:$0xff] %v20339_v3  ;;  %v20351_v14 = vpop.f32.mrf.mxu0  ;;  %3940 = vmatmul.mubr.bf16.gmra.mxu0 %v17420_v45  ;;  %15935 = vmatpush3.msra.mxu1 %v13744_v1  ;;  %v3279_v7 = vadd.f32 %v20317_v12, %v25617_v16  ;;  %v25618_v45 = vld [vmem:[#allocation7_spill] sm:$0xff] }
 0x31a   :  { %25614 = vst [vmem:[#allocation51_spill] sm:$0xff] %v20351_v14  ;;  %15863 = vmatmul.mubr.msk.f32.gmra.mxu1 %vm5373_vm1, %v20339_v3  ;;  %3947 = vmatprep.mubr.bf16.mxu0 %v17425_v48  ;;  %25616 = vst [vmem:[#allocation5_spill] sm:$0xff] %v20361_v23  ;;  %v20366_v1 = vadd.f32 %v25618_v45, %v3271_v8  ;;  %v25620_v48 = vld [vmem:[#allocation66_spill] sm:$0xff]  ;;  %v25623_v45 = vld [vmem:[#allocation69_spill] sm:$0xff] }
 0x31b   :  { %v3752_v18 = vpop.f32.mrf.mxu0  ;;  %15865 = vmatprep.mubr.msk.f32.mxu1 %vm5373_vm1, %v20347_v44  ;;  %15936 = vmatprep.subr.mxu1 %v13743_v19  ;;  %v3282_v2 = vadd.f32 %v20317_v12, %v25620_v48  ;;  %v20387_v16 = vadd.f32 %v25621_v58, %v3279_v7  ;;  %v3287_v48 = vadd.f32 %v20317_v12, %v25623_v45  ;;  %v25628_v7 = vld [vmem:[#allocation11_spill] sm:$0xff]  ;;  %v25631_v45 = vld [vmem:[#allocation16_spill] sm:$0xff] }
 0x31c   :  { %15937 = vmatpush3.msra.mxu1 %v13743_v19  ;;  %25619 = vst [vmem:[#allocation54_spill] sm:$0xff] %v20366_v1  ;;  %v17423_v18 = vld [vmem:[%s25092_s0 + $0x8a0] ss:$12 sps:$4 sm:$0xff]   ;;  %v17428_v19 = vld [vmem:[%s25092_s0 + $0x8bc] ss:$12 sps:$4 sm:$0xff]  }
 0x31d   :  { %v3753_v14 = vpop.f32.mrf.mxu0  ;;  %15938 = vmatprep.subr.mxu1 %v13742_v46  ;;  %25622 = vst [vmem:[#allocation8_spill] sm:$0xff] %v20387_v16  ;;  %v20395_v59 = vadd.f32 %v25624_v22, %v3282_v2  ;;  %v20406_v58 = vadd.f32 %v25628_v7, %v3287_v48  ;;  %v25630_v22 = vld [vmem:[#allocation78_spill] sm:$0xff]  ;;  %v25637_v7 = vld [vmem:[#allocation87_spill] sm:$0xff] }
 0x31e   :  { %15866 = vmatmul.mubr.msk.f32.gmra.mxu1 %vm5373_vm1, %v20361_v23  ;;  %v14024_v14 = vld [vmem:[%s25095_s3 + $0x1e0] sm:$0xff]  ;;  %v3298_v2 = vadd.f32 %v20317_v12, %v25630_v22  ;;  %v3311_v22 = vadd.f32 %v20317_v12, %v25637_v7 }
 0x31f   :  { %v3754_v8 = vpop.f32.mrf.mxu0  ;;  %15868 = vmatprep.mubr.msk.f32.mxu1 %vm5373_vm1, %v20366_v1  ;;  %15939 = vmatpush3.msra.mxu1 %v13742_v46  ;;  %25625 = vst [vmem:[#allocation57_spill] sm:$0xff] %v20395_v59  ;;  %25629 = vst [vmem:[#allocation63_spill] sm:$0xff] %v20406_v58  ;;  %v25644_v7 = vld [vmem:[#allocation89_spill] sm:$0xff] }
 0x320   :  { %15940 = vmatprep.subr.mxu1 %v13741_v26  ;;  %16374 = vmatprep.subr.mxu0 %v14024_v14  ;;  %v25626_v8 = vld [vmem:[#allocation75_spill] sm:$0xff] }
 0x321   :  { %v3295_v61 = vadd.f32 %v20317_v12, %v25626_v8  ;;  %v20399_v27 = vpop.f32.mrf.mxu0  ;;  %3948 = vmatmul.mubr.bf16.gmra.mxu0 %v17423_v18  ;;  %15941 = vmatpush3.msra.mxu1 %v13741_v26  ;;  %v25633_v26 = vld [vmem:[#allocation81_spill] sm:$0xff] }
 0x322   :  { %25627 = vst [vmem:[#allocation10_spill] sm:$0xff] %v20399_v27  ;;  %15869 = vmatmul.mubr.msk.f32.gmra.mxu1 %vm5373_vm1, %v20387_v16  ;;  %3955 = vmatprep.mubr.bf16.mxu0 %v17428_v19  ;;  %v3303_v8 = vadd.f32 %v20317_v12, %v25633_v26 }
 0x323   :  { %v3759_v46 = vpop.f32.mrf.mxu0  ;;  %15871 = vmatprep.mubr.msk.f32.mxu1 %vm5373_vm1, %v20395_v59  ;;  %15942 = vmatprep.subr.mxu1 %v13740_v28  ;;  %v20411_v18 = vadd.f32 %v25631_v45, %v3295_v61  ;;  %v25635_v61 = vld [vmem:[#allocation18_spill] sm:$0xff]  ;;  %v25638_v45 = vld [vmem:[#allocation15_spill] sm:$0xff] }
 0x324   :  { %15943 = vmatpush3.msra.mxu1 %v13740_v28  ;;  %16375 = vmatpush3.msra.mxu0 %v14024_v14  ;;  %v17426_v46 = vld [vmem:[%s25092_s0 + $0x8b8] ss:$12 sps:$4 sm:$0xff]   ;;  %v17431_v28 = vld [vmem:[%s25092_s0 + $0x8d4] ss:$12 sps:$4 sm:$0xff]   ;;  %v20428_v48 = vadd.f32 %v25635_v61, %v3298_v2  ;;  %v20433_v26 = vadd.f32 %v25638_v45, %v3303_v8  ;;  %v3319_v8 = vadd.f32 %v20317_v12, %v25644_v7  ;;  %v25645_v45 = vld [vmem:[#allocation22_spill] sm:$0xff] }
 0x325   :  { %25632 = vst [vmem:[#allocation7_spill] sm:$0xff] %v20411_v18  ;;  %v20415_v19 = vpop.f32.mrf.mxu0  ;;  %v25642_v2 = vld [vmem:[#allocation20_spill] sm:$0xff]  ;;  %v20449_v35 = vadd.f32 %v25645_v45, %v3314_v63  ;;  %v25649_v63 = vld [vmem:[#allocation19_spill] sm:$0xff] }
 0x326   :  { %25634 = vst [vmem:[#allocation66_spill] sm:$0xff] %v20415_v19  ;;  %15872 = vmatmul.mubr.msk.f32.gmra.mxu1 %vm5373_vm1, %v20406_v58  ;;  %25636 = vst [vmem:[#allocation12_spill] sm:$0xff] %v20428_v48  ;;  %v20444_v61 = vadd.f32 %v25642_v2, %v3311_v22  ;;  %v17434_v22 = vld [vmem:[%s25092_s0 + $0x8ec] ss:$12 sps:$4 sm:$0xff]   ;;  %v20466_v2 = vadd.f32 %v25649_v63, %v3319_v8 }
 0x327   :  { %v3762_v14 = vpop.f32.mrf.mxu0  ;;  %15874 = vmatprep.mubr.msk.f32.mxu1 %vm5373_vm1, %v20411_v18  ;;  %25639 = vst [vmem:[#allocation69_spill] sm:$0xff] %v20433_v26  ;;  %25646 = vst [vmem:[#allocation11_spill] sm:$0xff] %v20449_v35  ;;  %v25651_v7 = vld [vmem:[#allocation92_spill] sm:$0xff]  ;;  %v25656_v8 = vld [vmem:[#allocation26_spill] sm:$0xff] }
 0x328   :  { %25643 = vst [vmem:[#allocation75_spill] sm:$0xff] %v20444_v61  ;;  %25650 = vst [vmem:[#allocation16_spill] sm:$0xff] %v20466_v2  ;;  %v3330_v45 = vadd.f32 %v20317_v12, %v25651_v7  ;;  %v25658_v7 = vld [vmem:[#allocation95_spill] sm:$0xff]  ;;  %v25774_v19 = vld [vmem:[#allocation60_spill] sm:$0xff] }
 0x329   :  { %v20437_v32 = vpop.f32.mrf.mxu0  ;;  %3956 = vmatmul.mubr.bf16.gmra.mxu0 %v17426_v46  ;;  %v3327_v46 = vadd.f32 %v20317_v12, %v25647_v38  ;;  %v25652_v38 = vld [vmem:[#allocation24_spill] sm:$0xff] }
 0x32a   :  { %25641 = vst [vmem:[#allocation14_spill] sm:$0xff] %v20437_v32  ;;  %15875 = vmatmul.mubr.msk.f32.gmra.mxu1 %vm5373_vm1, %v20428_v48  ;;  %3963 = vmatprep.mubr.bf16.mxu0 %v17431_v28  ;;  %v17429_v28 = vld [vmem:[%s25092_s0 + $0x8d0] ss:$12 sps:$4 sm:$0xff]   ;;  %v20482_v63 = vadd.f32 %v25656_v8, %v3330_v45 }
 0x32b   :  { %v3767_v14 = vpop.f32.mrf.mxu0  ;;  %15877 = vmatprep.mubr.msk.f32.mxu1 %vm5373_vm1, %v20433_v26  ;;  %v17437_v45 = vld [vmem:[%s25092_s0 + $0x904] ss:$12 sps:$4 sm:$0xff]  }
 0x32c   :  { %25657 = vst [vmem:[#allocation87_spill] sm:$0xff] %v20482_v63 }
 0x32d   :  { %v20453_v36 = vpop.f32.mrf.mxu0 }
 0x32e   :  { %25648 = vst [vmem:[#allocation78_spill] sm:$0xff] %v20453_v36  ;;  %15878 = vmatmul.mubr.msk.f32.gmra.mxu1 %vm5373_vm1, %v20444_v61  ;;  %v20471_v36 = vadd.f32 %v25652_v38, %v3327_v46  ;;  %v3343_v46 = vadd.f32 %v20317_v12, %v25658_v7  ;;  %v25659_v38 = vld [vmem:[#allocation23_spill] sm:$0xff]  ;;  %v25665_v7 = vld [vmem:[#allocation97_spill] sm:$0xff] }
 0x32f   :  { %v3770_v14 = vpop.f32.mrf.mxu0  ;;  %15880 = vmatprep.mubr.msk.f32.mxu1 %vm5373_vm1, %v20449_v35  ;;  %v20487_v41 = vadd.f32 %v25659_v38, %v3335_v21  ;;  %v25663_v21 = vld [vmem:[#allocation29_spill] sm:$0xff]  ;;  %v3351_v38 = vadd.f32 %v20317_v12, %v25665_v7  ;;  %v25672_v7 = vld [vmem:[#allocation100_spill] sm:$0xff] }
 0x330   :  { %25653 = vst [vmem:[#allocation81_spill] sm:$0xff] %v20471_v36  ;;  %v20504_v8 = vadd.f32 %v25663_v21, %v3343_v46  ;;  %v25670_v46 = vld [vmem:[#allocation27_spill] sm:$0xff] }
 0x331   :  { %v20475_v60 = vpop.f32.mrf.mxu0  ;;  %3964 = vmatmul.mubr.bf16.gmra.mxu0 %v17429_v28  ;;  %25660 = vst [vmem:[#allocation15_spill] sm:$0xff] %v20487_v41  ;;  %v3346_v28 = vadd.f32 %v20317_v12, %v25661_v9  ;;  %v25666_v9 = vld [vmem:[#allocation32_spill] sm:$0xff]  ;;  %v20520_v21 = vadd.f32 %v25670_v46, %v3351_v38 }
 0x332   :  { %25655 = vst [vmem:[#allocation18_spill] sm:$0xff] %v20475_v60  ;;  %15881 = vmatmul.mubr.msk.f32.gmra.mxu1 %vm5373_vm1, %v20466_v2  ;;  %3971 = vmatprep.mubr.bf16.mxu0 %v17434_v22  ;;  %v17432_v22 = vld [vmem:[%s25092_s0 + $0x8e8] ss:$12 sps:$4 sm:$0xff]   ;;  %25664 = vst [vmem:[#allocation20_spill] sm:$0xff] %v20504_v8  ;;  %v6286_v60 = vrot.slane %v25601_v17, 1 }
 0x333   :  { %v3775_v14 = vpop.f32.mrf.mxu0  ;;  %15883 = vmatprep.mubr.msk.f32.mxu1 %vm5373_vm1, %v20471_v36  ;;  %v20509_v37 = vadd.f32 %v25666_v9, %v3346_v28  ;;  %25671 = vst [vmem:[#allocation91_spill] sm:$0xff] %v20520_v21  ;;  %v3362_v28 = vadd.f32 %v20317_v12, %v25672_v7  ;;  %v25673_v9 = vld [vmem:[#allocation35_spill] sm:$0xff]  ;;  %v17440_v38 = vld [vmem:[%s25092_s0 + $0x91c] ss:$12 sps:$4 sm:$0xff]  }
 0x334   :  { %v20525_v52 = vadd.f32 %v25673_v9, %v3359_v24  ;;  %v25677_v24 = vld [vmem:[#allocation38_spill] sm:$0xff]  ;;  %v25679_v7 = vld [vmem:[#allocation103_spill] sm:$0xff] }
 0x335   :  { %v20491_v47 = vpop.f32.mrf.mxu0  ;;  %25667 = vst [vmem:[#allocation89_spill] sm:$0xff] %v20509_v37  ;;  %v20542_v46 = vadd.f32 %v25677_v24, %v3362_v28  ;;  %v3375_v9 = vadd.f32 %v20317_v12, %v25679_v7  ;;  %v20560_v28 = vld [vmem:[%s25095_s3 + $0xf8] sm:$0xff] }
 0x336   :  { %25662 = vst [vmem:[#allocation88_spill] sm:$0xff] %v20491_v47  ;;  %15884 = vmatmul.mubr.msk.f32.gmra.mxu1 %vm5373_vm1, %v20482_v63  ;;  %25674 = vst [vmem:[#allocation19_spill] sm:$0xff] %v20525_v52  ;;  %16016 = vmatprep.subr.mxu1 %v20560_v28 }
 0x337   :  { %v3778_v14 = vpop.f32.mrf.mxu0  ;;  %15886 = vmatprep.mubr.msk.f32.mxu1 %vm5373_vm1, %v20487_v41  ;;  %25678 = vst [vmem:[#allocation24_spill] sm:$0xff] %v20542_v46 }
 0x339   :  { %v20513_v6 = vpop.f32.mrf.mxu0  ;;  %3972 = vmatmul.mubr.bf16.gmra.mxu0 %v17432_v22  ;;  %v3367_v22 = vadd.f32 %v20317_v12, %v25675_v50  ;;  %v20546_v50 = vpop.f32.mrf.mxu1 }
 0x33a   :  { %25669 = vst [vmem:[#allocation22_spill] sm:$0xff] %v20513_v6  ;;  %15887 = vmatmul.mubr.msk.f32.gmra.mxu1 %vm5373_vm1, %v20504_v8  ;;  %3979 = vmatprep.mubr.bf16.mxu0 %v17437_v45  ;;  %v17435_v45 = vld [vmem:[%s25092_s0 + $0x900] ss:$12 sps:$4 sm:$0xff]   ;;  %25680 = vst [vmem:[#allocation93_spill] sm:$0xff] %v20546_v50  ;;  %v25691_v50 = vld [vmem:[#allocation107_spill] sm:$0xff] }
 0x33b   :  { %v3783_v14 = vpop.f32.mrf.mxu0  ;;  %15889 = vmatprep.mubr.msk.f32.mxu1 %vm5373_vm1, %v20509_v37  ;;  %v20570_v24 = vpop.f32.mrf.mxu1  ;;  %v3391_v53 = vadd.f32 %v20317_v12, %v25691_v50  ;;  %v25695_v50 = vld [vmem:[#allocation108_spill] sm:$0xff] }
 0x33c   :  { %25688 = vst [vmem:[#allocation96_spill] sm:$0xff] %v20570_v24 }
 0x33d   :  { %v20529_v13 = vpop.f32.mrf.mxu0  ;;  %v20594_v24 = vpop.f32.mrf.mxu1  ;;  %v20597_v49 = vadd.f32 %v25697_v57, %v3391_v53 }
 0x33e   :  { %25676 = vst [vmem:[#allocation92_spill] sm:$0xff] %v20529_v13  ;;  %15890 = vmatmul.mubr.msk.f32.gmra.mxu1 %vm5373_vm1, %v20520_v21  ;;  %v25681_v13 = vld [vmem:[#allocation33_spill] sm:$0xff]  ;;  %25696 = vst [vmem:[#allocation99_spill] sm:$0xff] %v20594_v24  ;;  %v20615_v24 = vadd.f32 %v25705_v43, %v3399_v20 }
 0x33f   :  { %v3786_v14 = vpop.f32.mrf.mxu0  ;;  %15892 = vmatprep.mubr.msk.f32.mxu1 %vm5373_vm1, %v20525_v52  ;;  %v20549_v31 = vadd.f32 %v25681_v13, %v3367_v22  ;;  %v25685_v13 = vld [vmem:[#allocation41_spill] sm:$0xff]  ;;  %25698 = vst [vmem:[#allocation27_spill] sm:$0xff] %v20597_v49  ;;  %v20612_v53 = vpop.f32.mrf.mxu1 }
 0x340   :  { %v20566_v42 = vadd.f32 %v25685_v13, %v3375_v9  ;;  %v25687_v22 = vld [vmem:[#allocation105_spill] sm:$0xff]  ;;  %25704 = vst [vmem:[#allocation101_spill] sm:$0xff] %v20612_v53  ;;  %25706 = vst [vmem:[#allocation38_spill] sm:$0xff] %v20615_v24  ;;  %v25713_v53 = vld [vmem:[#allocation56_spill] sm:$0xff] }
 0x341   :  { %25682 = vst [vmem:[#allocation26_spill] sm:$0xff] %v20549_v31  ;;  %v20553_v29 = vpop.f32.mrf.mxu0  ;;  %3980 = vmatmul.mubr.bf16.gmra.mxu0 %v17435_v45  ;;  %v3383_v45 = vadd.f32 %v20317_v12, %v25687_v22  ;;  %v17443_v9 = vld [vmem:[%s25092_s0 + $0x934] ss:$12 sps:$4 sm:$0xff]  }
 0x342   :  { %25684 = vst [vmem:[#allocation95_spill] sm:$0xff] %v20553_v29  ;;  %15893 = vmatmul.mubr.msk.f32.gmra.mxu1 %vm5373_vm1, %v20542_v46  ;;  %3987 = vmatprep.mubr.bf16.mxu0 %v17440_v38  ;;  %25686 = vst [vmem:[#allocation23_spill] sm:$0xff] %v20566_v42  ;;  %v25689_v38 = vld [vmem:[#allocation44_spill] sm:$0xff]  ;;  %v25709_v20 = vld [vmem:[#allocation53_spill] sm:$0xff] }
 0x343   :  { %v3791_v14 = vpop.f32.mrf.mxu0  ;;  %15895 = vmatprep.mubr.msk.f32.mxu1 %vm5373_vm1, %v20549_v31  ;;  %v20573_v7 = vadd.f32 %v25689_v38, %v3378_v62  ;;  %v25693_v62 = vld [vmem:[#allocation39_spill] sm:$0xff]  ;;  %v3394_v38 = vadd.f32 %v20317_v12, %v25695_v50 }
 0x344   :  { %v20590_v22 = vadd.f32 %v25693_v62, %v3383_v45  ;;  %v25703_v50 = vld [vmem:[#allocation111_spill] sm:$0xff] }
 0x345   :  { %25690 = vst [vmem:[#allocation29_spill] sm:$0xff] %v20573_v7  ;;  %v20577_v14 = vpop.f32.mrf.mxu0  ;;  %v3407_v57 = vadd.f32 %v20317_v12, %v25703_v50  ;;  %v25711_v50 = vld [vmem:[#allocation113_spill] sm:$0xff] }
 0x346   :  { %25692 = vst [vmem:[#allocation97_spill] sm:$0xff] %v20577_v14  ;;  %15896 = vmatmul.mubr.msk.f32.gmra.mxu1 %vm5373_vm1, %v20566_v42  ;;  %25694 = vst [vmem:[#allocation32_spill] sm:$0xff] %v20590_v22  ;;  %v3415_v43 = vadd.f32 %v20317_v12, %v25711_v50  ;;  %v25719_v50 = vld [vmem:[#allocation116_spill] sm:$0xff] }
 0x347   :  { %v3794_v13 = vpop.f32.mrf.mxu0  ;;  %15898 = vmatprep.mubr.msk.f32.mxu1 %vm5373_vm1, %v20573_v7  ;;  %v25748_v14 = vld [vmem:[#allocation136_spill] sm:$0xff] }
 0x348   :  { %v25701_v13 = vld [vmem:[#allocation50_spill] sm:$0xff]  ;;  %v3463_v4 = vadd.f32 %v20317_v12, %v25748_v14 }
 0x349   :  { %v20601_v55 = vpop.f32.mrf.mxu0  ;;  %3988 = vmatmul.mubr.bf16.gmra.mxu0 %v17438_v33  ;;  %v20608_v62 = vadd.f32 %v25701_v13, %v3394_v38  ;;  %v25707_v33 = vld [vmem:[#allocation112_spill] sm:$0xff]  ;;  %v20632_v13 = vadd.f32 %v25709_v20, %v3407_v57  ;;  %v25754_v14 = vld [vmem:[#allocation70_spill] sm:$0xff] }
 0x34a   :  { %25700 = vst [vmem:[#allocation100_spill] sm:$0xff] %v20601_v55  ;;  %15899 = vmatmul.mubr.msk.f32.gmra.mxu1 %vm5373_vm1, %v20590_v22  ;;  %3995 = vmatprep.mubr.bf16.mxu0 %v17443_v9  ;;  %v3410_v54 = vadd.f32 %v20317_v12, %v25707_v33  ;;  %v17441_v9 = vld [vmem:[%s25092_s0 + $0x930] ss:$12 sps:$4 sm:$0xff]   ;;  %v17446_v38 = vld [vmem:[%s25092_s0 + $0x94c] ss:$12 sps:$4 sm:$0xff]   ;;  %v20636_v33 = vpop.f32.mrf.mxu1 }
 0x34b   :  { %v3799_v45 = vpop.f32.mrf.mxu0  ;;  %15901 = vmatprep.mubr.msk.f32.mxu1 %vm5373_vm1, %v20597_v49  ;;  %25702 = vst [vmem:[#allocation35_spill] sm:$0xff] %v20608_v62  ;;  %25710 = vst [vmem:[#allocation33_spill] sm:$0xff] %v20632_v13 }
 0x34c   :  { %25712 = vst [vmem:[#allocation104_spill] sm:$0xff] %v20636_v33  ;;  %v20657_v33 = vadd.f32 %v25721_v56, %v3423_v39  ;;  %v25728_v56 = vld [vmem:[#allocation119_spill] sm:$0xff] }
 0x34d   :  { %v20619_v51 = vpop.f32.mrf.mxu0 }
 0x34e   :  { %25708 = vst [vmem:[#allocation103_spill] sm:$0xff] %v20619_v51  ;;  %15902 = vmatmul.mubr.msk.f32.gmra.mxu1 %vm5373_vm1, %v20608_v62  ;;  %v20639_v51 = vadd.f32 %v25713_v53, %v3410_v54  ;;  %v3426_v54 = vadd.f32 %v20317_v12, %v25719_v50  ;;  %v20654_v53 = vpop.f32.mrf.mxu1  ;;  %25722 = vst [vmem:[#allocation39_spill] sm:$0xff] %v20657_v33 }
 0x34f   :  { %v3802_v45 = vpop.f32.mrf.mxu0  ;;  %15904 = vmatprep.mubr.msk.f32.mxu1 %vm5373_vm1, %v20615_v24  ;;  %25720 = vst [vmem:[#allocation107_spill] sm:$0xff] %v20654_v53  ;;  %v25729_v53 = vld [vmem:[#allocation58_spill] sm:$0xff] }
 0x350   :  { %25714 = vst [vmem:[#allocation41_spill] sm:$0xff] %v20639_v51  ;;  %v25717_v45 = vld [vmem:[#allocation52_spill] sm:$0xff] }
 0x351   :  { %v20643_v34 = vpop.f32.mrf.mxu0  ;;  %3996 = vmatmul.mubr.bf16.gmra.mxu0 %v17441_v9  ;;  %v20650_v20 = vadd.f32 %v25717_v45, %v3415_v43  ;;  %v25723_v9 = vld [vmem:[#allocation117_spill] sm:$0xff]  ;;  %v25726_v45 = vld [vmem:[#allocation62_spill] sm:$0xff] }
 0x352   :  { %25716 = vst [vmem:[#allocation105_spill] sm:$0xff] %v20643_v34  ;;  %15905 = vmatmul.mubr.msk.f32.gmra.mxu1 %vm5373_vm1, %v20632_v13  ;;  %4003 = vmatprep.mubr.bf16.mxu0 %v17446_v38  ;;  %v3431_v0 = vadd.f32 %v20317_v12, %v25723_v9  ;;  %v17444_v38 = vld [vmem:[%s25092_s0 + $0x948] ss:$12 sps:$4 sm:$0xff]   ;;  %v17449_v43 = vld [vmem:[%s25092_s0 + $0x964] ss:$12 sps:$4 sm:$0xff]   ;;  %v20676_v50 = vadd.f32 %v25726_v45, %v3426_v54 }
 0x353   :  { %v3807_v57 = vpop.f32.mrf.mxu0  ;;  %15907 = vmatprep.mubr.msk.f32.mxu1 %vm5373_vm1, %v20639_v51  ;;  %25718 = vst [vmem:[#allocation44_spill] sm:$0xff] %v20650_v20  ;;  %v3439_v9 = vadd.f32 %v20317_v12, %v25728_v56  ;;  %v25738_v56 = vld [vmem:[#allocation68_spill] sm:$0xff] }
 0x354   :  { %v20666_v57 = vpop.f32.mrf.mxu1  ;;  %25727 = vst [vmem:[#allocation109_spill] sm:$0xff] %v20676_v50 }
 0x355   :  { %v20661_v40 = vpop.f32.mrf.mxu0  ;;  %25725 = vst [vmem:[#allocation47_spill] sm:$0xff] %v20666_v57  ;;  %v25731_v57 = vld [vmem:[#allocation122_spill] sm:$0xff] }
 0x356   :  { %25724 = vst [vmem:[#allocation108_spill] sm:$0xff] %v20661_v40  ;;  %15908 = vmatmul.mubr.msk.f32.gmra.mxu1 %vm5373_vm1, %v20650_v20  ;;  %v20681_v40 = vadd.f32 %v25729_v53, %v3431_v0  ;;  %v3442_v5 = vadd.f32 %v20317_v12, %v25731_v57  ;;  %v20687_v55 = vpop.f32.mrf.mxu1  ;;  %v25736_v0 = vld [vmem:[#allocation124_spill] sm:$0xff] }
 0x357   :  { %v3810_v39 = vpop.f32.mrf.mxu0  ;;  %15910 = vmatprep.mubr.msk.f32.mxu1 %vm5373_vm1, %v20657_v33  ;;  %25733 = vst [vmem:[#allocation46_spill] sm:$0xff] %v20687_v55  ;;  %v3447_v53 = vadd.f32 %v20317_v12, %v25736_v0  ;;  %v25740_v55 = vld [vmem:[#allocation130_spill] sm:$0xff] }
 0x358   :  { %25730 = vst [vmem:[#allocation50_spill] sm:$0xff] %v20681_v40  ;;  %v25734_v39 = vld [vmem:[#allocation65_spill] sm:$0xff]  ;;  %v20698_v57 = vpop.f32.mrf.mxu1 }
 0x359   :  { %v20685_v34 = vpop.f32.mrf.mxu0  ;;  %4004 = vmatmul.mubr.bf16.gmra.mxu0 %v17444_v38  ;;  %v20694_v45 = vadd.f32 %v25734_v39, %v3439_v9  ;;  %25737 = vst [vmem:[#allocation53_spill] sm:$0xff] %v20698_v57  ;;  %v20701_v38 = vadd.f32 %v25738_v56, %v3442_v5  ;;  %v17452_v9 = vld [vmem:[%s25092_s0 + $0x97c] ss:$12 sps:$4 sm:$0xff]  }
 0x35a   :  { %25732 = vst [vmem:[#allocation111_spill] sm:$0xff] %v20685_v34  ;;  %15911 = vmatmul.mubr.msk.f32.gmra.mxu1 %vm5373_vm1, %v20676_v50  ;;  %4011 = vmatprep.mubr.bf16.mxu0 %v17449_v43  ;;  %v3455_v34 = vadd.f32 %v20317_v12, %v25740_v55  ;;  %v17447_v43 = vld [vmem:[%s25092_s0 + $0x960] ss:$12 sps:$4 sm:$0xff]   ;;  %v20722_v56 = vpop.f32.mrf.mxu1 }
 0x35b   :  { %v3815_v54 = vpop.f32.mrf.mxu0  ;;  %15913 = vmatprep.mubr.msk.f32.mxu1 %vm5373_vm1, %v20681_v40  ;;  %25735 = vst [vmem:[#allocation112_spill] sm:$0xff] %v20694_v45  ;;  %25739 = vst [vmem:[#allocation113_spill] sm:$0xff] %v20701_v38  ;;  %v25742_v5 = vld [vmem:[#allocation64_spill] sm:$0xff]  ;;  %v25744_v55 = vld [vmem:[#allocation133_spill] sm:$0xff] }
 0x35c   :  { %v20718_v39 = vadd.f32 %v25742_v5, %v3447_v53  ;;  %v3458_v0 = vadd.f32 %v20317_v12, %v25744_v55  ;;  %25745 = vst [vmem:[#allocation52_spill] sm:$0xff] %v20722_v56  ;;  %v25751_v5 = vld [vmem:[#allocation74_spill] sm:$0xff]  ;;  %v20743_v56 = vadd.f32 %v25754_v14, %v3463_v4  ;;  %v25761_v14 = vld [vmem:[#allocation148_spill] sm:$0xff] }
 0x35d   :  { %v20705_v15 = vpop.f32.mrf.mxu0 }
 0x35e   :  { %25741 = vst [vmem:[#allocation56_spill] sm:$0xff] %v20705_v15  ;;  %15914 = vmatmul.mubr.msk.f32.gmra.mxu1 %vm5373_vm1, %v20694_v45  ;;  %25743 = vst [vmem:[#allocation115_spill] sm:$0xff] %v20718_v39  ;;  %v25746_v15 = vld [vmem:[#allocation71_spill] sm:$0xff]  ;;  %v20738_v55 = vadd.f32 %v25751_v5, %v3458_v0  ;;  %v25759_v5 = vld [vmem:[#allocation77_spill] sm:$0xff] }
 0x35f   :  { %v3818_v54 = vpop.f32.mrf.mxu0  ;;  %15916 = vmatprep.mubr.msk.f32.mxu1 %vm5373_vm1, %v20701_v38  ;;  %v20725_v57 = vadd.f32 %v25746_v15, %v3455_v34  ;;  %v25753_v15 = vld [vmem:[#allocation142_spill] sm:$0xff]  ;;  %25755 = vst [vmem:[#allocation119_spill] sm:$0xff] %v20743_v56  ;;  %v17455_v0 = vld [vmem:[%s25092_s0 + $0x994] ss:$12 sps:$4 sm:$0xff]  }
 0x360   :  { %v20731_v54 = vpop.f32.mrf.mxu1  ;;  %25752 = vst [vmem:[#allocation62_spill] sm:$0xff] %v20738_v55  ;;  %v3471_v34 = vadd.f32 %v20317_v12, %v25753_v15 }
 0x361   :  { %25747 = vst [vmem:[#allocation116_spill] sm:$0xff] %v20725_v57  ;;  %v20729_v29 = vpop.f32.mrf.mxu0  ;;  %4012 = vmatmul.mubr.bf16.gmra.mxu0 %v17447_v43  ;;  %25750 = vst [vmem:[#allocation117_spill] sm:$0xff] %v20731_v54  ;;  %v25756_v43 = vld [vmem:[#allocation145_spill] sm:$0xff] }
 0x362   :  { %25749 = vst [vmem:[#allocation59_spill] sm:$0xff] %v20729_v29  ;;  %15917 = vmatmul.mubr.msk.f32.gmra.mxu1 %vm5373_vm1, %v20718_v39  ;;  %4017 = vmatprep.mubr.bf16.mxu0 %v17452_v9  ;;  %v3474_v54 = vadd.f32 %v20317_v12, %v25756_v43  ;;  %v17450_v9 = vld [vmem:[%s25092_s0 + $0x978] ss:$12 sps:$4 sm:$0xff]   ;;  %v20762_v15 = vadd.f32 %v25759_v5, %v3471_v34 }
 0x363   :  { %v3823_v53 = vpop.f32.mrf.mxu0  ;;  %15919 = vmatprep.mubr.msk.f32.mxu1 %vm5373_vm1, %v20725_v57  ;;  %v3479_v43 = vadd.f32 %v20317_v12, %v25761_v14  ;;  %v25766_v5 = vld [vmem:[#allocation76_spill] sm:$0xff] }
 0x364   :  { %v20752_v53 = vpop.f32.mrf.mxu1  ;;  %25760 = vst [vmem:[#allocation65_spill] sm:$0xff] %v20762_v15 }
 0x365   :  { %v20747_v29 = vpop.f32.mrf.mxu0  ;;  %25758 = vst [vmem:[#allocation122_spill] sm:$0xff] %v20752_v53  ;;  %v25763_v53 = vld [vmem:[#allocation80_spill] sm:$0xff]  ;;  %v20780_v14 = vadd.f32 %v25766_v5, %v3479_v43 }
 0x366   :  { %25757 = vst [vmem:[#allocation58_spill] sm:$0xff] %v20747_v29  ;;  %15920 = vmatmul.mubr.msk.f32.gmra.mxu1 %vm5373_vm1, %v20738_v55  ;;  %v20766_v29 = vpop.f32.mrf.mxu1  ;;  %v20769_v6 = vadd.f32 %v25763_v53, %v3474_v54  ;;  %v25769_v53 = vld [vmem:[#allocation48_spill] sm:$0xff] }
 0x367   :  { %v3826_v4 = vpop.f32.mrf.mxu0  ;;  %15922 = vmatprep.mubr.msk.f32.mxu1 %vm5373_vm1, %v20743_v56  ;;  %25762 = vst [vmem:[#allocation124_spill] sm:$0xff] %v20766_v29  ;;  %25767 = vst [vmem:[#allocation64_spill] sm:$0xff] %v20780_v14  ;;  %v3258_v17 = vadd.f32 %v20317_v12, %v25769_v53  ;;  %v6293_v53 = vrot.slane %v25607_v10, 1 }
 0x368   :  { %25764 = vst [vmem:[#allocation68_spill] sm:$0xff] %v20769_v6  ;;  %v6285_v4 = vrot.slane %v25599_v30, 1  ;;  %v20782_v54 = vpop.f32.mrf.mxu1 }
 0x369   :  { %v20771_v47 = vpop.f32.mrf.mxu0  ;;  %4018 = vmatmul.mubr.bf16.gmra.mxu0 %v17450_v9  ;;  %25768 = vst [vmem:[#allocation133_spill] sm:$0xff] %v20782_v54  ;;  %v6288_v9 = vrot.slane %v25602_v25, 1  ;;  %v17458_v25 = vld [vmem:[%s25092_s0 + $0x9ac] ss:$12 sps:$4 sm:$0xff]  }
 0x36a   :  { %25765 = vst [vmem:[#allocation130_spill] sm:$0xff] %v20771_v47  ;;  %15923 = vmatmul.mubr.msk.f32.gmra.mxu1 %vm5373_vm1, %v20762_v15  ;;  %4023 = vmatprep.mubr.bf16.mxu0 %v17455_v0  ;;  %v17453_v0 = vld [vmem:[%s25092_s0 + $0x990] ss:$12 sps:$4 sm:$0xff]   ;;  %v20793_v32 = vpop.f32.mrf.mxu1  ;;  %v6287_v30 = vsel %vm6284_vm2, %v6285_v4, %v6286_v60 }
 0x36b   :  { %v3831_v34 = vpop.f32.mrf.mxu0  ;;  %15925 = vmatprep.mubr.msk.f32.mxu1 %vm5373_vm1, %v20769_v6  ;;  %25772 = vst [vmem:[#allocation136_spill] sm:$0xff] %v20793_v32  ;;  %v6289_v5 = vsel %vm6284_vm2, %v6286_v60, %v6288_v9  ;;  %v25773_v54 = vld [vmem:[#allocation6_spill] sm:$0xff]  ;;  %v6295_v32 = vrot.slane %v20339_v3, 1 }
 0x36c   :  { %v25771_v34 = vld [vmem:[#allocation37_spill] sm:$0xff]  ;;  %v13802_v4 = vld [vmem:[%s25095_s3 + $0xf0] sm:$0xff]  ;;  %v20813_v27 = vpop.f32.mrf.mxu1 }
 0x36d   :  { %v20787_v29 = vpop.f32.mrf.mxu0  ;;  %v6290_v47 = vrot.slane %v25771_v34, 1  ;;  %v4338_v34 = vadd.f32 %v25773_v54, %v3258_v17  ;;  %25775 = vst [vmem:[#allocation74_spill] sm:$0xff] %v20813_v27  ;;  %v6292_v54 = vrot.slane %v25606_v11, 1  ;;  %v25892_v11 = vld [vmem:[#allocation138_spill] sm:$0xff] }
 0x36e   :  { %25770 = vst [vmem:[#allocation71_spill] sm:$0xff] %v20787_v29  ;;  %15926 = vmatmul.mubr.msk.f32.gmra.mxu1 %vm5373_vm1, %v20780_v14 }
 0x36f   :  { %v3834_v43 = vpop.f32.mrf.mxu0  ;;  %15944 = vmatprep.mubr.msk.f32.mxu1 %vm5373_vm1, %v6287_v30  ;;  %v6291_v60 = vsel %vm6284_vm2, %v6288_v9, %v6290_v47  ;;  %v20823_v30 = vpop.f32.mrf.mxu1  ;;  %v20828_v47 = vsel %vm6284_vm2, %v6292_v54, %v6293_v53  ;;  %v17456_v9 = vld [vmem:[%s25092_s0 + $0x9a8] ss:$12 sps:$4 sm:$0xff]   ;;  %v17461_v54 = vld [vmem:[%s25092_s0 + $0x9c4] ss:$12 sps:$4 sm:$0xff]  }
 0x370   :  { %v3274_v43 = vadd.f32 %v20317_v12, %v25774_v19  ;;  %v6297_v19 = vrot.slane %v4338_v34, 1  ;;  %25776 = vst [vmem:[#allocation142_spill] sm:$0xff] %v20828_v47  ;;  %v20841_v34 = vsel %vm6284_vm2, %v6293_v53, %v6295_v32  ;;  %v13799_v53 = vld [vmem:[%s25095_s3 + $0xd8] sm:$0xff] }
 0x371   :  { %v20805_v29 = vpop.f32.mrf.mxu0  ;;  %4024 = vmatmul.mubr.bf16.gmra.mxu0 %v17453_v0  ;;  %v13801_v0 = vld [vmem:[%s25095_s3 + $0xe8] sm:$0xff]  ;;  %25778 = vst [vmem:[#allocation70_spill] sm:$0xff] %v20841_v34 }
 0x372   :  { %15945 = vmatmul.mubr.msk.f32.vlgmr.msra.gmra.mxu1 %vm5373_vm1, %v6289_v5  ;;  %4031 = vmatprep.mubr.bf16.mxu0 %v17458_v25  ;;  %v6300_v25 = vrot.slane %v20361_v23, 1  ;;  %v25777_v5 = vld [vmem:[#allocation9_spill] sm:$0xff]  ;;  %v20849_v23 = vpop.f32.mrf.mxu1 }
 0x373   :  { %v3839_v17 = vpop.f32.mrf.mxu0  ;;  %15947 = vmatprep.mubr.msk.f32.mxu1 %vm5373_vm1, %v6291_v60  ;;  %16017 = vmatpush3.msra.mxu1 %v20560_v28  ;;  %v13800_v28 = vld [vmem:[%s25095_s3 + $0xe0] sm:$0xff]  ;;  %v4354_v60 = vadd.f32 %v25777_v5, %v3274_v43  ;;  %25779 = vst [vmem:[#allocation145_spill] sm:$0xff] %v20849_v23  ;;  %v6302_v43 = vrot.slane %v20366_v1, 1 }
 0x374   :  { %16018 = vmatprep.subr.mxu1 %v13802_v4  ;;  %v6299_v17 = vrot.slane %v20347_v44, 1  ;;  %v25780_v5 = vld [vmem:[#allocation72_spill] sm:$0xff] }
 0x375   :  { %v20825_v27 = vpop.f32.mrf.mxu0  ;;  %16019 = vmatpush3.msra.mxu1 %v13802_v4 }
 0x376   :  { %15948 = vmatmul.mubr.msk.f32.gmra.mxu1 %vm5373_vm1, %v20828_v47  ;;  %16020 = vmatprep.subr.mxu1 %v13801_v0  ;;  %v3290_v47 = vadd.f32 %v20317_v12, %v25780_v5  ;;  %v20867_v23 = vsel %vm6284_vm2, %v6299_v17, %v6300_v25  ;;  %v13798_v5 = vld [vmem:[%s25095_s3 + $0xd0] sm:$0xff]  ;;  %v6309_v17 = vrot.slane %v20406_v58, 1  ;;  %v25790_v58 = vld [vmem:[#allocation17_spill] sm:$0xff] }
 0x377   :  { %v3842_v4 = vpop.f32.mrf.mxu0  ;;  %15950 = vmatprep.mubr.msk.f32.mxu1 %vm5373_vm1, %v20841_v34  ;;  %16021 = vmatpush3.msra.mxu1 %v13801_v0  ;;  %v6304_v0 = vrot.slane %v4354_v60, 1  ;;  %v20862_v34 = vpop.f32.mrf.mxu1  ;;  %25782 = vst [vmem:[#allocation148_spill] sm:$0xff] %v20867_v23  ;;  %v20879_v60 = vsel %vm6284_vm2, %v6300_v25, %v6302_v43 }
 0x378   :  { %16022 = vmatprep.subr.mxu1 %v13800_v28  ;;  %v20860_v4 = vsel %vm6284_vm2, %v6295_v32, %v6297_v19  ;;  %v6307_v32 = vrot.slane %v20395_v59, 1  ;;  %v25783_v19 = vld [vmem:[#allocation13_spill] sm:$0xff]  ;;  %25785 = vst [vmem:[#allocation76_spill] sm:$0xff] %v20879_v60 }
 0x379   :  { %v20857_v3 = vpop.f32.mrf.mxu0  ;;  %4032 = vmatmul.mubr.bf16.gmra.mxu0 %v17456_v9  ;;  %25781 = vst [vmem:[#allocation77_spill] sm:$0xff] %v20860_v4  ;;  %16023 = vmatpush3.msra.mxu1 %v13800_v28  ;;  %v4370_v9 = vadd.f32 %v25783_v19, %v3290_v47  ;;  %v20890_v47 = vpop.f32.mrf.mxu1  ;;  %v20895_v25 = vsel %vm6284_vm2, %v6302_v43, %v6304_v0  ;;  %v17464_v19 = vld [vmem:[%s25092_s0 + $0x9dc] ss:$12 sps:$4 sm:$0xff]  }
 0x37a   :  { %15951 = vmatmul.mubr.msk.f32.gmra.mxu1 %vm5373_vm1, %v20860_v4  ;;  %4038 = vmatprep.mubr.bf16.mxu0 %v17461_v54  ;;  %v17459_v54 = vld [vmem:[%s25092_s0 + $0x9c0] ss:$12 sps:$4 sm:$0xff]   ;;  %25787 = vst [vmem:[#allocation48_spill] sm:$0xff] %v20890_v47  ;;  %25788 = vst [vmem:[#allocation37_spill] sm:$0xff] %v20895_v25  ;;  %v6306_v4 = vrot.slane %v20387_v16, 1 }
 0x37b   :  { %v3847_v1 = vpop.f32.mrf.mxu0  ;;  %15953 = vmatprep.mubr.msk.f32.mxu1 %vm5373_vm1, %v20867_v23  ;;  %16024 = vmatprep.subr.mxu1 %v13799_v53  ;;  %v13796_v47 = vld [vmem:[%s25095_s3 + $0xc0] sm:$0xff]  ;;  %v6311_v43 = vrot.slane %v4370_v9, 1 }
 0x37c   :  { %16025 = vmatpush3.msra.mxu1 %v13799_v53  ;;  %v13797_v1 = vld [vmem:[%s25095_s3 + $0xc8] sm:$0xff]  ;;  %v25786_v53 = vld [vmem:[#allocation84_spill] sm:$0xff] }
 0x37d   :  { %v20876_v28 = vpop.f32.mrf.mxu0  ;;  %16026 = vmatprep.subr.mxu1 %v13798_v5  ;;  %v3306_v23 = vadd.f32 %v20317_v12, %v25786_v53  ;;  %v20903_v53 = vpop.f32.mrf.mxu1 }
 0x37e   :  { %25784 = vst [vmem:[#allocation80_spill] sm:$0xff] %v20876_v28  ;;  %15954 = vmatmul.mubr.msk.f32.gmra.mxu1 %vm5373_vm1, %v20879_v60  ;;  %v20911_v60 = vsel %vm6284_vm2, %v6306_v4, %v6307_v32  ;;  %v6313_v4 = vrot.slane %v20411_v18, 1  ;;  %v25903_v28 = vld [vmem:[#allocation108_spill] sm:$0xff] }
 0x37f   :  { %v3850_v59 = vpop.f32.mrf.mxu0  ;;  %15956 = vmatprep.mubr.msk.f32.mxu1 %vm5373_vm1, %v20895_v25  ;;  %16027 = vmatpush3.msra.mxu1 %v13798_v5  ;;  %25789 = vst [vmem:[#allocation6_spill] sm:$0xff] %v20911_v60  ;;  %v4386_v25 = vadd.f32 %v25790_v58, %v3306_v23  ;;  %v20918_v5 = vsel %vm6284_vm2, %v6307_v32, %v6309_v17  ;;  %v20923_v9 = vpop.f32.mrf.mxu1  ;;  %v25793_v23 = vld [vmem:[#allocation90_spill] sm:$0xff] }
 0x380   :  { %16028 = vmatprep.subr.mxu1 %v13797_v1  ;;  %v6314_v59 = vrot.slane %v20428_v48, 1  ;;  %25791 = vst [vmem:[#allocation60_spill] sm:$0xff] %v20918_v5  ;;  %25792 = vst [vmem:[#allocation9_spill] sm:$0xff] %v20923_v9  ;;  %v3322_v58 = vadd.f32 %v20317_v12, %v25793_v23  ;;  %v20931_v32 = vsel %vm6284_vm2, %v6309_v17, %v6311_v43  ;;  %v17467_v23 = vld [vmem:[%s25092_s0 + $0x9f4] ss:$12 sps:$4 sm:$0xff]   ;;  %v6321_v17 = vrot.slane %v20449_v35, 1 }
 0x381   :  { %v20908_v0 = vpop.f32.mrf.mxu0  ;;  %4039 = vmatmul.mubr.bf16.gmra.mxu0 %v17459_v54  ;;  %16029 = vmatpush3.msra.mxu1 %v13797_v1  ;;  %v6316_v54 = vrot.slane %v20433_v26, 1  ;;  %25794 = vst [vmem:[#allocation72_spill] sm:$0xff] %v20931_v32  ;;  %v25796_v43 = vld [vmem:[#allocation21_spill] sm:$0xff]  ;;  %v25798_v26 = vld [vmem:[#allocation94_spill] sm:$0xff] }
 0x382   :  { %15957 = vmatmul.mubr.msk.f32.gmra.mxu1 %vm5373_vm1, %v20911_v60  ;;  %4046 = vmatprep.mubr.bf16.mxu0 %v17464_v19  ;;  %v6318_v19 = vrot.slane %v4386_v25, 1  ;;  %v4402_v25 = vadd.f32 %v25796_v43, %v3322_v58  ;;  %v3338_v48 = vadd.f32 %v20317_v12, %v25798_v26  ;;  %v6320_v58 = vrot.slane %v20444_v61, 1  ;;  %v17492_v35 = vld [vmem:[%s25092_s0 + $0xac8] ss:$12 sps:$4 sm:$0xff]  }
 0x383   :  { %v3855_v16 = vpop.f32.mrf.mxu0  ;;  %15959 = vmatprep.mubr.msk.f32.mxu1 %vm5373_vm1, %v20918_v5  ;;  %16030 = vmatprep.subr.mxu1 %v13796_v47  ;;  %v20936_v5 = vpop.f32.mrf.mxu1  ;;  %v25890_v61 = vld [vmem:[#allocation190_spill] sm:$0xff] }
 0x384   :  { %16031 = vmatpush3.msra.mxu1 %v13796_v47  ;;  %v17462_v16 = vld [vmem:[%s25092_s0 + $0x9d8] ss:$12 sps:$4 sm:$0xff]   ;;  %v20941_v47 = vsel %vm6284_vm2, %v6313_v4, %v6314_v59  ;;  %v6323_v4 = vrot.slane %v20466_v2, 1  ;;  %v6325_v43 = vrot.slane %v4402_v25, 1  ;;  %v20973_v26 = vsel %vm6284_vm2, %v6320_v58, %v6321_v17 }
 0x385   :  { %v20928_v1 = vpop.f32.mrf.mxu0  ;;  %25795 = vst [vmem:[#allocation13_spill] sm:$0xff] %v20941_v47  ;;  %v20958_v18 = vpop.f32.mrf.mxu1  ;;  %25802 = vst [vmem:[#allocation94_spill] sm:$0xff] %v20973_v26  ;;  %v17470_v25 = vld [vmem:[%s25092_s0 + $0xa0c] ss:$12 sps:$4 sm:$0xff]  }
 0x386   :  { %15960 = vmatmul.mubr.msk.f32.gmra.mxu1 %vm5373_vm1, %v20931_v32  ;;  %v20953_v32 = vsel %vm6284_vm2, %v6314_v59, %v6316_v54  ;;  %25799 = vst [vmem:[#allocation17_spill] sm:$0xff] %v20958_v18 }
 0x387   :  { %v3858_v9 = vpop.f32.mrf.mxu0  ;;  %15962 = vmatprep.mubr.msk.f32.mxu1 %vm5373_vm1, %v20941_v47  ;;  %25797 = vst [vmem:[#allocation84_spill] sm:$0xff] %v20953_v32  ;;  %v20968_v59 = vpop.f32.mrf.mxu1 }
 0x388   :  { %v20963_v9 = vsel %vm6284_vm2, %v6316_v54, %v6318_v19  ;;  %v17465_v54 = vld [vmem:[%s25092_s0 + $0x9f0] ss:$12 sps:$4 sm:$0xff]   ;;  %v6328_v19 = vrot.slane %v20482_v63, 1 }
 0x389   :  { %v20950_v60 = vpop.f32.mrf.mxu0  ;;  %4047 = vmatmul.mubr.bf16.gmra.mxu0 %v17462_v16  ;;  %25800 = vst [vmem:[#allocation90_spill] sm:$0xff] %v20963_v9 }
 0x38a   :  { %15963 = vmatmul.mubr.msk.f32.gmra.mxu1 %vm5373_vm1, %v20953_v32  ;;  %4053 = vmatprep.mubr.bf16.mxu0 %v17467_v23  ;;  %v25803_v23 = vld [vmem:[#allocation25_spill] sm:$0xff]  ;;  %v20991_v32 = vpop.f32.mrf.mxu1 }
 0x38b   :  { %v3863_v16 = vpop.f32.mrf.mxu0  ;;  %15965 = vmatprep.mubr.msk.f32.mxu1 %vm5373_vm1, %v20963_v9  ;;  %v4418_v18 = vadd.f32 %v25803_v23, %v3338_v48  ;;  %v6327_v9 = vrot.slane %v20471_v36, 1  ;;  %25805 = vst [vmem:[#allocation295_spill] sm:$0xff] %v20991_v32  ;;  %v6330_v48 = vrot.slane %v20487_v41, 1  ;;  %v25806_v23 = vld [vmem:[#allocation98_spill] sm:$0xff] }
 0x38c   :  { %v20983_v16 = vsel %vm6284_vm2, %v6321_v17, %v6323_v4  ;;  %v20999_v17 = vsel %vm6284_vm2, %v6323_v4, %v6325_v43  ;;  %v17468_v43 = vld [vmem:[%s25092_s0 + $0xa08] ss:$12 sps:$4 sm:$0xff]  }
 0x38d   :  { %v20970_v47 = vpop.f32.mrf.mxu0  ;;  %25804 = vst [vmem:[#allocation25_spill] sm:$0xff] %v20983_v16  ;;  %25807 = vst [vmem:[#allocation98_spill] sm:$0xff] %v20999_v17  ;;  %v6332_v2 = vrot.slane %v4418_v18, 1  ;;  %v21015_v18 = vsel %vm6284_vm2, %v6328_v19, %v6330_v48 }
 0x38e   :  { %25801 = vst [vmem:[#allocation21_spill] sm:$0xff] %v20970_v47  ;;  %15966 = vmatmul.mubr.msk.f32.gmra.mxu1 %vm5373_vm1, %v20973_v26  ;;  %v3354_v26 = vadd.f32 %v20317_v12, %v25806_v23  ;;  %v6335_v23 = vrot.slane %v20509_v37, 1 }
 0x38f   :  { %v3866_v58 = vpop.f32.mrf.mxu0  ;;  %15968 = vmatprep.mubr.msk.f32.mxu1 %vm5373_vm1, %v20983_v16  ;;  %v21006_v16 = vsel %vm6284_vm2, %v6327_v9, %v6328_v19  ;;  %v6337_v9 = vrot.slane %v20520_v21, 1  ;;  %v17473_v19 = vld [vmem:[%s25092_s0 + $0xa24] ss:$12 sps:$4 sm:$0xff]  }
 0x390   :  { %v21001_v58 = vpop.f32.mrf.mxu1  ;;  %25808 = vst [vmem:[#allocation296_spill] sm:$0xff] %v21006_v16 }
 0x391   :  { %v20996_v63 = vpop.f32.mrf.mxu0  ;;  %4054 = vmatmul.mubr.bf16.gmra.mxu0 %v17465_v54  ;;  %v25809_v54 = vld [vmem:[#allocation30_spill] sm:$0xff] }
 0x392   :  { %15969 = vmatmul.mubr.msk.f32.gmra.mxu1 %vm5373_vm1, %v20999_v17  ;;  %4061 = vmatprep.mubr.bf16.mxu0 %v17470_v25  ;;  %v4434_v41 = vadd.f32 %v25809_v54, %v3354_v26  ;;  %25810 = vst [vmem:[#allocation30_spill] sm:$0xff] %v21015_v18  ;;  %v25811_v25 = vld [vmem:[#allocation102_spill] sm:$0xff]  ;;  %v21023_v17 = vpop.f32.mrf.mxu1  ;;  %v21028_v26 = vsel %vm6284_vm2, %v6330_v48, %v6332_v2  ;;  %v6334_v54 = vrot.slane %v20504_v8, 1  ;;  %v6342_v2 = vrot.slane %v20542_v46, 1  ;;  %v25815_v48 = vld [vmem:[#allocation36_spill] sm:$0xff] }
 0x393   :  { %v3871_v32 = vpop.f32.mrf.mxu0  ;;  %15971 = vmatprep.mubr.msk.f32.mxu1 %vm5373_vm1, %v21006_v16  ;;  %25812 = vst [vmem:[#allocation102_spill] sm:$0xff] %v21023_v17  ;;  %25813 = vst [vmem:[#allocation297_spill] sm:$0xff] %v21028_v26  ;;  %v25818_v46 = vld [vmem:[#allocation106_spill] sm:$0xff] }
 0x394   :  { %v3370_v32 = vadd.f32 %v20317_v12, %v25811_v25  ;;  %v21036_v21 = vpop.f32.mrf.mxu1  ;;  %v6339_v25 = vrot.slane %v4434_v41, 1  ;;  %v6341_v41 = vrot.slane %v20525_v52, 1  ;;  %v25824_v52 = vld [vmem:[#allocation110_spill] sm:$0xff] }
 0x395   :  { %v21012_v4 = vpop.f32.mrf.mxu0  ;;  %v3402_v8 = vadd.f32 %v20317_v12, %v25824_v52 }
 0x396   :  { %15972 = vmatmul.mubr.msk.f32.gmra.mxu1 %vm5373_vm1, %v21015_v18  ;;  %v21041_v18 = vsel %vm6284_vm2, %v6334_v54, %v6335_v23  ;;  %v4450_v37 = vadd.f32 %v25815_v48, %v3370_v32  ;;  %v6344_v54 = vrot.slane %v20549_v31, 1  ;;  %v3386_v32 = vadd.f32 %v20317_v12, %v25818_v46  ;;  %v17476_v46 = vld [vmem:[%s25092_s0 + $0xa3c] ss:$12 sps:$4 sm:$0xff]  }
 0x397   :  { %v3874_v16 = vpop.f32.mrf.mxu0  ;;  %15974 = vmatprep.mubr.msk.f32.mxu1 %vm5373_vm1, %v21028_v26  ;;  %25814 = vst [vmem:[#allocation298_spill] sm:$0xff] %v21041_v18 }
 0x398   :  { %v21048_v16 = vsel %vm6284_vm2, %v6335_v23, %v6337_v9  ;;  %v17471_v23 = vld [vmem:[%s25092_s0 + $0xa20] ss:$12 sps:$4 sm:$0xff]  }
 0x399   :  { %v21038_v17 = vpop.f32.mrf.mxu0  ;;  %4062 = vmatmul.mubr.bf16.gmra.mxu0 %v17468_v43  ;;  %25816 = vst [vmem:[#allocation36_spill] sm:$0xff] %v21048_v16  ;;  %v21053_v43 = vpop.f32.mrf.mxu1 }
 0x39a   :  { %15975 = vmatmul.mubr.msk.f32.gmra.mxu1 %vm5373_vm1, %v21041_v18  ;;  %4068 = vmatprep.mubr.bf16.mxu0 %v17473_v19  ;;  %25817 = vst [vmem:[#allocation299_spill] sm:$0xff] %v21053_v43  ;;  %v21061_v18 = vsel %vm6284_vm2, %v6337_v9, %v6339_v25  ;;  %v21071_v43 = vsel %vm6284_vm2, %v6341_v41, %v6342_v2  ;;  %v6349_v9 = vrot.slane %v20573_v7, 1  ;;  %v25822_v25 = vld [vmem:[#allocation42_spill] sm:$0xff]  ;;  %v6351_v41 = vrot.slane %v20590_v22, 1 }
 0x39b   :  { %v3879_v26 = vpop.f32.mrf.mxu0  ;;  %15977 = vmatprep.mubr.msk.f32.mxu1 %vm5373_vm1, %v21048_v16  ;;  %25820 = vst [vmem:[#allocation300_spill] sm:$0xff] %v21061_v18  ;;  %v21066_v19 = vpop.f32.mrf.mxu1  ;;  %25821 = vst [vmem:[#allocation301_spill] sm:$0xff] %v21071_v43 }
 0x39c   :  { %v6346_v26 = vrot.slane %v4450_v37, 1  ;;  %v4466_v37 = vadd.f32 %v25822_v25, %v3386_v32  ;;  %v6348_v32 = vrot.slane %v20566_v42, 1 }
 0x39d   :  { %v21058_v48 = vpop.f32.mrf.mxu0  ;;  %v21088_v36 = vpop.f32.mrf.mxu1 }
 0x39e   :  { %25819 = vst [vmem:[#allocation106_spill] sm:$0xff] %v21058_v48  ;;  %15978 = vmatmul.mubr.msk.f32.gmra.mxu1 %vm5373_vm1, %v21061_v18  ;;  %v21083_v18 = vsel %vm6284_vm2, %v6342_v2, %v6344_v54  ;;  %25825 = vst [vmem:[#allocation110_spill] sm:$0xff] %v21088_v36  ;;  %v14023_v2 = vld [vmem:[%s25095_s3 + $0x1d8] sm:$0xff]  ;;  %v6353_v25 = vrot.slane %v4466_v37, 1  ;;  %v17479_v37 = vld [vmem:[%s25092_s0 + $0xa54] ss:$12 sps:$4 sm:$0xff]  }
 0x39f   :  { %v3882_v16 = vpop.f32.mrf.mxu0  ;;  %15980 = vmatprep.mubr.msk.f32.mxu1 %vm5373_vm1, %v21071_v43  ;;  %25823 = vst [vmem:[#allocation42_spill] sm:$0xff] %v21083_v18  ;;  %v21101_v52 = vpop.f32.mrf.mxu1  ;;  %16376 = vmatprep.subr.mxu0 %v14023_v2 }
 0x3a0   :  { %v21093_v16 = vsel %vm6284_vm2, %v6344_v54, %v6346_v26  ;;  %v21106_v54 = vsel %vm6284_vm2, %v6348_v32, %v6349_v9  ;;  %v17474_v26 = vld [vmem:[%s25092_s0 + $0xa38] ss:$12 sps:$4 sm:$0xff]   ;;  %16377 = vmatpush3.msra.mxu0 %v14023_v2  ;;  %v6355_v2 = vrot.slane %v20597_v49, 1 }
 0x3a1   :  { %v21080_v31 = vpop.f32.mrf.mxu0  ;;  %4069 = vmatmul.mubr.bf16.gmra.mxu0 %v17471_v23  ;;  %25826 = vst [vmem:[#allocation302_spill] sm:$0xff] %v21093_v16  ;;  %25827 = vst [vmem:[#allocation303_spill] sm:$0xff] %v21106_v54  ;;  %v21124_v43 = vpop.f32.mrf.mxu1  ;;  %v25849_v49 = vld [vmem:[#allocation139_spill] sm:$0xff] }
 0x3a2   :  { %15981 = vmatmul.mubr.msk.f32.gmra.mxu1 %vm5373_vm1, %v21083_v18  ;;  %4076 = vmatprep.mubr.bf16.mxu0 %v17476_v46  ;;  %v6356_v46 = vrot.slane %v20608_v62, 1  ;;  %v21116_v18 = vsel %vm6284_vm2, %v6349_v9, %v6351_v41  ;;  %25830 = vst [vmem:[#allocation304_spill] sm:$0xff] %v21124_v43  ;;  %v21132_v9 = vsel %vm6284_vm2, %v6351_v41, %v6353_v25  ;;  %v6363_v41 = vrot.slane %v20639_v51, 1 }
 0x3a3   :  { %v3887_v23 = vpop.f32.mrf.mxu0  ;;  %15983 = vmatprep.mubr.msk.f32.mxu1 %vm5373_vm1, %v21093_v16 }
 0x3a4   :  { %v25828_v23 = vld [vmem:[#allocation49_spill] sm:$0xff] }
 0x3a5   :  { %v21103_v36 = vpop.f32.mrf.mxu0  ;;  %v4482_v16 = vadd.f32 %v25828_v23, %v3402_v8  ;;  %25829 = vst [vmem:[#allocation49_spill] sm:$0xff] %v21116_v18  ;;  %v6358_v8 = vrot.slane %v20615_v24, 1  ;;  %v25831_v23 = vld [vmem:[#allocation114_spill] sm:$0xff] }
 0x3a6   :  { %15984 = vmatmul.mubr.msk.f32.gmra.mxu1 %vm5373_vm1, %v21106_v54  ;;  %v3418_v54 = vadd.f32 %v20317_v12, %v25831_v23  ;;  %25832 = vst [vmem:[#allocation114_spill] sm:$0xff] %v21132_v9  ;;  %v21144_v23 = vld [vmem:[%s25095_s3 + $0x138] sm:$0xff] }
 0x3a7   :  { %v3890_v32 = vpop.f32.mrf.mxu0  ;;  %15986 = vmatprep.mubr.msk.f32.mxu1 %vm5373_vm1, %v21116_v18  ;;  %v6360_v22 = vrot.slane %v4482_v16, 1  ;;  %v21139_v18 = vsel %vm6284_vm2, %v6355_v2, %v6356_v46  ;;  %16104 = vmatprep.subr.mxu1 %v21144_v23  ;;  %v25834_v16 = vld [vmem:[#allocation55_spill] sm:$0xff]  ;;  %v21154_v2 = vsel %vm6284_vm2, %v6356_v46, %v6358_v8 }
 0x3a8   :  { %v21134_v32 = vpop.f32.mrf.mxu1  ;;  %25833 = vst [vmem:[#allocation305_spill] sm:$0xff] %v21139_v18  ;;  %v4498_v25 = vadd.f32 %v25834_v16, %v3418_v54  ;;  %25836 = vst [vmem:[#allocation306_spill] sm:$0xff] %v21154_v2  ;;  %v17482_v46 = vld [vmem:[%s25092_s0 + $0xa6c] ss:$12 sps:$4 sm:$0xff]   ;;  %v6362_v16 = vrot.slane %v20632_v13, 1 }
 0x3a9   :  { %v21129_v62 = vpop.f32.mrf.mxu0  ;;  %4077 = vmatmul.mubr.bf16.gmra.mxu0 %v17474_v26  ;;  %v21167_v54 = vsel %vm6284_vm2, %v6358_v8, %v6360_v22  ;;  %v6370_v22 = vrot.slane %v20676_v50, 1  ;;  %v25841_v8 = vld [vmem:[#allocation61_spill] sm:$0xff] }
 0x3aa   :  { %15987 = vmatmul.mubr.msk.f32.gmra.mxu1 %vm5373_vm1, %v21132_v9  ;;  %4083 = vmatprep.mubr.bf16.mxu0 %v17479_v37  ;;  %v17477_v37 = vld [vmem:[%s25092_s0 + $0xa50] ss:$12 sps:$4 sm:$0xff]   ;;  %v21162_v24 = vpop.f32.mrf.mxu1  ;;  %25839 = vst [vmem:[#allocation307_spill] sm:$0xff] %v21167_v54 }
 0x3ab   :  { %v3895_v43 = vpop.f32.mrf.mxu0  ;;  %15989 = vmatprep.mubr.msk.f32.mxu1 %vm5373_vm1, %v21139_v18  ;;  %v25837_v9 = vld [vmem:[#allocation118_spill] sm:$0xff] }
 0x3ac   :  { %v6365_v43 = vrot.slane %v20650_v20, 1  ;;  %v3434_v18 = vadd.f32 %v20317_v12, %v25837_v9  ;;  %25838 = vst [vmem:[#allocation118_spill] sm:$0xff] %v21162_v24  ;;  %v21175_v20 = vpop.f32.mrf.mxu1  ;;  %v6367_v12 = vrot.slane %v4498_v25, 1  ;;  %v21180_v24 = vsel %vm6284_vm2, %v6362_v16, %v6363_v41 }
 0x3ad   :  { %v21151_v26 = vpop.f32.mrf.mxu0  ;;  %25840 = vst [vmem:[#allocation308_spill] sm:$0xff] %v21180_v24  ;;  %v6369_v25 = vrot.slane %v20657_v33, 1  ;;  %v6372_v16 = vrot.slane %v20681_v40, 1 }
 0x3ae   :  { %25835 = vst [vmem:[#allocation55_spill] sm:$0xff] %v21151_v26  ;;  %15990 = vmatmul.mubr.msk.f32.gmra.mxu1 %vm5373_vm1, %v21154_v2  ;;  %v4514_v2 = vadd.f32 %v25841_v8, %v3434_v18  ;;  %v21198_v18 = vld [vmem:[%s25094_s2] ss:$0 sm:$0xff]  ;;  %v25844_v8 = vld [vmem:[#allocation127_spill] sm:$0xff] }
 0x3af   :  { %v3898_v51 = vpop.f32.mrf.mxu0  ;;  %15992 = vmatprep.mubr.msk.f32.mxu1 %vm5373_vm1, %v21167_v54  ;;  %v21215_v40 = vsel %vm6284_vm2, %v6369_v25, %v6370_v22  ;;  %v6379_v25 = vrot.slane %v20718_v39, 1  ;;  %v3466_v7 = vadd.f32 %v21198_v18, %v25849_v49 }
 0x3b0   :  { %v21187_v51 = vsel %vm6284_vm2, %v6363_v41, %v6365_v43  ;;  %v3450_v41 = vadd.f32 %v21198_v18, %v25844_v8  ;;  %25846 = vst [vmem:[#allocation310_spill] sm:$0xff] %v21215_v40  ;;  %v17485_v8 = vld [vmem:[%s25092_s0 + $0xa84] ss:$12 sps:$4 sm:$0xff]  }
 0x3b1   :  { %v21177_v9 = vpop.f32.mrf.mxu0  ;;  %4084 = vmatmul.mubr.bf16.gmra.mxu0 %v17477_v37  ;;  %25842 = vst [vmem:[#allocation61_spill] sm:$0xff] %v21187_v51  ;;  %v21192_v37 = vpop.f32.mrf.mxu1 }
 0x3b2   :  { %15993 = vmatmul.mubr.msk.f32.gmra.mxu1 %vm5373_vm1, %v21180_v24  ;;  %4091 = vmatprep.mubr.bf16.mxu0 %v17482_v46  ;;  %25843 = vst [vmem:[#allocation309_spill] sm:$0xff] %v21192_v37  ;;  %v17480_v46 = vld [vmem:[%s25092_s0 + $0xa68] ss:$12 sps:$4 sm:$0xff]  }
 0x3b3   :  { %v3903_v54 = vpop.f32.mrf.mxu0  ;;  %15995 = vmatprep.mubr.msk.f32.mxu1 %vm5373_vm1, %v21187_v51  ;;  %v6374_v51 = vrot.slane %v4514_v2, 1  ;;  %v21210_v50 = vpop.f32.mrf.mxu1 }
 0x3b4   :  { %v21205_v54 = vsel %vm6284_vm2, %v6365_v43, %v6367_v12  ;;  %v6377_v43 = vrot.slane %v20701_v38, 1  ;;  %v25847_v12 = vld [vmem:[#allocation67_spill] sm:$0xff] }
 0x3b5   :  { %v21202_v24 = vpop.f32.mrf.mxu0  ;;  %25845 = vst [vmem:[#allocation127_spill] sm:$0xff] %v21205_v54  ;;  %v4530_v2 = vadd.f32 %v25847_v12, %v3450_v41  ;;  %v21232_v42 = vpop.f32.mrf.mxu1  ;;  %v6376_v41 = vrot.slane %v20694_v45, 1 }
 0x3b6   :  { %15996 = vmatmul.mubr.msk.f32.gmra.mxu1 %vm5373_vm1, %v21205_v54  ;;  %v21227_v54 = vsel %vm6284_vm2, %v6370_v22, %v6372_v16  ;;  %25850 = vst [vmem:[#allocation139_spill] sm:$0xff] %v21232_v42 }
 0x3b7   :  { %v3906_v33 = vpop.f32.mrf.mxu0  ;;  %15998 = vmatprep.mubr.msk.f32.mxu1 %vm5373_vm1, %v21215_v40  ;;  %25848 = vst [vmem:[#allocation67_spill] sm:$0xff] %v21227_v54  ;;  %v21242_v22 = vpop.f32.mrf.mxu1  ;;  %v6381_v12 = vrot.slane %v4530_v2, 1  ;;  %v21247_v49 = vsel %vm6284_vm2, %v6376_v41, %v6377_v43  ;;  %v17488_v2 = vld [vmem:[%s25092_s0 + $0xa9c] ss:$12 sps:$4 sm:$0xff]  }
 0x3b8   :  { %v21237_v33 = vsel %vm6284_vm2, %v6372_v16, %v6374_v51  ;;  %25853 = vst [vmem:[#allocation313_spill] sm:$0xff] %v21247_v49  ;;  %v17483_v51 = vld [vmem:[%s25092_s0 + $0xa80] ss:$12 sps:$4 sm:$0xff]   ;;  %v6384_v16 = vrot.slane %v20738_v55, 1 }
 0x3b9   :  { %v21224_v13 = vpop.f32.mrf.mxu0  ;;  %4092 = vmatmul.mubr.bf16.gmra.mxu0 %v17480_v46  ;;  %25851 = vst [vmem:[#allocation311_spill] sm:$0xff] %v21237_v33  ;;  %v21265_v39 = vpop.f32.mrf.mxu1 }
 0x3ba   :  { %15999 = vmatmul.mubr.msk.f32.gmra.mxu1 %vm5373_vm1, %v21227_v54  ;;  %4098 = vmatprep.mubr.bf16.mxu0 %v17485_v8  ;;  %v25854_v8 = vld [vmem:[#allocation73_spill] sm:$0xff]  ;;  %25856 = vst [vmem:[#allocation314_spill] sm:$0xff] %v21265_v39 }
 0x3bb   :  { %v3911_v46 = vpop.f32.mrf.mxu0  ;;  %16001 = vmatprep.mubr.msk.f32.mxu1 %vm5373_vm1, %v21237_v33  ;;  %v4546_v54 = vadd.f32 %v25854_v8, %v3466_v7  ;;  %v6383_v33 = vrot.slane %v20725_v57, 1  ;;  %v6386_v7 = vrot.slane %v20743_v56, 1  ;;  %v25857_v8 = vld [vmem:[#allocation151_spill] sm:$0xff]  ;;  %v25878_v57 = vld [vmem:[#allocation88_spill] sm:$0xff] }
 0x3bc   :  { %v21257_v46 = vsel %vm6284_vm2, %v6377_v43, %v6379_v25  ;;  %v21273_v43 = vsel %vm6284_vm2, %v6379_v25, %v6381_v12  ;;  %v17486_v12 = vld [vmem:[%s25092_s0 + $0xa98] ss:$12 sps:$4 sm:$0xff]  }
 0x3bd   :  { %v21244_v40 = vpop.f32.mrf.mxu0  ;;  %25855 = vst [vmem:[#allocation73_spill] sm:$0xff] %v21257_v46  ;;  %25858 = vst [vmem:[#allocation151_spill] sm:$0xff] %v21273_v43  ;;  %v6388_v38 = vrot.slane %v4546_v54, 1  ;;  %v21289_v54 = vsel %vm6284_vm2, %v6384_v16, %v6386_v7 }
 0x3be   :  { %25852 = vst [vmem:[#allocation312_spill] sm:$0xff] %v21244_v40  ;;  %16002 = vmatmul.mubr.msk.f32.gmra.mxu1 %vm5373_vm1, %v21247_v49  ;;  %v3482_v49 = vadd.f32 %v21198_v18, %v25857_v8  ;;  %v6391_v8 = vrot.slane %v20769_v6, 1  ;;  %v25898_v40 = vld [vmem:[#allocation185_spill] sm:$0xff] }
 0x3bf   :  { %v3914_v41 = vpop.f32.mrf.mxu0  ;;  %16004 = vmatprep.mubr.msk.f32.mxu1 %vm5373_vm1, %v21257_v46  ;;  %v21280_v46 = vsel %vm6284_vm2, %v6383_v33, %v6384_v16  ;;  %v6393_v33 = vrot.slane %v20780_v14, 1  ;;  %v6390_v16 = vrot.slane %v20762_v15, 1 }
 0x3c0   :  { %v21275_v41 = vpop.f32.mrf.mxu1  ;;  %25859 = vst [vmem:[#allocation315_spill] sm:$0xff] %v21280_v46 }
 0x3c1   :  { %v21270_v55 = vpop.f32.mrf.mxu0  ;;  %4099 = vmatmul.mubr.bf16.gmra.mxu0 %v17483_v51  ;;  %v25860_v51 = vld [vmem:[#allocation79_spill] sm:$0xff] }
 0x3c2   :  { %16005 = vmatmul.mubr.msk.f32.gmra.mxu1 %vm5373_vm1, %v21273_v43  ;;  %4106 = vmatprep.mubr.bf16.mxu0 %v17488_v2  ;;  %v4562_v56 = vadd.f32 %v25860_v51, %v3482_v49  ;;  %25861 = vst [vmem:[#allocation79_spill] sm:$0xff] %v21289_v54  ;;  %v21295_v2 = vpop.f32.mrf.mxu1  ;;  %v17491_v49 = vld [vmem:[%s25092_s0 + $0xab4] ss:$12 sps:$4 sm:$0xff]  }
 0x3c3   :  { %v3919_v39 = vpop.f32.mrf.mxu0  ;;  %16007 = vmatprep.mubr.msk.f32.mxu1 %vm5373_vm1, %v21280_v46  ;;  %25862 = vst [vmem:[#allocation316_spill] sm:$0xff] %v21295_v2  ;;  %v25864_v2 = vld [vmem:[#allocation10_spill] sm:$0xff] }
 0x3c4   :  { %v21300_v39 = vsel %vm6284_vm2, %v6386_v7, %v6388_v38  ;;  %v6395_v43 = vrot.slane %v4562_v56, 1  ;;  %v3758_v14 = vadd.f32 %v21198_v18, %v25864_v2  ;;  %v21315_v38 = vsel %vm6284_vm2, %v6390_v16, %v6391_v8  ;;  %v25867_v56 = vld [vmem:[#allocation66_spill] sm:$0xff] }
 0x3c5   :  { %v21286_v25 = vpop.f32.mrf.mxu0  ;;  %25863 = vst [vmem:[#allocation317_spill] sm:$0xff] %v21300_v39  ;;  %25865 = vst [vmem:[#allocation10_spill] sm:$0xff] %v21315_v38  ;;  %v21320_v7 = vsel %vm6284_vm2, %v6391_v8, %v6393_v33  ;;  %v3761_v2 = vadd.f32 %v21198_v18, %v25867_v56  ;;  %v25871_v16 = vld [vmem:[#allocation14_spill] sm:$0xff] }
 0x3c6   :  { %16008 = vmatmul.mubr.msk.f32.gmra.mxu1 %vm5373_vm1, %v21289_v54  ;;  %v21308_v46 = vpop.f32.mrf.mxu1  ;;  %25866 = vst [vmem:[#allocation318_spill] sm:$0xff] %v21320_v7  ;;  %v3766_v15 = vadd.f32 %v21198_v18, %v25871_v16  ;;  %v21336_v8 = vsel %vm6284_vm2, %v6393_v33, %v6395_v43  ;;  %v25875_v43 = vld [vmem:[#allocation18_spill] sm:$0xff] }
 0x3c7   :  { %v3922_v51 = vpop.f32.mrf.mxu0  ;;  %16010 = vmatprep.mubr.msk.f32.mxu1 %vm5373_vm1, %v21300_v39  ;;  %25873 = vst [vmem:[#allocation319_spill] sm:$0xff] %v21336_v8  ;;  %v3774_v33 = vadd.f32 %v21198_v18, %v25875_v43 }
 0x3c8   :  { %v21326_v39 = vpop.f32.mrf.mxu1 }
 0x3c9   :  { %v21312_v54 = vpop.f32.mrf.mxu0  ;;  %4107 = vmatmul.mubr.bf16.gmra.mxu0 %v17486_v12  ;;  %25868 = vst [vmem:[#allocation66_spill] sm:$0xff] %v21326_v39  ;;  %v25869_v12 = vld [vmem:[#allocation126_spill] sm:$0xff] }
 0x3ca   :  { %16011 = vmatmul.mubr.msk.f32.gmra.mxu1 %vm5373_vm1, %v21315_v38  ;;  %4113 = vmatprep.mubr.bf16.mxu0 %v17491_v49  ;;  %v21329_v6 = vadd.f32 %v25869_v12, %v3758_v14  ;;  %v17489_v49 = vld [vmem:[%s25092_s0 + $0xab0] ss:$12 sps:$4 sm:$0xff]   ;;  %v17494_v14 = vld [vmem:[%s25092_s0 + $0xacc] ss:$12 sps:$4 sm:$0xff]   ;;  %v25874_v12 = vld [vmem:[#allocation129_spill] sm:$0xff] }
 0x3cb   :  { %v3927_v51 = vpop.f32.mrf.mxu0  ;;  %16013 = vmatprep.mubr.msk.f32.mxu1 %vm5373_vm1, %v21320_v7  ;;  %v21349_v16 = vadd.f32 %v25874_v12, %v3761_v2  ;;  %v25876_v7 = vld [vmem:[#allocation125_spill] sm:$0xff] }
 0x3cc   :  { %25870 = vst [vmem:[#allocation126_spill] sm:$0xff] %v21329_v6 }
 0x3cd   :  { %v21333_v38 = vpop.f32.mrf.mxu0 }
 0x3ce   :  { %25872 = vst [vmem:[#allocation14_spill] sm:$0xff] %v21333_v38  ;;  %v15839_v51 = vpop.f32.mrf.mxu1  ;;  %16014 = vmatmul.mubr.msk.f32.gmra.mxu1 %vm5373_vm1, %v21336_v8  ;;  %v3777_v8 = vadd.f32 %v21198_v18, %v25878_v57  ;;  %v13857_v57 = vld [vmem:[%s25095_s3 + $0x128] sm:$0xff] }
 0x3cf   :  { %v3930_v56 = vpop.f32.mrf.mxu0  ;;  %16032 = vmatprep.mubr.msk.f32.mxu1 %vm5373_vm1, %v21329_v6  ;;  %v21354_v51 = vadd.f32 %v25876_v7, %v3766_v15  ;;  %v25879_v15 = vld [vmem:[#allocation132_spill] sm:$0xff] }
 0x3d0   :  { %v5814_v39 = vpop.f32.mrf.mxu1  ;;  %v13858_v56 = vld [vmem:[%s25095_s3 + $0x130] sm:$0xff]  ;;  %v21373_v7 = vadd.f32 %v25879_v15, %v3774_v33  ;;  %v13856_v33 = vld [vmem:[%s25095_s3 + $0x120] sm:$0xff] }
 0x3d1   :  { %25877 = vst [vmem:[#allocation129_spill] sm:$0xff] %v21354_v51  ;;  %v3933_v45 = vpop.f32.mrf.mxu0  ;;  %4114 = vmatmul.mubr.bf16.gmra.mxu0 %v17489_v49  ;;  %v25886_v15 = vld [vmem:[#allocation187_spill] sm:$0xff] }
 0x3d2   :  { %v3934_v42 = vadd.f32 %v21198_v18, %v3933_v45  ;;  %v21362_v2 = vpop.f32.mrf.mxu1  ;;  %16033 = vmatmul.mubr.msk.f32.vlgmr.msra.gmra.mxu1 %vm5373_vm1, %v21349_v16  ;;  %4121 = vmatprep.mubr.bf16.mxu0 %v17494_v14  ;;  %25880 = vst [vmem:[#allocation18_spill] sm:$0xff] %v21373_v7  ;;  %v25881_v45 = vld [vmem:[#allocation22_spill] sm:$0xff]  ;;  %v25883_v14 = vld [vmem:[#allocation135_spill] sm:$0xff] }
 0x3d3   :  { %v3935_v39 = vpop.f32.mrf.mxu0  ;;  %16035 = vmatprep.mubr.msk.f32.mxu1 %vm5373_vm1, %v21354_v51  ;;  %16105 = vmatpush3.msra.mxu1 %v21144_v23  ;;  %v3782_v49 = vadd.f32 %v21198_v18, %v25881_v45  ;;  %v21380_v43 = vadd.f32 %v25883_v14, %v3777_v8  ;;  %v17497_v14 = vld [vmem:[%s25092_s0 + $0xae4] ss:$12 sps:$4 sm:$0xff]  }
 0x3d4   :  { %v21377_v12 = vpop.f32.mrf.mxu1  ;;  %16106 = vmatprep.subr.mxu1 %v13858_v56  ;;  %v25885_v39 = vld [vmem:[#allocation95_spill] sm:$0xff]  ;;  %v21391_v45 = vadd.f32 %v25886_v15, %v3934_v42  ;;  %v25889_v15 = vld [vmem:[#allocation97_spill] sm:$0xff] }
 0x3d5   :  { %25882 = vst [vmem:[#allocation125_spill] sm:$0xff] %v21377_v12  ;;  %25884 = vst [vmem:[#allocation88_spill] sm:$0xff] %v21380_v43  ;;  %v3790_v37 = vadd.f32 %v21198_v18, %v25885_v39  ;;  %v3936_v23 = vpop.f32.mrf.mxu0  ;;  %16107 = vmatpush3.msra.mxu1 %v13858_v56  ;;  %v25887_v39 = vld [vmem:[#allocation131_spill] sm:$0xff] }
 0x3d6   :  { %v3937_v12 = vadd.f32 %v21198_v18, %v3936_v23  ;;  %v21394_v8 = vpop.f32.mrf.mxu1  ;;  %16036 = vmatmul.mubr.msk.f32.gmra.mxu1 %vm5373_vm1, %v21373_v7  ;;  %16108 = vmatprep.subr.mxu1 %v13857_v57  ;;  %v21404_v42 = vadd.f32 %v25887_v39, %v3782_v49  ;;  %v3793_v23 = vadd.f32 %v21198_v18, %v25889_v15  ;;  %v7948_v15 = vrot.slane %v21391_v45, 1 }
 0x3d7   :  { %v3938_v56 = vpop.f32.mrf.mxu0  ;;  %16038 = vmatprep.mubr.msk.f32.mxu1 %vm5373_vm1, %v21380_v43  ;;  %16109 = vmatpush3.msra.mxu1 %v13857_v57  ;;  %v21417_v38 = vadd.f32 %v25892_v11, %v3790_v37  ;;  %v25894_v57 = vld [vmem:[#allocation100_spill] sm:$0xff]  ;;  %v13854_v11 = vld [vmem:[%s25095_s3 + $0x110] sm:$0xff] }
 0x3d8   :  { %25888 = vst [vmem:[#allocation132_spill] sm:$0xff] %v21404_v42  ;;  %v21409_v44 = vadd.f32 %v25890_v61, %v3937_v12  ;;  %v21411_v10 = vpop.f32.mrf.mxu1  ;;  %16110 = vmatprep.subr.mxu1 %v13856_v33  ;;  %v13855_v56 = vld [vmem:[%s25095_s3 + $0x118] sm:$0xff]  ;;  %v3798_v49 = vadd.f32 %v21198_v18, %v25894_v57  ;;  %v25897_v57 = vld [vmem:[#allocation105_spill] sm:$0xff] }
 0x3d9   :  { %25891 = vst [vmem:[#allocation22_spill] sm:$0xff] %v21411_v10  ;;  %25893 = vst [vmem:[#allocation135_spill] sm:$0xff] %v21417_v38  ;;  %v3941_v39 = vpop.f32.mrf.mxu0  ;;  %4122 = vmatmul.mubr.bf16.gmra.mxu0 %v17492_v35  ;;  %16111 = vmatpush3.msra.mxu1 %v13856_v33  ;;  %v25895_v35 = vld [vmem:[#allocation141_spill] sm:$0xff] }
 0x3da   :  { %v7949_v61 = vrot.slane %v21409_v44, 1  ;;  %v3942_v12 = vadd.f32 %v21198_v18, %v3941_v39  ;;  %v21424_v10 = vpop.f32.mrf.mxu1  ;;  %16039 = vmatmul.mubr.msk.f32.gmra.mxu1 %vm5373_vm1, %v21404_v42  ;;  %4128 = vmatprep.mubr.bf16.mxu0 %v17497_v14  ;;  %v21434_v33 = vadd.f32 %v25895_v35, %v3793_v23  ;;  %v3806_v39 = vadd.f32 %v21198_v18, %v25897_v57  ;;  %v17495_v35 = vld [vmem:[%s25092_s0 + $0xae0] ss:$12 sps:$4 sm:$0xff]  }
 0x3db   :  { %v3943_v37 = vpop.f32.mrf.mxu0  ;;  %16041 = vmatprep.mubr.msk.f32.mxu1 %vm5373_vm1, %v21417_v38  ;;  %16112 = vmatprep.subr.mxu1 %v13855_v56  ;;  %v3809_v38 = vadd.f32 %v21198_v18, %v25903_v28  ;;  %v17500_v28 = vld [vmem:[%s25092_s0 + $0xafc] ss:$12 sps:$4 sm:$0xff]  }
 0x3dc   :  { %25896 = vst [vmem:[#allocation95_spill] sm:$0xff] %v21434_v33  ;;  %v21439_v26 = vadd.f32 %v25898_v40, %v3942_v12  ;;  %v21441_v48 = vpop.f32.mrf.mxu1  ;;  %16113 = vmatpush3.msra.mxu1 %v13855_v56  ;;  %v21444_v14 = vsel %vm6284_vm2, %v7948_v15, %v7949_v61  ;;  %v25901_v37 = vld [vmem:[#allocation137_spill] sm:$0xff]  ;;  %v25904_v57 = vld [vmem:[#allocation144_spill] sm:$0xff] }
 0x3dd   :  { %25899 = vst [vmem:[#allocation187_spill] sm:$0xff] %v21441_v48  ;;  %25900 = vst [vmem:[#allocation131_spill] sm:$0xff] %v21444_v14  ;;  %v21447_v47 = vadd.f32 %v25901_v37, %v3798_v49  ;;  %v3944_v23 = vpop.f32.mrf.mxu0  ;;  %16114 = vmatprep.subr.mxu1 %v13854_v11  ;;  %v13853_v40 = vld [vmem:[%s25095_s3 + $0x108] sm:$0xff]  ;;  %v21469_v37 = vadd.f32 %v25904_v57, %v3806_v39  ;;  %v25906_v48 = vld [vmem:[#allocation111_spill] sm:$0xff] }
 0x3de   :  { %v7951_v56 = vrot.slane %v21439_v26, 1  ;;  %v3945_v15 = vadd.f32 %v21198_v18, %v3944_v23  ;;  %v21459_v12 = vpop.f32.mrf.mxu1  ;;  %16042 = vmatmul.mubr.msk.f32.gmra.mxu1 %vm5373_vm1, %v21434_v33  ;;  %v3814_v23 = vadd.f32 %v21198_v18, %v25906_v48  ;;  %v25907_v14 = vld [vmem:[#allocation188_spill] sm:$0xff]  ;;  %v25912_v39 = vld [vmem:[#allocation59_spill] sm:$0xff] }
 0x3df   :  { %25902 = vst [vmem:[#allocation97_spill] sm:$0xff] %v21447_v47  ;;  %v3946_v49 = vpop.f32.mrf.mxu0  ;;  %16044 = vmatprep.mubr.msk.f32.mxu1 %vm5373_vm1, %v21447_v47  ;;  %16115 = vmatpush3.msra.mxu1 %v13854_v11  ;;  %25905 = vst [vmem:[#allocation190_spill] sm:$0xff] %v21469_v37  ;;  %v13852_v33 = vld [vmem:[%s25095_s3 + $0x100] sm:$0xff]  ;;  %v25910_v47 = vld [vmem:[#allocation147_spill] sm:$0xff]  ;;  %v3822_v57 = vadd.f32 %v21198_v18, %v25912_v39 }
 0x3e0   :  { %v5025_v7 = vadd.f32 %v25907_v14, %v3945_v15  ;;  %v21474_v42 = vpop.f32.mrf.mxu1  ;;  %16116 = vmatprep.subr.mxu1 %v13853_v40  ;;  %v21480_v49 = vsel %vm6284_vm2, %v7949_v61, %v7951_v56  ;;  %v21483_v11 = vadd.f32 %v25910_v47, %v3809_v38  ;;  %v25913_v47 = vld [vmem:[#allocation143_spill] sm:$0xff]  ;;  %v25915_v39 = vld [vmem:[#allocation58_spill] sm:$0xff] }
 0x3e1   :  { %25908 = vst [vmem:[#allocation138_spill] sm:$0xff] %v21474_v42  ;;  %25909 = vst [vmem:[#allocation100_spill] sm:$0xff] %v21480_v49  ;;  %v3949_v43 = vpop.f32.mrf.mxu0  ;;  %4129 = vmatmul.mubr.bf16.gmra.mxu0 %v17495_v35  ;;  %16117 = vmatpush3.msra.mxu1 %v13853_v40  ;;  %v21495_v38 = vadd.f32 %v25913_v47, %v3814_v23  ;;  %v3825_v35 = vadd.f32 %v21198_v18, %v25915_v39  ;;  %v25918_v40 = vld [vmem:[#allocation150_spill] sm:$0xff]  ;;  %v17498_v23 = vld [vmem:[%s25092_s0 + $0xaf8] ss:$12 sps:$4 sm:$0xff]  }
 0x3e2   :  { %25911 = vst [vmem:[#allocation141_spill] sm:$0xff] %v21483_v11  ;;  %v7953_v48 = vrot.slane %v5025_v7, 1  ;;  %v3950_v14 = vadd.f32 %v21198_v18, %v3949_v43  ;;  %v21488_v15 = vpop.f32.mrf.mxu1  ;;  %16045 = vmatmul.mubr.msk.f32.gmra.mxu1 %vm5373_vm1, %v21469_v37  ;;  %4136 = vmatprep.mubr.bf16.mxu0 %v17500_v28  ;;  %v21505_v42 = vadd.f32 %v25918_v40, %v3822_v57  ;;  %v25920_v28 = vld [vmem:[#allocation130_spill] sm:$0xff]  ;;  %v25921_v47 = vld [vmem:[#allocation193_spill] sm:$0xff] }
 0x3e3   :  { %v3951_v61 = vpop.f32.mrf.mxu0  ;;  %16047 = vmatprep.mubr.msk.f32.mxu1 %vm5373_vm1, %v21483_v11  ;;  %16118 = vmatprep.subr.mxu1 %v13852_v33  ;;  %25914 = vst [vmem:[#allocation105_spill] sm:$0xff] %v21495_v38  ;;  %v25939_v11 = vld [vmem:[#allocation162_spill] sm:$0xff] }
 0x3e4   :  { %v21499_v7 = vpop.f32.mrf.mxu1  ;;  %16119 = vmatpush3.msra.mxu1 %v13852_v33  ;;  %v21502_v43 = vsel %vm6284_vm2, %v7951_v56, %v7953_v48  ;;  %25919 = vst [vmem:[#allocation108_spill] sm:$0xff] %v21505_v42  ;;  %v3830_v61 = vadd.f32 %v21198_v18, %v25920_v28  ;;  %v21513_v37 = vadd.f32 %v25921_v47, %v3950_v14  ;;  %v17503_v56 = vld [vmem:[%s25092_s0 + $0xb14] ss:$12 sps:$4 sm:$0xff]  }
 0x3e5   :  { %25916 = vst [vmem:[#allocation185_spill] sm:$0xff] %v21499_v7  ;;  %25917 = vst [vmem:[#allocation137_spill] sm:$0xff] %v21502_v43  ;;  %v3952_v49 = vpop.f32.mrf.mxu0  ;;  %v25922_v48 = vld [vmem:[#allocation153_spill] sm:$0xff]  ;;  %v3838_v14 = vadd.f32 %v21198_v18, %v20805_v29 }
 0x3e6   :  { %v3953_v39 = vadd.f32 %v21198_v18, %v3952_v49  ;;  %v21516_v33 = vpop.f32.mrf.mxu1  ;;  %16048 = vmatmul.mubr.msk.f32.gmra.mxu1 %vm5373_vm1, %v21495_v38  ;;  %v21526_v40 = vadd.f32 %v25922_v48, %v3825_v35  ;;  %v25924_v49 = vld [vmem:[#allocation195_spill] sm:$0xff]  ;;  %v25926_v7 = vld [vmem:[#allocation149_spill] sm:$0xff] }
 0x3e7   :  { %v3954_v57 = vpop.f32.mrf.mxu0  ;;  %16050 = vmatprep.mubr.msk.f32.mxu1 %vm5373_vm1, %v21505_v42  ;;  %v21536_v43 = vadd.f32 %v25926_v7, %v3830_v61  ;;  %v7955_v42 = vrot.slane %v21513_v37, 1  ;;  %v25928_v7 = vld [vmem:[#allocation156_spill] sm:$0xff]  ;;  %v3846_v61 = vadd.f32 %v21198_v18, %v20857_v3 }
 0x3e8   :  { %25923 = vst [vmem:[#allocation144_spill] sm:$0xff] %v21526_v40  ;;  %v21531_v28 = vadd.f32 %v25924_v49, %v3953_v39  ;;  %v21533_v47 = vpop.f32.mrf.mxu1  ;;  %v3841_v57 = vadd.f32 %v21198_v18, %v20825_v27  ;;  %v21550_v27 = vadd.f32 %v25928_v7, %v3838_v14  ;;  %v17501_v14 = vld [vmem:[%s25092_s0 + $0xb10] ss:$12 sps:$4 sm:$0xff]  }
 0x3e9   :  { %25925 = vst [vmem:[#allocation111_spill] sm:$0xff] %v21533_v47  ;;  %25927 = vst [vmem:[#allocation188_spill] sm:$0xff] %v21536_v43  ;;  %v3957_v38 = vpop.f32.mrf.mxu0  ;;  %4137 = vmatmul.mubr.bf16.gmra.mxu0 %v17498_v23  ;;  %v25930_v23 = vld [vmem:[#allocation191_spill] sm:$0xff] }
 0x3ea   :  { %v7956_v35 = vrot.slane %v21531_v28, 1  ;;  %v3958_v48 = vadd.f32 %v21198_v18, %v3957_v38  ;;  %v21543_v29 = vpop.f32.mrf.mxu1  ;;  %16051 = vmatmul.mubr.msk.f32.gmra.mxu1 %vm5373_vm1, %v21526_v40  ;;  %4143 = vmatprep.mubr.bf16.mxu0 %v17503_v56  ;;  %25929 = vst [vmem:[#allocation147_spill] sm:$0xff] %v21550_v27  ;;  %v25933_v40 = vld [vmem:[#allocation159_spill] sm:$0xff] }
 0x3eb   :  { %v3959_v39 = vpop.f32.mrf.mxu0  ;;  %16053 = vmatprep.mubr.msk.f32.mxu1 %vm5373_vm1, %v21536_v43  ;;  %v21563_v56 = vadd.f32 %v25933_v40, %v3841_v57 }
 0x3ec   :  { %v21555_v49 = vadd.f32 %v25930_v23, %v3958_v48  ;;  %v21557_v38 = vpop.f32.mrf.mxu1  ;;  %v21560_v47 = vsel %vm6284_vm2, %v7955_v42, %v7956_v35  ;;  %v3854_v39 = vadd.f32 %v21198_v18, %v20908_v0  ;;  %v17506_v42 = vld [vmem:[%s25092_s0 + $0xb2c] ss:$12 sps:$4 sm:$0xff]   ;;  %v3857_v23 = vadd.f32 %v21198_v18, %v20928_v1 }
 0x3ed   :  { %25931 = vst [vmem:[#allocation59_spill] sm:$0xff] %v21557_v38  ;;  %25932 = vst [vmem:[#allocation143_spill] sm:$0xff] %v21560_v47  ;;  %v3960_v43 = vpop.f32.mrf.mxu0  ;;  %v25935_v0 = vld [vmem:[#allocation155_spill] sm:$0xff] }
 0x3ee   :  { %25934 = vst [vmem:[#allocation58_spill] sm:$0xff] %v21563_v56  ;;  %v7958_v3 = vrot.slane %v21555_v49, 1  ;;  %v3961_v48 = vadd.f32 %v21198_v18, %v3960_v43  ;;  %v21572_v7 = vpop.f32.mrf.mxu1  ;;  %16054 = vmatmul.mubr.msk.f32.gmra.mxu1 %vm5373_vm1, %v21550_v27  ;;  %v21582_v57 = vadd.f32 %v25935_v0, %v3846_v61  ;;  %v25936_v43 = vld [vmem:[#allocation194_spill] sm:$0xff]  ;;  %v21593_v51 = vadd.f32 %v25939_v11, %v3854_v39  ;;  %v25941_v11 = vld [vmem:[#allocation165_spill] sm:$0xff] }
 0x3ef   :  { %v3962_v40 = vpop.f32.mrf.mxu0  ;;  %16056 = vmatprep.mubr.msk.f32.mxu1 %vm5373_vm1, %v21563_v56 }
 0x3f0   :  { %v5041_v38 = vadd.f32 %v25936_v43, %v3961_v48  ;;  %v21587_v47 = vpop.f32.mrf.mxu1  ;;  %v21590_v27 = vsel %vm6284_vm2, %v7956_v35, %v7958_v3  ;;  %25940 = vst [vmem:[#allocation193_spill] sm:$0xff] %v21593_v51  ;;  %v3862_v40 = vadd.f32 %v21198_v18, %v20950_v60  ;;  %v21605_v35 = vadd.f32 %v25941_v11, %v3857_v23  ;;  %v17504_v23 = vld [vmem:[%s25092_s0 + $0xb28] ss:$12 sps:$4 sm:$0xff]  }
 0x3f1   :  { %25937 = vst [vmem:[#allocation150_spill] sm:$0xff] %v21587_v47  ;;  %25938 = vst [vmem:[#allocation130_spill] sm:$0xff] %v21590_v27  ;;  %v3965_v56 = vpop.f32.mrf.mxu0  ;;  %4144 = vmatmul.mubr.bf16.gmra.mxu0 %v17501_v14  ;;  %v3870_v60 = vadd.f32 %v21198_v18, %v20996_v63  ;;  %v3873_v48 = vadd.f32 %v21198_v18, %v21012_v4  ;;  %v25947_v43 = vld [vmem:[#allocation198_spill] sm:$0xff] }
 0x3f2   :  { %v7960_v61 = vrot.slane %v5041_v38, 1  ;;  %v3966_v0 = vadd.f32 %v21198_v18, %v3965_v56  ;;  %v21598_v6 = vpop.f32.mrf.mxu1  ;;  %16057 = vmatmul.mubr.msk.f32.gmra.mxu1 %vm5373_vm1, %v21582_v57  ;;  %4151 = vmatprep.mubr.bf16.mxu0 %v17506_v42  ;;  %25942 = vst [vmem:[#allocation153_spill] sm:$0xff] %v21605_v35  ;;  %v25945_v56 = vld [vmem:[#allocation161_spill] sm:$0xff] }
 0x3f3   :  { %v3967_v1 = vpop.f32.mrf.mxu0  ;;  %16059 = vmatprep.mubr.msk.f32.mxu1 %vm5373_vm1, %v21593_v51  ;;  %v21615_v14 = vadd.f32 %v25945_v56, %v3862_v40  ;;  %v25948_v40 = vld [vmem:[#allocation167_spill] sm:$0xff]  ;;  %v25950_v56 = vld [vmem:[#allocation201_spill] sm:$0xff]  ;;  %v3905_v51 = vadd.f32 %v21198_v18, %v21202_v24  ;;  %v3910_v24 = vadd.f32 %v21198_v18, %v21224_v13 }
 0x3f4   :  { %v21609_v39 = vpop.f32.mrf.mxu1  ;;  %v21612_v38 = vsel %vm6284_vm2, %v7958_v3, %v7960_v61  ;;  %v21623_v1 = vadd.f32 %v25947_v43, %v3966_v0  ;;  %v17509_v3 = vld [vmem:[%s25092_s0 + $0xb44] ss:$12 sps:$4 sm:$0xff]   ;;  %v21636_v61 = vadd.f32 %v25948_v40, %v3870_v60  ;;  %v3878_v0 = vadd.f32 %v21198_v18, %v21038_v17 }
 0x3f5   :  { %25943 = vst [vmem:[#allocation195_spill] sm:$0xff] %v21609_v39  ;;  %25944 = vst [vmem:[#allocation149_spill] sm:$0xff] %v21612_v38  ;;  %v3968_v42 = vpop.f32.mrf.mxu0  ;;  %v25952_v39 = vld [vmem:[#allocation169_spill] sm:$0xff] }
 0x3f6   :  { %25946 = vst [vmem:[#allocation156_spill] sm:$0xff] %v21615_v14  ;;  %v3969_v63 = vadd.f32 %v21198_v18, %v3968_v42  ;;  %v21626_v11 = vpop.f32.mrf.mxu1  ;;  %16060 = vmatmul.mubr.msk.f32.gmra.mxu1 %vm5373_vm1, %v21605_v35  ;;  %25949 = vst [vmem:[#allocation191_spill] sm:$0xff] %v21636_v61  ;;  %v21646_v47 = vadd.f32 %v25952_v39, %v3873_v48  ;;  %v7962_v27 = vrot.slane %v21623_v1, 1  ;;  %v25954_v39 = vld [vmem:[#allocation166_spill] sm:$0xff] }
 0x3f7   :  { %v3970_v4 = vpop.f32.mrf.mxu0  ;;  %16062 = vmatprep.mubr.msk.f32.mxu1 %vm5373_vm1, %v21615_v14  ;;  %v21663_v48 = vadd.f32 %v25954_v39, %v3878_v0 }
 0x3f8   :  { %v21641_v42 = vadd.f32 %v25950_v56, %v3969_v63  ;;  %v21643_v43 = vpop.f32.mrf.mxu1  ;;  %25953 = vst [vmem:[#allocation155_spill] sm:$0xff] %v21646_v47  ;;  %v3886_v4 = vadd.f32 %v21198_v18, %v21080_v31  ;;  %v14022_v31 = vld [vmem:[%s25095_s3 + $0x1d0] sm:$0xff] }
 0x3f9   :  { %25951 = vst [vmem:[#allocation159_spill] sm:$0xff] %v21643_v43  ;;  %v3973_v38 = vpop.f32.mrf.mxu0  ;;  %4152 = vmatmul.mubr.bf16.gmra.mxu0 %v17504_v23  ;;  %25955 = vst [vmem:[#allocation194_spill] sm:$0xff] %v21663_v48  ;;  %v25956_v23 = vld [vmem:[#allocation196_spill] sm:$0xff]  ;;  %16378 = vmatprep.subr.mxu0 %v14022_v31 }
 0x3fa   :  { %v7963_v60 = vrot.slane %v21641_v42, 1  ;;  %v3974_v40 = vadd.f32 %v21198_v18, %v3973_v38  ;;  %v21653_v17 = vpop.f32.mrf.mxu1  ;;  %16063 = vmatmul.mubr.msk.f32.gmra.mxu1 %vm5373_vm1, %v21636_v61  ;;  %4158 = vmatprep.mubr.bf16.mxu0 %v17509_v3  ;;  %v3889_v38 = vadd.f32 %v21198_v18, %v21103_v36  ;;  %v17507_v36 = vld [vmem:[%s25092_s0 + $0xb40] ss:$12 sps:$4 sm:$0xff]  }
 0x3fb   :  { %v3975_v63 = vpop.f32.mrf.mxu0  ;;  %16065 = vmatprep.mubr.msk.f32.mxu1 %vm5373_vm1, %v21646_v47  ;;  %v3894_v47 = vadd.f32 %v21198_v18, %v21129_v62  ;;  %16379 = vmatpush3.msra.mxu0 %v14022_v31  ;;  %v17512_v62 = vld [vmem:[%s25092_s0 + $0xb5c] ss:$12 sps:$4 sm:$0xff]   ;;  %v14020_v31 = vld [vmem:[%s25095_s3 + $0x1c0] sm:$0xff] }
 0x3fc   :  { %v21668_v56 = vadd.f32 %v25956_v23, %v3974_v40  ;;  %v21670_v43 = vpop.f32.mrf.mxu1  ;;  %v21673_v3 = vsel %vm6284_vm2, %v7962_v27, %v7963_v60  ;;  %v25959_v63 = vld [vmem:[#allocation171_spill] sm:$0xff]  ;;  %v14021_v40 = vld [vmem:[%s25095_s3 + $0x1c8] sm:$0xff] }
 0x3fd   :  { %25957 = vst [vmem:[#allocation162_spill] sm:$0xff] %v21670_v43  ;;  %25958 = vst [vmem:[#allocation165_spill] sm:$0xff] %v21673_v3  ;;  %v21676_v61 = vadd.f32 %v25959_v63, %v3886_v4  ;;  %v3976_v0 = vpop.f32.mrf.mxu0  ;;  %16380 = vmatprep.subr.mxu0 %v14021_v40  ;;  %v25961_v63 = vld [vmem:[#allocation173_spill] sm:$0xff]  ;;  %v3902_v43 = vadd.f32 %v21198_v18, %v21177_v9  ;;  %v25962_v3 = vld [vmem:[#allocation199_spill] sm:$0xff] }
 0x3fe   :  { %v7965_v39 = vrot.slane %v21668_v56, 1  ;;  %v3977_v27 = vadd.f32 %v21198_v18, %v3976_v0  ;;  %v21688_v23 = vpop.f32.mrf.mxu1  ;;  %16066 = vmatmul.mubr.msk.f32.gmra.mxu1 %vm5373_vm1, %v21663_v48  ;;  %16381 = vmatpush3.msra.mxu0 %v14021_v40  ;;  %v21701_v0 = vadd.f32 %v25961_v63, %v3889_v38 }
 0x3ff   :  { %25960 = vst [vmem:[#allocation161_spill] sm:$0xff] %v21676_v61  ;;  %v3978_v4 = vpop.f32.mrf.mxu0  ;;  %16068 = vmatprep.mubr.msk.f32.mxu1 %vm5373_vm1, %v21676_v61  ;;  %16382 = vmatprep.subr.mxu0 %v14020_v31  ;;  %v25965_v61 = vld [vmem:[#allocation170_spill] sm:$0xff] }
 0x400   :  { %v5057_v48 = vadd.f32 %v25962_v3, %v3977_v27  ;;  %v21706_v14 = vpop.f32.mrf.mxu1  ;;  %v21709_v4 = vsel %vm6284_vm2, %v7963_v60, %v7965_v39  ;;  %v21712_v40 = vadd.f32 %v25965_v61, %v3894_v47  ;;  %16383 = vmatpush3.msra.mxu0 %v14020_v31  ;;  %v25966_v47 = vld [vmem:[#allocation175_spill] sm:$0xff]  ;;  %v3918_v27 = vadd.f32 %v21198_v18, %v21270_v55  ;;  %v25971_v31 = vld [vmem:[#allocation204_spill] sm:$0xff] }
 0x401   :  { %25963 = vst [vmem:[#allocation198_spill] sm:$0xff] %v21706_v14  ;;  %25964 = vst [vmem:[#allocation167_spill] sm:$0xff] %v21709_v4  ;;  %v3981_v35 = vpop.f32.mrf.mxu0  ;;  %4159 = vmatmul.mubr.bf16.gmra.mxu0 %v17507_v36  ;;  %v21724_v61 = vadd.f32 %v25966_v47, %v3902_v43  ;;  %v17510_v43 = vld [vmem:[%s25092_s0 + $0xb58] ss:$12 sps:$4 sm:$0xff]  }
 0x402   :  { %v7967_v38 = vrot.slane %v5057_v48, 1  ;;  %v3982_v63 = vadd.f32 %v21198_v18, %v3981_v35  ;;  %v21717_v9 = vpop.f32.mrf.mxu1  ;;  %16069 = vmatmul.mubr.msk.f32.gmra.mxu1 %vm5373_vm1, %v21701_v0  ;;  %4166 = vmatprep.mubr.bf16.mxu0 %v17512_v62  ;;  %v25970_v48 = vld [vmem:[#allocation177_spill] sm:$0xff] }
 0x403   :  { %v3983_v3 = vpop.f32.mrf.mxu0  ;;  %16071 = vmatprep.mubr.msk.f32.mxu1 %vm5373_vm1, %v21712_v40  ;;  %25967 = vst [vmem:[#allocation201_spill] sm:$0xff] %v21724_v61  ;;  %v21734_v36 = vadd.f32 %v25970_v48, %v3905_v51  ;;  %v17515_v51 = vld [vmem:[%s25092_s0 + $0xb74] ss:$12 sps:$4 sm:$0xff]   ;;  %v25974_v48 = vld [vmem:[#allocation206_spill] sm:$0xff] }
 0x404   :  { %v21728_v60 = vpop.f32.mrf.mxu1  ;;  %v21731_v35 = vsel %vm6284_vm2, %v7965_v39, %v7967_v38  ;;  %v21742_v3 = vadd.f32 %v25971_v31, %v3982_v63  ;;  %v25972_v39 = vld [vmem:[#allocation174_spill] sm:$0xff]  ;;  %v3921_v63 = vadd.f32 %v21198_v18, %v21286_v25 }
 0x405   :  { %25968 = vst [vmem:[#allocation169_spill] sm:$0xff] %v21728_v60  ;;  %25969 = vst [vmem:[#allocation166_spill] sm:$0xff] %v21731_v35  ;;  %v3984_v62 = vpop.f32.mrf.mxu0  ;;  %v21755_v38 = vadd.f32 %v25972_v39, %v3910_v24  ;;  %v25976_v60 = vld [vmem:[#allocation180_spill] sm:$0xff] }
 0x406   :  { %v3985_v13 = vadd.f32 %v21198_v18, %v3984_v62  ;;  %v21745_v47 = vpop.f32.mrf.mxu1  ;;  %16072 = vmatmul.mubr.msk.f32.gmra.mxu1 %vm5373_vm1, %v21724_v61  ;;  %v21765_v14 = vadd.f32 %v25976_v60, %v3918_v27  ;;  %v7969_v4 = vrot.slane %v21742_v3, 1  ;;  %v25978_v60 = vld [vmem:[#allocation184_spill] sm:$0xff]  ;;  %v25980_v27 = vld [vmem:[#allocation202_spill] sm:$0xff] }
 0x407   :  { %v3986_v55 = vpop.f32.mrf.mxu0  ;;  %16074 = vmatprep.mubr.msk.f32.mxu1 %vm5373_vm1, %v21734_v36  ;;  %25973 = vst [vmem:[#allocation196_spill] sm:$0xff] %v21755_v38 }
 0x408   :  { %v21760_v62 = vadd.f32 %v25974_v48, %v3985_v13  ;;  %v21762_v31 = vpop.f32.mrf.mxu1  ;;  %25977 = vst [vmem:[#allocation173_spill] sm:$0xff] %v21765_v14  ;;  %v3926_v55 = vadd.f32 %v21198_v18, %v21312_v54  ;;  %v21779_v54 = vadd.f32 %v25978_v60, %v3921_v63 }
 0x409   :  { %25975 = vst [vmem:[#allocation171_spill] sm:$0xff] %v21762_v31  ;;  %v3989_v35 = vpop.f32.mrf.mxu0  ;;  %4167 = vmatmul.mubr.bf16.gmra.mxu0 %v17510_v43  ;;  %v25983_v31 = vld [vmem:[#allocation178_spill] sm:$0xff] }
 0x40a   :  { %v7970_v24 = vrot.slane %v21760_v62, 1  ;;  %v3990_v39 = vadd.f32 %v21198_v18, %v3989_v35  ;;  %v21772_v25 = vpop.f32.mrf.mxu1  ;;  %16075 = vmatmul.mubr.msk.f32.gmra.mxu1 %vm5373_vm1, %v21755_v38  ;;  %4173 = vmatprep.mubr.bf16.mxu0 %v17515_v51  ;;  %25979 = vst [vmem:[#allocation199_spill] sm:$0xff] %v21779_v54  ;;  %v21790_v61 = vadd.f32 %v25983_v31, %v3926_v55  ;;  %v17513_v51 = vld [vmem:[%s25092_s0 + $0xb70] ss:$12 sps:$4 sm:$0xff]   ;;  %v25984_v55 = vld [vmem:[#allocation205_spill] sm:$0xff] }
 0x40b   :  { %v3991_v13 = vpop.f32.mrf.mxu0  ;;  %16077 = vmatprep.mubr.msk.f32.mxu1 %vm5373_vm1, %v21765_v14 }
 0x40c   :  { %v21782_v43 = vadd.f32 %v25980_v27, %v3990_v39  ;;  %v21784_v48 = vpop.f32.mrf.mxu1  ;;  %v21787_v35 = vsel %vm6284_vm2, %v7969_v4, %v7970_v24  ;;  %v17518_v4 = vld [vmem:[%s25092_s0 + $0xb8c] ss:$12 sps:$4 sm:$0xff]  }
 0x40d   :  { %25981 = vst [vmem:[#allocation170_spill] sm:$0xff] %v21784_v48  ;;  %25982 = vst [vmem:[#allocation175_spill] sm:$0xff] %v21787_v35  ;;  %v3992_v38 = vpop.f32.mrf.mxu0 }
 0x40e   :  { %v7972_v13 = vrot.slane %v21782_v43, 1  ;;  %v3993_v63 = vadd.f32 %v21198_v18, %v3992_v38  ;;  %v21797_v60 = vpop.f32.mrf.mxu1  ;;  %16078 = vmatmul.mubr.msk.f32.gmra.mxu1 %vm5373_vm1, %v21779_v54 }
 0x40f   :  { %v3994_v31 = vpop.f32.mrf.mxu0  ;;  %16080 = vmatprep.mubr.msk.f32.mxu1 %vm5373_vm1, %v21790_v61 }
 0x410   :  { %v5073_v39 = vadd.f32 %v25984_v55, %v3993_v63  ;;  %v21807_v27 = vpop.f32.mrf.mxu1  ;;  %v21810_v48 = vsel %vm6284_vm2, %v7970_v24, %v7972_v13 }
 0x411   :  { %25985 = vst [vmem:[#allocation177_spill] sm:$0xff] %v21807_v27  ;;  %25986 = vst [vmem:[#allocation204_spill] sm:$0xff] %v21810_v48  ;;  %v3997_v38 = vpop.f32.mrf.mxu0  ;;  %4174 = vmatmul.mubr.bf16.gmra.mxu0 %v17513_v51  ;;  %v17516_v51 = vld [vmem:[%s25092_s0 + $0xb88] ss:$12 sps:$4 sm:$0xff]  }
 0x412   :  { %v7974_v35 = vrot.slane %v5073_v39, 1  ;;  %v3998_v14 = vadd.f32 %v21198_v18, %v3997_v38  ;;  %v21813_v54 = vpop.f32.mrf.mxu1  ;;  %16081 = vmatmul.mubr.msk.f32.gmra.mxu1 %vm5373_vm1, %v21391_v45  ;;  %4181 = vmatprep.mubr.bf16.mxu0 %v17518_v4  ;;  %v25989_v39 = vld [vmem:[#allocation209_spill] sm:$0xff] }
 0x413   :  { %v3999_v31 = vpop.f32.mrf.mxu0  ;;  %16083 = vmatprep.mubr.msk.f32.mxu1 %vm5373_vm1, %v21409_v44  ;;  %v17521_v44 = vld [vmem:[%s25092_s0 + $0xba4] ss:$12 sps:$4 sm:$0xff]  }
 0x414   :  { %v21819_v63 = vpop.f32.mrf.mxu1  ;;  %v21822_v24 = vsel %vm6284_vm2, %v7972_v13, %v7974_v35  ;;  %v5078_v38 = vadd.f32 %v25989_v39, %v3998_v14  ;;  %v25990_v13 = vld [vmem:[#allocation212_spill] sm:$0xff] }
 0x415   :  { %25987 = vst [vmem:[#allocation174_spill] sm:$0xff] %v21819_v63  ;;  %25988 = vst [vmem:[#allocation206_spill] sm:$0xff] %v21822_v24  ;;  %v4000_v55 = vpop.f32.mrf.mxu0 }
 0x416   :  { %v4001_v27 = vadd.f32 %v21198_v18, %v4000_v55  ;;  %v21829_v45 = vpop.f32.mrf.mxu1  ;;  %16084 = vmatmul.mubr.msk.f32.gmra.mxu1 %vm5373_vm1, %v21439_v26  ;;  %v7976_v55 = vrot.slane %v5078_v38, 1 }
 0x417   :  { %v4002_v35 = vpop.f32.mrf.mxu0  ;;  %16086 = vmatprep.mubr.msk.f32.mxu1 %vm5373_vm1, %v21513_v37  ;;  %v25992_v37 = vld [vmem:[#allocation207_spill] sm:$0xff] }
 0x418   :  { %v5081_v4 = vadd.f32 %v25990_v13, %v4001_v27  ;;  %v21839_v31 = vpop.f32.mrf.mxu1 }
 0x419   :  { %25991 = vst [vmem:[#allocation180_spill] sm:$0xff] %v21839_v31  ;;  %v4005_v14 = vpop.f32.mrf.mxu0  ;;  %4182 = vmatmul.mubr.bf16.gmra.mxu0 %v17516_v51 }
 0x41a   :  { %v7977_v39 = vrot.slane %v5081_v4, 1  ;;  %v4006_v63 = vadd.f32 %v21198_v18, %v4005_v14  ;;  %v21842_v24 = vpop.f32.mrf.mxu1  ;;  %16087 = vmatmul.mubr.msk.f32.gmra.mxu1 %vm5373_vm1, %v21531_v28  ;;  %4188 = vmatprep.mubr.bf16.mxu0 %v17521_v44  ;;  %v17519_v14 = vld [vmem:[%s25092_s0 + $0xba0] ss:$12 sps:$4 sm:$0xff]  }
 0x41b   :  { %v4007_v26 = vpop.f32.mrf.mxu0  ;;  %16089 = vmatprep.mubr.msk.f32.mxu1 %vm5373_vm1, %v21555_v49  ;;  %v17524_v49 = vld [vmem:[%s25092_s0 + $0xbbc] ss:$12 sps:$4 sm:$0xff]  }
 0x41c   :  { %v5086_v27 = vadd.f32 %v25992_v37, %v4006_v63  ;;  %v21849_v35 = vpop.f32.mrf.mxu1  ;;  %v21852_v51 = vsel %vm6284_vm2, %v7976_v55, %v7977_v39  ;;  %v25995_v55 = vld [vmem:[#allocation210_spill] sm:$0xff] }
 0x41d   :  { %25993 = vst [vmem:[#allocation184_spill] sm:$0xff] %v21849_v35  ;;  %25994 = vst [vmem:[#allocation202_spill] sm:$0xff] %v21852_v51  ;;  %v4008_v13 = vpop.f32.mrf.mxu0 }
 0x41e   :  { %v7979_v31 = vrot.slane %v5086_v27, 1  ;;  %v4009_v28 = vadd.f32 %v21198_v18, %v4008_v13  ;;  %v21858_v44 = vpop.f32.mrf.mxu1  ;;  %16090 = vmatmul.mubr.msk.f32.gmra.mxu1 %vm5373_vm1, %v21623_v1 }
 0x41f   :  { %v4010_v63 = vpop.f32.mrf.mxu0  ;;  %16092 = vmatprep.mubr.msk.f32.mxu1 %vm5373_vm1, %v21641_v42 }
 0x420   :  { %v5089_v26 = vadd.f32 %v25995_v55, %v4009_v28  ;;  %v21868_v37 = vpop.f32.mrf.mxu1  ;;  %v21871_v35 = vsel %vm6284_vm2, %v7977_v39, %v7979_v31 }
 0x421   :  { %v4013_v13 = vpop.f32.mrf.mxu0  ;;  %4189 = vmatmul.mubr.bf16.gmra.mxu0 %v17519_v14  ;;  %v17522_v14 = vld [vmem:[%s25092_s0 + $0xbb8] ss:$12 sps:$4 sm:$0xff]  }
 0x422   :  { %v7981_v51 = vrot.slane %v5089_v26, 1  ;;  %v21873_v48 = vpop.f32.mrf.mxu1  ;;  %16093 = vmatmul.mubr.msk.f32.gmra.mxu1 %vm5373_vm1, %v21668_v56  ;;  %4196 = vmatprep.mubr.bf16.mxu0 %v17524_v49  ;;  %v17527_v56 = vld [vmem:[%s25092_s0 + $0xbd4] ss:$12 sps:$4 sm:$0xff]   ;;  %v17525_v13 = vld [vmem:[%s25092_s0 + $0xbd0] ss:$12 sps:$4 sm:$0xff]  }
 0x423   :  { %v4014_v1 = vpop.f32.mrf.mxu0  ;;  %16095 = vmatprep.mubr.msk.f32.mxu1 %vm5373_vm1, %v21742_v3 }
 0x424   :  { %v21879_v42 = vpop.f32.mrf.mxu1  ;;  %v21882_v28 = vsel %vm6284_vm2, %v7979_v31, %v7981_v51  ;;  %v17530_v1 = vld [vmem:[%s25092_s0 + $0xbec] ss:$12 sps:$4 sm:$0xff]  }
 0x425   :  { %25996 = vst [vmem:[#allocation178_spill] sm:$0xff] %v21879_v42  ;;  %v4015_v39 = vpop.f32.mrf.mxu0 }
 0x426   :  { %v21887_v63 = vpop.f32.mrf.mxu1  ;;  %16096 = vmatmul.mubr.msk.f32.gmra.mxu1 %vm5373_vm1, %v21760_v62 }
 0x427   :  { %v4016_v3 = vpop.f32.mrf.mxu0  ;;  %16098 = vmatprep.mubr.msk.f32.mxu1 %vm5373_vm1, %v21782_v43 }
 0x428   :  { %v21896_v31 = vpop.f32.mrf.mxu1 }
 0x429   :  { %25997 = vst [vmem:[#allocation205_spill] sm:$0xff] %v21896_v31  ;;  %v4019_v51 = vpop.f32.mrf.mxu0  ;;  %4197 = vmatmul.mubr.bf16.gmra.mxu0 %v17522_v14  ;;  %v25999_v14 = vld [vmem:[#allocation93_spill] sm:$0xff]  ;;  %v26002_v31 = vld [vmem:[#allocation99_spill] sm:$0xff] }
 0x42a   :  { %v21898_v49 = vpop.f32.mrf.mxu1  ;;  %16099 = vmatmul.mubr.msk.f32.gmra.mxu1 %vm5373_vm1, %v5078_v38  ;;  %4203 = vmatprep.mubr.bf16.mxu0 %v17527_v56  ;;  %v6037_v56 = vadd.f32 %v21362_v2, %v25999_v14  ;;  %v17528_v2 = vld [vmem:[%s25092_s0 + $0xbe8] ss:$12 sps:$4 sm:$0xff]  }
 0x42b   :  { %v4020_v55 = vpop.f32.mrf.mxu0  ;;  %16101 = vmatprep.mubr.msk.f32.mxu1 %vm5373_vm1, %v5081_v4 }
 0x42c   :  { %v21902_v62 = vpop.f32.mrf.mxu1 }
 0x42d   :  { %25998 = vst [vmem:[#allocation209_spill] sm:$0xff] %v21902_v62  ;;  %v4021_v26 = vpop.f32.mrf.mxu0 }
 0x42e   :  { %v15927_v43 = vpop.f32.mrf.mxu1  ;;  %16102 = vmatmul.mubr.msk.f32.gmra.mxu1 %vm5373_vm1, %v5086_v27 }
 0x42f   :  { %v4022_v39 = vpop.f32.mrf.mxu0  ;;  %v26000_v43 = vld [vmem:[#allocation216_spill] sm:$0xff] }
 0x430   :  { %v6261_v38 = vpop.f32.mrf.mxu1  ;;  %v6047_v39 = vadd.f32 %v21394_v8, %v26002_v31  ;;  %v26005_v31 = vld [vmem:[#allocation104_spill] sm:$0xff] }
 0x431   :  { %v4025_v4 = vpop.f32.mrf.mxu0  ;;  %4204 = vmatmul.mubr.bf16.gmra.mxu0 %v17525_v13 }
 0x432   :  { %v4026_v3 = vadd.f32 %v21198_v18, %v4025_v4  ;;  %v15946_v51 = vpop.f32.mrf.mxu1  ;;  %4211 = vmatprep.mubr.bf16.mxu0 %v17530_v1  ;;  %v17533_v1 = vld [vmem:[%s25092_s0 + $0xc04] ss:$12 sps:$4 sm:$0xff]  }
 0x433   :  { %v21914_v55 = vadd.f32 %v15946_v51, %v6037_v56  ;;  %v4027_v26 = vpop.f32.mrf.mxu0 }
 0x434   :  { %v5106_v27 = vadd.f32 %v26000_v43, %v4026_v3  ;;  %v21917_v62 = vpop.f32.mrf.mxu1  ;;  %v26003_v3 = vld [vmem:[#allocation218_spill] sm:$0xff]  ;;  %v6057_v26 = vadd.f32 %v21424_v10, %v26005_v31 }
 0x435   :  { %26001 = vst [vmem:[#allocation212_spill] sm:$0xff] %v21917_v62  ;;  %v4028_v38 = vpop.f32.mrf.mxu0  ;;  %v17531_v10 = vld [vmem:[%s25092_s0 + $0xc00] ss:$12 sps:$4 sm:$0xff]  }
 0x436   :  { %v4029_v13 = vadd.f32 %v21198_v18, %v4028_v38  ;;  %v15949_v14 = vpop.f32.mrf.mxu1  ;;  %16120 = vmatprep.mubr.msk.f32.mxu1 %vm5373_vm1, %v5106_v27 }
 0x437   :  { %v21929_v56 = vadd.f32 %v15949_v14, %v6047_v39  ;;  %v4030_v4 = vpop.f32.mrf.mxu0  ;;  %v26006_v14 = vld [vmem:[#allocation214_spill] sm:$0xff] }
 0x438   :  { %v5109_v51 = vadd.f32 %v26003_v3, %v4029_v13  ;;  %v21932_v8 = vpop.f32.mrf.mxu1  ;;  %v26008_v13 = vld [vmem:[#allocation47_spill] sm:$0xff] }
 0x439   :  { %26004 = vst [vmem:[#allocation207_spill] sm:$0xff] %v21932_v8  ;;  %v4033_v43 = vpop.f32.mrf.mxu0  ;;  %4212 = vmatmul.mubr.bf16.gmra.mxu0 %v17528_v2  ;;  %v6067_v3 = vadd.f32 %v21459_v12, %v26008_v13 }
 0x43a   :  { %v4034_v38 = vadd.f32 %v21198_v18, %v4033_v43  ;;  %v15952_v42 = vpop.f32.mrf.mxu1  ;;  %16121 = vmatmul.mubr.msk.f32.vlgmr.msra.gmra.mxu1 %vm5373_vm1, %v5109_v51  ;;  %4218 = vmatprep.mubr.bf16.mxu0 %v17533_v1 }
 0x43b   :  { %v21938_v27 = vadd.f32 %v15952_v42, %v6057_v26  ;;  %v4035_v39 = vpop.f32.mrf.mxu0  ;;  %v17536_v42 = vld [vmem:[%s25092_s0 + $0xc1c] ss:$12 sps:$4 sm:$0xff]  }
 0x43c   :  { %v5114_v4 = vadd.f32 %v26006_v14, %v4034_v38  ;;  %v21941_v62 = vpop.f32.mrf.mxu1  ;;  %v26009_v26 = vld [vmem:[#allocation53_spill] sm:$0xff] }
 0x43d   :  { %26007 = vst [vmem:[#allocation210_spill] sm:$0xff] %v21941_v62  ;;  %v4036_v8 = vpop.f32.mrf.mxu0  ;;  %v6077_v12 = vadd.f32 %v21488_v15, %v26009_v26  ;;  %v17534_v15 = vld [vmem:[%s25092_s0 + $0xc18] ss:$12 sps:$4 sm:$0xff]  }
 0x43e   :  { %v15955_v2 = vpop.f32.mrf.mxu1  ;;  %16123 = vmatprep.mubr.msk.f32.mxu1 %vm5373_vm1, %v5114_v4  ;;  %v26010_v4 = vld [vmem:[#allocation221_spill] sm:$0xff] }
 0x43f   :  { %v21952_v1 = vadd.f32 %v15955_v2, %v6067_v3  ;;  %v4037_v51 = vpop.f32.mrf.mxu0  ;;  %v26012_v3 = vld [vmem:[#allocation117_spill] sm:$0xff] }
 0x440   :  { %v21954_v31 = vpop.f32.mrf.mxu1  ;;  %v6087_v2 = vadd.f32 %v21516_v33, %v26012_v3 }
 0x441   :  { %v4040_v8 = vpop.f32.mrf.mxu0  ;;  %4219 = vmatmul.mubr.bf16.gmra.mxu0 %v17531_v10 }
 0x442   :  { %v4041_v43 = vadd.f32 %v21198_v18, %v4040_v8  ;;  %v15958_v38 = vpop.f32.mrf.mxu1  ;;  %4226 = vmatprep.mubr.bf16.mxu0 %v17536_v42  ;;  %v17539_v42 = vld [vmem:[%s25092_s0 + $0xc34] ss:$12 sps:$4 sm:$0xff]  }
 0x443   :  { %v21959_v39 = vadd.f32 %v15958_v38, %v6077_v12  ;;  %v4042_v14 = vpop.f32.mrf.mxu0 }
 0x444   :  { %v5121_v13 = vadd.f32 %v26010_v4, %v4041_v43  ;;  %v21962_v62 = vpop.f32.mrf.mxu1  ;;  %v26013_v43 = vld [vmem:[#allocation222_spill] sm:$0xff]  ;;  %v26015_v14 = vld [vmem:[#allocation124_spill] sm:$0xff] }
 0x445   :  { %26011 = vst [vmem:[#allocation93_spill] sm:$0xff] %v21962_v62  ;;  %v4043_v51 = vpop.f32.mrf.mxu0  ;;  %v6097_v4 = vadd.f32 %v21543_v29, %v26015_v14  ;;  %v26018_v29 = vld [vmem:[#allocation136_spill] sm:$0xff] }
 0x446   :  { %v4044_v10 = vadd.f32 %v21198_v18, %v4043_v51  ;;  %v15961_v26 = vpop.f32.mrf.mxu1  ;;  %16124 = vmatmul.mubr.msk.f32.gmra.mxu1 %vm5373_vm1, %v5121_v13  ;;  %v21984_v18 = vld [vmem:[%s25094_s2] ss:$0 sm:$0xff] }
 0x447   :  { %v21974_v12 = vadd.f32 %v15961_v26, %v6087_v2  ;;  %v4045_v8 = vpop.f32.mrf.mxu0  ;;  %v26016_v26 = vld [vmem:[#allocation219_spill] sm:$0xff] }
 0x448   :  { %v5124_v38 = vadd.f32 %v26013_v43, %v4044_v10  ;;  %v21977_v33 = vpop.f32.mrf.mxu1 }
 0x449   :  { %26014 = vst [vmem:[#allocation216_spill] sm:$0xff] %v21977_v33  ;;  %v4048_v3 = vpop.f32.mrf.mxu0  ;;  %4227 = vmatmul.mubr.bf16.gmra.mxu0 %v17534_v15  ;;  %v6107_v15 = vadd.f32 %v21572_v7, %v26018_v29  ;;  %v17537_v33 = vld [vmem:[%s25092_s0 + $0xc30] ss:$12 sps:$4 sm:$0xff]   ;;  %v6117_v7 = vadd.f32 %v21598_v6, %v20823_v30  ;;  %v17540_v6 = vld [vmem:[%s25092_s0 + $0xc48] ss:$12 sps:$4 sm:$0xff]  }
 0x44a   :  { %v4049_v13 = vadd.f32 %v21984_v18, %v4048_v3  ;;  %v15964_v51 = vpop.f32.mrf.mxu1  ;;  %16126 = vmatprep.mubr.msk.f32.mxu1 %vm5373_vm1, %v5124_v38  ;;  %4233 = vmatprep.mubr.bf16.mxu0 %v17539_v42  ;;  %v17542_v42 = vld [vmem:[%s25092_s0 + $0xc4c] ss:$12 sps:$4 sm:$0xff]  }
 0x44b   :  { %v21988_v2 = vadd.f32 %v15964_v51, %v6097_v4  ;;  %v4050_v10 = vpop.f32.mrf.mxu0 }
 0x44c   :  { %v5129_v8 = vadd.f32 %v26016_v26, %v4049_v13  ;;  %v21991_v43 = vpop.f32.mrf.mxu1 }
 0x44d   :  { %26017 = vst [vmem:[#allocation99_spill] sm:$0xff] %v21991_v43  ;;  %v4051_v14 = vpop.f32.mrf.mxu0 }
 0x44e   :  { %v15967_v3 = vpop.f32.mrf.mxu1  ;;  %16127 = vmatmul.mubr.msk.f32.gmra.mxu1 %vm5373_vm1, %v5129_v8  ;;  %v26020_v14 = vld [vmem:[#allocation225_spill] sm:$0xff] }
 0x44f   :  { %v22002_v38 = vadd.f32 %v15967_v3, %v6107_v15  ;;  %v4052_v4 = vpop.f32.mrf.mxu0  ;;  %v6127_v15 = vadd.f32 %v21626_v11, %v20862_v34  ;;  %v6137_v11 = vadd.f32 %v21653_v17, %v20903_v53  ;;  %v17543_v53 = vld [vmem:[%s25092_s0 + $0xc60] ss:$12 sps:$4 sm:$0xff]  }
 0x450   :  { %v22004_v13 = vpop.f32.mrf.mxu1 }
 0x451   :  { %26019 = vst [vmem:[#allocation218_spill] sm:$0xff] %v22004_v13  ;;  %v4055_v51 = vpop.f32.mrf.mxu0  ;;  %4234 = vmatmul.mubr.bf16.gmra.mxu0 %v17537_v33 }
 0x452   :  { %v4056_v10 = vadd.f32 %v21984_v18, %v4055_v51  ;;  %v15970_v26 = vpop.f32.mrf.mxu1  ;;  %4241 = vmatprep.mubr.bf16.mxu0 %v17542_v42  ;;  %v17545_v42 = vld [vmem:[%s25092_s0 + $0xc64] ss:$12 sps:$4 sm:$0xff]  }
 0x453   :  { %v22009_v29 = vadd.f32 %v15970_v26, %v6117_v7  ;;  %v4057_v8 = vpop.f32.mrf.mxu0  ;;  %v26022_v51 = vld [vmem:[#allocation227_spill] sm:$0xff] }
 0x454   :  { %v5136_v43 = vadd.f32 %v26020_v14, %v4056_v10  ;;  %v22012_v62 = vpop.f32.mrf.mxu1 }
 0x455   :  { %26021 = vst [vmem:[#allocation104_spill] sm:$0xff] %v22012_v62  ;;  %v4058_v3 = vpop.f32.mrf.mxu0 }
 0x456   :  { %v4059_v30 = vadd.f32 %v21984_v18, %v4058_v3  ;;  %v15973_v33 = vpop.f32.mrf.mxu1  ;;  %16129 = vmatprep.mubr.msk.f32.mxu1 %vm5373_vm1, %v5136_v43  ;;  %v26024_v3 = vld [vmem:[#allocation223_spill] sm:$0xff] }
 0x457   :  { %v22024_v4 = vadd.f32 %v15973_v33, %v6127_v15  ;;  %v4060_v7 = vpop.f32.mrf.mxu0 }
 0x458   :  { %v5139_v10 = vadd.f32 %v26022_v51, %v4059_v30  ;;  %v22027_v34 = vpop.f32.mrf.mxu1  ;;  %v6147_v30 = vadd.f32 %v21688_v23, %v20936_v5  ;;  %v6157_v5 = vadd.f32 %v21717_v9, %v20968_v59  ;;  %v17546_v59 = vld [vmem:[%s25092_s0 + $0xc78] ss:$12 sps:$4 sm:$0xff]  }
 0x459   :  { %26023 = vst [vmem:[#allocation214_spill] sm:$0xff] %v22027_v34  ;;  %v4063_v26 = vpop.f32.mrf.mxu0  ;;  %4242 = vmatmul.mubr.bf16.gmra.mxu0 %v17540_v6  ;;  %v17548_v6 = vld [vmem:[%s25092_s0 + $0xc7c] ss:$12 sps:$4 sm:$0xff]  }
 0x45a   :  { %v4064_v8 = vadd.f32 %v21984_v18, %v4063_v26  ;;  %v15976_v14 = vpop.f32.mrf.mxu1  ;;  %16130 = vmatmul.mubr.msk.f32.gmra.mxu1 %vm5373_vm1, %v5139_v10  ;;  %4248 = vmatprep.mubr.bf16.mxu0 %v17545_v42 }
 0x45b   :  { %v22033_v43 = vadd.f32 %v15976_v14, %v6137_v11  ;;  %v4065_v15 = vpop.f32.mrf.mxu0 }
 0x45c   :  { %v5144_v33 = vadd.f32 %v26024_v3, %v4064_v8  ;;  %v22036_v7 = vpop.f32.mrf.mxu1  ;;  %v26027_v3 = vld [vmem:[#allocation230_spill] sm:$0xff] }
 0x45d   :  { %26025 = vst [vmem:[#allocation47_spill] sm:$0xff] %v22036_v7  ;;  %v4066_v51 = vpop.f32.mrf.mxu0 }
 0x45e   :  { %v15979_v17 = vpop.f32.mrf.mxu1  ;;  %16132 = vmatprep.mubr.msk.f32.mxu1 %vm5373_vm1, %v5144_v33 }
 0x45f   :  { %v22047_v42 = vadd.f32 %v15979_v17, %v6147_v30  ;;  %v4067_v10 = vpop.f32.mrf.mxu0  ;;  %v6167_v30 = vadd.f32 %v21745_v47, %v21001_v58  ;;  %v6177_v47 = vadd.f32 %v21772_v25, %v21036_v21  ;;  %v17549_v21 = vld [vmem:[%s25092_s0 + $0xc90] ss:$12 sps:$4 sm:$0xff]  }
 0x460   :  { %v22049_v11 = vpop.f32.mrf.mxu1 }
 0x461   :  { %26026 = vst [vmem:[#allocation53_spill] sm:$0xff] %v22049_v11  ;;  %v4070_v23 = vpop.f32.mrf.mxu0  ;;  %4249 = vmatmul.mubr.bf16.gmra.mxu0 %v17543_v53 }
 0x462   :  { %v4071_v26 = vadd.f32 %v21984_v18, %v4070_v23  ;;  %v15982_v8 = vpop.f32.mrf.mxu1  ;;  %4256 = vmatprep.mubr.bf16.mxu0 %v17548_v6  ;;  %v17551_v6 = vld [vmem:[%s25092_s0 + $0xc94] ss:$12 sps:$4 sm:$0xff]  }
 0x463   :  { %v22054_v14 = vadd.f32 %v15982_v8, %v6157_v5  ;;  %v4072_v15 = vpop.f32.mrf.mxu0  ;;  %v26029_v23 = vld [vmem:[#allocation231_spill] sm:$0xff] }
 0x464   :  { %v5151_v33 = vadd.f32 %v26027_v3, %v4071_v26  ;;  %v22057_v51 = vpop.f32.mrf.mxu1 }
 0x465   :  { %26028 = vst [vmem:[#allocation221_spill] sm:$0xff] %v22057_v51  ;;  %v4073_v17 = vpop.f32.mrf.mxu0  ;;  %v26088_v51 = vld [vmem:[#allocation265_spill] sm:$0xff] }
 0x466   :  { %v4074_v9 = vadd.f32 %v21984_v18, %v4073_v17  ;;  %v15985_v53 = vpop.f32.mrf.mxu1  ;;  %16133 = vmatmul.mubr.msk.f32.gmra.mxu1 %vm5373_vm1, %v5151_v33  ;;  %v26031_v17 = vld [vmem:[#allocation228_spill] sm:$0xff] }
 0x467   :  { %v22069_v10 = vadd.f32 %v15985_v53, %v6167_v30  ;;  %v4075_v5 = vpop.f32.mrf.mxu0 }
 0x468   :  { %v5154_v26 = vadd.f32 %v26029_v23, %v4074_v9  ;;  %v22072_v58 = vpop.f32.mrf.mxu1  ;;  %v6187_v9 = vadd.f32 %v21797_v60, %v21066_v19  ;;  %v6197_v19 = vadd.f32 %v21813_v54, %v21101_v52  ;;  %v17552_v52 = vld [vmem:[%s25092_s0 + $0xca8] ss:$12 sps:$4 sm:$0xff]  }
 0x469   :  { %26030 = vst [vmem:[#allocation117_spill] sm:$0xff] %v22072_v58  ;;  %v4078_v8 = vpop.f32.mrf.mxu0  ;;  %4257 = vmatmul.mubr.bf16.gmra.mxu0 %v17546_v59  ;;  %v17554_v59 = vld [vmem:[%s25092_s0 + $0xcac] ss:$12 sps:$4 sm:$0xff]  }
 0x46a   :  { %v4079_v15 = vadd.f32 %v21984_v18, %v4078_v8  ;;  %v15988_v3 = vpop.f32.mrf.mxu1  ;;  %16135 = vmatprep.mubr.msk.f32.mxu1 %vm5373_vm1, %v5154_v26  ;;  %4263 = vmatprep.mubr.bf16.mxu0 %v17551_v6 }
 0x46b   :  { %v22078_v33 = vadd.f32 %v15988_v3, %v6177_v47  ;;  %v4080_v30 = vpop.f32.mrf.mxu0 }
 0x46c   :  { %v5159_v53 = vadd.f32 %v26031_v17, %v4079_v15  ;;  %v22081_v5 = vpop.f32.mrf.mxu1  ;;  %v26034_v17 = vld [vmem:[#allocation234_spill] sm:$0xff] }
 0x46d   :  { %26032 = vst [vmem:[#allocation222_spill] sm:$0xff] %v22081_v5  ;;  %v4081_v23 = vpop.f32.mrf.mxu0  ;;  %v26084_v5 = vld [vmem:[#allocation260_spill] sm:$0xff] }
 0x46e   :  { %v15991_v25 = vpop.f32.mrf.mxu1  ;;  %16136 = vmatmul.mubr.msk.f32.gmra.mxu1 %vm5373_vm1, %v5159_v53 }
 0x46f   :  { %v22092_v6 = vadd.f32 %v15991_v25, %v6187_v9  ;;  %v4082_v26 = vpop.f32.mrf.mxu0  ;;  %v6207_v9 = vadd.f32 %v21829_v45, %v21134_v32  ;;  %v6217_v32 = vadd.f32 %v21842_v24, %v21175_v20  ;;  %v6227_v20 = vadd.f32 %v21858_v44, %v21210_v50  ;;  %v26041_v50 = vld [vmem:[#allocation183_spill] sm:$0xff] }
 0x470   :  { %v22094_v47 = vpop.f32.mrf.mxu1 }
 0x471   :  { %26033 = vst [vmem:[#allocation124_spill] sm:$0xff] %v22094_v47  ;;  %v4085_v60 = vpop.f32.mrf.mxu0  ;;  %4264 = vmatmul.mubr.bf16.gmra.mxu0 %v17549_v21 }
 0x472   :  { %v4086_v8 = vadd.f32 %v21984_v18, %v4085_v60  ;;  %v15994_v15 = vpop.f32.mrf.mxu1  ;;  %4269 = vmatprep.mubr.bf16.mxu0 %v17554_v59 }
 0x473   :  { %v22099_v3 = vadd.f32 %v15994_v15, %v6197_v19  ;;  %v4087_v30 = vpop.f32.mrf.mxu0  ;;  %v26036_v19 = vld [vmem:[#allocation236_spill] sm:$0xff] }
 0x474   :  { %v5166_v53 = vadd.f32 %v26034_v17, %v4086_v8  ;;  %v22102_v23 = vpop.f32.mrf.mxu1  ;;  %v26038_v17 = vld [vmem:[#allocation179_spill] sm:$0xff] }
 0x475   :  { %26035 = vst [vmem:[#allocation219_spill] sm:$0xff] %v22102_v23  ;;  %v4088_v25 = vpop.f32.mrf.mxu0  ;;  %v26077_v23 = vld [vmem:[#allocation247_spill] sm:$0xff] }
 0x476   :  { %v4089_v54 = vadd.f32 %v21984_v18, %v4088_v25  ;;  %v15997_v21 = vpop.f32.mrf.mxu1  ;;  %16138 = vmatprep.mubr.msk.f32.mxu1 %vm5373_vm1, %v5166_v53  ;;  %v26039_v25 = vld [vmem:[#allocation232_spill] sm:$0xff] }
 0x477   :  { %v22111_v59 = vadd.f32 %v15997_v21, %v6207_v9  ;;  %v4090_v26 = vpop.f32.mrf.mxu0 }
 0x478   :  { %v5169_v60 = vadd.f32 %v26036_v19, %v4089_v54  ;;  %v22114_v8 = vpop.f32.mrf.mxu1 }
 0x479   :  { %26037 = vst [vmem:[#allocation136_spill] sm:$0xff] %v22114_v8  ;;  %v4093_v45 = vpop.f32.mrf.mxu0  ;;  %4270 = vmatmul.mubr.bf16.gmra.mxu0 %v17552_v52 }
 0x47a   :  { %v4094_v15 = vadd.f32 %v21984_v18, %v4093_v45  ;;  %v16000_v30 = vpop.f32.mrf.mxu1  ;;  %16139 = vmatmul.mubr.msk.f32.gmra.mxu1 %vm5373_vm1, %v5169_v60  ;;  %16384 = vmatprep.mubr.msk.f32.mxu0 %vm5373_vm1, %v26038_v17 }
 0x47b   :  { %v22122_v53 = vadd.f32 %v16000_v30, %v6217_v32  ;;  %v4095_v9 = vpop.f32.mrf.mxu0  ;;  %v6237_v32 = vadd.f32 %v21873_v48, %v21242_v22  ;;  %v26040_v30 = vld [vmem:[#allocation181_spill] sm:$0xff]  ;;  %v6247_v22 = vadd.f32 %v21887_v63, %v21275_v41  ;;  %v6257_v41 = vadd.f32 %v21898_v49, %v21308_v46  ;;  %v26052_v49 = vld [vmem:[#allocation200_spill] sm:$0xff] }
 0x47c   :  { %v5174_v54 = vadd.f32 %v26039_v25, %v4094_v15  ;;  %v22125_v21 = vpop.f32.mrf.mxu1  ;;  %v26042_v25 = vld [vmem:[#allocation239_spill] sm:$0xff] }
 0x47d   :  { %v4096_v24 = vpop.f32.mrf.mxu0 }
 0x47e   :  { %v16003_v52 = vpop.f32.mrf.mxu1  ;;  %16141 = vmatprep.mubr.msk.f32.mxu1 %vm5373_vm1, %v5174_v54  ;;  %v26044_v24 = vld [vmem:[#allocation186_spill] sm:$0xff] }
 0x47f   :  { %v22130_v26 = vadd.f32 %v16003_v52, %v6227_v20  ;;  %v4097_v19 = vpop.f32.mrf.mxu0 }
 0x480   :  { %v22132_v60 = vpop.f32.mrf.mxu1 }
 0x481   :  { %v4100_v45 = vpop.f32.mrf.mxu0  ;;  %16385 = vmatmul.mubr.msk.f32.vlgmr.msra.gmra.mxu0 %vm5373_vm1, %v26040_v30 }
 0x482   :  { %v4101_v15 = vadd.f32 %v21984_v18, %v4100_v45  ;;  %v16006_v17 = vpop.f32.mrf.mxu1  ;;  %16387 = vmatprep.mubr.msk.f32.mxu0 %vm5373_vm1, %v26041_v50  ;;  %v26045_v45 = vld [vmem:[#allocation189_spill] sm:$0xff] }
 0x483   :  { %v22141_v44 = vadd.f32 %v16006_v17, %v6237_v32  ;;  %v4102_v9 = vpop.f32.mrf.mxu0 }
 0x484   :  { %v5181_v54 = vadd.f32 %v26042_v25, %v4101_v15  ;;  %v22144_v20 = vpop.f32.mrf.mxu1  ;;  %v26046_v15 = vld [vmem:[#allocation240_spill] sm:$0xff] }
 0x485   :  { %26043 = vst [vmem:[#allocation225_spill] sm:$0xff] %v22144_v20  ;;  %v4103_v48 = vpop.f32.mrf.mxu0  ;;  %16388 = vmatmul.mubr.msk.f32.gmra.mxu0 %vm5373_vm1, %v26044_v24  ;;  %v26048_v9 = vld [vmem:[#allocation192_spill] sm:$0xff] }
 0x486   :  { %v4104_v52 = vadd.f32 %v21984_v18, %v4103_v48  ;;  %v16009_v19 = vpop.f32.mrf.mxu1  ;;  %16142 = vmatmul.mubr.msk.f32.gmra.mxu1 %vm5373_vm1, %v5181_v54  ;;  %16390 = vmatprep.mubr.msk.f32.mxu0 %vm5373_vm1, %v26045_v45  ;;  %v26049_v48 = vld [vmem:[#allocation197_spill] sm:$0xff] }
 0x487   :  { %v22154_v32 = vadd.f32 %v16009_v19, %v6247_v22  ;;  %v4105_v30 = vpop.f32.mrf.mxu0 }
 0x488   :  { %v5184_v17 = vadd.f32 %v26046_v15, %v4104_v52  ;;  %v22157_v50 = vpop.f32.mrf.mxu1  ;;  %v26050_v52 = vld [vmem:[#allocation237_spill] sm:$0xff]  ;;  %v26053_v15 = vld [vmem:[#allocation203_spill] sm:$0xff] }
 0x489   :  { %26047 = vst [vmem:[#allocation227_spill] sm:$0xff] %v22157_v50  ;;  %v4108_v63 = vpop.f32.mrf.mxu0  ;;  %16391 = vmatmul.mubr.msk.f32.gmra.mxu0 %vm5373_vm1, %v26048_v9 }
 0x48a   :  { %v4109_v25 = vadd.f32 %v21984_v18, %v4108_v63  ;;  %v16012_v54 = vpop.f32.mrf.mxu1  ;;  %16144 = vmatprep.mubr.msk.f32.mxu1 %vm5373_vm1, %v5184_v17  ;;  %16393 = vmatprep.mubr.msk.f32.mxu0 %vm5373_vm1, %v26049_v48  ;;  %v26055_v48 = vld [vmem:[#allocation211_spill] sm:$0xff] }
 0x48b   :  { %v22167_v22 = vadd.f32 %v16012_v54, %v6257_v41  ;;  %v4110_v24 = vpop.f32.mrf.mxu0  ;;  %v26054_v41 = vld [vmem:[#allocation208_spill] sm:$0xff] }
 0x48c   :  { %v5189_v19 = vadd.f32 %v26050_v52, %v4109_v25  ;;  %v22170_v45 = vpop.f32.mrf.mxu1 }
 0x48d   :  { %26051 = vst [vmem:[#allocation223_spill] sm:$0xff] %v22170_v45  ;;  %v4111_v46 = vpop.f32.mrf.mxu0  ;;  %16394 = vmatmul.mubr.msk.f32.gmra.mxu0 %vm5373_vm1, %v26052_v49  ;;  %v26063_v45 = vld [vmem:[#allocation224_spill] sm:$0xff] }
 0x48e   :  { %v16015_v30 = vpop.f32.mrf.mxu1  ;;  %16145 = vmatmul.mubr.msk.f32.gmra.mxu1 %vm5373_vm1, %v5189_v19  ;;  %16396 = vmatprep.mubr.msk.f32.mxu0 %vm5373_vm1, %v26053_v15  ;;  %v26056_v19 = vld [vmem:[#allocation243_spill] sm:$0xff]  ;;  %v26057_v15 = vld [vmem:[#allocation213_spill] sm:$0xff] }
 0x48f   :  { %v4112_v17 = vpop.f32.mrf.mxu0 }
 0x490   :  { %v6798_v63 = vpop.f32.mrf.mxu1 }
 0x491   :  { %v4115_v9 = vpop.f32.mrf.mxu0  ;;  %16397 = vmatmul.mubr.msk.f32.gmra.mxu0 %vm5373_vm1, %v26054_v41 }
 0x492   :  { %v4116_v25 = vadd.f32 %v21984_v18, %v4115_v9  ;;  %v16034_v54 = vpop.f32.mrf.mxu1  ;;  %16399 = vmatprep.mubr.msk.f32.mxu0 %vm5373_vm1, %v26055_v48  ;;  %v26058_v9 = vld [vmem:[#allocation215_spill] sm:$0xff] }
 0x493   :  { %v22183_v24 = vadd.f32 %v16034_v54, %v21914_v55  ;;  %v4117_v52 = vpop.f32.mrf.mxu0  ;;  %v26059_v54 = vld [vmem:[#allocation245_spill] sm:$0xff] }
 0x494   :  { %v5196_v46 = vadd.f32 %v26056_v19, %v4116_v25  ;;  %v22186_v49 = vpop.f32.mrf.mxu1  ;;  %v26060_v19 = vld [vmem:[#allocation217_spill] sm:$0xff] }
 0x495   :  { %v4118_v30 = vpop.f32.mrf.mxu0  ;;  %16400 = vmatmul.mubr.msk.f32.gmra.mxu0 %vm5373_vm1, %v26057_v15 }
 0x496   :  { %v4119_v17 = vadd.f32 %v21984_v18, %v4118_v30  ;;  %v16037_v63 = vpop.f32.mrf.mxu1  ;;  %16147 = vmatprep.mubr.msk.f32.mxu1 %vm5373_vm1, %v5196_v46  ;;  %16402 = vmatprep.mubr.msk.f32.mxu0 %vm5373_vm1, %v26058_v9  ;;  %v26061_v46 = vld [vmem:[#allocation220_spill] sm:$0xff]  ;;  %v26062_v9 = vld [vmem:[#allocation241_spill] sm:$0xff] }
 0x497   :  { %v22195_v55 = vadd.f32 %v16037_v63, %v21929_v56  ;;  %v4120_v41 = vpop.f32.mrf.mxu0 }
 0x498   :  { %v5199_v25 = vadd.f32 %v26059_v54, %v4119_v17  ;;  %v22198_v48 = vpop.f32.mrf.mxu1 }
 0x499   :  { %v4123_v52 = vpop.f32.mrf.mxu0  ;;  %16403 = vmatmul.mubr.msk.f32.gmra.mxu0 %vm5373_vm1, %v26060_v19 }
 0x49a   :  { %v4124_v30 = vadd.f32 %v21984_v18, %v4123_v52  ;;  %v16040_v15 = vpop.f32.mrf.mxu1  ;;  %16148 = vmatmul.mubr.msk.f32.gmra.mxu1 %vm5373_vm1, %v5199_v25  ;;  %16405 = vmatprep.mubr.msk.f32.mxu0 %vm5373_vm1, %v26061_v46  ;;  %v26064_v52 = vld [vmem:[#allocation226_spill] sm:$0xff] }
 0x49b   :  { %v22207_v56 = vadd.f32 %v16040_v15, %v21938_v27  ;;  %v4125_v63 = vpop.f32.mrf.mxu0 }
 0x49c   :  { %v5204_v17 = vadd.f32 %v26062_v9, %v4124_v30  ;;  %v22210_v41 = vpop.f32.mrf.mxu1  ;;  %v26065_v30 = vld [vmem:[#allocation229_spill] sm:$0xff] }
 0x49d   :  { %v4126_v54 = vpop.f32.mrf.mxu0  ;;  %16406 = vmatmul.mubr.msk.f32.gmra.mxu0 %vm5373_vm1, %v26063_v45  ;;  %v26066_v45 = vld [vmem:[#allocation233_spill] sm:$0xff] }
 0x49e   :  { %v16043_v19 = vpop.f32.mrf.mxu1  ;;  %16150 = vmatprep.mubr.msk.f32.mxu1 %vm5373_vm1, %v5204_v17  ;;  %16408 = vmatprep.mubr.msk.f32.mxu0 %vm5373_vm1, %v26064_v52  ;;  %v13915_v17 = vld [vmem:[%s25095_s3 + $0x178] sm:$0xff] }
 0x49f   :  { %v22218_v25 = vadd.f32 %v16043_v19, %v21952_v1  ;;  %v4127_v27 = vpop.f32.mrf.mxu0  ;;  %16192 = vmatprep.subr.mxu1 %v13915_v17  ;;  %v26067_v19 = vld [vmem:[#allocation248_spill] sm:$0xff] }
 0x4a0   :  { %v22220_v15 = vpop.f32.mrf.mxu1  ;;  %16193 = vmatpush3.msra.mxu1 %v13915_v17 }
 0x4a1   :  { %v4130_v46 = vpop.f32.mrf.mxu0  ;;  %16409 = vmatmul.mubr.msk.f32.gmra.mxu0 %vm5373_vm1, %v26065_v30 }
 0x4a2   :  { %v4131_v63 = vadd.f32 %v21984_v18, %v4130_v46  ;;  %v16046_v9 = vpop.f32.mrf.mxu1  ;;  %16411 = vmatprep.mubr.msk.f32.mxu0 %vm5373_vm1, %v26066_v45  ;;  %v13914_v46 = vld [vmem:[%s25095_s3 + $0x170] sm:$0xff] }
 0x4a3   :  { %v22231_v1 = vadd.f32 %v16046_v9, %v21959_v39  ;;  %v4132_v54 = vpop.f32.mrf.mxu0  ;;  %v26069_v45 = vld [vmem:[#allocation235_spill] sm:$0xff]  ;;  %16194 = vmatprep.subr.mxu1 %v13914_v46  ;;  %v26070_v9 = vld [vmem:[#allocation238_spill] sm:$0xff] }
 0x4a4   :  { %v5211_v52 = vadd.f32 %v26067_v19, %v4131_v63  ;;  %v22234_v27 = vpop.f32.mrf.mxu1  ;;  %v13913_v63 = vld [vmem:[%s25095_s3 + $0x168] sm:$0xff]  ;;  %16195 = vmatpush3.msra.mxu1 %v13914_v46  ;;  %v26074_v46 = vld [vmem:[#allocation244_spill] sm:$0xff] }
 0x4a5   :  { %26068 = vst [vmem:[#allocation230_spill] sm:$0xff] %v22234_v27  ;;  %v4133_v30 = vpop.f32.mrf.mxu0  ;;  %16412 = vmatmul.mubr.msk.f32.gmra.mxu0 %vm5373_vm1, %v26069_v45  ;;  %v26071_v19 = vld [vmem:[#allocation249_spill] sm:$0xff]  ;;  %16196 = vmatprep.subr.mxu1 %v13913_v63 }
 0x4a6   :  { %v4134_v50 = vadd.f32 %v21984_v18, %v4133_v30  ;;  %v16049_v39 = vpop.f32.mrf.mxu1  ;;  %16151 = vmatmul.mubr.msk.f32.gmra.mxu1 %vm5373_vm1, %v5211_v52  ;;  %16414 = vmatprep.mubr.msk.f32.mxu0 %vm5373_vm1, %v26070_v9  ;;  %v13912_v52 = vld [vmem:[%s25095_s3 + $0x160] sm:$0xff]  ;;  %v26073_v9 = vld [vmem:[#allocation242_spill] sm:$0xff] }
 0x4a7   :  { %v22249_v17 = vadd.f32 %v16049_v39, %v21974_v12  ;;  %v4135_v54 = vpop.f32.mrf.mxu0  ;;  %16197 = vmatpush3.msra.mxu1 %v13913_v63 }
 0x4a8   :  { %v5214_v45 = vadd.f32 %v26071_v19, %v4134_v50  ;;  %v22252_v20 = vpop.f32.mrf.mxu1  ;;  %v13911_v50 = vld [vmem:[%s25095_s3 + $0x158] sm:$0xff]  ;;  %16198 = vmatprep.subr.mxu1 %v13912_v52  ;;  %v26075_v19 = vld [vmem:[#allocation246_spill] sm:$0xff] }
 0x4a9   :  { %26072 = vst [vmem:[#allocation231_spill] sm:$0xff] %v22252_v20  ;;  %v4138_v30 = vpop.f32.mrf.mxu0  ;;  %16415 = vmatmul.mubr.msk.f32.gmra.mxu0 %vm5373_vm1, %v26073_v9  ;;  %16199 = vmatpush3.msra.mxu1 %v13912_v52 }
 0x4aa   :  { %v4139_v8 = vadd.f32 %v21984_v18, %v4138_v30  ;;  %v16052_v12 = vpop.f32.mrf.mxu1  ;;  %16153 = vmatprep.mubr.msk.f32.mxu1 %vm5373_vm1, %v5214_v45  ;;  %16417 = vmatprep.mubr.msk.f32.mxu0 %vm5373_vm1, %v26074_v46  ;;  %v13910_v45 = vld [vmem:[%s25095_s3 + $0x150] sm:$0xff] }
 0x4ab   :  { %v22267_v39 = vadd.f32 %v16052_v12, %v21988_v2  ;;  %v4140_v54 = vpop.f32.mrf.mxu0  ;;  %16200 = vmatprep.subr.mxu1 %v13911_v50  ;;  %v26078_v2 = vld [vmem:[#allocation251_spill] sm:$0xff] }
 0x4ac   :  { %v5219_v9 = vadd.f32 %v26075_v19, %v4139_v8  ;;  %v22270_v63 = vpop.f32.mrf.mxu1  ;;  %16201 = vmatpush3.msra.mxu1 %v13911_v50  ;;  %v26080_v19 = vld [vmem:[#allocation253_spill] sm:$0xff]  ;;  %v26081_v50 = vld [vmem:[#allocation256_spill] sm:$0xff] }
 0x4ad   :  { %26076 = vst [vmem:[#allocation228_spill] sm:$0xff] %v22270_v63  ;;  %v4141_v30 = vpop.f32.mrf.mxu0  ;;  %16418 = vmatmul.mubr.msk.f32.gmra.mxu0 %vm5373_vm1, %v26077_v23  ;;  %v13909_v23 = vld [vmem:[%s25095_s3 + $0x148] sm:$0xff]  ;;  %16202 = vmatprep.subr.mxu1 %v13910_v45 }
 0x4ae   :  { %v16055_v46 = vpop.f32.mrf.mxu1  ;;  %16154 = vmatmul.mubr.msk.f32.gmra.mxu1 %vm5373_vm1, %v5219_v9  ;;  %16420 = vmatprep.mubr.msk.f32.mxu0 %vm5373_vm1, %v26078_v2  ;;  %v13908_v9 = vld [vmem:[%s25095_s3 + $0x140] sm:$0xff] }
 0x4af   :  { %v22281_v8 = vadd.f32 %v16055_v46, %v22002_v38  ;;  %v4142_v12 = vpop.f32.mrf.mxu0  ;;  %16203 = vmatpush3.msra.mxu1 %v13910_v45 }
 0x4b0   :  { %v22286_v52 = vpop.f32.mrf.mxu1  ;;  %16204 = vmatprep.subr.mxu1 %v13909_v23  ;;  %v26082_v12 = vld [vmem:[#allocation252_spill] sm:$0xff] }
 0x4b1   :  { %26079 = vst [vmem:[#allocation234_spill] sm:$0xff] %v22286_v52  ;;  %v4145_v54 = vpop.f32.mrf.mxu0  ;;  %16421 = vmatmul.mubr.msk.f32.gmra.mxu0 %vm5373_vm1, %v26080_v19  ;;  %16205 = vmatpush3.msra.mxu1 %v13909_v23 }
 0x4b2   :  { %v4146_v38 = vadd.f32 %v21984_v18, %v4145_v54  ;;  %v16058_v30 = vpop.f32.mrf.mxu1  ;;  %16423 = vmatprep.mubr.msk.f32.mxu0 %vm5373_vm1, %v26081_v50  ;;  %16206 = vmatprep.subr.mxu1 %v13908_v9  ;;  %v26085_v50 = vld [vmem:[#allocation262_spill] sm:$0xff] }
 0x4b3   :  { %v22297_v46 = vadd.f32 %v16058_v30, %v22009_v29  ;;  %v4147_v2 = vpop.f32.mrf.mxu0  ;;  %16207 = vmatpush3.msra.mxu1 %v13908_v9 }
 0x4b4   :  { %v5226_v47 = vadd.f32 %v26082_v12, %v4146_v38  ;;  %v22300_v19 = vpop.f32.mrf.mxu1  ;;  %v26086_v38 = vld [vmem:[#allocation254_spill] sm:$0xff] }
 0x4b5   :  { %26083 = vst [vmem:[#allocation236_spill] sm:$0xff] %v22300_v19  ;;  %v4148_v45 = vpop.f32.mrf.mxu0  ;;  %16424 = vmatmul.mubr.msk.f32.gmra.mxu0 %vm5373_vm1, %v26084_v5 }
 0x4b6   :  { %v4149_v54 = vadd.f32 %v21984_v18, %v4148_v45  ;;  %v16061_v58 = vpop.f32.mrf.mxu1  ;;  %16156 = vmatprep.mubr.msk.f32.mxu1 %vm5373_vm1, %v5226_v47  ;;  %16426 = vmatprep.mubr.msk.f32.mxu0 %vm5373_vm1, %v26085_v50  ;;  %v26089_v47 = vld [vmem:[#allocation269_spill] sm:$0xff]  ;;  %v26090_v45 = vld [vmem:[#allocation250_spill] sm:$0xff] }
 0x4b7   :  { %v22309_v29 = vadd.f32 %v16061_v58, %v22024_v4  ;;  %v4150_v23 = vpop.f32.mrf.mxu0 }
 0x4b8   :  { %v5229_v30 = vadd.f32 %v26086_v38, %v4149_v54  ;;  %v22312_v2 = vpop.f32.mrf.mxu1  ;;  %v26092_v38 = vld [vmem:[#allocation271_spill] sm:$0xff] }
 0x4b9   :  { %26087 = vst [vmem:[#allocation179_spill] sm:$0xff] %v22312_v2  ;;  %v4153_v12 = vpop.f32.mrf.mxu0  ;;  %16427 = vmatmul.mubr.msk.f32.gmra.mxu0 %vm5373_vm1, %v26088_v51 }
 0x4ba   :  { %v4154_v5 = vadd.f32 %v21984_v18, %v4153_v12  ;;  %v16064_v9 = vpop.f32.mrf.mxu1  ;;  %16157 = vmatmul.mubr.msk.f32.gmra.mxu1 %vm5373_vm1, %v5229_v30  ;;  %16429 = vmatprep.mubr.msk.f32.mxu0 %vm5373_vm1, %v26089_v47  ;;  %v26093_v12 = vld [vmem:[#allocation274_spill] sm:$0xff] }
 0x4bb   :  { %v22321_v4 = vadd.f32 %v16064_v9, %v22033_v43  ;;  %v4155_v58 = vpop.f32.mrf.mxu0 }
 0x4bc   :  { %v5234_v54 = vadd.f32 %v26090_v45, %v4154_v5  ;;  %v22324_v50 = vpop.f32.mrf.mxu1  ;;  %v26095_v5 = vld [vmem:[#allocation278_spill] sm:$0xff] }
 0x4bd   :  { %26091 = vst [vmem:[#allocation232_spill] sm:$0xff] %v22324_v50  ;;  %v4156_v23 = vpop.f32.mrf.mxu0  ;;  %16430 = vmatmul.mubr.msk.f32.gmra.mxu0 %vm5373_vm1, %v26092_v38 }
 0x4be   :  { %v16067_v51 = vpop.f32.mrf.mxu1  ;;  %16159 = vmatprep.mubr.msk.f32.mxu1 %vm5373_vm1, %v5234_v54  ;;  %16432 = vmatprep.mubr.msk.f32.mxu0 %vm5373_vm1, %v26093_v12  ;;  %v26096_v23 = vld [vmem:[#allocation280_spill] sm:$0xff]  ;;  %v26097_v12 = vld [vmem:[#allocation257_spill] sm:$0xff] }
 0x4bf   :  { %v22332_v30 = vadd.f32 %v16067_v51, %v22047_v42  ;;  %v4157_v43 = vpop.f32.mrf.mxu0 }
 0x4c0   :  { %v22334_v9 = vpop.f32.mrf.mxu1 }
 0x4c1   :  { %26094 = vst [vmem:[#allocation181_spill] sm:$0xff] %v22334_v9  ;;  %v4160_v47 = vpop.f32.mrf.mxu0  ;;  %16433 = vmatmul.mubr.msk.f32.gmra.mxu0 %vm5373_vm1, %v26095_v5  ;;  %v26099_v9 = vld [vmem:[#allocation283_spill] sm:$0xff] }
 0x4c2   :  { %v4161_v58 = vadd.f32 %v21984_v18, %v4160_v47  ;;  %v16070_v45 = vpop.f32.mrf.mxu1  ;;  %16435 = vmatprep.mubr.msk.f32.mxu0 %vm5373_vm1, %v26096_v23  ;;  %v26100_v47 = vld [vmem:[#allocation286_spill] sm:$0xff] }
 0x4c3   :  { %v22342_v54 = vadd.f32 %v16070_v45, %v22054_v14  ;;  %v4162_v38 = vpop.f32.mrf.mxu0  ;;  %v26101_v23 = vld [vmem:[#allocation258_spill] sm:$0xff] }
 0x4c4   :  { %v5241_v42 = vadd.f32 %v26097_v12, %v4161_v58  ;;  %v22345_v51 = vpop.f32.mrf.mxu1 }
 0x4c5   :  { %26098 = vst [vmem:[#allocation183_spill] sm:$0xff] %v22345_v51  ;;  %v4163_v43 = vpop.f32.mrf.mxu0  ;;  %16436 = vmatmul.mubr.msk.f32.gmra.mxu0 %vm5373_vm1, %v26099_v9  ;;  %v26103_v51 = vld [vmem:[#allocation287_spill] sm:$0xff] }
 0x4c6   :  { %v4164_v5 = vadd.f32 %v21984_v18, %v4163_v43  ;;  %v16073_v11 = vpop.f32.mrf.mxu1  ;;  %16160 = vmatmul.mubr.msk.f32.gmra.mxu1 %vm5373_vm1, %v5241_v42  ;;  %16438 = vmatprep.mubr.msk.f32.mxu0 %vm5373_vm1, %v26100_v47  ;;  %v26104_v42 = vld [vmem:[#allocation288_spill] sm:$0xff]  ;;  %v26105_v47 = vld [vmem:[#allocation255_spill] sm:$0xff] }
 0x4c7   :  { %v22354_v14 = vadd.f32 %v16073_v11, %v22069_v10  ;;  %v4165_v45 = vpop.f32.mrf.mxu0 }
 0x4c8   :  { %v5244_v58 = vadd.f32 %v26101_v23, %v4164_v5  ;;  %v22357_v38 = vpop.f32.mrf.mxu1 }
 0x4c9   :  { %26102 = vst [vmem:[#allocation239_spill] sm:$0xff] %v22357_v38  ;;  %v4168_v12 = vpop.f32.mrf.mxu0  ;;  %16439 = vmatmul.mubr.msk.f32.gmra.mxu0 %vm5373_vm1, %v26103_v51  ;;  %v26107_v38 = vld [vmem:[#allocation289_spill] sm:$0xff] }
 0x4ca   :  { %v4169_v9 = vadd.f32 %v21984_v18, %v4168_v12  ;;  %v16076_v43 = vpop.f32.mrf.mxu1  ;;  %16162 = vmatprep.mubr.msk.f32.mxu1 %vm5373_vm1, %v5244_v58  ;;  %16441 = vmatprep.mubr.msk.f32.mxu0 %vm5373_vm1, %v26104_v42  ;;  %v26108_v12 = vld [vmem:[#allocation290_spill] sm:$0xff] }
 0x4cb   :  { %v22366_v11 = vadd.f32 %v16076_v43, %v22078_v33  ;;  %v4170_v10 = vpop.f32.mrf.mxu0 }
 0x4cc   :  { %v5249_v5 = vadd.f32 %v26105_v47, %v4169_v9  ;;  %v22369_v45 = vpop.f32.mrf.mxu1  ;;  %v26110_v9 = vld [vmem:[#allocation291_spill] sm:$0xff] }
 0x4cd   :  { %26106 = vst [vmem:[#allocation186_spill] sm:$0xff] %v22369_v45  ;;  %v4171_v23 = vpop.f32.mrf.mxu0  ;;  %16442 = vmatmul.mubr.msk.f32.gmra.mxu0 %vm5373_vm1, %v26107_v38  ;;  %v26111_v38 = vld [vmem:[#allocation292_spill] sm:$0xff] }
 0x4ce   :  { %v16079_v51 = vpop.f32.mrf.mxu1  ;;  %16163 = vmatmul.mubr.msk.f32.gmra.mxu1 %vm5373_vm1, %v5249_v5  ;;  %16444 = vmatprep.mubr.msk.f32.mxu0 %vm5373_vm1, %v26108_v12  ;;  %v26112_v5 = vld [vmem:[#allocation28_spill] sm:$0xff] }
 0x4cf   :  { %v22377_v58 = vadd.f32 %v16079_v51, %v22092_v6  ;;  %v4172_v33 = vpop.f32.mrf.mxu0  ;;  %v3743_v23 = vadd.f32 %v21984_v18, %v26112_v5  ;;  %v26113_v51 = vld [vmem:[#allocation31_spill] sm:$0xff]  ;;  %v26117_v5 = vld [vmem:[#allocation294_spill] sm:$0xff] }
 0x4d0   :  { %v22379_v43 = vpop.f32.mrf.mxu1  ;;  %v3746_v33 = vadd.f32 %v21984_v18, %v26113_v51 }
 0x4d1   :  { %26109 = vst [vmem:[#allocation189_spill] sm:$0xff] %v22379_v43  ;;  %v4175_v42 = vpop.f32.mrf.mxu0  ;;  %16445 = vmatmul.mubr.msk.f32.gmra.mxu0 %vm5373_vm1, %v26110_v9  ;;  %v26114_v43 = vld [vmem:[#allocation261_spill] sm:$0xff] }
 0x4d2   :  { %v4176_v10 = vadd.f32 %v21984_v18, %v4175_v42  ;;  %v16082_v47 = vpop.f32.mrf.mxu1  ;;  %16447 = vmatprep.mubr.msk.f32.mxu0 %vm5373_vm1, %v26111_v38  ;;  %v26116_v42 = vld [vmem:[#allocation293_spill] sm:$0xff] }
 0x4d3   :  { %v22389_v12 = vadd.f32 %v16082_v47, %v22099_v3  ;;  %v4177_v6 = vpop.f32.mrf.mxu0  ;;  %v26118_v3 = vld [vmem:[#allocation121_spill] sm:$0xff] }
 0x4d4   :  { %v5256_v45 = vadd.f32 %v26114_v43, %v4176_v10  ;;  %v22394_v50 = vpop.f32.mrf.mxu1  ;;  %v4823_v47 = vadd.f32 %v26118_v3, %v3743_v23  ;;  %v26119_v6 = vld [vmem:[#allocation51_spill] sm:$0xff]  ;;  %v26123_v23 = vld [vmem:[#allocation120_spill] sm:$0xff] }
 0x4d5   :  { %26115 = vst [vmem:[#allocation240_spill] sm:$0xff] %v22394_v50  ;;  %v4178_v9 = vpop.f32.mrf.mxu0  ;;  %16448 = vmatmul.mubr.msk.f32.gmra.mxu0 %vm5373_vm1, %v26116_v42  ;;  %v3751_v51 = vadd.f32 %v21984_v18, %v26119_v6  ;;  %v26120_v50 = vld [vmem:[#allocation123_spill] sm:$0xff] }
 0x4d6   :  { %v4179_v38 = vadd.f32 %v21984_v18, %v4178_v9  ;;  %v16085_v7 = vpop.f32.mrf.mxu1  ;;  %16165 = vmatprep.mubr.msk.f32.mxu1 %vm5373_vm1, %v5256_v45  ;;  %16450 = vmatprep.mubr.msk.f32.mxu0 %vm5373_vm1, %v26117_v5  ;;  %v4826_v2 = vadd.f32 %v26120_v50, %v3746_v33  ;;  %v26121_v42 = vld [vmem:[#allocation263_spill] sm:$0xff] }
 0x4d7   :  { %v22406_v43 = vadd.f32 %v16085_v7, %v22111_v59  ;;  %v4180_v10 = vpop.f32.mrf.mxu0  ;;  %v4831_v7 = vadd.f32 %v26123_v23, %v3751_v51  ;;  %v26124_v33 = vld [vmem:[#allocation259_spill] sm:$0xff] }
 0x4d8   :  { %v5259_v34 = vadd.f32 %v26121_v42, %v4179_v38  ;;  %v22410_v9 = vpop.f32.mrf.mxu1 }
 0x4d9   :  { %26122 = vst [vmem:[#allocation192_spill] sm:$0xff] %v22410_v9  ;;  %v4183_v19 = vpop.f32.mrf.mxu0  ;;  %16451 = vmatmul.mubr.msk.f32.gmra.mxu0 %vm5373_vm1, %v4823_v47  ;;  %v26131_v9 = vld [vmem:[#allocation270_spill] sm:$0xff] }
 0x4da   :  { %v4184_v45 = vadd.f32 %v21984_v18, %v4183_v19  ;;  %v16088_v5 = vpop.f32.mrf.mxu1  ;;  %16166 = vmatmul.mubr.msk.f32.gmra.mxu1 %vm5373_vm1, %v5259_v34  ;;  %16453 = vmatprep.mubr.msk.f32.mxu0 %vm5373_vm1, %v4826_v2 }
 0x4db   :  { %v22418_v59 = vadd.f32 %v16088_v5, %v22122_v53  ;;  %v4185_v50 = vpop.f32.mrf.mxu0  ;;  %v26125_v5 = vld [vmem:[#allocation266_spill] sm:$0xff] }
 0x4dc   :  { %v5264_v38 = vadd.f32 %v26124_v33, %v4184_v45  ;;  %v22421_v3 = vpop.f32.mrf.mxu1 }
 0x4dd   :  { %v4186_v6 = vpop.f32.mrf.mxu0  ;;  %16454 = vmatmul.mubr.msk.f32.gmra.mxu0 %vm5373_vm1, %v4831_v7 }
 0x4de   :  { %v16091_v47 = vpop.f32.mrf.mxu1  ;;  %16168 = vmatprep.mubr.msk.f32.mxu1 %vm5373_vm1, %v5264_v38 }
 0x4df   :  { %v22426_v34 = vadd.f32 %v16091_v47, %v22130_v26  ;;  %v4187_v19 = vpop.f32.mrf.mxu0  ;;  %v26127_v47 = vld [vmem:[#allocation267_spill] sm:$0xff] }
 0x4e0   :  { %v22428_v2 = vpop.f32.mrf.mxu1 }
 0x4e1   :  { %v4190_v51 = vpop.f32.mrf.mxu0 }
 0x4e2   :  { %v4191_v53 = vadd.f32 %v21984_v18, %v4190_v51  ;;  %v16094_v10 = vpop.f32.mrf.mxu1 }
 0x4e3   :  { %v22432_v42 = vadd.f32 %v16094_v10, %v22141_v44  ;;  %v4192_v45 = vpop.f32.mrf.mxu0 }
 0x4e4   :  { %v5271_v23 = vadd.f32 %v26125_v5, %v4191_v53  ;;  %v22435_v7 = vpop.f32.mrf.mxu1 }
 0x4e5   :  { %26126 = vst [vmem:[#allocation197_spill] sm:$0xff] %v22435_v7  ;;  %v4193_v50 = vpop.f32.mrf.mxu0 }
 0x4e6   :  { %v4194_v33 = vadd.f32 %v21984_v18, %v4193_v50  ;;  %v16097_v26 = vpop.f32.mrf.mxu1  ;;  %16169 = vmatmul.mubr.msk.f32.gmra.mxu1 %vm5373_vm1, %v5271_v23  ;;  %v26129_v50 = vld [vmem:[#allocation264_spill] sm:$0xff] }
 0x4e7   :  { %v22440_v38 = vadd.f32 %v16097_v26, %v22154_v32  ;;  %v4195_v6 = vpop.f32.mrf.mxu0 }
 0x4e8   :  { %v5274_v19 = vadd.f32 %v26127_v47, %v4194_v33  ;;  %v22443_v51 = vpop.f32.mrf.mxu1 }
 0x4e9   :  { %26128 = vst [vmem:[#allocation237_spill] sm:$0xff] %v22443_v51  ;;  %v4198_v44 = vpop.f32.mrf.mxu0 }
 0x4ea   :  { %v4199_v10 = vadd.f32 %v21984_v18, %v4198_v44  ;;  %v16100_v53 = vpop.f32.mrf.mxu1  ;;  %16171 = vmatprep.mubr.msk.f32.mxu1 %vm5373_vm1, %v5274_v19 }
 0x4eb   :  { %v22448_v45 = vadd.f32 %v16100_v53, %v22167_v22  ;;  %v4200_v5 = vpop.f32.mrf.mxu0  ;;  %v26132_v53 = vld [vmem:[#allocation272_spill] sm:$0xff] }
 0x4ec   :  { %v5279_v23 = vadd.f32 %v26129_v50, %v4199_v10  ;;  %v22451_v7 = vpop.f32.mrf.mxu1 }
 0x4ed   :  { %26130 = vst [vmem:[#allocation200_spill] sm:$0xff] %v22451_v7  ;;  %v4201_v32 = vpop.f32.mrf.mxu0 }
 0x4ee   :  { %v16103_v26 = vpop.f32.mrf.mxu1  ;;  %16172 = vmatmul.mubr.msk.f32.gmra.mxu1 %vm5373_vm1, %v5279_v23 }
 0x4ef   :  { %v4202_v33 = vpop.f32.mrf.mxu0 }
 0x4f0   :  { %v7300_v6 = vpop.f32.mrf.mxu1  ;;  %v26133_v33 = vld [vmem:[#allocation268_spill] sm:$0xff] }
 0x4f1   :  { %v4205_v47 = vpop.f32.mrf.mxu0 }
 0x4f2   :  { %v4206_v44 = vadd.f32 %v21984_v18, %v4205_v47 }
 0x4f3   :  { %v4207_v51 = vpop.f32.mrf.mxu0 }
 0x4f4   :  { %v5286_v19 = vadd.f32 %v26131_v9, %v4206_v44 }
 0x4f5   :  { %v4208_v62 = vpop.f32.mrf.mxu0 }
 0x4f6   :  { %v4209_v22 = vadd.f32 %v21984_v18, %v4208_v62  ;;  %16174 = vmatprep.mubr.msk.f32.mxu1 %vm5373_vm1, %v5286_v19  ;;  %v22470_v19 = vld [vmem:[%s25095_s3 + $0x1b8] sm:$0xff] }
 0x4f7   :  { %v4210_v10 = vpop.f32.mrf.mxu0  ;;  %16280 = vmatprep.subr.mxu1 %v22470_v19 }
 0x4f8   :  { %v5289_v5 = vadd.f32 %v26132_v53, %v4209_v22  ;;  %v26134_v10 = vld [vmem:[#allocation275_spill] sm:$0xff] }
 0x4f9   :  { %v4213_v50 = vpop.f32.mrf.mxu0 }
 0x4fa   :  { %v4214_v32 = vadd.f32 %v21984_v18, %v4213_v50  ;;  %v16122_v23 = vpop.f32.mrf.mxu1  ;;  %16175 = vmatmul.mubr.msk.f32.gmra.mxu1 %vm5373_vm1, %v5289_v5 }
 0x4fb   :  { %v22462_v26 = vadd.f32 %v16122_v23, %v22183_v24  ;;  %v4215_v51 = vpop.f32.mrf.mxu0 }
 0x4fc   :  { %v5294_v9 = vadd.f32 %v26133_v33, %v4214_v32  ;;  %v22473_v24 = vpop.f32.mrf.mxu1  ;;  %v26135_v33 = vld [vmem:[#allocation276_spill] sm:$0xff] }
 0x4fd   :  { %v4216_v6 = vpop.f32.mrf.mxu0 }
 0x4fe   :  { %16177 = vmatprep.mubr.msk.f32.mxu1 %vm5373_vm1, %v5294_v9 }
 0x4ff   :  { %v4217_v62 = vpop.f32.mrf.mxu0 }
 0x501   :  { %v4220_v47 = vpop.f32.mrf.mxu0 }
 0x502   :  { %v4221_v44 = vadd.f32 %v21984_v18, %v4220_v47 }
 0x503   :  { %v4222_v22 = vpop.f32.mrf.mxu0 }
 0x504   :  { %v5301_v53 = vadd.f32 %v26134_v10, %v4221_v44  ;;  %v26136_v44 = vld [vmem:[#allocation273_spill] sm:$0xff] }
 0x505   :  { %v4223_v5 = vpop.f32.mrf.mxu0 }
 0x506   :  { %v4224_v50 = vadd.f32 %v21984_v18, %v4223_v5  ;;  %v16125_v32 = vpop.f32.mrf.mxu1  ;;  %16178 = vmatmul.mubr.msk.f32.gmra.mxu1 %vm5373_vm1, %v5301_v53 }
 0x507   :  { %v22479_v23 = vadd.f32 %v16125_v32, %v22195_v55  ;;  %v4225_v51 = vpop.f32.mrf.mxu0 }
 0x508   :  { %v5304_v9 = vadd.f32 %v26135_v33, %v4224_v50  ;;  %v22484_v22 = vpop.f32.mrf.mxu1  ;;  %v26137_v33 = vld [vmem:[#allocation279_spill] sm:$0xff] }
 0x509   :  { %v4228_v6 = vpop.f32.mrf.mxu0 }
 0x50a   :  { %v4229_v62 = vadd.f32 %v21984_v18, %v4228_v6  ;;  %16180 = vmatprep.mubr.msk.f32.mxu1 %vm5373_vm1, %v5304_v9 }
 0x50b   :  { %v4230_v47 = vpop.f32.mrf.mxu0 }
 0x50c   :  { %v5309_v10 = vadd.f32 %v26136_v44, %v4229_v62 }
 0x50d   :  { %v4231_v5 = vpop.f32.mrf.mxu0 }
 0x50e   :  { %v16128_v7 = vpop.f32.mrf.mxu1  ;;  %16181 = vmatmul.mubr.msk.f32.gmra.mxu1 %vm5373_vm1, %v5309_v10  ;;  %v26138_v5 = vld [vmem:[#allocation281_spill] sm:$0xff] }
 0x50f   :  { %v22489_v55 = vadd.f32 %v16128_v7, %v22207_v56  ;;  %v4232_v53 = vpop.f32.mrf.mxu0 }
 0x510   :  { %v22495_v44 = vpop.f32.mrf.mxu1 }
 0x511   :  { %v4235_v32 = vpop.f32.mrf.mxu0 }
 0x512   :  { %v4236_v50 = vadd.f32 %v21984_v18, %v4235_v32 }
 0x513   :  { %v4237_v51 = vpop.f32.mrf.mxu0 }
 0x514   :  { %v5316_v6 = vadd.f32 %v26137_v33, %v4236_v50  ;;  %v26140_v50 = vld [vmem:[#allocation277_spill] sm:$0xff] }
 0x515   :  { %v4238_v9 = vpop.f32.mrf.mxu0 }
 0x516   :  { %v4239_v47 = vadd.f32 %v21984_v18, %v4238_v9  ;;  %16183 = vmatprep.mubr.msk.f32.mxu1 %vm5373_vm1, %v5316_v6 }
 0x517   :  { %v4240_v62 = vpop.f32.mrf.mxu0 }
 0x518   :  { %v5319_v10 = vadd.f32 %v26138_v5, %v4239_v47 }
 0x519   :  { %v4243_v52 = vpop.f32.mrf.mxu0 }
 0x51a   :  { %v4244_v56 = vadd.f32 %v21984_v18, %v4243_v52  ;;  %v16131_v7 = vpop.f32.mrf.mxu1  ;;  %16184 = vmatmul.mubr.msk.f32.gmra.mxu1 %vm5373_vm1, %v5319_v10  ;;  %v26141_v52 = vld [vmem:[#allocation284_spill] sm:$0xff]  ;;  %v26142_v10 = vld [vmem:[#allocation78_spill] sm:$0xff] }
 0x51b   :  { %v22501_v53 = vadd.f32 %v16131_v7, %v22218_v25  ;;  %v4245_v32 = vpop.f32.mrf.mxu0  ;;  %v3769_v25 = vadd.f32 %v21984_v18, %v26142_v10 }
 0x51c   :  { %v5324_v51 = vadd.f32 %v26140_v50, %v4244_v56  ;;  %v22506_v5 = vpop.f32.mrf.mxu1 }
 0x51d   :  { %26139 = vst [vmem:[#allocation203_spill] sm:$0xff] %v22501_v53  ;;  %v4246_v33 = vpop.f32.mrf.mxu0 }
 0x51e   :  { %16186 = vmatprep.mubr.msk.f32.mxu1 %vm5373_vm1, %v5324_v51  ;;  %v26144_v51 = vld [vmem:[#allocation285_spill] sm:$0xff] }
 0x51f   :  { %v4247_v6 = vpop.f32.mrf.mxu0 }
 0x521   :  { %v4250_v9 = vpop.f32.mrf.mxu0 }
 0x522   :  { %v4251_v62 = vadd.f32 %v21984_v18, %v4250_v9  ;;  %v7872_v9 = vrot.slane %v21349_v16, 1 }
 0x523   :  { %v4252_v47 = vpop.f32.mrf.mxu0 }
 0x524   :  { %v5331_v13 = vadd.f32 %v26141_v52, %v4251_v62  ;;  %v26145_v47 = vld [vmem:[#allocation128_spill] sm:$0xff] }
 0x525   :  { %v4253_v63 = vpop.f32.mrf.mxu0  ;;  %v4849_v62 = vadd.f32 %v26145_v47, %v3769_v25 }
 0x526   :  { %v4254_v7 = vadd.f32 %v21984_v18, %v4253_v63  ;;  %v16134_v32 = vpop.f32.mrf.mxu1  ;;  %16187 = vmatmul.mubr.msk.f32.gmra.mxu1 %vm5373_vm1, %v5331_v13  ;;  %v26146_v63 = vld [vmem:[#allocation126_spill] sm:$0xff] }
 0x527   :  { %v22514_v56 = vadd.f32 %v16134_v32, %v22231_v1  ;;  %v4255_v50 = vpop.f32.mrf.mxu0  ;;  %v7871_v20 = vrot.slane %v26146_v63, 1  ;;  %v26147_v13 = vld [vmem:[#allocation282_spill] sm:$0xff]  ;;  %v26148_v32 = vld [vmem:[#allocation129_spill] sm:$0xff]  ;;  %v7876_v16 = vrot.slane %v4849_v62, 1  ;;  %v26152_v62 = vld [vmem:[#allocation132_spill] sm:$0xff] }
 0x528   :  { %v5334_v33 = vadd.f32 %v26144_v51, %v4254_v7  ;;  %v22522_v27 = vpop.f32.mrf.mxu1  ;;  %v7874_v50 = vrot.slane %v26148_v32, 1  ;;  %v26151_v63 = vld [vmem:[#allocation134_spill] sm:$0xff] }
 0x529   :  { %26143 = vst [vmem:[#allocation208_spill] sm:$0xff] %v22514_v56  ;;  %v4258_v6 = vpop.f32.mrf.mxu0  ;;  %v26149_v56 = vld [vmem:[#allocation92_spill] sm:$0xff]  ;;  %v7873_v25 = vsel %vm6284_vm2, %v7871_v20, %v7872_v9  ;;  %v26154_v32 = vld [vmem:[#allocation18_spill] sm:$0xff] }
 0x52a   :  { %v4259_v52 = vadd.f32 %v21984_v18, %v4258_v6  ;;  %16189 = vmatprep.mubr.msk.f32.mxu1 %vm5373_vm1, %v5334_v33  ;;  %v3785_v7 = vadd.f32 %v21984_v18, %v26149_v56  ;;  %v7875_v47 = vsel %vm6284_vm2, %v7872_v9, %v7874_v50  ;;  %v13970_v56 = vld [vmem:[%s25095_s3 + $0x1b0] sm:$0xff]  ;;  %v22544_v20 = vld [vmem:[%s25094_s2] ss:$0 sm:$0xff]  ;;  %v7877_v9 = vsel %vm6284_vm2, %v7874_v50, %v7876_v16 }
 0x52b   :  { %v4260_v10 = vpop.f32.mrf.mxu0  ;;  %v13968_v50 = vld [vmem:[%s25095_s3 + $0x1a0] sm:$0xff]  ;;  %v26155_v16 = vld [vmem:[#allocation95_spill] sm:$0xff] }
 0x52c   :  { %v5339_v1 = vadd.f32 %v26147_v13, %v4259_v52  ;;  %v26150_v52 = vld [vmem:[#allocation88_spill] sm:$0xff]  ;;  %v4865_v13 = vadd.f32 %v26151_v63, %v3785_v7  ;;  %v7878_v7 = vrot.slane %v26154_v32, 1 }
 0x52d   :  { %v4261_v51 = vpop.f32.mrf.mxu0  ;;  %v7879_v10 = vrot.slane %v26150_v52, 1 }
 0x52e   :  { %v16137_v53 = vpop.f32.mrf.mxu1  ;;  %16190 = vmatmul.mubr.msk.f32.gmra.mxu1 %vm5373_vm1, %v5339_v1  ;;  %v7881_v1 = vrot.slane %v26152_v62, 1 }
 0x52f   :  { %v22531_v33 = vadd.f32 %v16137_v53, %v22249_v17  ;;  %v4262_v6 = vpop.f32.mrf.mxu0  ;;  %16208 = vmatprep.mubr.msk.f32.mxu1 %vm5373_vm1, %v7873_v25  ;;  %v26153_v17 = vld [vmem:[#allocation103_spill] sm:$0xff]  ;;  %v13969_v25 = vld [vmem:[%s25095_s3 + $0x1a8] sm:$0xff]  ;;  %v7880_v63 = vsel %vm6284_vm2, %v7878_v7, %v7879_v10 }
 0x530   :  { %v3801_v53 = vadd.f32 %v22544_v20, %v26153_v17  ;;  %v7883_v6 = vrot.slane %v4865_v13, 1  ;;  %v13967_v13 = vld [vmem:[%s25095_s3 + $0x198] sm:$0xff]  ;;  %v22569_v32 = vpop.f32.mrf.mxu1  ;;  %v26158_v7 = vld [vmem:[#allocation97_spill] sm:$0xff] }
 0x531   :  { %v4265_v18 = vpop.f32.mrf.mxu0 }
 0x532   :  { %16209 = vmatmul.mubr.msk.f32.vlgmr.msra.gmra.mxu1 %vm5373_vm1, %v7875_v47  ;;  %v7886_v47 = vrot.slane %v26155_v16, 1  ;;  %v26156_v18 = vld [vmem:[#allocation140_spill] sm:$0xff] }
 0x533   :  { %v4266_v51 = vpop.f32.mrf.mxu0  ;;  %16211 = vmatprep.mubr.msk.f32.mxu1 %vm5373_vm1, %v7877_v9  ;;  %16281 = vmatpush3.msra.mxu1 %v22470_v19  ;;  %v4881_v62 = vadd.f32 %v26156_v18, %v3801_v53  ;;  %v7882_v19 = vsel %vm6284_vm2, %v7879_v10, %v7881_v1  ;;  %v7888_v53 = vrot.slane %v26158_v7, 1 }
 0x534   :  { %16282 = vmatprep.subr.mxu1 %v13970_v56  ;;  %v26159_v51 = vld [vmem:[#allocation56_spill] sm:$0xff] }
 0x535   :  { %v4267_v52 = vpop.f32.mrf.mxu0  ;;  %16283 = vmatpush3.msra.mxu1 %v13970_v56  ;;  %v26157_v56 = vld [vmem:[#allocation135_spill] sm:$0xff]  ;;  %v7890_v16 = vrot.slane %v4881_v62, 1  ;;  %v26161_v62 = vld [vmem:[#allocation146_spill] sm:$0xff] }
 0x536   :  { %16212 = vmatmul.mubr.msk.f32.gmra.mxu1 %vm5373_vm1, %v7880_v63  ;;  %16284 = vmatprep.subr.mxu1 %v13969_v25  ;;  %v7885_v9 = vrot.slane %v26157_v56, 1  ;;  %v3817_v52 = vadd.f32 %v22544_v20, %v26159_v51  ;;  %v7884_v63 = vsel %vm6284_vm2, %v7881_v1, %v7883_v6  ;;  %v13965_v1 = vld [vmem:[%s25095_s3 + $0x188] sm:$0xff] }
 0x537   :  { %v4268_v17 = vpop.f32.mrf.mxu0  ;;  %16214 = vmatprep.mubr.msk.f32.mxu1 %vm5373_vm1, %v7882_v19  ;;  %16285 = vmatpush3.msra.mxu1 %v13969_v25  ;;  %v13966_v25 = vld [vmem:[%s25095_s3 + $0x190] sm:$0xff]  ;;  %v26160_v6 = vld [vmem:[#allocation141_spill] sm:$0xff] }
 0x538   :  { %16286 = vmatprep.subr.mxu1 %v13968_v50  ;;  %v7887_v19 = vsel %vm6284_vm2, %v7885_v9, %v7886_v47  ;;  %v4897_v7 = vadd.f32 %v26161_v62, %v3817_v52  ;;  %v7889_v9 = vsel %vm6284_vm2, %v7886_v47, %v7888_v53 }
 0x539   :  { %v4271_v10 = vpop.f32.mrf.mxu0  ;;  %16287 = vmatpush3.msra.mxu1 %v13968_v50  ;;  %v7893_v50 = vrot.slane %v26160_v6, 1 }
 0x53a   :  { %v16140_v18 = vpop.f32.mrf.mxu1  ;;  %16215 = vmatmul.mubr.msk.f32.gmra.mxu1 %vm5373_vm1, %v7884_v63  ;;  %16288 = vmatprep.subr.mxu1 %v13967_v13  ;;  %v26162_v10 = vld [vmem:[#allocation105_spill] sm:$0xff]  ;;  %v7897_v47 = vrot.slane %v4897_v7, 1 }
 0x53b   :  { %v22581_v17 = vadd.f32 %v16140_v18, %v22267_v39  ;;  %v4272_v56 = vpop.f32.mrf.mxu0  ;;  %16217 = vmatprep.mubr.msk.f32.mxu1 %vm5373_vm1, %v7887_v19  ;;  %16289 = vmatpush3.msra.mxu1 %v13967_v13  ;;  %v13964_v39 = vld [vmem:[%s25095_s3 + $0x180] sm:$0xff]  ;;  %v7895_v63 = vrot.slane %v26162_v10, 1  ;;  %v26163_v13 = vld [vmem:[#allocation71_spill] sm:$0xff]  ;;  %v7891_v19 = vsel %vm6284_vm2, %v7888_v53, %v7890_v16 }
 0x53c   :  { %16290 = vmatprep.subr.mxu1 %v13966_v25  ;;  %v3833_v18 = vadd.f32 %v22544_v20, %v26163_v13  ;;  %v26164_v56 = vld [vmem:[#allocation190_spill] sm:$0xff]  ;;  %v26167_v13 = vld [vmem:[#allocation152_spill] sm:$0xff]  ;;  %v22611_v7 = vpop.f32.mrf.mxu1 }
 0x53d   :  { %v4273_v51 = vpop.f32.mrf.mxu0  ;;  %16291 = vmatpush3.msra.mxu1 %v13966_v25  ;;  %v7892_v52 = vrot.slane %v26164_v56, 1  ;;  %v7896_v53 = vsel %vm6284_vm2, %v7893_v50, %v7895_v63  ;;  %v26170_v56 = vld [vmem:[#allocation188_spill] sm:$0xff] }
 0x53e   :  { %16218 = vmatmul.mubr.msk.f32.gmra.mxu1 %vm5373_vm1, %v7889_v9  ;;  %16292 = vmatprep.subr.mxu1 %v13965_v1  ;;  %v26166_v51 = vld [vmem:[#allocation144_spill] sm:$0xff]  ;;  %v4913_v9 = vadd.f32 %v26167_v13, %v3833_v18  ;;  %v7898_v18 = vsel %vm6284_vm2, %v7895_v63, %v7897_v47  ;;  %v7909_v47 = vrot.slane %v21582_v57, 1 }
 0x53f   :  { %v4274_v6 = vpop.f32.mrf.mxu0  ;;  %16220 = vmatprep.mubr.msk.f32.mxu1 %vm5373_vm1, %v7891_v19  ;;  %16293 = vmatpush3.msra.mxu1 %v13965_v1  ;;  %v7894_v62 = vsel %vm6284_vm2, %v7892_v52, %v7893_v50  ;;  %v7900_v10 = vrot.slane %v26166_v51, 1  ;;  %v26169_v1 = vld [vmem:[#allocation108_spill] sm:$0xff] }
 0x540   :  { %16294 = vmatprep.subr.mxu1 %v13964_v39  ;;  %v7899_v19 = vrot.slane %v26169_v1, 1  ;;  %v7902_v6 = vrot.slane %v26170_v56, 1  ;;  %v26171_v52 = vld [vmem:[#allocation80_spill] sm:$0xff]  ;;  %v26174_v56 = vld [vmem:[#allocation58_spill] sm:$0xff] }
 0x541   :  { %v22600_v25 = vpop.f32.mrf.mxu0  ;;  %16295 = vmatpush3.msra.mxu1 %v13964_v39  ;;  %v3849_v39 = vadd.f32 %v22544_v20, %v26171_v52  ;;  %v26175_v52 = vld [vmem:[#allocation158_spill] sm:$0xff] }
 0x542   :  { %26165 = vst [vmem:[#allocation211_spill] sm:$0xff] %v22600_v25  ;;  %16221 = vmatmul.mubr.msk.f32.gmra.mxu1 %vm5373_vm1, %v7894_v62  ;;  %v7904_v62 = vrot.slane %v4913_v9, 1  ;;  %v7901_v50 = vsel %vm6284_vm2, %v7899_v19, %v7900_v10  ;;  %v7903_v63 = vsel %vm6284_vm2, %v7900_v10, %v7902_v6  ;;  %v26177_v9 = vld [vmem:[#allocation21_spill] sm:$0xff] }
 0x543   :  { %16223 = vmatprep.mubr.msk.f32.mxu1 %vm5373_vm1, %v7896_v53  ;;  %v22608_v16 = vpop.f32.mrf.mxu0  ;;  %v4929_v25 = vadd.f32 %v26175_v52, %v3849_v39  ;;  %v3865_v19 = vadd.f32 %v22544_v20, %v26177_v9  ;;  %v26181_v10 = vld [vmem:[#allocation153_spill] sm:$0xff]  ;;  %v26182_v9 = vld [vmem:[#allocation164_spill] sm:$0xff] }
 0x544   :  { %26168 = vst [vmem:[#allocation243_spill] sm:$0xff] %v22608_v16  ;;  %v7907_v16 = vrot.slane %v26174_v56, 1 }
 0x545   :  { %v22616_v51 = vpop.f32.mrf.mxu0  ;;  %v7911_v56 = vrot.slane %v4929_v25, 1  ;;  %v26185_v25 = vld [vmem:[#allocation193_spill] sm:$0xff] }
 0x546   :  { %26172 = vst [vmem:[#allocation213_spill] sm:$0xff] %v22616_v51  ;;  %v16143_v13 = vpop.f32.mrf.mxu1  ;;  %16224 = vmatmul.mubr.msk.f32.gmra.mxu1 %vm5373_vm1, %v7898_v18  ;;  %v26178_v18 = vld [vmem:[#allocation147_spill] sm:$0xff] }
 0x547   :  { %v22622_v53 = vadd.f32 %v16143_v13, %v22281_v8  ;;  %16226 = vmatprep.mubr.msk.f32.mxu1 %vm5373_vm1, %v7901_v50  ;;  %v22625_v1 = vpop.f32.mrf.mxu0  ;;  %v7905_v8 = vsel %vm6284_vm2, %v7902_v6, %v7904_v62  ;;  %v7906_v13 = vrot.slane %v26178_v18, 1  ;;  %v7910_v6 = vsel %vm6284_vm2, %v7907_v16, %v7909_v47 }
 0x548   :  { %26173 = vst [vmem:[#allocation215_spill] sm:$0xff] %v22625_v1  ;;  %v22641_v39 = vpop.f32.mrf.mxu1  ;;  %v4945_v1 = vadd.f32 %v26182_v9, %v3865_v19  ;;  %v7913_v18 = vrot.slane %v26185_v25, 1  ;;  %v26190_v25 = vld [vmem:[#allocation168_spill] sm:$0xff] }
 0x549   :  { %v22629_v51 = vpop.f32.mrf.mxu0  ;;  %v7908_v57 = vsel %vm6284_vm2, %v7906_v13, %v7907_v16 }
 0x54a   :  { %26176 = vst [vmem:[#allocation245_spill] sm:$0xff] %v22629_v51  ;;  %16227 = vmatmul.mubr.msk.f32.gmra.mxu1 %vm5373_vm1, %v7903_v63  ;;  %v7914_v51 = vrot.slane %v26181_v10, 1  ;;  %v7918_v9 = vrot.slane %v4945_v1, 1 }
 0x54b   :  { %16229 = vmatprep.mubr.msk.f32.mxu1 %vm5373_vm1, %v7905_v8  ;;  %v22639_v50 = vpop.f32.mrf.mxu0 }
 0x54c   :  { %26179 = vst [vmem:[#allocation217_spill] sm:$0xff] %v22639_v50  ;;  %v26187_v50 = vld [vmem:[#allocation106_spill] sm:$0xff] }
 0x54d   :  { %v22643_v52 = vpop.f32.mrf.mxu0  ;;  %v3881_v10 = vadd.f32 %v22544_v20, %v26187_v50 }
 0x54e   :  { %26180 = vst [vmem:[#allocation220_spill] sm:$0xff] %v22643_v52  ;;  %v16146_v63 = vpop.f32.mrf.mxu1  ;;  %16230 = vmatmul.mubr.msk.f32.gmra.mxu1 %vm5373_vm1, %v7908_v57  ;;  %v26186_v52 = vld [vmem:[#allocation156_spill] sm:$0xff]  ;;  %v7912_v57 = vsel %vm6284_vm2, %v7909_v47, %v7911_v56  ;;  %v26193_v47 = vld [vmem:[#allocation55_spill] sm:$0xff] }
 0x54f   :  { %v22651_v62 = vadd.f32 %v16146_v63, %v22297_v46  ;;  %16232 = vmatprep.mubr.msk.f32.mxu1 %vm5373_vm1, %v7910_v6  ;;  %v22654_v8 = vpop.f32.mrf.mxu0  ;;  %v7916_v13 = vrot.slane %v26186_v52, 1  ;;  %v7915_v46 = vsel %vm6284_vm2, %v7913_v18, %v7914_v51  ;;  %v26189_v63 = vld [vmem:[#allocation155_spill] sm:$0xff]  ;;  %v4961_v52 = vadd.f32 %v26190_v25, %v3881_v10 }
 0x550   :  { %26184 = vst [vmem:[#allocation224_spill] sm:$0xff] %v22654_v8  ;;  %v7921_v6 = vrot.slane %v26189_v63, 1  ;;  %v3897_v1 = vadd.f32 %v22544_v20, %v26193_v47  ;;  %v26194_v18 = vld [vmem:[#allocation191_spill] sm:$0xff]  ;;  %v22682_v10 = vpop.f32.mrf.mxu1  ;;  %v26196_v47 = vld [vmem:[#allocation172_spill] sm:$0xff] }
 0x551   :  { %26183 = vst [vmem:[#allocation241_spill] sm:$0xff] %v22651_v62  ;;  %v22660_v19 = vpop.f32.mrf.mxu0  ;;  %v7917_v50 = vsel %vm6284_vm2, %v7914_v51, %v7916_v13  ;;  %v7919_v56 = vsel %vm6284_vm2, %v7916_v13, %v7918_v9  ;;  %v7925_v63 = vrot.slane %v4961_v52, 1  ;;  %v26198_v52 = vld [vmem:[#allocation161_spill] sm:$0xff] }
 0x552   :  { %26188 = vst [vmem:[#allocation226_spill] sm:$0xff] %v22660_v19  ;;  %16233 = vmatmul.mubr.msk.f32.gmra.mxu1 %vm5373_vm1, %v7912_v57  ;;  %v26192_v19 = vld [vmem:[#allocation194_spill] sm:$0xff]  ;;  %v7920_v57 = vrot.slane %v26194_v18, 1  ;;  %v7927_v18 = vrot.slane %v26198_v52, 1 }
 0x553   :  { %16235 = vmatprep.mubr.msk.f32.mxu1 %vm5373_vm1, %v7915_v46  ;;  %v22666_v16 = vpop.f32.mrf.mxu0  ;;  %v7923_v62 = vrot.slane %v26192_v19, 1  ;;  %v7928_v19 = vrot.slane %v21701_v0, 1 }
 0x554   :  { %v7922_v51 = vsel %vm6284_vm2, %v7920_v57, %v7921_v6  ;;  %v7930_v57 = vrot.slane %v21712_v40, 1 }
 0x555   :  { %v22670_v8 = vpop.f32.mrf.mxu0  ;;  %v7924_v13 = vsel %vm6284_vm2, %v7921_v6, %v7923_v62 }
 0x556   :  { %26191 = vst [vmem:[#allocation229_spill] sm:$0xff] %v22670_v8  ;;  %16236 = vmatmul.mubr.msk.f32.gmra.mxu1 %vm5373_vm1, %v7917_v50  ;;  %v4977_v8 = vadd.f32 %v26196_v47, %v3897_v1 }
 0x557   :  { %16238 = vmatprep.mubr.msk.f32.mxu1 %vm5373_vm1, %v7919_v56  ;;  %v22680_v46 = vpop.f32.mrf.mxu0 }
 0x558   :  { %v7932_v47 = vrot.slane %v4977_v8, 1 }
 0x559   :  { %v22684_v25 = vpop.f32.mrf.mxu0 }
 0x55a   :  { %26195 = vst [vmem:[#allocation233_spill] sm:$0xff] %v22684_v25  ;;  %v16149_v50 = vpop.f32.mrf.mxu1  ;;  %16239 = vmatmul.mubr.msk.f32.gmra.mxu1 %vm5373_vm1, %v7922_v51  ;;  %v26199_v25 = vld [vmem:[#allocation312_spill] sm:$0xff]  ;;  %v7926_v51 = vsel %vm6284_vm2, %v7923_v62, %v7925_v63  ;;  %v26205_v62 = vld [vmem:[#allocation14_spill] sm:$0xff]  ;;  %v7933_v63 = vsel %vm6284_vm2, %v7930_v57, %v7932_v47  ;;  %v26209_v47 = vld [vmem:[#allocation199_spill] sm:$0xff] }
 0x55b   :  { %v22692_v9 = vadd.f32 %v16149_v50, %v22309_v29  ;;  %16241 = vmatprep.mubr.msk.f32.mxu1 %vm5373_vm1, %v7924_v13  ;;  %v22695_v56 = vpop.f32.mrf.mxu0  ;;  %v3913_v0 = vadd.f32 %v22544_v20, %v26199_v25  ;;  %v7929_v29 = vsel %vm6284_vm2, %v7927_v18, %v7928_v19  ;;  %v7935_v50 = vrot.slane %v21734_v36, 1  ;;  %v26202_v13 = vld [vmem:[#allocation176_spill] sm:$0xff]  ;;  %v26206_v36 = vld [vmem:[#allocation201_spill] sm:$0xff] }
 0x55c   :  { %26197 = vst [vmem:[#allocation248_spill] sm:$0xff] %v22695_v56  ;;  %v7931_v25 = vsel %vm6284_vm2, %v7928_v19, %v7930_v57  ;;  %v3929_v8 = vadd.f32 %v22544_v20, %v26205_v62  ;;  %v22722_v18 = vld [vmem:[%s25095_s3 + $0x238] sm:$0xff]  ;;  %v22729_v19 = vpop.f32.mrf.mxu1 }
 0x55d   :  { %v22701_v1 = vpop.f32.mrf.mxu0  ;;  %v4993_v40 = vadd.f32 %v26202_v13, %v3913_v0  ;;  %v7934_v0 = vrot.slane %v26206_v36, 1  ;;  %16456 = vmatprep.subr.mxu1 %v22722_v18  ;;  %v7942_v13 = vrot.slane %v26209_v47, 1 }
 0x55e   :  { %26200 = vst [vmem:[#allocation235_spill] sm:$0xff] %v22701_v1  ;;  %16242 = vmatmul.mubr.msk.f32.gmra.mxu1 %vm5373_vm1, %v7926_v51  ;;  %v26204_v1 = vld [vmem:[#allocation196_spill] sm:$0xff] }
 0x55f   :  { %16244 = vmatprep.mubr.msk.f32.mxu1 %vm5373_vm1, %v7929_v29  ;;  %v22707_v6 = vpop.f32.mrf.mxu0  ;;  %v7937_v56 = vrot.slane %v26204_v1, 1  ;;  %v7939_v1 = vrot.slane %v4993_v40, 1  ;;  %v7936_v57 = vsel %vm6284_vm2, %v7934_v0, %v7935_v50  ;;  %v26211_v40 = vld [vmem:[#allocation173_spill] sm:$0xff]  ;;  %v7944_v0 = vrot.slane %v21790_v61, 1 }
 0x560   :  { %26201 = vst [vmem:[#allocation238_spill] sm:$0xff] %v22707_v6 }
 0x561   :  { %v22711_v52 = vpop.f32.mrf.mxu0 }
 0x562   :  { %26203 = vst [vmem:[#allocation249_spill] sm:$0xff] %v22711_v52  ;;  %16245 = vmatmul.mubr.msk.f32.gmra.mxu1 %vm5373_vm1, %v7931_v25  ;;  %v26210_v25 = vld [vmem:[#allocation182_spill] sm:$0xff] }
 0x563   :  { %16247 = vmatprep.mubr.msk.f32.mxu1 %vm5373_vm1, %v7933_v63  ;;  %v22726_v51 = vpop.f32.mrf.mxu0  ;;  %v5009_v62 = vadd.f32 %v26210_v25, %v3929_v8  ;;  %v7938_v63 = vsel %vm6284_vm2, %v7935_v50, %v7937_v56  ;;  %v7940_v8 = vsel %vm6284_vm2, %v7937_v56, %v7939_v1  ;;  %v7945_v25 = vsel %vm6284_vm2, %v7942_v13, %v7944_v0 }
 0x564   :  { %26207 = vst [vmem:[#allocation242_spill] sm:$0xff] %v22726_v51 }
 0x565   :  { %v22731_v29 = vpop.f32.mrf.mxu0  ;;  %v7946_v47 = vrot.slane %v5009_v62, 1 }
 0x566   :  { %26208 = vst [vmem:[#allocation244_spill] sm:$0xff] %v22731_v29  ;;  %v16152_v52 = vpop.f32.mrf.mxu1  ;;  %16248 = vmatmul.mubr.msk.f32.gmra.mxu1 %vm5373_vm1, %v7936_v57  ;;  %v7941_v29 = vrot.slane %v26211_v40, 1  ;;  %v26216_v40 = vld [vmem:[#allocation100_spill] sm:$0xff] }
 0x567   :  { %v22739_v36 = vadd.f32 %v16152_v52, %v22321_v4  ;;  %16250 = vmatprep.mubr.msk.f32.mxu1 %vm5373_vm1, %v7938_v63  ;;  %v22742_v51 = vpop.f32.mrf.mxu0  ;;  %v7947_v56 = vsel %vm6284_vm2, %v7944_v0, %v7946_v47  ;;  %v26215_v63 = vld [vmem:[#allocation131_spill] sm:$0xff]  ;;  %v26219_v0 = vld [vmem:[#allocation137_spill] sm:$0xff] }
 0x568   :  { %v7943_v50 = vsel %vm6284_vm2, %v7941_v29, %v7942_v13  ;;  %v22754_v52 = vpop.f32.mrf.mxu1 }
 0x569   :  { %v22746_v6 = vpop.f32.mrf.mxu0 }
 0x56a   :  { %16251 = vmatmul.mubr.msk.f32.gmra.mxu1 %vm5373_vm1, %v7940_v8 }
 0x56b   :  { %16253 = vmatprep.mubr.msk.f32.mxu1 %vm5373_vm1, %v7943_v50  ;;  %v22752_v4 = vpop.f32.mrf.mxu0 }
 0x56d   :  { %v22756_v57 = vpop.f32.mrf.mxu0 }
 0x56e   :  { %26212 = vst [vmem:[#allocation246_spill] sm:$0xff] %v22756_v57  ;;  %v16155_v61 = vpop.f32.mrf.mxu1  ;;  %16254 = vmatmul.mubr.msk.f32.gmra.mxu1 %vm5373_vm1, %v7945_v25 }
 0x56f   :  { %v22762_v1 = vadd.f32 %v16155_v61, %v22332_v30  ;;  %16256 = vmatprep.mubr.msk.f32.mxu1 %vm5373_vm1, %v7947_v56  ;;  %v22765_v29 = vpop.f32.mrf.mxu0  ;;  %v26220_v30 = vld [vmem:[#allocation143_spill] sm:$0xff]  ;;  %v26223_v56 = vld [vmem:[#allocation130_spill] sm:$0xff] }
 0x570   :  { %26213 = vst [vmem:[#allocation247_spill] sm:$0xff] %v22765_v29  ;;  %v22783_v50 = vpop.f32.mrf.mxu1  ;;  %v26272_v29 = vld [vmem:[#allocation91_spill] sm:$0xff] }
 0x571   :  { %v22767_v62 = vpop.f32.mrf.mxu0 }
 0x572   :  { %26214 = vst [vmem:[#allocation251_spill] sm:$0xff] %v22767_v62  ;;  %16257 = vmatmul.mubr.msk.f32.gmra.mxu1 %vm5373_vm1, %v26215_v63 }
 0x573   :  { %16259 = vmatprep.mubr.msk.f32.mxu1 %vm5373_vm1, %v26216_v40  ;;  %v22773_v13 = vpop.f32.mrf.mxu0  ;;  %v26224_v40 = vld [vmem:[#allocation149_spill] sm:$0xff] }
 0x574   :  { %26217 = vst [vmem:[#allocation253_spill] sm:$0xff] %v22773_v13 }
 0x575   :  { %v22775_v8 = vpop.f32.mrf.mxu0 }
 0x576   :  { %26218 = vst [vmem:[#allocation256_spill] sm:$0xff] %v22775_v8  ;;  %16260 = vmatmul.mubr.msk.f32.gmra.mxu1 %vm5373_vm1, %v26219_v0 }
 0x577   :  { %16262 = vmatprep.mubr.msk.f32.mxu1 %vm5373_vm1, %v26220_v30  ;;  %v22781_v47 = vpop.f32.mrf.mxu0  ;;  %v26227_v30 = vld [vmem:[#allocation165_spill] sm:$0xff] }
 0x578   :  { %26221 = vst [vmem:[#allocation252_spill] sm:$0xff] %v22781_v47  ;;  %v26228_v47 = vld [vmem:[#allocation167_spill] sm:$0xff] }
 0x579   :  { %v22785_v25 = vpop.f32.mrf.mxu0 }
 0x57a   :  { %26222 = vst [vmem:[#allocation260_spill] sm:$0xff] %v22785_v25  ;;  %v16158_v61 = vpop.f32.mrf.mxu1  ;;  %16263 = vmatmul.mubr.msk.f32.gmra.mxu1 %vm5373_vm1, %v26223_v56  ;;  %v26231_v56 = vld [vmem:[#allocation166_spill] sm:$0xff] }
 0x57b   :  { %v22790_v63 = vadd.f32 %v16158_v61, %v22342_v54  ;;  %16265 = vmatprep.mubr.msk.f32.mxu1 %vm5373_vm1, %v26224_v40  ;;  %v22794_v0 = vpop.f32.mrf.mxu0  ;;  %v26232_v54 = vld [vmem:[#allocation175_spill] sm:$0xff] }
 0x57c   :  { %26225 = vst [vmem:[#allocation262_spill] sm:$0xff] %v22794_v0  ;;  %v22812_v40 = vpop.f32.mrf.mxu1  ;;  %v26235_v0 = vld [vmem:[#allocation204_spill] sm:$0xff] }
 0x57d   :  { %v22796_v8 = vpop.f32.mrf.mxu0 }
 0x57e   :  { %26226 = vst [vmem:[#allocation254_spill] sm:$0xff] %v22796_v8  ;;  %16266 = vmatmul.mubr.msk.f32.gmra.mxu1 %vm5373_vm1, %v26227_v30 }
 0x57f   :  { %16268 = vmatprep.mubr.msk.f32.mxu1 %vm5373_vm1, %v26228_v47  ;;  %v22802_v25 = vpop.f32.mrf.mxu0 }
 0x580   :  { %26229 = vst [vmem:[#allocation265_spill] sm:$0xff] %v22802_v25 }
 0x581   :  { %v22804_v13 = vpop.f32.mrf.mxu0 }
 0x582   :  { %26230 = vst [vmem:[#allocation269_spill] sm:$0xff] %v22804_v13  ;;  %16269 = vmatmul.mubr.msk.f32.gmra.mxu1 %vm5373_vm1, %v26231_v56  ;;  %v26236_v13 = vld [vmem:[#allocation206_spill] sm:$0xff] }
 0x583   :  { %16271 = vmatprep.mubr.msk.f32.mxu1 %vm5373_vm1, %v26232_v54  ;;  %v22810_v61 = vpop.f32.mrf.mxu0  ;;  %v26239_v54 = vld [vmem:[#allocation202_spill] sm:$0xff] }
 0x584   :  { %26233 = vst [vmem:[#allocation250_spill] sm:$0xff] %v22810_v61 }
 0x585   :  { %v22814_v8 = vpop.f32.mrf.mxu0 }
 0x586   :  { %26234 = vst [vmem:[#allocation271_spill] sm:$0xff] %v22814_v8  ;;  %v16161_v30 = vpop.f32.mrf.mxu1  ;;  %16272 = vmatmul.mubr.msk.f32.gmra.mxu1 %vm5373_vm1, %v26235_v0 }
 0x587   :  { %v22819_v47 = vadd.f32 %v16161_v30, %v22354_v14  ;;  %16274 = vmatprep.mubr.msk.f32.mxu1 %vm5373_vm1, %v26236_v13  ;;  %v22823_v56 = vpop.f32.mrf.mxu0  ;;  %v26242_v30 = vld [vmem:[#allocation40_spill] sm:$0xff] }
 0x588   :  { %26237 = vst [vmem:[#allocation274_spill] sm:$0xff] %v22823_v56  ;;  %v22833_v61 = vpop.f32.mrf.mxu1  ;;  %v26256_v56 = vld [vmem:[#allocation57_spill] sm:$0xff] }
 0x589   :  { %v22825_v25 = vpop.f32.mrf.mxu0 }
 0x58a   :  { %26238 = vst [vmem:[#allocation278_spill] sm:$0xff] %v22825_v25  ;;  %16275 = vmatmul.mubr.msk.f32.gmra.mxu1 %vm5373_vm1, %v26239_v54 }
 0x58b   :  { %16277 = vmatprep.mubr.msk.f32.mxu1 %vm5373_vm1, %v21871_v35  ;;  %v22831_v8 = vpop.f32.mrf.mxu0  ;;  %v14082_v35 = vld [vmem:[%s25095_s3 + $0x230] sm:$0xff] }
 0x58c   :  { %26240 = vst [vmem:[#allocation280_spill] sm:$0xff] %v22831_v8  ;;  %v26245_v8 = vld [vmem:[#allocation43_spill] sm:$0xff] }
 0x58d   :  { %v22835_v0 = vpop.f32.mrf.mxu0 }
 0x58e   :  { %26241 = vst [vmem:[#allocation257_spill] sm:$0xff] %v22835_v0  ;;  %v16164_v14 = vpop.f32.mrf.mxu1  ;;  %16278 = vmatmul.mubr.msk.f32.gmra.mxu1 %vm5373_vm1, %v21882_v28  ;;  %v26246_v0 = vld [vmem:[#allocation34_spill] sm:$0xff] }
 0x58f   :  { %v22840_v13 = vadd.f32 %v16164_v14, %v22366_v11  ;;  %16296 = vmatprep.mubr.msk.f32.mxu1 %vm5373_vm1, %v26242_v30  ;;  %v22844_v54 = vpop.f32.mrf.mxu0  ;;  %v14081_v11 = vld [vmem:[%s25095_s3 + $0x228] sm:$0xff]  ;;  %v14080_v30 = vld [vmem:[%s25095_s3 + $0x220] sm:$0xff] }
 0x590   :  { %26243 = vst [vmem:[#allocation283_spill] sm:$0xff] %v22844_v54  ;;  %v26253_v54 = vld [vmem:[#allocation54_spill] sm:$0xff] }
 0x591   :  { %v22846_v25 = vpop.f32.mrf.mxu0 }
 0x592   :  { %26244 = vst [vmem:[#allocation286_spill] sm:$0xff] %v22846_v25  ;;  %16297 = vmatmul.mubr.msk.f32.vlgmr.msra.gmra.mxu1 %vm5373_vm1, %v26245_v8  ;;  %v26249_v8 = vld [vmem:[#allocation45_spill] sm:$0xff] }
 0x593   :  { %16299 = vmatprep.mubr.msk.f32.mxu1 %vm5373_vm1, %v26246_v0  ;;  %v22855_v28 = vpop.f32.mrf.mxu0  ;;  %16457 = vmatpush3.msra.mxu1 %v22722_v18  ;;  %v26250_v0 = vld [vmem:[#allocation5_spill] sm:$0xff] }
 0x594   :  { %26247 = vst [vmem:[#allocation258_spill] sm:$0xff] %v22855_v28  ;;  %16458 = vmatprep.subr.mxu1 %v14082_v35  ;;  %v14079_v28 = vld [vmem:[%s25095_s3 + $0x218] sm:$0xff] }
 0x595   :  { %v22861_v14 = vpop.f32.mrf.mxu0  ;;  %16459 = vmatpush3.msra.mxu1 %v14082_v35 }
 0x596   :  { %26248 = vst [vmem:[#allocation287_spill] sm:$0xff] %v22861_v14  ;;  %16300 = vmatmul.mubr.msk.f32.gmra.mxu1 %vm5373_vm1, %v26249_v8  ;;  %16460 = vmatprep.subr.mxu1 %v14081_v11  ;;  %v22875_v14 = vpop.f32.mrf.mxu1  ;;  %v14078_v8 = vld [vmem:[%s25095_s3 + $0x210] sm:$0xff] }
 0x597   :  { %16302 = vmatprep.mubr.msk.f32.mxu1 %vm5373_vm1, %v26250_v0  ;;  %v22870_v18 = vpop.f32.mrf.mxu0  ;;  %16461 = vmatpush3.msra.mxu1 %v14081_v11  ;;  %v26254_v0 = vld [vmem:[#allocation8_spill] sm:$0xff] }
 0x598   :  { %26251 = vst [vmem:[#allocation288_spill] sm:$0xff] %v22870_v18  ;;  %16462 = vmatprep.subr.mxu1 %v14080_v30 }
 0x599   :  { %v22877_v35 = vpop.f32.mrf.mxu0  ;;  %16463 = vmatpush3.msra.mxu1 %v14080_v30  ;;  %v14077_v30 = vld [vmem:[%s25095_s3 + $0x208] sm:$0xff] }
 0x59a   :  { %26252 = vst [vmem:[#allocation255_spill] sm:$0xff] %v22877_v35  ;;  %v16167_v25 = vpop.f32.mrf.mxu1  ;;  %16303 = vmatmul.mubr.msk.f32.gmra.mxu1 %vm5373_vm1, %v26253_v54  ;;  %16464 = vmatprep.subr.mxu1 %v14079_v28  ;;  %v14076_v54 = vld [vmem:[%s25095_s3 + $0x200] sm:$0xff] }
 0x59b   :  { %v22885_v11 = vadd.f32 %v16167_v25, %v22377_v58  ;;  %16305 = vmatprep.mubr.msk.f32.mxu1 %vm5373_vm1, %v26254_v0  ;;  %v22889_v18 = vpop.f32.mrf.mxu0  ;;  %16465 = vmatpush3.msra.mxu1 %v14079_v28  ;;  %v26257_v58 = vld [vmem:[#allocation63_spill] sm:$0xff] }
 0x59c   :  { %26255 = vst [vmem:[#allocation289_spill] sm:$0xff] %v22889_v18  ;;  %16466 = vmatprep.subr.mxu1 %v14078_v8  ;;  %v26258_v28 = vld [vmem:[#allocation7_spill] sm:$0xff]  ;;  %v26260_v18 = vld [vmem:[#allocation69_spill] sm:$0xff] }
 0x59d   :  { %v16455_v35 = vpop.f32.mrf.mxu0  ;;  %16467 = vmatpush3.msra.mxu1 %v14078_v8  ;;  %v22905_v8 = vpop.f32.mrf.mxu1 }
 0x59e   :  { %16306 = vmatmul.mubr.msk.f32.gmra.mxu1 %vm5373_vm1, %v26256_v56  ;;  %16468 = vmatprep.subr.mxu1 %v14077_v30  ;;  %v26259_v35 = vld [vmem:[#allocation12_spill] sm:$0xff] }
 0x59f   :  { %16308 = vmatprep.mubr.msk.f32.mxu1 %vm5373_vm1, %v26257_v58  ;;  %v9118_v25 = vpop.f32.mrf.mxu0  ;;  %16469 = vmatpush3.msra.mxu1 %v14077_v30  ;;  %v26261_v58 = vld [vmem:[#allocation75_spill] sm:$0xff] }
 0x5a0   :  { %16470 = vmatprep.subr.mxu1 %v14076_v54  ;;  %v26262_v30 = vld [vmem:[#allocation11_spill] sm:$0xff] }
 0x5a1   :  { %16471 = vmatpush3.msra.mxu1 %v14076_v54  ;;  %v26263_v54 = vld [vmem:[#allocation16_spill] sm:$0xff] }
 0x5a2   :  { %16309 = vmatmul.mubr.msk.f32.gmra.mxu1 %vm5373_vm1, %v26258_v28 }
 0x5a3   :  { %16311 = vmatprep.mubr.msk.f32.mxu1 %vm5373_vm1, %v26259_v35  ;;  %v26265_v35 = vld [vmem:[#allocation81_spill] sm:$0xff] }
 0x5a6   :  { %v16170_v0 = vpop.f32.mrf.mxu1  ;;  %16312 = vmatmul.mubr.msk.f32.gmra.mxu1 %vm5373_vm1, %v26260_v18 }
 0x5a7   :  { %v22910_v56 = vadd.f32 %v16170_v0, %v22389_v12  ;;  %16314 = vmatprep.mubr.msk.f32.mxu1 %vm5373_vm1, %v26261_v58  ;;  %v26266_v12 = vld [vmem:[#allocation87_spill] sm:$0xff]  ;;  %v26268_v58 = vld [vmem:[#allocation20_spill] sm:$0xff] }
 0x5a8   :  { %v22918_v25 = vpop.f32.mrf.mxu1  ;;  %v26267_v0 = vld [vmem:[#allocation15_spill] sm:$0xff] }
 0x5a9   :  { %26264 = vst [vmem:[#allocation290_spill] sm:$0xff] %v22918_v25  ;;  %v26271_v25 = vld [vmem:[#allocation184_spill] sm:$0xff] }
 0x5aa   :  { %16315 = vmatmul.mubr.msk.f32.gmra.mxu1 %vm5373_vm1, %v26262_v30  ;;  %v26269_v30 = vld [vmem:[#allocation89_spill] sm:$0xff] }
 0x5ab   :  { %16317 = vmatprep.mubr.msk.f32.mxu1 %vm5373_vm1, %v26263_v54  ;;  %v26270_v54 = vld [vmem:[#allocation309_spill] sm:$0xff] }
 0x5ac   :  { %v6212_v62 = vadd.f32 %v26271_v25, %v26270_v54 }
 0x5ae   :  { %v16173_v28 = vpop.f32.mrf.mxu1  ;;  %16318 = vmatmul.mubr.msk.f32.gmra.mxu1 %vm5373_vm1, %v26265_v35 }
 0x5af   :  { %v22923_v18 = vadd.f32 %v16173_v28, %v22406_v43  ;;  %16320 = vmatprep.mubr.msk.f32.mxu1 %vm5373_vm1, %v26266_v12  ;;  %v6841_v28 = vadd.f32 %v22125_v21, %v6212_v62  ;;  %v26274_v12 = vld [vmem:[#allocation19_spill] sm:$0xff]  ;;  %v26279_v21 = vld [vmem:[#allocation29_spill] sm:$0xff] }
 0x5b0   :  { %v22937_v43 = vpop.f32.mrf.mxu1  ;;  %v26280_v62 = vld [vmem:[#allocation139_spill] sm:$0xff] }
 0x5b1   :  { %26273 = vst [vmem:[#allocation291_spill] sm:$0xff] %v22937_v43  ;;  %v26278_v43 = vld [vmem:[#allocation23_spill] sm:$0xff] }
 0x5b2   :  { %16321 = vmatmul.mubr.msk.f32.gmra.mxu1 %vm5373_vm1, %v26267_v0  ;;  %v7343_v0 = vadd.f32 %v22421_v3, %v6841_v28  ;;  %v6222_v3 = vadd.f32 %v21868_v37, %v26280_v62  ;;  %v26285_v37 = vld [vmem:[#allocation38_spill] sm:$0xff]  ;;  %v26287_v62 = vld [vmem:[#allocation41_spill] sm:$0xff] }
 0x5b3   :  { %16323 = vmatprep.mubr.msk.f32.mxu1 %vm5373_vm1, %v26268_v58 }
 0x5b4   :  { %v6843_v28 = vadd.f32 %v22132_v60, %v6222_v3  ;;  %v26289_v3 = vld [vmem:[#allocation39_spill] sm:$0xff] }
 0x5b6   :  { %16324 = vmatmul.mubr.msk.f32.gmra.mxu1 %vm5373_vm1, %v26269_v30  ;;  %v26275_v30 = vld [vmem:[#allocation24_spill] sm:$0xff] }
 0x5b7   :  { %16326 = vmatprep.mubr.msk.f32.mxu1 %vm5373_vm1, %v26272_v29  ;;  %v26277_v29 = vld [vmem:[#allocation26_spill] sm:$0xff] }
 0x5ba   :  { %v16176_v35 = vpop.f32.mrf.mxu1  ;;  %16327 = vmatmul.mubr.msk.f32.gmra.mxu1 %vm5373_vm1, %v26274_v12  ;;  %v26282_v12 = vld [vmem:[#allocation27_spill] sm:$0xff] }
 0x5bb   :  { %v22944_v58 = vadd.f32 %v16176_v35, %v22418_v59  ;;  %16329 = vmatprep.mubr.msk.f32.mxu1 %vm5373_vm1, %v26275_v30  ;;  %v26281_v59 = vld [vmem:[#allocation32_spill] sm:$0xff] }
 0x5bc   :  { %v7752_v25 = vpop.f32.mrf.mxu1 }
 0x5bd   :  { %v22948_v54 = vadd.f32 %v7752_v25, %v7343_v0  ;;  %v7345_v0 = vadd.f32 %v22428_v2, %v6843_v28  ;;  %v26291_v28 = vld [vmem:[#allocation50_spill] sm:$0xff] }
 0x5be   :  { %16330 = vmatmul.mubr.msk.f32.gmra.mxu1 %vm5373_vm1, %v26277_v29 }
 0x5bf   :  { %26276 = vst [vmem:[#allocation292_spill] sm:$0xff] %v22948_v54  ;;  %16332 = vmatprep.mubr.msk.f32.mxu1 %vm5373_vm1, %v26278_v43  ;;  %v26283_v43 = vld [vmem:[#allocation35_spill] sm:$0xff] }
 0x5c2   :  { %16333 = vmatmul.mubr.msk.f32.gmra.mxu1 %vm5373_vm1, %v26279_v21  ;;  %v26286_v21 = vld [vmem:[#allocation33_spill] sm:$0xff] }
 0x5c3   :  { %16335 = vmatprep.mubr.msk.f32.mxu1 %vm5373_vm1, %v26281_v59  ;;  %v26290_v59 = vld [vmem:[#allocation109_spill] sm:$0xff] }
 0x5c6   :  { %v16179_v35 = vpop.f32.mrf.mxu1  ;;  %16336 = vmatmul.mubr.msk.f32.gmra.mxu1 %vm5373_vm1, %v26282_v12 }
 0x5c7   :  { %v22965_v30 = vadd.f32 %v16179_v35, %v22426_v34  ;;  %16338 = vmatprep.mubr.msk.f32.mxu1 %vm5373_vm1, %v26283_v43  ;;  %v26288_v34 = vld [vmem:[#allocation44_spill] sm:$0xff] }
 0x5c8   :  { %v7762_v25 = vpop.f32.mrf.mxu1  ;;  %v26292_v35 = vld [vmem:[#allocation112_spill] sm:$0xff] }
 0x5c9   :  { %v22969_v29 = vadd.f32 %v7762_v25, %v7345_v0  ;;  %v26295_v25 = vld [vmem:[#allocation115_spill] sm:$0xff] }
 0x5ca   :  { %16339 = vmatmul.mubr.msk.f32.gmra.mxu1 %vm5373_vm1, %v26285_v37  ;;  %v26296_v37 = vld [vmem:[#allocation116_spill] sm:$0xff] }
 0x5cb   :  { %26284 = vst [vmem:[#allocation28_spill] sm:$0xff] %v22969_v29  ;;  %16341 = vmatprep.mubr.msk.f32.mxu1 %vm5373_vm1, %v26286_v21  ;;  %v26297_v21 = vld [vmem:[#allocation62_spill] sm:$0xff] }
 0x5cc   :  { %v26315_v29 = vld [vmem:[#allocation22_spill] sm:$0xff] }
 0x5ce   :  { %v16182_v60 = vpop.f32.mrf.mxu1  ;;  %16342 = vmatmul.mubr.msk.f32.gmra.mxu1 %vm5373_vm1, %v26287_v62  ;;  %v26299_v62 = vld [vmem:[#allocation65_spill] sm:$0xff] }
 0x5cf   :  { %v22978_v2 = vadd.f32 %v16182_v60, %v22432_v42  ;;  %16344 = vmatprep.mubr.msk.f32.mxu1 %vm5373_vm1, %v26288_v34  ;;  %v26294_v42 = vld [vmem:[#allocation113_spill] sm:$0xff]  ;;  %v26298_v60 = vld [vmem:[#allocation119_spill] sm:$0xff]  ;;  %v26300_v34 = vld [vmem:[#allocation154_spill] sm:$0xff] }
 0x5d0   :  { %v22990_v12 = vpop.f32.mrf.mxu1 }
 0x5d1   :  { %26293 = vst [vmem:[#allocation31_spill] sm:$0xff] %v22990_v12  ;;  %v26314_v12 = vld [vmem:[#allocation101_spill] sm:$0xff] }
 0x5d2   :  { %16345 = vmatmul.mubr.msk.f32.gmra.mxu1 %vm5373_vm1, %v26289_v3  ;;  %v3487_v3 = vadd.f32 %v22544_v20, %v26300_v34  ;;  %v26307_v34 = vld [vmem:[#allocation86_spill] sm:$0xff]  ;;  %v6042_v54 = vadd.f32 %v26315_v29, %v26314_v12 }
 0x5d3   :  { %16347 = vmatprep.mubr.msk.f32.mxu1 %vm5373_vm1, %v26290_v59  ;;  %v26302_v59 = vld [vmem:[#allocation157_spill] sm:$0xff] }
 0x5d6   :  { %16348 = vmatmul.mubr.msk.f32.gmra.mxu1 %vm5373_vm1, %v26291_v28  ;;  %v3490_v28 = vadd.f32 %v22544_v20, %v26302_v59 }
 0x5d7   :  { %16350 = vmatprep.mubr.msk.f32.mxu1 %vm5373_vm1, %v26292_v35 }
 0x5da   :  { %v16185_v0 = vpop.f32.mrf.mxu1  ;;  %16351 = vmatmul.mubr.msk.f32.gmra.mxu1 %vm5373_vm1, %v26294_v42 }
 0x5db   :  { %v22995_v43 = vadd.f32 %v16185_v0, %v22440_v38  ;;  %16353 = vmatprep.mubr.msk.f32.mxu1 %vm5373_vm1, %v26295_v25  ;;  %v26303_v0 = vld [vmem:[#allocation68_spill] sm:$0xff] }
 0x5dc   :  { %v23009_v38 = vpop.f32.mrf.mxu1  ;;  %v26304_v25 = vld [vmem:[#allocation64_spill] sm:$0xff] }
 0x5dd   :  { %26301 = vst [vmem:[#allocation261_spill] sm:$0xff] %v23009_v38  ;;  %v23026_v38 = vadd.f32 %v26307_v34, %v3490_v28 }
 0x5de   :  { %16354 = vmatmul.mubr.msk.f32.gmra.mxu1 %vm5373_vm1, %v26296_v37  ;;  %v26305_v37 = vld [vmem:[#allocation83_spill] sm:$0xff] }
 0x5df   :  { %16356 = vmatprep.mubr.msk.f32.mxu1 %vm5373_vm1, %v26297_v21  ;;  %v23021_v21 = vadd.f32 %v26305_v37, %v3487_v3  ;;  %v26311_v3 = vld [vmem:[#allocation125_spill] sm:$0xff] }
 0x5e2   :  { %16357 = vmatmul.mubr.msk.f32.gmra.mxu1 %vm5373_vm1, %v26298_v60  ;;  %v26306_v60 = vld [vmem:[#allocation160_spill] sm:$0xff] }
 0x5e3   :  { %16359 = vmatprep.mubr.msk.f32.mxu1 %vm5373_vm1, %v26299_v62  ;;  %v3495_v62 = vadd.f32 %v22544_v20, %v26306_v60  ;;  %v26312_v20 = vld [vmem:[#allocation212_spill] sm:$0xff]  ;;  %v26313_v60 = vld [vmem:[#allocation142_spill] sm:$0xff] }
 0x5e6   :  { %v16188_v35 = vpop.f32.mrf.mxu1  ;;  %16360 = vmatmul.mubr.msk.f32.gmra.mxu1 %vm5373_vm1, %v26303_v0  ;;  %v26310_v0 = vld [vmem:[#allocation96_spill] sm:$0xff] }
 0x5e7   :  { %v23016_v42 = vadd.f32 %v16188_v35, %v22448_v45  ;;  %16362 = vmatprep.mubr.msk.f32.mxu1 %vm5373_vm1, %v26304_v25  ;;  %v26308_v45 = vld [vmem:[#allocation82_spill] sm:$0xff]  ;;  %v6032_v25 = vadd.f32 %v26311_v3, %v26310_v0  ;;  %v26317_v0 = vld [vmem:[#allocation207_spill] sm:$0xff] }
 0x5e8   :  { %v23033_v59 = vadd.f32 %v26308_v45, %v3495_v62  ;;  %v23035_v35 = vpop.f32.mrf.mxu1  ;;  %v6807_v3 = vadd.f32 %v26317_v0, %v6042_v54  ;;  %v26322_v54 = vld [vmem:[#allocation210_spill] sm:$0xff] }
 0x5e9   :  { %26309 = vst [vmem:[#allocation293_spill] sm:$0xff] %v23035_v35  ;;  %v6805_v28 = vadd.f32 %v26312_v20, %v6032_v25  ;;  %v26316_v35 = vld [vmem:[#allocation70_spill] sm:$0xff]  ;;  %v26318_v25 = vld [vmem:[#allocation77_spill] sm:$0xff] }
 0x5ea   :  { %16363 = vmatmul.mubr.msk.f32.gmra.mxu1 %vm5373_vm1, %v23021_v21 }
 0x5eb   :  { %16365 = vmatprep.mubr.msk.f32.mxu1 %vm5373_vm1, %v23026_v38  ;;  %v7307_v62 = vadd.f32 %v22186_v49, %v6805_v28  ;;  %v7309_v49 = vadd.f32 %v22198_v48, %v6807_v3 }
 0x5ee   :  { %v16191_v37 = vpop.f32.mrf.mxu1  ;;  %16366 = vmatmul.mubr.msk.f32.gmra.mxu1 %vm5373_vm1, %v23033_v59 }
 0x5ef   :  { %16472 = vmatprep.mubr.msk.f32.mxu1 %vm5373_vm1, %v26313_v60  ;;  %v7809_v37 = vadd.f32 %v22473_v24, %v7307_v62  ;;  %v26319_v60 = vld [vmem:[#allocation107_spill] sm:$0xff] }
 0x5f0   :  { %v7802_v34 = vpop.f32.mrf.mxu1 }
 0x5f1   :  { %v26320_v34 = vld [vmem:[#allocation187_spill] sm:$0xff] }
 0x5f2   :  { %v16210_v45 = vpop.f32.mrf.mxu1  ;;  %16473 = vmatmul.mubr.msk.f32.vlgmr.msra.gmra.mxu1 %vm5373_vm1, %v26316_v35  ;;  %v6052_v29 = vadd.f32 %v26320_v34, %v26319_v60  ;;  %v26321_v35 = vld [vmem:[#allocation148_spill] sm:$0xff]  ;;  %v26325_v60 = vld [vmem:[#allocation138_spill] sm:$0xff]  ;;  %v26326_v34 = vld [vmem:[#allocation37_spill] sm:$0xff] }
 0x5f3   :  { %v23052_v57 = vadd.f32 %v16210_v45, %v22462_v26  ;;  %16475 = vmatprep.mubr.msk.f32.mxu1 %vm5373_vm1, %v26318_v25  ;;  %v7811_v26 = vadd.f32 %v22484_v22, %v7309_v49  ;;  %v26323_v45 = vld [vmem:[#allocation76_spill] sm:$0xff]  ;;  %v26324_v25 = vld [vmem:[#allocation46_spill] sm:$0xff] }
 0x5f4   :  { %v8154_v20 = vpop.f32.mrf.mxu1  ;;  %v6809_v24 = vadd.f32 %v26322_v54, %v6052_v29  ;;  %v6062_v48 = vadd.f32 %v26325_v60, %v26324_v25  ;;  %v26327_v49 = vld [vmem:[#allocation6_spill] sm:$0xff]  ;;  %v26329_v54 = vld [vmem:[#allocation185_spill] sm:$0xff]  ;;  %v26332_v25 = vld [vmem:[#allocation203_spill] sm:$0xff] }
 0x5f5   :  { %v23059_v12 = vadd.f32 %v8154_v20, %v7809_v37 }
 0x5f6   :  { %v16213_v28 = vpop.f32.mrf.mxu1  ;;  %16476 = vmatmul.mubr.msk.f32.gmra.mxu1 %vm5373_vm1, %v26321_v35  ;;  %v7311_v3 = vadd.f32 %v22210_v41, %v6809_v24  ;;  %v6811_v22 = vadd.f32 %v21954_v31, %v6062_v48  ;;  %v26328_v35 = vld [vmem:[#allocation52_spill] sm:$0xff]  ;;  %v26331_v31 = vld [vmem:[#allocation93_spill] sm:$0xff] }
 0x5f7   :  { %v23066_v62 = vadd.f32 %v16213_v28, %v22479_v23  ;;  %16478 = vmatprep.mubr.msk.f32.mxu1 %vm5373_vm1, %v26323_v45  ;;  %v6072_v41 = vadd.f32 %v26329_v54, %v26328_v35  ;;  %v26333_v48 = vld [vmem:[#allocation72_spill] sm:$0xff]  ;;  %v26337_v35 = vld [vmem:[#allocation13_spill] sm:$0xff] }
 0x5f8   :  { %v8164_v0 = vpop.f32.mrf.mxu1  ;;  %v7813_v23 = vadd.f32 %v22495_v44, %v7311_v3  ;;  %v7313_v24 = vadd.f32 %v22220_v15, %v6811_v22  ;;  %v26336_v22 = vld [vmem:[#allocation230_spill] sm:$0xff]  ;;  %v26338_v54 = vld [vmem:[#allocation216_spill] sm:$0xff] }
 0x5f9   :  { %v23073_v37 = vadd.f32 %v8164_v0, %v7811_v26  ;;  %v26330_v0 = vld [vmem:[#allocation60_spill] sm:$0xff]  ;;  %v6813_v44 = vadd.f32 %v26331_v31, %v6072_v41 }
 0x5fa   :  { %v16216_v20 = vpop.f32.mrf.mxu1  ;;  %16479 = vmatmul.mubr.msk.f32.gmra.mxu1 %vm5373_vm1, %v26326_v34  ;;  %v26335_v34 = vld [vmem:[#allocation111_spill] sm:$0xff] }
 0x5fb   :  { %v23080_v29 = vadd.f32 %v16216_v20, %v22489_v55  ;;  %16481 = vmatprep.mubr.msk.f32.mxu1 %vm5373_vm1, %v26327_v49  ;;  %v7815_v55 = vadd.f32 %v22506_v5, %v7313_v24  ;;  %v26334_v20 = vld [vmem:[#allocation122_spill] sm:$0xff]  ;;  %v26339_v24 = vld [vmem:[#allocation208_spill] sm:$0xff] }
 0x5fc   :  { %v8174_v28 = vpop.f32.mrf.mxu1  ;;  %v6082_v15 = vadd.f32 %v26335_v34, %v26334_v20 }
 0x5fd   :  { %v23087_v26 = vadd.f32 %v8174_v28, %v7813_v23  ;;  %v7315_v23 = vadd.f32 %v26336_v22, %v6813_v44  ;;  %v26344_v22 = vld [vmem:[#allocation90_spill] sm:$0xff] }
 0x5fe   :  { %v16219_v45 = vpop.f32.mrf.mxu1  ;;  %16482 = vmatmul.mubr.msk.f32.gmra.mxu1 %vm5373_vm1, %v26330_v0  ;;  %v6815_v5 = vadd.f32 %v26338_v54, %v6082_v15  ;;  %v26340_v0 = vld [vmem:[#allocation84_spill] sm:$0xff]  ;;  %v26345_v15 = vld [vmem:[#allocation99_spill] sm:$0xff] }
 0x5ff   :  { %v23094_v60 = vadd.f32 %v16219_v45, %v26332_v25  ;;  %16484 = vmatprep.mubr.msk.f32.mxu1 %vm5373_vm1, %v26333_v48  ;;  %v7817_v41 = vadd.f32 %v22522_v27, %v7315_v23  ;;  %v26341_v25 = vld [vmem:[#allocation133_spill] sm:$0xff]  ;;  %v26342_v48 = vld [vmem:[#allocation59_spill] sm:$0xff] }
 0x600   :  { %v8184_v3 = vpop.f32.mrf.mxu1  ;;  %v6092_v44 = vadd.f32 %v26342_v48, %v26341_v25 }
 0x601   :  { %v23101_v49 = vadd.f32 %v8184_v3, %v7815_v55  ;;  %v26343_v55 = vld [vmem:[#allocation231_spill] sm:$0xff] }
 0x602   :  { %v16222_v28 = vpop.f32.mrf.mxu1  ;;  %16485 = vmatmul.mubr.msk.f32.gmra.mxu1 %vm5373_vm1, %v26337_v35  ;;  %v7317_v3 = vadd.f32 %v26343_v55, %v6815_v5  ;;  %v6817_v27 = vadd.f32 %v26345_v15, %v6092_v44  ;;  %v26346_v35 = vld [vmem:[#allocation94_spill] sm:$0xff]  ;;  %v26350_v55 = vld [vmem:[#allocation25_spill] sm:$0xff] }
 0x603   :  { %v23108_v45 = vadd.f32 %v16222_v28, %v26339_v24  ;;  %16487 = vmatprep.mubr.msk.f32.mxu1 %vm5373_vm1, %v26340_v0  ;;  %v26347_v24 = vld [vmem:[#allocation74_spill] sm:$0xff]  ;;  %v26353_v15 = vld [vmem:[#allocation145_spill] sm:$0xff] }
 0x604   :  { %v8194_v31 = vpop.f32.mrf.mxu1  ;;  %v7819_v23 = vadd.f32 %v22569_v32, %v7317_v3  ;;  %v26348_v0 = vld [vmem:[#allocation150_spill] sm:$0xff] }
 0x605   :  { %v23115_v20 = vadd.f32 %v8194_v31, %v7817_v41  ;;  %v6102_v5 = vadd.f32 %v26348_v0, %v26347_v24  ;;  %v26349_v41 = vld [vmem:[#allocation228_spill] sm:$0xff]  ;;  %v26351_v44 = vld [vmem:[#allocation218_spill] sm:$0xff] }
 0x606   :  { %v16225_v34 = vpop.f32.mrf.mxu1  ;;  %16488 = vmatmul.mubr.msk.f32.gmra.mxu1 %vm5373_vm1, %v26344_v22  ;;  %v7319_v31 = vadd.f32 %v26349_v41, %v6817_v27  ;;  %v26356_v41 = vld [vmem:[#allocation296_spill] sm:$0xff] }
 0x607   :  { %v23122_v28 = vadd.f32 %v16225_v34, %v22531_v33  ;;  %16490 = vmatprep.mubr.msk.f32.mxu1 %vm5373_vm1, %v26346_v35  ;;  %v6819_v32 = vadd.f32 %v26351_v44, %v6102_v5  ;;  %v26352_v34 = vld [vmem:[#allocation98_spill] sm:$0xff]  ;;  %v26354_v35 = vld [vmem:[#allocation195_spill] sm:$0xff]  ;;  %v26357_v5 = vld [vmem:[#allocation104_spill] sm:$0xff] }
 0x608   :  { %v8204_v54 = vpop.f32.mrf.mxu1  ;;  %v7821_v33 = vadd.f32 %v22611_v7, %v7319_v31  ;;  %v6112_v27 = vadd.f32 %v26354_v35, %v26353_v15  ;;  %v26359_v44 = vld [vmem:[#allocation48_spill] sm:$0xff] }
 0x609   :  { %v23129_v25 = vadd.f32 %v8204_v54, %v7819_v23  ;;  %v26355_v23 = vld [vmem:[#allocation234_spill] sm:$0xff] }
 0x60a   :  { %v16228_v48 = vpop.f32.mrf.mxu1  ;;  %16491 = vmatmul.mubr.msk.f32.gmra.mxu1 %vm5373_vm1, %v26350_v55  ;;  %v7321_v54 = vadd.f32 %v26355_v23, %v6819_v32  ;;  %v6821_v7 = vadd.f32 %v26357_v5, %v6112_v27  ;;  %v26362_v23 = vld [vmem:[#allocation297_spill] sm:$0xff]  ;;  %v26363_v27 = vld [vmem:[#allocation214_spill] sm:$0xff] }
 0x60b   :  { %v23136_v3 = vadd.f32 %v16228_v48, %v22581_v17  ;;  %16493 = vmatprep.mubr.msk.f32.mxu1 %vm5373_vm1, %v26352_v34  ;;  %v26358_v48 = vld [vmem:[#allocation30_spill] sm:$0xff]  ;;  %v26360_v34 = vld [vmem:[#allocation159_spill] sm:$0xff] }
 0x60c   :  { %v8214_v22 = vpop.f32.mrf.mxu1  ;;  %v7823_v17 = vadd.f32 %v22641_v39, %v7321_v54  ;;  %v6122_v32 = vadd.f32 %v26360_v34, %v26359_v44  ;;  %v26364_v54 = vld [vmem:[#allocation241_spill] sm:$0xff]  ;;  %v26367_v44 = vld [vmem:[#allocation162_spill] sm:$0xff] }
 0x60d   :  { %v23143_v24 = vadd.f32 %v8214_v22, %v7821_v33  ;;  %v26361_v33 = vld [vmem:[#allocation236_spill] sm:$0xff] }
 0x60e   :  { %v16231_v0 = vpop.f32.mrf.mxu1  ;;  %16494 = vmatmul.mubr.msk.f32.gmra.mxu1 %vm5373_vm1, %v26356_v41  ;;  %v7323_v22 = vadd.f32 %v26361_v33, %v6821_v7  ;;  %v6823_v39 = vadd.f32 %v26363_v27, %v6122_v32  ;;  %v26365_v41 = vld [vmem:[#allocation298_spill] sm:$0xff]  ;;  %v26370_v32 = vld [vmem:[#allocation47_spill] sm:$0xff]  ;;  %v26371_v27 = vld [vmem:[#allocation300_spill] sm:$0xff] }
 0x60f   :  { %v23150_v31 = vadd.f32 %v16231_v0, %v22622_v53  ;;  %16496 = vmatprep.mubr.msk.f32.mxu1 %vm5373_vm1, %v26358_v48  ;;  %v26366_v48 = vld [vmem:[#allocation9_spill] sm:$0xff] }
 0x610   :  { %v8224_v55 = vpop.f32.mrf.mxu1  ;;  %v7825_v53 = vadd.f32 %v22682_v10, %v7323_v22  ;;  %v6132_v7 = vadd.f32 %v26367_v44, %v26366_v48  ;;  %v26373_v48 = vld [vmem:[#allocation198_spill] sm:$0xff] }
 0x611   :  { %v23157_v15 = vadd.f32 %v8224_v55, %v7823_v17  ;;  %v26368_v17 = vld [vmem:[#allocation179_spill] sm:$0xff] }
 0x612   :  { %v16234_v35 = vpop.f32.mrf.mxu1  ;;  %16497 = vmatmul.mubr.msk.f32.gmra.mxu1 %vm5373_vm1, %v26362_v23  ;;  %v7325_v55 = vadd.f32 %v26368_v17, %v6823_v39  ;;  %v26369_v23 = vld [vmem:[#allocation36_spill] sm:$0xff]  ;;  %v6825_v10 = vadd.f32 %v26370_v32, %v6132_v7  ;;  %v26376_v7 = vld [vmem:[#allocation53_spill] sm:$0xff] }
 0x613   :  { %v23164_v0 = vadd.f32 %v16234_v35, %v26364_v54  ;;  %16499 = vmatprep.mubr.msk.f32.mxu1 %vm5373_vm1, %v26365_v41  ;;  %v26372_v41 = vld [vmem:[#allocation17_spill] sm:$0xff] }
 0x614   :  { %v8234_v5 = vpop.f32.mrf.mxu1  ;;  %v7827_v22 = vadd.f32 %v22729_v19, %v7325_v55  ;;  %v6142_v39 = vadd.f32 %v26373_v48, %v26372_v41  ;;  %v26379_v41 = vld [vmem:[#allocation169_spill] sm:$0xff] }
 0x615   :  { %v23171_v34 = vadd.f32 %v8234_v5, %v7825_v53  ;;  %v26374_v53 = vld [vmem:[#allocation232_spill] sm:$0xff] }
 0x616   :  { %v16237_v33 = vpop.f32.mrf.mxu1  ;;  %16500 = vmatmul.mubr.msk.f32.gmra.mxu1 %vm5373_vm1, %v26369_v23  ;;  %v7327_v5 = vadd.f32 %v26374_v53, %v6825_v10  ;;  %v26375_v23 = vld [vmem:[#allocation301_spill] sm:$0xff]  ;;  %v6827_v19 = vadd.f32 %v26376_v7, %v6142_v39 }
 0x617   :  { %v23178_v35 = vadd.f32 %v16237_v33, %v22692_v9  ;;  %16502 = vmatprep.mubr.msk.f32.mxu1 %vm5373_vm1, %v26371_v27  ;;  %v26377_v33 = vld [vmem:[#allocation42_spill] sm:$0xff]  ;;  %v26378_v27 = vld [vmem:[#allocation295_spill] sm:$0xff]  ;;  %v26382_v39 = vld [vmem:[#allocation221_spill] sm:$0xff] }
 0x618   :  { %v8244_v54 = vpop.f32.mrf.mxu1  ;;  %v7829_v9 = vadd.f32 %v22754_v52, %v7327_v5  ;;  %v6152_v10 = vadd.f32 %v26379_v41, %v26378_v27  ;;  %v26385_v27 = vld [vmem:[#allocation171_spill] sm:$0xff] }
 0x619   :  { %v23185_v44 = vadd.f32 %v8244_v54, %v7827_v22  ;;  %v26380_v22 = vld [vmem:[#allocation181_spill] sm:$0xff] }
 0x61a   :  { %v16240_v17 = vpop.f32.mrf.mxu1  ;;  %16503 = vmatmul.mubr.msk.f32.gmra.mxu1 %vm5373_vm1, %v26375_v23  ;;  %v7329_v54 = vadd.f32 %v26380_v22, %v6827_v19  ;;  %v26381_v23 = vld [vmem:[#allocation302_spill] sm:$0xff]  ;;  %v6829_v52 = vadd.f32 %v26382_v39, %v6152_v10  ;;  %v26388_v10 = vld [vmem:[#allocation117_spill] sm:$0xff] }
 0x61b   :  { %v23192_v55 = vadd.f32 %v16240_v17, %v22739_v36  ;;  %16505 = vmatprep.mubr.msk.f32.mxu1 %vm5373_vm1, %v26377_v33  ;;  %v26383_v17 = vld [vmem:[#allocation303_spill] sm:$0xff]  ;;  %v26384_v33 = vld [vmem:[#allocation102_spill] sm:$0xff] }
 0x61c   :  { %v8254_v32 = vpop.f32.mrf.mxu1  ;;  %v7831_v36 = vadd.f32 %v22783_v50, %v7329_v54  ;;  %v6162_v19 = vadd.f32 %v26385_v27, %v26384_v33  ;;  %v26391_v33 = vld [vmem:[#allocation170_spill] sm:$0xff] }
 0x61d   :  { %v23199_v48 = vadd.f32 %v8254_v32, %v7829_v9  ;;  %v26386_v9 = vld [vmem:[#allocation183_spill] sm:$0xff] }
 0x61e   :  { %v16243_v53 = vpop.f32.mrf.mxu1  ;;  %16506 = vmatmul.mubr.msk.f32.gmra.mxu1 %vm5373_vm1, %v26381_v23  ;;  %v7331_v32 = vadd.f32 %v26386_v9, %v6829_v52  ;;  %v26387_v23 = vld [vmem:[#allocation49_spill] sm:$0xff]  ;;  %v6831_v50 = vadd.f32 %v26388_v10, %v6162_v19  ;;  %v26395_v19 = vld [vmem:[#allocation222_spill] sm:$0xff] }
 0x61f   :  { %v23206_v5 = vadd.f32 %v16243_v53, %v22762_v1  ;;  %16508 = vmatprep.mubr.msk.f32.mxu1 %vm5373_vm1, %v26383_v17  ;;  %v26389_v53 = vld [vmem:[#allocation114_spill] sm:$0xff]  ;;  %v26390_v17 = vld [vmem:[#allocation299_spill] sm:$0xff] }
 0x620   :  { %v8264_v7 = vpop.f32.mrf.mxu1  ;;  %v7833_v1 = vadd.f32 %v22812_v40, %v7331_v32  ;;  %v6172_v52 = vadd.f32 %v26391_v33, %v26390_v17  ;;  %v26398_v17 = vld [vmem:[#allocation177_spill] sm:$0xff] }
 0x621   :  { %v23213_v41 = vadd.f32 %v8264_v7, %v7831_v36  ;;  %v26392_v36 = vld [vmem:[#allocation239_spill] sm:$0xff] }
 0x622   :  { %v16246_v22 = vpop.f32.mrf.mxu1  ;;  %16509 = vmatmul.mubr.msk.f32.gmra.mxu1 %vm5373_vm1, %v26387_v23  ;;  %v7333_v7 = vadd.f32 %v26392_v36, %v6831_v50  ;;  %v26394_v23 = vld [vmem:[#allocation305_spill] sm:$0xff]  ;;  %v6833_v40 = vadd.f32 %v26395_v19, %v6172_v52  ;;  %v26403_v19 = vld [vmem:[#allocation308_spill] sm:$0xff] }
 0x623   :  { %v23220_v54 = vadd.f32 %v16246_v22, %v22790_v63  ;;  %16511 = vmatprep.mubr.msk.f32.mxu1 %vm5373_vm1, %v26389_v53  ;;  %v26396_v22 = vld [vmem:[#allocation306_spill] sm:$0xff] }
 0x624   :  { %v8274_v39 = vpop.f32.mrf.mxu1  ;;  %v7835_v63 = vadd.f32 %v22833_v61, %v7333_v7  ;;  %v26397_v53 = vld [vmem:[#allocation110_spill] sm:$0xff]  ;;  %v9603_v61 = vld [vmem:[%s25097_s5 + $0x38] sm:$0xff] }
 0x625   :  { %v23227_v27 = vadd.f32 %v8274_v39, %v7833_v1  ;;  %v6182_v50 = vadd.f32 %v26398_v17, %v26397_v53  ;;  %v26399_v1 = vld [vmem:[#allocation186_spill] sm:$0xff]  ;;  %16623 = vmatprep.subr.mxu1 %v9603_v61 }
 0x626   :  { %v16249_v9 = vpop.f32.mrf.mxu1  ;;  %16512 = vmatmul.mubr.msk.f32.gmra.mxu1 %vm5373_vm1, %v26394_v23  ;;  %v7335_v39 = vadd.f32 %v26399_v1, %v6833_v40  ;;  %v26401_v23 = vld [vmem:[#allocation307_spill] sm:$0xff] }
 0x627   :  { %26393 = vst [vmem:[#allocation294_spill] sm:$0xff] %v23227_v27  ;;  %v23234_v32 = vadd.f32 %v16249_v9, %v22819_v47  ;;  %16514 = vmatprep.mubr.msk.f32.mxu1 %vm5373_vm1, %v26396_v22  ;;  %v26402_v47 = vld [vmem:[#allocation124_spill] sm:$0xff]  ;;  %16624 = vmatpush3.msra.mxu1 %v9603_v61  ;;  %v26404_v22 = vld [vmem:[#allocation189_spill] sm:$0xff] }
 0x628   :  { %v8284_v10 = vpop.f32.mrf.mxu1  ;;  %v6835_v52 = vadd.f32 %v26402_v47, %v6182_v50  ;;  %v7837_v7 = vadd.f32 %v22875_v14, %v7335_v39  ;;  %v26406_v14 = vld [vmem:[#allocation61_spill] sm:$0xff]  ;;  %v26407_v39 = vld [vmem:[#allocation127_spill] sm:$0xff] }
 0x629   :  { %v23241_v33 = vadd.f32 %v8284_v10, %v7835_v63  ;;  %v9602_v63 = vld [vmem:[%s25097_s5 + $0x30] sm:$0xff]  ;;  %v9600_v61 = vld [vmem:[%s25097_s5 + $0x20] sm:$0xff] }
 0x62a   :  { %v16252_v36 = vpop.f32.mrf.mxu1  ;;  %16515 = vmatmul.mubr.msk.f32.gmra.mxu1 %vm5373_vm1, %v26401_v23  ;;  %v7337_v10 = vadd.f32 %v26404_v22, %v6835_v52  ;;  %16625 = vmatprep.subr.mxu1 %v9602_v63  ;;  %v14140_v23 = vld [vmem:[%s25097_s5 + $0x78] sm:$0xff]  ;;  %v14139_v52 = vld [vmem:[%s25097_s5 + $0x70] sm:$0xff]  ;;  %v14138_v22 = vld [vmem:[%s25097_s5 + $0x68] sm:$0xff] }
 0x62b   :  { %26400 = vst [vmem:[#allocation121_spill] sm:$0xff] %v23241_v33  ;;  %v23251_v9 = vadd.f32 %v16252_v36, %v22840_v13  ;;  %16517 = vmatprep.mubr.msk.f32.mxu1 %vm5373_vm1, %v26403_v19  ;;  %v9601_v13 = vld [vmem:[%s25097_s5 + $0x28] sm:$0xff]  ;;  %16626 = vmatpush3.msra.mxu1 %v9602_v63 }
 0x62c   :  { %v8294_v40 = vpop.f32.mrf.mxu1  ;;  %v7839_v50 = vadd.f32 %v22905_v8, %v7337_v10  ;;  %16627 = vmatprep.subr.mxu1 %v9601_v13  ;;  %16544 = vmatprep.subr.mxu0 %v14140_v23  ;;  %v26409_v8 = vld [vmem:[#allocation310_spill] sm:$0xff] }
 0x62d   :  { %v23259_v53 = vadd.f32 %v8294_v40, %v7837_v7  ;;  %16628 = vmatpush3.msra.mxu1 %v9601_v13  ;;  %v9599_v7 = vld [vmem:[%s25097_s5 + $0x18] sm:$0xff]  ;;  %16545 = vmatpush3.msra.mxu0 %v14140_v23  ;;  %v9598_v10 = vld [vmem:[%s25097_s5 + $0x10] sm:$0xff] }
 0x62e   :  { %v16255_v17 = vpop.f32.mrf.mxu1  ;;  %16518 = vmatmul.mubr.msk.f32.gmra.mxu1 %vm5373_vm1, %v26406_v14  ;;  %16629 = vmatprep.subr.mxu1 %v9600_v61  ;;  %v26410_v40 = vld [vmem:[#allocation67_spill] sm:$0xff]  ;;  %v14137_v14 = vld [vmem:[%s25097_s5 + $0x60] sm:$0xff] }
 0x62f   :  { %26405 = vst [vmem:[#allocation51_spill] sm:$0xff] %v23259_v53  ;;  %v23268_v1 = vadd.f32 %v16255_v17, %v22885_v11  ;;  %16520 = vmatprep.mubr.msk.f32.mxu1 %vm5373_vm1, %v26407_v39  ;;  %16630 = vmatpush3.msra.mxu1 %v9600_v61  ;;  %v26412_v17 = vld [vmem:[#allocation311_spill] sm:$0xff]  ;;  %v9597_v39 = vld [vmem:[%s25097_s5 + $0x8] sm:$0xff] }
 0x630   :  { %v8304_v36 = vpop.f32.mrf.mxu1  ;;  %16546 = vmatprep.subr.mxu0 %v14139_v52  ;;  %16631 = vmatprep.subr.mxu1 %v9599_v7  ;;  %v14136_v23 = vld [vmem:[%s25097_s5 + $0x58] sm:$0xff]  ;;  %v26415_v61 = vld [vmem:[#allocation73_spill] sm:$0xff] }
 0x631   :  { %v23278_v47 = vadd.f32 %v8304_v36, %v7839_v50  ;;  %16547 = vmatpush3.msra.mxu0 %v14139_v52  ;;  %v26413_v50 = vld [vmem:[#allocation313_spill] sm:$0xff]  ;;  %16632 = vmatpush3.msra.mxu1 %v9599_v7  ;;  %v26416_v52 = vld [vmem:[#allocation151_spill] sm:$0xff] }
 0x632   :  { %v16258_v11 = vpop.f32.mrf.mxu1  ;;  %16521 = vmatmul.mubr.msk.f32.gmra.mxu1 %vm5373_vm1, %v26409_v8  ;;  %16548 = vmatprep.subr.mxu0 %v14138_v22  ;;  %v14135_v7 = vld [vmem:[%s25097_s5 + $0x50] sm:$0xff] }
 0x633   :  { %26408 = vst [vmem:[#allocation123_spill] sm:$0xff] %v23278_v47  ;;  %v23289_v19 = vadd.f32 %v16258_v11, %v22910_v56  ;;  %16523 = vmatprep.mubr.msk.f32.mxu1 %vm5373_vm1, %v26410_v40  ;;  %16633 = vmatprep.subr.mxu1 %v9598_v10  ;;  %v9596_v11 = vld [vmem:[%s25097_s5] sm:$0xff] }
 0x634   :  { %v23293_v63 = vpop.f32.mrf.mxu1  ;;  %16549 = vmatpush3.msra.mxu0 %v14138_v22  ;;  %16634 = vmatpush3.msra.mxu1 %v9598_v10  ;;  %v26418_v10 = vld [vmem:[#allocation315_spill] sm:$0xff] }
 0x635   :  { %26411 = vst [vmem:[#allocation263_spill] sm:$0xff] %v23293_v63  ;;  %16550 = vmatprep.subr.mxu0 %v14137_v14  ;;  %16635 = vmatprep.subr.mxu1 %v9597_v39 }
 0x636   :  { %v16261_v56 = vpop.f32.mrf.mxu1  ;;  %16524 = vmatmul.mubr.msk.f32.gmra.mxu1 %vm5373_vm1, %v26412_v17  ;;  %16551 = vmatpush3.msra.mxu0 %v14137_v14  ;;  %v26419_v17 = vld [vmem:[#allocation79_spill] sm:$0xff] }
 0x637   :  { %v23307_v13 = vadd.f32 %v16261_v56, %v22923_v18  ;;  %16526 = vmatprep.mubr.msk.f32.mxu1 %vm5373_vm1, %v26413_v50  ;;  %16636 = vmatpush3.msra.mxu1 %v9597_v39  ;;  %v14133_v50 = vld [vmem:[%s25097_s5 + $0x40] sm:$0xff] }
 0x638   :  { %v23314_v36 = vpop.f32.mrf.mxu1  ;;  %16552 = vmatprep.subr.mxu0 %v14136_v23  ;;  %16637 = vmatprep.subr.mxu1 %v9596_v11  ;;  %v18072_v39 = vld [vmem:[%s25094_s2] ss:$0 sm:$0xff] }
 0x639   :  { %26414 = vst [vmem:[#allocation120_spill] sm:$0xff] %v23314_v36  ;;  %16553 = vmatpush3.msra.mxu0 %v14136_v23  ;;  %16638 = vmatpush3.msra.mxu1 %v9596_v11  ;;  %v26421_v23 = vld [vmem:[#allocation163_spill] sm:$0xff] }
 0x63a   :  { %v16264_v18 = vpop.f32.mrf.mxu1  ;;  %16527 = vmatmul.mubr.msk.f32.gmra.mxu1 %vm5373_vm1, %v26415_v61  ;;  %16554 = vmatprep.subr.mxu0 %v14135_v7  ;;  %v26422_v61 = vld [vmem:[#allocation317_spill] sm:$0xff] }
 0x63b   :  { %v23325_v8 = vadd.f32 %v16264_v18, %v22944_v58  ;;  %16529 = vmatprep.mubr.msk.f32.mxu1 %vm5373_vm1, %v26416_v52  ;;  %v14134_v58 = vld [vmem:[%s25097_s5 + $0x48] sm:$0xff]  ;;  %16555 = vmatpush3.msra.mxu0 %v14135_v7  ;;  %v3498_v18 = vadd.f32 %v18072_v39, %v26421_v23  ;;  %v9175_v39 = vrot.slane %v23033_v59, 1 }
 0x63c   :  { %v23332_v40 = vpop.f32.mrf.mxu1  ;;  %16556 = vmatprep.subr.mxu0 %v14134_v58  ;;  %v26423_v52 = vld [vmem:[#allocation10_spill] sm:$0xff] }
 0x63d   :  { %26417 = vst [vmem:[#allocation259_spill] sm:$0xff] %v23332_v40  ;;  %16557 = vmatpush3.msra.mxu0 %v14134_v58 }
 0x63e   :  { %v16267_v22 = vpop.f32.mrf.mxu1  ;;  %16530 = vmatmul.mubr.msk.f32.gmra.mxu1 %vm5373_vm1, %v26418_v10  ;;  %16558 = vmatprep.subr.mxu0 %v14133_v50  ;;  %v26425_v10 = vld [vmem:[#allocation85_spill] sm:$0xff] }
 0x63f   :  { %v23340_v56 = vadd.f32 %v16267_v22, %v22965_v30  ;;  %16532 = vmatprep.mubr.msk.f32.mxu1 %vm5373_vm1, %v26419_v17  ;;  %16559 = vmatpush3.msra.mxu0 %v14133_v50  ;;  %v9173_v22 = vrot.slane %v23026_v38, 1  ;;  %v4578_v17 = vadd.f32 %v26425_v10, %v3498_v18 }
 0x640   :  { %v23344_v14 = vpop.f32.mrf.mxu1 }
 0x641   :  { %26420 = vst [vmem:[#allocation266_spill] sm:$0xff] %v23344_v14  ;;  %v26426_v14 = vld [vmem:[#allocation318_spill] sm:$0xff]  ;;  %v9177_v50 = vrot.slane %v4578_v17, 1  ;;  %v9176_v59 = vsel %vm6284_vm2, %v9173_v22, %v9175_v39 }
 0x642   :  { %v16270_v30 = vpop.f32.mrf.mxu1  ;;  %16533 = vmatmul.mubr.msk.f32.gmra.mxu1 %vm5373_vm1, %v26422_v61 }
 0x643   :  { %v23356_v11 = vadd.f32 %v16270_v30, %v22978_v2  ;;  %16535 = vmatprep.mubr.msk.f32.mxu1 %vm5373_vm1, %v26423_v52  ;;  %v9172_v2 = vrot.slane %v23021_v21, 1  ;;  %v26427_v30 = vld [vmem:[#allocation319_spill] sm:$0xff]  ;;  %v9178_v21 = vsel %vm6284_vm2, %v9175_v39, %v9177_v50 }
 0x644   :  { %v23360_v7 = vpop.f32.mrf.mxu1 }
 0x645   :  { %26424 = vst [vmem:[#allocation267_spill] sm:$0xff] %v23360_v7  ;;  %v9174_v38 = vsel %vm6284_vm2, %v9172_v2, %v9173_v22 }
 0x646   :  { %v16273_v23 = vpop.f32.mrf.mxu1  ;;  %16536 = vmatmul.mubr.msk.f32.gmra.mxu1 %vm5373_vm1, %v26426_v14 }
 0x647   :  { %v23369_v58 = vadd.f32 %v16273_v23, %v22995_v43  ;;  %16538 = vmatprep.mubr.msk.f32.mxu1 %vm5373_vm1, %v26427_v30 }
 0x648   :  { %v23373_v61 = vpop.f32.mrf.mxu1 }
 0x649   :  { %26428 = vst [vmem:[#allocation264_spill] sm:$0xff] %v23373_v61 }
 0x64a   :  { %v16276_v18 = vpop.f32.mrf.mxu1  ;;  %16539 = vmatmul.mubr.msk.f32.gmra.mxu1 %vm5373_vm1, %v9174_v38 }
 0x64b   :  { %v23379_v14 = vadd.f32 %v16276_v18, %v23016_v42  ;;  %16541 = vmatprep.mubr.msk.f32.mxu1 %vm5373_vm1, %v9176_v59 }
 0x64c   :  { %v23382_v43 = vpop.f32.mrf.mxu1 }
 0x64d   :  { %26429 = vst [vmem:[#allocation270_spill] sm:$0xff] %v23382_v43 }
 0x64e   :  { %v16279_v52 = vpop.f32.mrf.mxu1  ;;  %16542 = vmatmul.mubr.msk.f32.gmra.mxu1 %vm5373_vm1, %v9178_v21 }
 0x650   :  { %v8384_v10 = vpop.f32.mrf.mxu1 }
 0x652   :  { %v16298_v17 = vpop.f32.mrf.mxu1 }
 0x653   :  { %v23387_v23 = vadd.f32 %v16298_v17, %v23052_v57 }
 0x654   :  { %v23389_v2 = vpop.f32.mrf.mxu1 }
 0x656   :  { %v16301_v22 = vpop.f32.mrf.mxu1 }
 0x657   :  { %v23392_v42 = vadd.f32 %v16301_v22, %v23066_v62 }
 0x658   :  { %v23394_v30 = vpop.f32.mrf.mxu1 }
 0x65a   :  { %v16304_v38 = vpop.f32.mrf.mxu1 }
 0x65b   :  { %v23397_v18 = vadd.f32 %v16304_v38, %v23080_v29 }
 0x65c   :  { %v23399_v39 = vpop.f32.mrf.mxu1 }
 0x65e   :  { %v16307_v50 = vpop.f32.mrf.mxu1 }
 0x65f   :  { %v23402_v59 = vadd.f32 %v16307_v50, %v23094_v60 }
 0x660   :  { %v23404_v57 = vpop.f32.mrf.mxu1 }
 0x662   :  { %v16310_v21 = vpop.f32.mrf.mxu1 }
 0x663   :  { %v23407_v52 = vadd.f32 %v16310_v21, %v23108_v45 }
 0x664   :  { %v23409_v62 = vpop.f32.mrf.mxu1 }
 0x666   :  { %v16313_v10 = vpop.f32.mrf.mxu1 }
 0x667   :  { %v23412_v17 = vadd.f32 %v16313_v10, %v23122_v28 }
 0x668   :  { %v23414_v29 = vpop.f32.mrf.mxu1 }
 0x66a   :  { %v16316_v22 = vpop.f32.mrf.mxu1 }
 0x66b   :  { %v23417_v38 = vadd.f32 %v16316_v22, %v23136_v3 }
 0x66c   :  { %v23419_v60 = vpop.f32.mrf.mxu1 }
 0x66e   :  { %v16319_v50 = vpop.f32.mrf.mxu1 }
 0x66f   :  { %v23422_v43 = vadd.f32 %v16319_v50, %v23150_v31 }
 0x670   :  { %v23424_v45 = vpop.f32.mrf.mxu1 }
 0x672   :  { %v16322_v21 = vpop.f32.mrf.mxu1 }
 0x673   :  { %v23427_v61 = vadd.f32 %v16322_v21, %v23164_v0  ;;  %v23444_v0 = vld [vmem:[%s25097_s5 + $0xf8] sm:$0xff] }
 0x674   :  { %v23429_v28 = vpop.f32.mrf.mxu1  ;;  %16781 = vmatprep.subr.mxu1 %v23444_v0 }
 0x676   :  { %v16325_v10 = vpop.f32.mrf.mxu1 }
 0x677   :  { %v23432_v7 = vadd.f32 %v16325_v10, %v23178_v35 }
 0x678   :  { %v23434_v3 = vpop.f32.mrf.mxu1 }
 0x67a   :  { %v16328_v22 = vpop.f32.mrf.mxu1 }
 0x67b   :  { %v23437_v40 = vadd.f32 %v16328_v22, %v23192_v55  ;;  %v23460_v22 = vld [vmem:[%s25097_s5 + $0xb8] sm:$0xff] }
 0x67c   :  { %v23439_v31 = vpop.f32.mrf.mxu1  ;;  %16702 = vmatprep.subr.mxu0 %v23460_v22 }
 0x67e   :  { %v16331_v50 = vpop.f32.mrf.mxu1 }
 0x67f   :  { %v23447_v21 = vadd.f32 %v16331_v50, %v23206_v5 }
 0x680   :  { %v23450_v35 = vpop.f32.mrf.mxu1 }
 0x682   :  { %v16334_v10 = vpop.f32.mrf.mxu1 }
 0x683   :  { %v23453_v36 = vadd.f32 %v16334_v10, %v23220_v54 }
 0x684   :  { %v23455_v55 = vpop.f32.mrf.mxu1 }
 0x685   :  { %26430 = vst [vmem:[#allocation272_spill] sm:$0xff] %v23453_v36  ;;  %26431 = vst [vmem:[#allocation268_spill] sm:$0xff] %v23455_v55 }
 0x686   :  { %v16337_v63 = vpop.f32.mrf.mxu1 }
 0x687   :  { %v23464_v5 = vadd.f32 %v16337_v63, %v23234_v32 }
 0x688   :  { %v23466_v50 = vpop.f32.mrf.mxu1 }
 0x689   :  { %26432 = vst [vmem:[#allocation275_spill] sm:$0xff] %v23464_v5 }
 0x68a   :  { %v16340_v47 = vpop.f32.mrf.mxu1 }
 0x68b   :  { %v23469_v53 = vadd.f32 %v16340_v47, %v23251_v9 }
 0x68c   :  { %v23471_v54 = vpop.f32.mrf.mxu1 }
 0x68d   :  { %26433 = vst [vmem:[#allocation276_spill] sm:$0xff] %v23469_v53 }
 0x68e   :  { %v16343_v10 = vpop.f32.mrf.mxu1 }
 0x68f   :  { %v23474_v33 = vadd.f32 %v16343_v10, %v23268_v1 }
 0x690   :  { %v23476_v36 = vpop.f32.mrf.mxu1 }
 0x691   :  { %26434 = vst [vmem:[#allocation273_spill] sm:$0xff] %v23474_v33 }
 0x692   :  { %v16346_v55 = vpop.f32.mrf.mxu1 }
 0x693   :  { %v23479_v27 = vadd.f32 %v16346_v55, %v23289_v19 }
 0x694   :  { %v23481_v32 = vpop.f32.mrf.mxu1 }
 0x695   :  { %26435 = vst [vmem:[#allocation279_spill] sm:$0xff] %v23479_v27 }
 0x696   :  { %v16349_v63 = vpop.f32.mrf.mxu1 }
 0x697   :  { %v23484_v5 = vadd.f32 %v16349_v63, %v23307_v13 }
 0x698   :  { %v23486_v9 = vpop.f32.mrf.mxu1 }
 0x699   :  { %26436 = vst [vmem:[#allocation281_spill] sm:$0xff] %v23484_v5 }
 0x69a   :  { %v16352_v47 = vpop.f32.mrf.mxu1 }
 0x69b   :  { %v23489_v53 = vadd.f32 %v16352_v47, %v23325_v8 }
 0x69c   :  { %v23491_v1 = vpop.f32.mrf.mxu1 }
 0x69d   :  { %26437 = vst [vmem:[#allocation277_spill] sm:$0xff] %v23489_v53  ;;  %26438 = vst [vmem:[#allocation284_spill] sm:$0xff] %v23491_v1 }
 0x69e   :  { %v16355_v10 = vpop.f32.mrf.mxu1 }
 0x69f   :  { %v23494_v33 = vadd.f32 %v16355_v10, %v23340_v56 }
 0x6a0   :  { %v23496_v19 = vpop.f32.mrf.mxu1 }
 0x6a1   :  { %26439 = vst [vmem:[#allocation78_spill] sm:$0xff] %v23494_v33  ;;  %26440 = vst [vmem:[#allocation285_spill] sm:$0xff] %v23496_v19  ;;  %v8758_v33 = vadd.f32 %v23389_v2, %v23059_v12  ;;  %v26449_v2 = vld [vmem:[#allocation213_spill] sm:$0xff]  ;;  %v26450_v19 = vld [vmem:[#allocation215_spill] sm:$0xff] }
 0x6a2   :  { %v16358_v55 = vpop.f32.mrf.mxu1 }
 0x6a3   :  { %v23499_v27 = vadd.f32 %v16358_v55, %v23356_v11  ;;  %v26447_v55 = vld [vmem:[#allocation211_spill] sm:$0xff] }
 0x6a4   :  { %v23501_v13 = vpop.f32.mrf.mxu1 }
 0x6a5   :  { %26441 = vst [vmem:[#allocation128_spill] sm:$0xff] %v23499_v27  ;;  %26442 = vst [vmem:[#allocation126_spill] sm:$0xff] %v23501_v13  ;;  %v9126_v27 = vadd.f32 %v26447_v55, %v23387_v23  ;;  %v8762_v23 = vadd.f32 %v23399_v39, %v23087_v26 }
 0x6a6   :  { %v16361_v63 = vpop.f32.mrf.mxu1 }
 0x6a7   :  { %v23504_v5 = vadd.f32 %v16361_v63, %v23369_v58  ;;  %v23520_v58 = vld [vmem:[%s25096_s4] ss:$0 sm:$0xff] }
 0x6a8   :  { %v23506_v8 = vpop.f32.mrf.mxu1 }
 0x6a9   :  { %26443 = vst [vmem:[#allocation282_spill] sm:$0xff] %v23504_v5  ;;  %26444 = vst [vmem:[#allocation129_spill] sm:$0xff] %v23506_v8 }
 0x6aa   :  { %v16364_v47 = vpop.f32.mrf.mxu1 }
 0x6ab   :  { %v23509_v53 = vadd.f32 %v16364_v47, %v23379_v14  ;;  %v8760_v14 = vadd.f32 %v23394_v30, %v23073_v37  ;;  %v26448_v47 = vld [vmem:[#allocation243_spill] sm:$0xff] }
 0x6ac   :  { %v23511_v56 = vpop.f32.mrf.mxu1 }
 0x6ad   :  { %26445 = vst [vmem:[#allocation92_spill] sm:$0xff] %v23509_v53  ;;  %26446 = vst [vmem:[#allocation88_spill] sm:$0xff] %v23511_v56  ;;  %v9125_v53 = vadd.f32 %v26448_v47, %v8758_v33  ;;  %v9127_v1 = vadd.f32 %v26450_v19, %v8760_v14  ;;  %v26452_v19 = vld [vmem:[#allocation217_spill] sm:$0xff] }
 0x6ae   :  { %v16367_v10 = vpop.f32.mrf.mxu1  ;;  %v9129_v14 = vadd.f32 %v26452_v19, %v8762_v23  ;;  %v14278_v19 = vld [vmem:[%s25097_s5 + $0xd8] sm:$0xff] }
 0x6b0   :  { %v8751_v11 = vpop.f32.mrf.mxu1 }
 0x6b1   :  { %v9128_v11 = vadd.f32 %v26449_v2, %v23392_v42  ;;  %v14281_v42 = vld [vmem:[%s25097_s5 + $0xf0] sm:$0xff] }
 0x6b2   :  { %v16474_v13 = vpop.f32.mrf.mxu1 }
 0x6b3   :  { %v9498_v63 = vadd.f32 %v16474_v13, %v9126_v27 }
 0x6b4   :  { %v9260_v10 = vpop.f32.mrf.mxu1 }
 0x6b5   :  { %v9551_v56 = vadd.f32 %v23520_v58, %v9498_v63  ;;  %v9497_v12 = vadd.f32 %v9260_v10, %v9125_v53  ;;  %v26451_v53 = vld [vmem:[#allocation245_spill] sm:$0xff] }
 0x6b6   :  { %v16477_v55 = vpop.f32.mrf.mxu1  ;;  %v9130_v13 = vadd.f32 %v26451_v53, %v23397_v18  ;;  %v14231_v53 = vld [vmem:[%s25097_s5 + $0xb0] sm:$0xff] }
 0x6b7   :  { %v9550_v5 = vadd.f32 %v23520_v58, %v9497_v12  ;;  %v9500_v8 = vadd.f32 %v16477_v55, %v9128_v11  ;;  %v9657_v27 = vrot.slane %v9551_v56, 1  ;;  %v8766_v12 = vadd.f32 %v23409_v62, %v23115_v20 }
 0x6b8   :  { %v9270_v37 = vpop.f32.mrf.mxu1 }
 0x6b9   :  { %v9656_v30 = vrot.slane %v9550_v5, 1  ;;  %v9499_v33 = vadd.f32 %v9270_v37, %v9127_v1  ;;  %16639 = vmatprep.mubr.msk.f32.mxu1 %vm5373_vm1, %v9550_v5  ;;  %v23539_v26 = vadd.f32 %v23520_v58, %v9500_v8  ;;  %v8764_v1 = vadd.f32 %v23404_v57, %v23101_v49  ;;  %v14280_v8 = vld [vmem:[%s25097_s5 + $0xe8] sm:$0xff]  ;;  %v26453_v49 = vld [vmem:[#allocation220_spill] sm:$0xff] }
 0x6ba   :  { %v16480_v39 = vpop.f32.mrf.mxu1  ;;  %16640 = vmatmul.mubr.msk.f32.vlgmr.msra.gmra.mxu1 %vm5373_vm1, %v9551_v56  ;;  %v9132_v57 = vadd.f32 %v26453_v49, %v23402_v59 }
 0x6bb   :  { %v9552_v5 = vadd.f32 %v23520_v58, %v9499_v33  ;;  %v9502_v63 = vadd.f32 %v16480_v39, %v9130_v13  ;;  %v9658_v18 = vsel %vm6284_vm2, %v9656_v30, %v9657_v27  ;;  %16782 = vmatpush3.msra.mxu1 %v23444_v0  ;;  %v14279_v0 = vld [vmem:[%s25097_s5 + $0xe0] sm:$0xff]  ;;  %v9661_v2 = vrot.slane %v23539_v26, 1 }
 0x6bc   :  { %v9280_v47 = vpop.f32.mrf.mxu1  ;;  %16560 = vmatprep.mubr.msk.f32.mxu0 %vm5373_vm1, %v9658_v18  ;;  %16783 = vmatprep.subr.mxu1 %v14281_v42  ;;  %v26454_v30 = vld [vmem:[#allocation224_spill] sm:$0xff]  ;;  %v9133_v18 = vadd.f32 %v22666_v16, %v8766_v12  ;;  %v14230_v16 = vld [vmem:[%s25097_s5 + $0xa8] sm:$0xff] }
 0x6bd   :  { %v9659_v56 = vrot.slane %v9552_v5, 1  ;;  %v9501_v10 = vadd.f32 %v9280_v47, %v9129_v14  ;;  %16642 = vmatprep.mubr.msk.f32.mxu1 %vm5373_vm1, %v9552_v5  ;;  %16784 = vmatpush3.msra.mxu1 %v14281_v42  ;;  %v23562_v11 = vadd.f32 %v23520_v58, %v9502_v63  ;;  %v9131_v33 = vadd.f32 %v26454_v30, %v8764_v1  ;;  %v26455_v42 = vld [vmem:[#allocation226_spill] sm:$0xff] }
 0x6be   :  { %v16483_v23 = vpop.f32.mrf.mxu1  ;;  %16643 = vmatmul.mubr.msk.f32.gmra.mxu1 %vm5373_vm1, %v23539_v26  ;;  %16785 = vmatprep.subr.mxu1 %v14280_v8  ;;  %v9134_v39 = vadd.f32 %v26455_v42, %v23407_v52  ;;  %v8768_v14 = vadd.f32 %v23414_v29, %v23129_v25 }
 0x6bf   :  { %v9660_v59 = vsel %vm6284_vm2, %v9657_v27, %v9659_v56  ;;  %v23568_v55 = vadd.f32 %v23520_v58, %v9501_v10  ;;  %v9504_v37 = vadd.f32 %v16483_v23, %v9132_v57  ;;  %16786 = vmatpush3.msra.mxu1 %v14280_v8  ;;  %v9662_v62 = vsel %vm6284_vm2, %v9659_v56, %v9661_v2  ;;  %v26456_v10 = vld [vmem:[#allocation229_spill] sm:$0xff]  ;;  %v14277_v57 = vld [vmem:[%s25097_s5 + $0xd0] sm:$0xff] }
 0x6c0   :  { %v9290_v20 = vpop.f32.mrf.mxu1  ;;  %16561 = vmatmul.mubr.msk.f32.vlgmr.msra.gmra.mxu0 %vm5373_vm1, %v9660_v59  ;;  %16787 = vmatprep.subr.mxu1 %v14279_v0  ;;  %v9665_v1 = vrot.slane %v23562_v11, 1  ;;  %v9136_v49 = vadd.f32 %v26456_v10, %v23412_v17  ;;  %v9135_v59 = vadd.f32 %v22680_v46, %v8768_v14  ;;  %v14229_v46 = vld [vmem:[%s25097_s5 + $0xa0] sm:$0xff] }
 0x6c1   :  { %v9663_v13 = vrot.slane %v23568_v55, 1  ;;  %v9503_v27 = vadd.f32 %v9290_v20, %v9131_v33  ;;  %16563 = vmatprep.mubr.msk.f32.mxu0 %vm5373_vm1, %v9662_v62  ;;  %16645 = vmatprep.mubr.msk.f32.mxu1 %vm5373_vm1, %v23568_v55  ;;  %v23589_v5 = vadd.f32 %v23520_v58, %v9504_v37  ;;  %v26457_v62 = vld [vmem:[#allocation233_spill] sm:$0xff]  ;;  %v26458_v14 = vld [vmem:[#allocation248_spill] sm:$0xff] }
 0x6c2   :  { %v16486_v63 = vpop.f32.mrf.mxu1  ;;  %16646 = vmatmul.mubr.msk.f32.gmra.mxu1 %vm5373_vm1, %v23562_v11  ;;  %16703 = vmatpush3.msra.mxu0 %v23460_v22  ;;  %v14275_v10 = vld [vmem:[%s25097_s5 + $0xc0] sm:$0xff] }
 0x6c3   :  { %v23596_v52 = vadd.f32 %v23520_v58, %v9503_v27  ;;  %v9506_v8 = vadd.f32 %v16486_v63, %v9134_v39  ;;  %v23599_v47 = vsel %vm6284_vm2, %v9661_v2, %v9663_v13  ;;  %16788 = vmatpush3.msra.mxu1 %v14279_v0  ;;  %16704 = vmatprep.subr.mxu0 %v14231_v53  ;;  %v9669_v12 = vrot.slane %v23589_v5, 1 }
 0x6c4   :  { %v9300_v25 = vpop.f32.mrf.mxu1  ;;  %16564 = vmatmul.mubr.msk.f32.gmra.mxu0 %vm5373_vm1, %v23599_v47  ;;  %v23604_v29 = vsel %vm6284_vm2, %v9663_v13, %v9665_v1  ;;  %16789 = vmatprep.subr.mxu1 %v14278_v19  ;;  %v8770_v0 = vadd.f32 %v23419_v60, %v23143_v24  ;;  %v14276_v13 = vld [vmem:[%s25097_s5 + $0xc8] sm:$0xff]  ;;  %v8772_v27 = vadd.f32 %v23424_v45, %v23157_v15 }
 0x6c5   :  { %v9667_v22 = vrot.slane %v23596_v52, 1  ;;  %v9505_v56 = vadd.f32 %v9300_v25, %v9133_v18  ;;  %16566 = vmatprep.mubr.msk.f32.mxu0 %vm5373_vm1, %v23604_v29  ;;  %16648 = vmatprep.mubr.msk.f32.mxu1 %vm5373_vm1, %v23596_v52  ;;  %v23623_v2 = vadd.f32 %v23520_v58, %v9506_v8  ;;  %v14228_v8 = vld [vmem:[%s25097_s5 + $0x98] sm:$0xff] }
 0x6c6   :  { %v16489_v23 = vpop.f32.mrf.mxu1  ;;  %16649 = vmatmul.mubr.msk.f32.gmra.mxu1 %vm5373_vm1, %v23589_v5  ;;  %16705 = vmatpush3.msra.mxu0 %v14231_v53  ;;  %v9138_v53 = vadd.f32 %v26457_v62, %v23417_v38  ;;  %v26461_v62 = vld [vmem:[#allocation249_spill] sm:$0xff] }
 0x6c7   :  { %v23629_v17 = vadd.f32 %v23520_v58, %v9505_v56  ;;  %v9508_v37 = vadd.f32 %v16489_v23, %v9136_v49  ;;  %v23632_v30 = vsel %vm6284_vm2, %v9665_v1, %v9667_v22  ;;  %16790 = vmatpush3.msra.mxu1 %v14278_v19  ;;  %16706 = vmatprep.subr.mxu0 %v14230_v16  ;;  %v9673_v42 = vrot.slane %v23623_v2, 1  ;;  %v26460_v23 = vld [vmem:[#allocation238_spill] sm:$0xff] }
 0x6c8   :  { %v9310_v24 = vpop.f32.mrf.mxu1  ;;  %16567 = vmatmul.mubr.msk.f32.gmra.mxu0 %vm5373_vm1, %v23632_v30  ;;  %v23637_v60 = vsel %vm6284_vm2, %v9667_v22, %v9669_v12  ;;  %16791 = vmatprep.subr.mxu1 %v14277_v57  ;;  %v9137_v1 = vadd.f32 %v26458_v14, %v8770_v0  ;;  %v26459_v22 = vld [vmem:[#allocation235_spill] sm:$0xff]  ;;  %v8774_v49 = vadd.f32 %v23429_v28, %v23171_v34  ;;  %v26462_v14 = vld [vmem:[#allocation242_spill] sm:$0xff] }
 0x6c9   :  { %v9671_v33 = vrot.slane %v23629_v17, 1  ;;  %v9507_v20 = vadd.f32 %v9310_v24, %v9135_v59  ;;  %16569 = vmatprep.mubr.msk.f32.mxu0 %vm5373_vm1, %v23637_v60  ;;  %16651 = vmatprep.mubr.msk.f32.mxu1 %vm5373_vm1, %v23629_v17  ;;  %v23656_v39 = vadd.f32 %v23520_v58, %v9508_v37  ;;  %v9140_v56 = vadd.f32 %v26459_v22, %v23422_v43  ;;  %v26463_v22 = vld [vmem:[#allocation244_spill] sm:$0xff] }
 0x6ca   :  { %v16492_v19 = vpop.f32.mrf.mxu1  ;;  %16652 = vmatmul.mubr.msk.f32.gmra.mxu1 %vm5373_vm1, %v23623_v2  ;;  %16707 = vmatpush3.msra.mxu0 %v14230_v16  ;;  %v9139_v59 = vadd.f32 %v26460_v23, %v8772_v27  ;;  %v8778_v23 = vadd.f32 %v23439_v31, %v23199_v48 }
 0x6cb   :  { %v23662_v38 = vadd.f32 %v23520_v58, %v9507_v20  ;;  %v9510_v63 = vadd.f32 %v16492_v19, %v9138_v53  ;;  %v23665_v18 = vsel %vm6284_vm2, %v9669_v12, %v9671_v33  ;;  %16792 = vmatpush3.msra.mxu1 %v14277_v57  ;;  %16708 = vmatprep.subr.mxu0 %v14229_v46  ;;  %v9677_v57 = vrot.slane %v23656_v39, 1 }
 0x6cc   :  { %v9320_v15 = vpop.f32.mrf.mxu1  ;;  %16570 = vmatmul.mubr.msk.f32.gmra.mxu0 %vm5373_vm1, %v23665_v18  ;;  %v23670_v45 = vsel %vm6284_vm2, %v9671_v33, %v9673_v42  ;;  %16793 = vmatprep.subr.mxu1 %v14276_v13  ;;  %v9142_v53 = vadd.f32 %v26461_v62, %v23427_v61 }
 0x6cd   :  { %v9675_v25 = vrot.slane %v23662_v38, 1  ;;  %v9509_v16 = vadd.f32 %v9320_v15, %v9137_v1  ;;  %16572 = vmatprep.mubr.msk.f32.mxu0 %vm5373_vm1, %v23670_v45  ;;  %16654 = vmatprep.mubr.msk.f32.mxu1 %vm5373_vm1, %v23662_v38  ;;  %v23689_v0 = vadd.f32 %v23520_v58, %v9510_v63  ;;  %v9141_v1 = vadd.f32 %v26462_v14, %v8774_v49 }
 0x6ce   :  { %v16495_v12 = vpop.f32.mrf.mxu1  ;;  %16655 = vmatmul.mubr.msk.f32.gmra.mxu1 %vm5373_vm1, %v23656_v39  ;;  %16709 = vmatpush3.msra.mxu0 %v14229_v46  ;;  %v14227_v46 = vld [vmem:[%s25097_s5 + $0x90] sm:$0xff]  ;;  %v9145_v14 = vadd.f32 %v22752_v4, %v8778_v23 }
 0x6cf   :  { %v23695_v43 = vadd.f32 %v23520_v58, %v9509_v16  ;;  %v9512_v37 = vadd.f32 %v16495_v12, %v9140_v56  ;;  %v23698_v24 = vsel %vm6284_vm2, %v9673_v42, %v9675_v25  ;;  %16794 = vmatpush3.msra.mxu1 %v14276_v13  ;;  %16710 = vmatprep.subr.mxu0 %v14228_v8  ;;  %v9681_v27 = vrot.slane %v23689_v0, 1  ;;  %v26464_v4 = vld [vmem:[#allocation246_spill] sm:$0xff] }
 0x6d0   :  { %v9330_v34 = vpop.f32.mrf.mxu1  ;;  %16573 = vmatmul.mubr.msk.f32.gmra.mxu0 %vm5373_vm1, %v23698_v24  ;;  %v23703_v28 = vsel %vm6284_vm2, %v9675_v25, %v9677_v57  ;;  %16795 = vmatprep.subr.mxu1 %v14275_v10  ;;  %v8776_v13 = vadd.f32 %v23434_v3, %v23185_v44  ;;  %v9144_v56 = vadd.f32 %v26463_v22, %v23432_v7 }
 0x6d1   :  { %v9679_v33 = vrot.slane %v23695_v43, 1  ;;  %v9511_v20 = vadd.f32 %v9330_v34, %v9139_v59  ;;  %16575 = vmatprep.mubr.msk.f32.mxu0 %vm5373_vm1, %v23703_v28  ;;  %16657 = vmatprep.mubr.msk.f32.mxu1 %vm5373_vm1, %v23695_v43  ;;  %v23719_v42 = vadd.f32 %v23520_v58, %v9512_v37 }
 0x6d2   :  { %v16498_v19 = vpop.f32.mrf.mxu1  ;;  %16658 = vmatmul.mubr.msk.f32.gmra.mxu1 %vm5373_vm1, %v23689_v0  ;;  %16711 = vmatpush3.msra.mxu0 %v14228_v8  ;;  %v14226_v8 = vld [vmem:[%s25097_s5 + $0x88] sm:$0xff]  ;;  %v9143_v12 = vadd.f32 %v22742_v51, %v8776_v13  ;;  %v14225_v51 = vld [vmem:[%s25097_s5 + $0x80] sm:$0xff] }
 0x6d3   :  { %v23725_v63 = vadd.f32 %v23520_v58, %v9511_v20  ;;  %v9514_v15 = vadd.f32 %v16498_v19, %v9142_v53  ;;  %v23728_v61 = vsel %vm6284_vm2, %v9677_v57, %v9679_v33  ;;  %16796 = vmatpush3.msra.mxu1 %v14275_v10  ;;  %16712 = vmatprep.subr.mxu0 %v14227_v46  ;;  %v9685_v10 = vrot.slane %v23719_v42, 1 }
 0x6d4   :  { %v9340_v44 = vpop.f32.mrf.mxu1  ;;  %16576 = vmatmul.mubr.msk.f32.gmra.mxu0 %vm5373_vm1, %v23728_v61  ;;  %v23733_v3 = vsel %vm6284_vm2, %v9679_v33, %v9681_v27  ;;  %v8780_v20 = vadd.f32 %v23450_v35, %v23213_v41 }
 0x6d5   :  { %v9683_v25 = vrot.slane %v23725_v63, 1  ;;  %v9513_v16 = vadd.f32 %v9340_v44, %v9141_v1  ;;  %16578 = vmatprep.mubr.msk.f32.mxu0 %vm5373_vm1, %v23733_v3  ;;  %16660 = vmatprep.mubr.msk.f32.mxu1 %vm5373_vm1, %v23725_v63  ;;  %v23747_v49 = vadd.f32 %v23520_v58, %v9514_v15  ;;  %v9148_v15 = vadd.f32 %v26464_v4, %v23447_v21  ;;  %v26475_v4 = vld [vmem:[#allocation253_spill] sm:$0xff] }
 0x6d6   :  { %v16501_v57 = vpop.f32.mrf.mxu1  ;;  %16661 = vmatmul.mubr.msk.f32.gmra.mxu1 %vm5373_vm1, %v23719_v42  ;;  %16713 = vmatpush3.msra.mxu0 %v14227_v46  ;;  %v9146_v46 = vadd.f32 %v22746_v6, %v23437_v40 }
 0x6d7   :  { %v23755_v59 = vadd.f32 %v23520_v58, %v9513_v16  ;;  %v9516_v37 = vadd.f32 %v16501_v57, %v9144_v56  ;;  %v23758_v7 = vsel %vm6284_vm2, %v9681_v27, %v9683_v25  ;;  %16714 = vmatprep.subr.mxu0 %v14226_v8  ;;  %v23763_v33 = vsel %vm6284_vm2, %v9683_v25, %v9685_v10  ;;  %v26466_v16 = vld [vmem:[#allocation247_spill] sm:$0xff]  ;;  %v26467_v56 = vld [vmem:[#allocation294_spill] sm:$0xff] }
 0x6d8   :  { %v9350_v34 = vpop.f32.mrf.mxu1  ;;  %16579 = vmatmul.mubr.msk.f32.gmra.mxu0 %vm5373_vm1, %v23758_v7  ;;  %v9689_v62 = vrot.slane %v23747_v49, 1  ;;  %v9147_v22 = vadd.f32 %v26466_v16, %v8780_v20  ;;  %v26476_v16 = vld [vmem:[#allocation304_spill] sm:$0xff] }
 0x6d9   :  { %v9687_v48 = vrot.slane %v23755_v59, 1  ;;  %v9515_v31 = vadd.f32 %v9350_v34, %v9143_v12  ;;  %16581 = vmatprep.mubr.msk.f32.mxu0 %vm5373_vm1, %v23763_v33  ;;  %16663 = vmatprep.mubr.msk.f32.mxu1 %vm5373_vm1, %v23755_v59  ;;  %v23779_v53 = vadd.f32 %v23520_v58, %v9516_v37 }
 0x6da   :  { %v16504_v13 = vpop.f32.mrf.mxu1  ;;  %16664 = vmatmul.mubr.msk.f32.gmra.mxu1 %vm5373_vm1, %v23747_v49  ;;  %16715 = vmatpush3.msra.mxu0 %v14226_v8 }
 0x6db   :  { %v23784_v27 = vadd.f32 %v23520_v58, %v9515_v31  ;;  %v9518_v19 = vadd.f32 %v16504_v13, %v9146_v46  ;;  %v23788_v6 = vsel %vm6284_vm2, %v9685_v10, %v9687_v48  ;;  %16716 = vmatprep.subr.mxu0 %v14225_v51  ;;  %v23793_v40 = vsel %vm6284_vm2, %v9687_v48, %v9689_v62  ;;  %v26468_v10 = vld [vmem:[#allocation268_spill] sm:$0xff]  ;;  %v26471_v46 = vld [vmem:[#allocation251_spill] sm:$0xff] }
 0x6dc   :  { %v9360_v41 = vpop.f32.mrf.mxu1  ;;  %16582 = vmatmul.mubr.msk.f32.gmra.mxu0 %vm5373_vm1, %v23788_v6  ;;  %v9693_v44 = vrot.slane %v23779_v53, 1  ;;  %v8782_v57 = vadd.f32 %v26468_v10, %v26467_v56  ;;  %v26470_v31 = vld [vmem:[#allocation272_spill] sm:$0xff] }
 0x6dd   :  { %v9691_v35 = vrot.slane %v23784_v27, 1  ;;  %v9517_v1 = vadd.f32 %v9360_v41, %v9145_v14  ;;  %16584 = vmatprep.mubr.msk.f32.mxu0 %vm5373_vm1, %v23793_v40  ;;  %16666 = vmatprep.mubr.msk.f32.mxu1 %vm5373_vm1, %v23784_v27  ;;  %v23804_v8 = vadd.f32 %v23520_v58, %v9518_v19  ;;  %v9150_v20 = vadd.f32 %v26471_v46, %v26470_v31 }
 0x6de   :  { %v16507_v25 = vpop.f32.mrf.mxu1  ;;  %16667 = vmatmul.mubr.msk.f32.gmra.mxu1 %vm5373_vm1, %v23779_v53  ;;  %16717 = vmatpush3.msra.mxu0 %v14225_v51 }
 0x6df   :  { %26465 = vst [vmem:[#allocation134_spill] sm:$0xff] %v23804_v8  ;;  %v23812_v12 = vadd.f32 %v23520_v58, %v9517_v1  ;;  %v9520_v23 = vadd.f32 %v16507_v25, %v9148_v15  ;;  %v23815_v21 = vsel %vm6284_vm2, %v9689_v62, %v9691_v35  ;;  %v23820_v34 = vsel %vm6284_vm2, %v9691_v35, %v9693_v44  ;;  %v26472_v62 = vld [vmem:[#allocation121_spill] sm:$0xff] }
 0x6e0   :  { %v9370_v37 = vpop.f32.mrf.mxu1  ;;  %16585 = vmatmul.mubr.msk.f32.gmra.mxu0 %vm5373_vm1, %v23815_v21  ;;  %v8784_v13 = vadd.f32 %v23466_v50, %v26472_v62  ;;  %v9697_v19 = vrot.slane %v23804_v8, 1  ;;  %v9149_v15 = vadd.f32 %v26475_v4, %v8782_v57  ;;  %v26477_v50 = vld [vmem:[#allocation174_spill] sm:$0xff]  ;;  %v26481_v57 = vld [vmem:[#allocation256_spill] sm:$0xff]  ;;  %v26482_v62 = vld [vmem:[#allocation219_spill] sm:$0xff] }
 0x6e1   :  { %26469 = vst [vmem:[#allocation132_spill] sm:$0xff] %v23812_v12  ;;  %v9695_v48 = vrot.slane %v23812_v12, 1  ;;  %v9519_v51 = vadd.f32 %v9370_v37, %v9147_v22  ;;  %16587 = vmatprep.mubr.msk.f32.mxu0 %vm5373_vm1, %v23820_v34  ;;  %16669 = vmatprep.mubr.msk.f32.mxu1 %vm5373_vm1, %v23812_v12  ;;  %v23833_v14 = vadd.f32 %v23520_v58, %v9520_v23  ;;  %v26478_v23 = vld [vmem:[#allocation118_spill] sm:$0xff]  ;;  %v26479_v37 = vld [vmem:[#allocation180_spill] sm:$0xff] }
 0x6e2   :  { %v16510_v41 = vpop.f32.mrf.mxu1  ;;  %16670 = vmatmul.mubr.msk.f32.gmra.mxu1 %vm5373_vm1, %v23804_v8  ;;  %v6192_v22 = vadd.f32 %v26477_v50, %v26476_v16  ;;  %v26533_v12 = vld [vmem:[#allocation28_spill] sm:$0xff] }
 0x6e3   :  { %26473 = vst [vmem:[#allocation103_spill] sm:$0xff] %v23833_v14  ;;  %v23838_v35 = vadd.f32 %v23520_v58, %v9519_v51  ;;  %v9522_v1 = vadd.f32 %v16510_v41, %v9150_v20  ;;  %v23842_v25 = vsel %vm6284_vm2, %v9693_v44, %v9695_v48  ;;  %v23849_v10 = vsel %vm6284_vm2, %v9695_v48, %v9697_v19  ;;  %v26480_v44 = vld [vmem:[#allocation275_spill] sm:$0xff] }
 0x6e4   :  { %v9380_v56 = vpop.f32.mrf.mxu1  ;;  %16588 = vmatmul.mubr.msk.f32.gmra.mxu0 %vm5373_vm1, %v23842_v25  ;;  %v6202_v51 = vadd.f32 %v26479_v37, %v26478_v23  ;;  %v9152_v20 = vadd.f32 %v26481_v57, %v26480_v44  ;;  %v6837_v41 = vadd.f32 %v26482_v62, %v6192_v22  ;;  %v9701_v48 = vrot.slane %v23833_v14, 1  ;;  %v26487_v57 = vld [vmem:[#allocation240_spill] sm:$0xff] }
 0x6e5   :  { %26474 = vst [vmem:[#allocation18_spill] sm:$0xff] %v23838_v35  ;;  %v9699_v31 = vrot.slane %v23838_v35, 1  ;;  %v9521_v46 = vadd.f32 %v9380_v56, %v9149_v15  ;;  %16590 = vmatprep.mubr.msk.f32.mxu0 %vm5373_vm1, %v23849_v10  ;;  %16672 = vmatprep.mubr.msk.f32.mxu1 %vm5373_vm1, %v23838_v35  ;;  %v23863_v4 = vadd.f32 %v23520_v58, %v9522_v1  ;;  %v26484_v15 = vld [vmem:[#allocation252_spill] sm:$0xff]  ;;  %v26485_v56 = vld [vmem:[#allocation51_spill] sm:$0xff] }
 0x6e6   :  { %v16513_v16 = vpop.f32.mrf.mxu1  ;;  %16673 = vmatmul.mubr.msk.f32.gmra.mxu1 %vm5373_vm1, %v23833_v14  ;;  %v9151_v50 = vadd.f32 %v26484_v15, %v8784_v13  ;;  %v8786_v23 = vadd.f32 %v23471_v54, %v26485_v56  ;;  %v7339_v62 = vadd.f32 %v26487_v57, %v6837_v41  ;;  %v26489_v13 = vld [vmem:[#allocation136_spill] sm:$0xff]  ;;  %v26492_v41 = vld [vmem:[#allocation290_spill] sm:$0xff]  ;;  %v26493_v57 = vld [vmem:[#allocation123_spill] sm:$0xff] }
 0x6e7   :  { %26483 = vst [vmem:[#allocation95_spill] sm:$0xff] %v23863_v4  ;;  %v23871_v37 = vadd.f32 %v23520_v58, %v9521_v46  ;;  %v9524_v44 = vadd.f32 %v16513_v16, %v9152_v20  ;;  %v23874_v22 = vsel %vm6284_vm2, %v9697_v19, %v9699_v31  ;;  %v23880_v14 = vsel %vm6284_vm2, %v9699_v31, %v9701_v48  ;;  %v26490_v19 = vld [vmem:[#allocation276_spill] sm:$0xff] }
 0x6e8   :  { %v9390_v1 = vpop.f32.mrf.mxu1  ;;  %16591 = vmatmul.mubr.msk.f32.gmra.mxu0 %vm5373_vm1, %v23874_v22  ;;  %26488 = vst [vmem:[#allocation135_spill] sm:$0xff] %v23880_v14  ;;  %v6839_v15 = vadd.f32 %v26489_v13, %v6202_v51  ;;  %v26491_v46 = vld [vmem:[#allocation260_spill] sm:$0xff]  ;;  %v7841_v16 = vadd.f32 %v26492_v41, %v7339_v62  ;;  %v8788_v31 = vadd.f32 %v23476_v36, %v26493_v57  ;;  %v9705_v35 = vrot.slane %v23863_v4, 1  ;;  %v26500_v57 = vld [vmem:[#allocation263_spill] sm:$0xff] }
 0x6e9   :  { %26486 = vst [vmem:[#allocation140_spill] sm:$0xff] %v23871_v37  ;;  %v9703_v54 = vrot.slane %v23871_v37, 1  ;;  %v9523_v56 = vadd.f32 %v9390_v1, %v9151_v50  ;;  %16593 = vmatprep.mubr.msk.f32.mxu0 %vm5373_vm1, %v23880_v14  ;;  %16675 = vmatprep.mubr.msk.f32.mxu1 %vm5373_vm1, %v23871_v37  ;;  %v9154_v20 = vadd.f32 %v26491_v46, %v26490_v19  ;;  %v26496_v37 = vld [vmem:[#allocation262_spill] sm:$0xff]  ;;  %v26498_v46 = vld [vmem:[#allocation192_spill] sm:$0xff] }
 0x6ea   :  { %v23895_v51 = vadd.f32 %v23520_v58, %v9524_v44  ;;  %v16516_v50 = vpop.f32.mrf.mxu1  ;;  %16676 = vmatmul.mubr.msk.f32.gmra.mxu1 %vm5373_vm1, %v23863_v4  ;;  %v9153_v19 = vadd.f32 %v26496_v37, %v8786_v23  ;;  %v7341_v36 = vadd.f32 %v26498_v46, %v6839_v15  ;;  %v8423_v4 = vadd.f32 %v26500_v57, %v7841_v16  ;;  %v26502_v23 = vld [vmem:[#allocation254_spill] sm:$0xff]  ;;  %v26503_v15 = vld [vmem:[#allocation291_spill] sm:$0xff] }
 0x6eb   :  { %v23900_v1 = vadd.f32 %v23520_v58, %v9523_v56  ;;  %v9526_v13 = vadd.f32 %v16516_v50, %v9154_v20  ;;  %v23904_v62 = vsel %vm6284_vm2, %v9701_v48, %v9703_v54  ;;  %v23910_v44 = vsel %vm6284_vm2, %v9703_v54, %v9705_v35  ;;  %v26501_v48 = vld [vmem:[#allocation273_spill] sm:$0xff] }
 0x6ec   :  { %26494 = vst [vmem:[#allocation97_spill] sm:$0xff] %v23895_v51  ;;  %26497 = vst [vmem:[#allocation141_spill] sm:$0xff] %v23904_v62  ;;  %v9400_v41 = vpop.f32.mrf.mxu1  ;;  %16594 = vmatmul.mubr.msk.f32.gmra.mxu0 %vm5373_vm1, %v23904_v62  ;;  %v9156_v37 = vadd.f32 %v26502_v23, %v26501_v48  ;;  %v7843_v20 = vadd.f32 %v26503_v15, %v7341_v36  ;;  %v9709_v50 = vrot.slane %v23895_v51, 1  ;;  %v26508_v36 = vld [vmem:[#allocation120_spill] sm:$0xff]  ;;  %v26534_v62 = vld [vmem:[#allocation266_spill] sm:$0xff] }
 0x6ed   :  { %26495 = vst [vmem:[#allocation56_spill] sm:$0xff] %v23900_v1  ;;  %26499 = vst [vmem:[#allocation146_spill] sm:$0xff] %v23910_v44  ;;  %v9707_v56 = vrot.slane %v23900_v1, 1  ;;  %v9525_v8 = vadd.f32 %v9400_v41, %v9153_v19  ;;  %16596 = vmatprep.mubr.msk.f32.mxu0 %vm5373_vm1, %v23910_v44  ;;  %16678 = vmatprep.mubr.msk.f32.mxu1 %vm5373_vm1, %v23900_v1  ;;  %v23923_v54 = vadd.f32 %v23520_v58, %v9526_v13  ;;  %v26505_v19 = vld [vmem:[#allocation265_spill] sm:$0xff] }
 0x6ee   :  { %v16519_v16 = vpop.f32.mrf.mxu1  ;;  %16679 = vmatmul.mubr.msk.f32.gmra.mxu1 %vm5373_vm1, %v23895_v51  ;;  %v9155_v46 = vadd.f32 %v26505_v19, %v8788_v31  ;;  %v8790_v41 = vadd.f32 %v23481_v32, %v8423_v4  ;;  %v8425_v23 = vadd.f32 %v26508_v36, %v7843_v20  ;;  %v26510_v32 = vld [vmem:[#allocation279_spill] sm:$0xff]  ;;  %v26514_v36 = vld [vmem:[#allocation250_spill] sm:$0xff]  ;;  %v26519_v51 = vld [vmem:[#allocation205_spill] sm:$0xff]  ;;  %v8429_v14 = vadd.f32 %v26534_v62, %v26533_v12 }
 0x6ef   :  { %26504 = vst [vmem:[#allocation105_spill] sm:$0xff] %v23923_v54  ;;  %v23930_v57 = vadd.f32 %v23520_v58, %v9525_v8  ;;  %v9528_v1 = vadd.f32 %v16519_v16, %v9156_v37  ;;  %v23933_v48 = vsel %vm6284_vm2, %v9705_v35, %v9707_v56  ;;  %v23939_v13 = vsel %vm6284_vm2, %v9707_v56, %v9709_v50  ;;  %v26511_v8 = vld [vmem:[#allocation269_spill] sm:$0xff]  ;;  %v26537_v12 = vld [vmem:[#allocation278_spill] sm:$0xff] }
 0x6f0   :  { %26507 = vst [vmem:[#allocation190_spill] sm:$0xff] %v23933_v48  ;;  %v9410_v15 = vpop.f32.mrf.mxu1  ;;  %16597 = vmatmul.mubr.msk.f32.gmra.mxu0 %vm5373_vm1, %v23933_v48  ;;  %26509 = vst [vmem:[#allocation144_spill] sm:$0xff] %v23939_v13  ;;  %v9158_v35 = vadd.f32 %v26511_v8, %v26510_v32  ;;  %v8792_v4 = vadd.f32 %v23486_v9, %v8425_v23  ;;  %v9713_v37 = vrot.slane %v23923_v54, 1  ;;  %v26516_v32 = vld [vmem:[#allocation314_spill] sm:$0xff]  ;;  %v26518_v8 = vld [vmem:[#allocation316_spill] sm:$0xff] }
 0x6f1   :  { %26506 = vst [vmem:[#allocation71_spill] sm:$0xff] %v23930_v57  ;;  %v9711_v31 = vrot.slane %v23930_v57, 1  ;;  %v9527_v19 = vadd.f32 %v9410_v15, %v9155_v46  ;;  %16599 = vmatprep.mubr.msk.f32.mxu0 %vm5373_vm1, %v23939_v13  ;;  %16681 = vmatprep.mubr.msk.f32.mxu1 %vm5373_vm1, %v23930_v57  ;;  %v23951_v20 = vadd.f32 %v23520_v58, %v9528_v1  ;;  %v26517_v9 = vld [vmem:[#allocation178_spill] sm:$0xff] }
 0x6f2   :  { %v16522_v56 = vpop.f32.mrf.mxu1  ;;  %16682 = vmatmul.mubr.msk.f32.gmra.mxu1 %vm5373_vm1, %v23923_v54  ;;  %v9157_v15 = vadd.f32 %v26514_v36, %v8790_v41  ;;  %v6232_v23 = vadd.f32 %v26517_v9, %v26516_v32  ;;  %v6242_v1 = vadd.f32 %v26519_v51, %v26518_v8  ;;  %v26523_v51 = vld [vmem:[#allocation281_spill] sm:$0xff]  ;;  %v26524_v36 = vld [vmem:[#allocation271_spill] sm:$0xff] }
 0x6f3   :  { %26512 = vst [vmem:[#allocation152_spill] sm:$0xff] %v23951_v20  ;;  %v23956_v16 = vadd.f32 %v23520_v58, %v9527_v19  ;;  %v9530_v46 = vadd.f32 %v16522_v56, %v9158_v35  ;;  %v23960_v57 = vsel %vm6284_vm2, %v9709_v50, %v9711_v31  ;;  %v23969_v54 = vsel %vm6284_vm2, %v9711_v31, %v9713_v37  ;;  %v26521_v19 = vld [vmem:[#allocation292_spill] sm:$0xff]  ;;  %v26522_v35 = vld [vmem:[#allocation259_spill] sm:$0xff]  ;;  %v26525_v9 = vld [vmem:[#allocation225_spill] sm:$0xff] }
 0x6f4   :  { %26515 = vst [vmem:[#allocation188_spill] sm:$0xff] %v23960_v57  ;;  %v9420_v13 = vpop.f32.mrf.mxu1  ;;  %16600 = vmatmul.mubr.msk.f32.gmra.mxu0 %vm5373_vm1, %v23960_v57  ;;  %26520 = vst [vmem:[#allocation80_spill] sm:$0xff] %v23969_v54  ;;  %v8427_v56 = vadd.f32 %v26522_v35, %v26521_v19  ;;  %v9160_v32 = vadd.f32 %v26524_v36, %v26523_v51  ;;  %v6845_v8 = vadd.f32 %v26525_v9, %v6232_v23  ;;  %v26528_v35 = vld [vmem:[#allocation284_spill] sm:$0xff]  ;;  %v26530_v23 = vld [vmem:[#allocation66_spill] sm:$0xff] }
 0x6f5   :  { %26513 = vst [vmem:[#allocation108_spill] sm:$0xff] %v23956_v16  ;;  %v9715_v41 = vrot.slane %v23956_v16, 1  ;;  %v9529_v50 = vadd.f32 %v9420_v13, %v9157_v15  ;;  %16602 = vmatprep.mubr.msk.f32.mxu0 %vm5373_vm1, %v23969_v54  ;;  %16684 = vmatprep.mubr.msk.f32.mxu1 %vm5373_vm1, %v23956_v16  ;;  %v9717_v31 = vrot.slane %v23951_v20, 1  ;;  %v23983_v57 = vadd.f32 %v23520_v58, %v9530_v46  ;;  %v26527_v13 = vld [vmem:[#allocation274_spill] sm:$0xff]  ;;  %v26531_v36 = vld [vmem:[#allocation209_spill] sm:$0xff] }
 0x6f6   :  { %v16525_v19 = vpop.f32.mrf.mxu1  ;;  %16685 = vmatmul.mubr.msk.f32.gmra.mxu1 %vm5373_vm1, %v23951_v20  ;;  %v9159_v15 = vadd.f32 %v26527_v13, %v8792_v4  ;;  %v8794_v54 = vadd.f32 %v26528_v35, %v8427_v56  ;;  %v6252_v9 = vadd.f32 %v26531_v36, %v26530_v23  ;;  %v26532_v46 = vld [vmem:[#allocation197_spill] sm:$0xff]  ;;  %v26535_v56 = vld [vmem:[#allocation227_spill] sm:$0xff] }
 0x6f7   :  { %26526 = vst [vmem:[#allocation58_spill] sm:$0xff] %v23983_v57  ;;  %v23990_v16 = vadd.f32 %v23520_v58, %v9529_v50  ;;  %v9532_v48 = vadd.f32 %v16525_v19, %v9160_v32  ;;  %v23993_v51 = vsel %vm6284_vm2, %v9713_v37, %v9715_v41  ;;  %v7347_v44 = vadd.f32 %v26532_v46, %v6845_v8  ;;  %v26536_v8 = vld [vmem:[#allocation277_spill] sm:$0xff]  ;;  %v26538_v19 = vld [vmem:[#allocation31_spill] sm:$0xff]  ;;  %v26542_v46 = vld [vmem:[#allocation280_spill] sm:$0xff] }
 0x6f8   :  { %v9430_v20 = vpop.f32.mrf.mxu1  ;;  %16603 = vmatmul.mubr.msk.f32.gmra.mxu0 %vm5373_vm1, %v23993_v51  ;;  %v24003_v4 = vsel %vm6284_vm2, %v9715_v41, %v9717_v31  ;;  %v6847_v50 = vadd.f32 %v26535_v56, %v6242_v1  ;;  %v9162_v62 = vadd.f32 %v26537_v12, %v26536_v8  ;;  %v26539_v35 = vld [vmem:[#allocation285_spill] sm:$0xff]  ;;  %v9721_v41 = vrot.slane %v23983_v57, 1 }
 0x6f9   :  { %26529 = vst [vmem:[#allocation158_spill] sm:$0xff] %v23990_v16  ;;  %v9719_v37 = vrot.slane %v23990_v16, 1  ;;  %v9531_v32 = vadd.f32 %v9430_v20, %v9159_v15  ;;  %16605 = vmatprep.mubr.msk.f32.mxu0 %vm5373_vm1, %v24003_v4  ;;  %16687 = vmatprep.mubr.msk.f32.mxu1 %vm5373_vm1, %v23990_v16  ;;  %v7849_v13 = vadd.f32 %v26538_v19, %v7347_v44  ;;  %v26543_v44 = vld [vmem:[#allocation223_spill] sm:$0xff]  ;;  %v26544_v12 = vld [vmem:[#allocation237_spill] sm:$0xff] }
 0x6fa   :  { %v8796_v23 = vadd.f32 %v26539_v35, %v8429_v14  ;;  %v24017_v1 = vadd.f32 %v23520_v58, %v9532_v48  ;;  %v16528_v36 = vpop.f32.mrf.mxu1  ;;  %16688 = vmatmul.mubr.msk.f32.gmra.mxu1 %vm5373_vm1, %v23983_v57  ;;  %v9161_v56 = vadd.f32 %v26542_v46, %v8794_v54  ;;  %v6849_v14 = vadd.f32 %v26543_v44, %v6252_v9  ;;  %v26546_v57 = vld [vmem:[#allocation267_spill] sm:$0xff]  ;;  %v26547_v54 = vld [vmem:[#allocation78_spill] sm:$0xff] }
 0x6fb   :  { %v24022_v20 = vadd.f32 %v23520_v58, %v9531_v32  ;;  %v9534_v15 = vadd.f32 %v16528_v36, %v9162_v62  ;;  %v24026_v8 = vsel %vm6284_vm2, %v9717_v31, %v9719_v37  ;;  %v7349_v19 = vadd.f32 %v26544_v12, %v6847_v50  ;;  %v26548_v31 = vld [vmem:[#allocation257_spill] sm:$0xff]  ;;  %v26552_v12 = vld [vmem:[#allocation126_spill] sm:$0xff] }
 0x6fc   :  { %26540 = vst [vmem:[#allocation21_spill] sm:$0xff] %v24017_v1  ;;  %v9440_v35 = vpop.f32.mrf.mxu1  ;;  %16606 = vmatmul.mubr.msk.f32.gmra.mxu0 %vm5373_vm1, %v24026_v8  ;;  %v24033_v48 = vsel %vm6284_vm2, %v9719_v37, %v9721_v41  ;;  %v8431_v32 = vadd.f32 %v26546_v57, %v7849_v13  ;;  %v9164_v9 = vadd.f32 %v26548_v31, %v26547_v54  ;;  %v26549_v50 = vld [vmem:[#allocation261_spill] sm:$0xff]  ;;  %v9725_v44 = vrot.slane %v24017_v1, 1  ;;  %v26551_v13 = vld [vmem:[#allocation283_spill] sm:$0xff] }
 0x6fd   :  { %26541 = vst [vmem:[#allocation147_spill] sm:$0xff] %v24022_v20  ;;  %26545 = vst [vmem:[#allocation153_spill] sm:$0xff] %v24033_v48  ;;  %v9723_v62 = vrot.slane %v24022_v20, 1  ;;  %v9533_v36 = vadd.f32 %v9440_v35, %v9161_v56  ;;  %16608 = vmatprep.mubr.msk.f32.mxu0 %vm5373_vm1, %v24033_v48  ;;  %16690 = vmatprep.mubr.msk.f32.mxu1 %vm5373_vm1, %v24022_v20  ;;  %v7851_v46 = vadd.f32 %v26549_v50, %v7349_v19  ;;  %v26554_v19 = vld [vmem:[#allocation200_spill] sm:$0xff] }
 0x6fe   :  { %v24046_v37 = vadd.f32 %v23520_v58, %v9534_v15  ;;  %v16531_v57 = vpop.f32.mrf.mxu1  ;;  %16691 = vmatmul.mubr.msk.f32.gmra.mxu1 %vm5373_vm1, %v24017_v1  ;;  %v9163_v56 = vadd.f32 %v26551_v13, %v8796_v23  ;;  %v8798_v35 = vadd.f32 %v26552_v12, %v8431_v32  ;;  %v7351_v31 = vadd.f32 %v26554_v19, %v6849_v14  ;;  %v26555_v50 = vld [vmem:[#allocation264_spill] sm:$0xff]  ;;  %v26557_v14 = vld [vmem:[#allocation286_spill] sm:$0xff] }
 0x6ff   :  { %v24053_v20 = vadd.f32 %v23520_v58, %v9533_v36  ;;  %v9536_v16 = vadd.f32 %v16531_v57, %v9164_v9  ;;  %v24056_v54 = vsel %vm6284_vm2, %v9721_v41, %v9723_v62  ;;  %v8433_v15 = vadd.f32 %v26555_v50, %v7851_v46  ;;  %v26556_v41 = vld [vmem:[#allocation128_spill] sm:$0xff]  ;;  %v26558_v9 = vld [vmem:[#allocation293_spill] sm:$0xff]  ;;  %v26561_v50 = vld [vmem:[#allocation258_spill] sm:$0xff] }
 0x700   :  { %26550 = vst [vmem:[#allocation164_spill] sm:$0xff] %v24046_v37  ;;  %v9450_v48 = vpop.f32.mrf.mxu1  ;;  %16609 = vmatmul.mubr.msk.f32.gmra.mxu0 %vm5373_vm1, %v24056_v54  ;;  %v24063_v1 = vsel %vm6284_vm2, %v9723_v62, %v9725_v44  ;;  %v9166_v36 = vadd.f32 %v26557_v14, %v26556_v41  ;;  %v7853_v46 = vadd.f32 %v26558_v9, %v7351_v31  ;;  %v26559_v57 = vld [vmem:[#allocation129_spill] sm:$0xff]  ;;  %v9729_v12 = vrot.slane %v24046_v37, 1 }
 0x701   :  { %26553 = vst [vmem:[#allocation193_spill] sm:$0xff] %v24053_v20  ;;  %v9727_v23 = vrot.slane %v24053_v20, 1  ;;  %v9535_v32 = vadd.f32 %v9450_v48, %v9163_v56  ;;  %16611 = vmatprep.mubr.msk.f32.mxu0 %vm5373_vm1, %v24063_v1  ;;  %16693 = vmatprep.mubr.msk.f32.mxu1 %vm5373_vm1, %v24053_v20  ;;  %v8800_v13 = vadd.f32 %v26559_v57, %v8433_v15  ;;  %v26562_v15 = vld [vmem:[#allocation270_spill] sm:$0xff] }
 0x702   :  { %v24076_v62 = vadd.f32 %v23520_v58, %v9536_v16  ;;  %v16534_v19 = vpop.f32.mrf.mxu1  ;;  %16694 = vmatmul.mubr.msk.f32.gmra.mxu1 %vm5373_vm1, %v24046_v37  ;;  %v9165_v20 = vadd.f32 %v26561_v50, %v8798_v35  ;;  %v8435_v14 = vadd.f32 %v26562_v15, %v7853_v46  ;;  %v26564_v35 = vld [vmem:[#allocation287_spill] sm:$0xff]  ;;  %v26565_v46 = vld [vmem:[#allocation288_spill] sm:$0xff] }
 0x703   :  { %v24081_v48 = vadd.f32 %v23520_v58, %v9535_v32  ;;  %v9538_v56 = vadd.f32 %v16534_v19, %v9166_v36  ;;  %v24085_v41 = vsel %vm6284_vm2, %v9725_v44, %v9727_v23  ;;  %v24090_v16 = vsel %vm6284_vm2, %v9727_v23, %v9729_v12  ;;  %v26563_v44 = vld [vmem:[#allocation282_spill] sm:$0xff]  ;;  %v26566_v50 = vld [vmem:[#allocation88_spill] sm:$0xff] }
 0x704   :  { %v9460_v31 = vpop.f32.mrf.mxu1  ;;  %16612 = vmatmul.mubr.msk.f32.gmra.mxu0 %vm5373_vm1, %v24085_v41  ;;  %v9168_v32 = vadd.f32 %v26564_v35, %v26563_v44  ;;  %v9733_v36 = vrot.slane %v24076_v62, 1 }
 0x705   :  { %26560 = vst [vmem:[#allocation156_spill] sm:$0xff] %v24081_v48  ;;  %v9731_v9 = vrot.slane %v24081_v48, 1  ;;  %v9537_v57 = vadd.f32 %v9460_v31, %v9165_v20  ;;  %16614 = vmatprep.mubr.msk.f32.mxu0 %vm5373_vm1, %v24090_v16  ;;  %16696 = vmatprep.mubr.msk.f32.mxu1 %vm5373_vm1, %v24081_v48  ;;  %v24102_v19 = vadd.f32 %v23520_v58, %v9538_v56 }
 0x706   :  { %v16537_v23 = vpop.f32.mrf.mxu1  ;;  %16697 = vmatmul.mubr.msk.f32.gmra.mxu1 %vm5373_vm1, %v24076_v62  ;;  %v9167_v20 = vadd.f32 %v26565_v46, %v8800_v13  ;;  %v8802_v31 = vadd.f32 %v26566_v50, %v8435_v14 }
 0x707   :  { %v24109_v15 = vadd.f32 %v23520_v58, %v9537_v57  ;;  %v9540_v48 = vadd.f32 %v16537_v23, %v9168_v32  ;;  %v24112_v37 = vsel %vm6284_vm2, %v9729_v12, %v9731_v9  ;;  %v24117_v56 = vsel %vm6284_vm2, %v9731_v9, %v9733_v36  ;;  %v26568_v12 = vld [vmem:[#allocation92_spill] sm:$0xff]  ;;  %v26569_v57 = vld [vmem:[#allocation255_spill] sm:$0xff] }
 0x708   :  { %v9470_v44 = vpop.f32.mrf.mxu1  ;;  %16615 = vmatmul.mubr.msk.f32.gmra.mxu0 %vm5373_vm1, %v24112_v37  ;;  %v9170_v32 = vadd.f32 %v26569_v57, %v26568_v12  ;;  %v9737_v23 = vrot.slane %v24102_v19, 1 }
 0x709   :  { %26567 = vst [vmem:[#allocation106_spill] sm:$0xff] %v24109_v15  ;;  %v9735_v35 = vrot.slane %v24109_v15, 1  ;;  %v24121_v13 = vadd.f32 %v23520_v58, %v9540_v48  ;;  %v9539_v14 = vadd.f32 %v9470_v44, %v9167_v20  ;;  %16617 = vmatprep.mubr.msk.f32.mxu0 %vm5373_vm1, %v24117_v56  ;;  %16699 = vmatprep.mubr.msk.f32.mxu1 %vm5373_vm1, %v24109_v15  ;;  %v26570_v20 = vld [vmem:[#allocation289_spill] sm:$0xff] }
 0x70a   :  { %v16540_v46 = vpop.f32.mrf.mxu1  ;;  %16700 = vmatmul.mubr.msk.f32.gmra.mxu1 %vm5373_vm1, %v24102_v19  ;;  %v9169_v50 = vadd.f32 %v26570_v20, %v8802_v31 }
 0x70b   :  { %v24133_v9 = vadd.f32 %v23520_v58, %v9539_v14  ;;  %v9542_v48 = vadd.f32 %v16540_v46, %v9170_v32  ;;  %16797 = vmatprep.mubr.msk.f32.mxu1 %vm5373_vm1, %v23599_v47  ;;  %v24139_v44 = vsel %vm6284_vm2, %v9733_v36, %v9735_v35  ;;  %v24144_v12 = vsel %vm6284_vm2, %v9735_v35, %v9737_v23 }
 0x70c   :  { %v9480_v15 = vpop.f32.mrf.mxu1  ;;  %16618 = vmatmul.mubr.msk.f32.gmra.mxu0 %vm5373_vm1, %v24139_v44  ;;  %v10803_v57 = vrot.slane %v24121_v13, 1 }
 0x70d   :  { %v9739_v14 = vrot.slane %v24133_v9, 1  ;;  %v9595_v32 = vadd.f32 %v23520_v58, %v9542_v48  ;;  %v9541_v46 = vadd.f32 %v9480_v15, %v9169_v50  ;;  %16620 = vmatprep.mubr.msk.f32.mxu0 %vm5373_vm1, %v24144_v12 }
 0x70e   :  { %v16543_v47 = vpop.f32.mrf.mxu1  ;;  %16798 = vmatmul.mubr.msk.f32.vlgmr.msra.gmra.mxu1 %vm5373_vm1, %v23604_v29 }
 0x70f   :  { %v24154_v36 = vadd.f32 %v23520_v58, %v9541_v46  ;;  %16800 = vmatprep.mubr.msk.f32.mxu1 %vm5373_vm1, %v23632_v30  ;;  %v24159_v31 = vsel %vm6284_vm2, %v9737_v23, %v9739_v14  ;;  %v24162_v35 = vsel %vm6284_vm2, %v9739_v14, %v10803_v57  ;;  %v10807_v48 = vrot.slane %v9595_v32, 1  ;;  %v26578_v30 = vld [vmem:[#allocation103_spill] sm:$0xff] }
 0x710   :  { %v9490_v15 = vpop.f32.mrf.mxu1  ;;  %16621 = vmatmul.mubr.msk.f32.gmra.mxu0 %vm5373_vm1, %v24159_v31 }
 0x711   :  { %v10805_v20 = vrot.slane %v24154_v36, 1  ;;  %16718 = vmatprep.mubr.msk.f32.mxu0 %vm5373_vm1, %v23539_v26  ;;  %v26571_v26 = vld [vmem:[#allocation135_spill] sm:$0xff] }
 0x712   :  { %16801 = vmatmul.mubr.msk.f32.gmra.mxu1 %vm5373_vm1, %v23637_v60  ;;  %v26579_v60 = vld [vmem:[#allocation144_spill] sm:$0xff] }
 0x713   :  { %16803 = vmatprep.mubr.msk.f32.mxu1 %vm5373_vm1, %v23665_v18  ;;  %v24174_v58 = vsel %vm6284_vm2, %v10803_v57, %v10805_v20  ;;  %v24177_v29 = vsel %vm6284_vm2, %v10805_v20, %v10807_v48  ;;  %v26582_v18 = vld [vmem:[#allocation95_spill] sm:$0xff] }
 0x714   :  { %16719 = vmatmul.mubr.msk.f32.vlgmr.msra.gmra.mxu0 %vm5373_vm1, %v23568_v55  ;;  %v26573_v55 = vld [vmem:[#allocation132_spill] sm:$0xff] }
 0x715   :  { %16721 = vmatprep.mubr.msk.f32.mxu0 %vm5373_vm1, %v23562_v11  ;;  %v26572_v11 = vld [vmem:[#allocation141_spill] sm:$0xff] }
 0x716   :  { %16804 = vmatmul.mubr.msk.f32.gmra.mxu1 %vm5373_vm1, %v23670_v45  ;;  %v26583_v45 = vld [vmem:[#allocation80_spill] sm:$0xff] }
 0x717   :  { %16806 = vmatprep.mubr.msk.f32.mxu1 %vm5373_vm1, %v23698_v24  ;;  %v26586_v24 = vld [vmem:[#allocation71_spill] sm:$0xff] }
 0x718   :  { %16722 = vmatmul.mubr.msk.f32.gmra.mxu0 %vm5373_vm1, %v23596_v52  ;;  %v26575_v52 = vld [vmem:[#allocation146_spill] sm:$0xff] }
 0x719   :  { %16724 = vmatprep.mubr.msk.f32.mxu0 %vm5373_vm1, %v23589_v5  ;;  %v26574_v5 = vld [vmem:[#allocation134_spill] sm:$0xff] }
 0x71a   :  { %16807 = vmatmul.mubr.msk.f32.gmra.mxu1 %vm5373_vm1, %v23703_v28  ;;  %v26587_v28 = vld [vmem:[#allocation105_spill] sm:$0xff] }
 0x71b   :  { %16809 = vmatprep.mubr.msk.f32.mxu1 %vm5373_vm1, %v23728_v61  ;;  %v26590_v61 = vld [vmem:[#allocation152_spill] sm:$0xff] }
 0x71c   :  { %16725 = vmatmul.mubr.msk.f32.gmra.mxu0 %vm5373_vm1, %v23629_v17  ;;  %v26577_v17 = vld [vmem:[#allocation18_spill] sm:$0xff] }
 0x71d   :  { %16727 = vmatprep.mubr.msk.f32.mxu0 %vm5373_vm1, %v23623_v2  ;;  %v26576_v2 = vld [vmem:[#allocation190_spill] sm:$0xff] }
 0x71e   :  { %16810 = vmatmul.mubr.msk.f32.gmra.mxu1 %vm5373_vm1, %v23733_v3  ;;  %v26591_v3 = vld [vmem:[#allocation158_spill] sm:$0xff] }
 0x71f   :  { %16812 = vmatprep.mubr.msk.f32.mxu1 %vm5373_vm1, %v23758_v7  ;;  %v26594_v7 = vld [vmem:[#allocation21_spill] sm:$0xff] }
 0x720   :  { %16728 = vmatmul.mubr.msk.f32.gmra.mxu0 %vm5373_vm1, %v23662_v38  ;;  %v26581_v38 = vld [vmem:[#allocation140_spill] sm:$0xff] }
 0x721   :  { %16730 = vmatprep.mubr.msk.f32.mxu0 %vm5373_vm1, %v23656_v39  ;;  %v26580_v39 = vld [vmem:[#allocation188_spill] sm:$0xff] }
 0x722   :  { %16813 = vmatmul.mubr.msk.f32.gmra.mxu1 %vm5373_vm1, %v23763_v33  ;;  %v26595_v33 = vld [vmem:[#allocation193_spill] sm:$0xff] }
 0x723   :  { %16815 = vmatprep.mubr.msk.f32.mxu1 %vm5373_vm1, %v23788_v6  ;;  %v26598_v6 = vld [vmem:[#allocation106_spill] sm:$0xff] }
 0x724   :  { %16731 = vmatmul.mubr.msk.f32.gmra.mxu0 %vm5373_vm1, %v23695_v43  ;;  %v26585_v43 = vld [vmem:[#allocation97_spill] sm:$0xff] }
 0x725   :  { %16733 = vmatprep.mubr.msk.f32.mxu0 %vm5373_vm1, %v23689_v0  ;;  %v26584_v0 = vld [vmem:[#allocation56_spill] sm:$0xff] }
 0x726   :  { %16816 = vmatmul.mubr.msk.f32.gmra.mxu1 %vm5373_vm1, %v23793_v40 }
 0x727   :  { %16818 = vmatprep.mubr.msk.f32.mxu1 %vm5373_vm1, %v23815_v21 }
 0x728   :  { %16734 = vmatmul.mubr.msk.f32.gmra.mxu0 %vm5373_vm1, %v23725_v63  ;;  %v26589_v63 = vld [vmem:[#allocation108_spill] sm:$0xff] }
 0x729   :  { %16736 = vmatprep.mubr.msk.f32.mxu0 %vm5373_vm1, %v23719_v42  ;;  %v26588_v42 = vld [vmem:[#allocation153_spill] sm:$0xff] }
 0x72a   :  { %16819 = vmatmul.mubr.msk.f32.gmra.mxu1 %vm5373_vm1, %v23820_v34 }
 0x72b   :  { %16821 = vmatprep.mubr.msk.f32.mxu1 %vm5373_vm1, %v23842_v25 }
 0x72c   :  { %16737 = vmatmul.mubr.msk.f32.gmra.mxu0 %vm5373_vm1, %v23755_v59  ;;  %v26593_v59 = vld [vmem:[#allocation147_spill] sm:$0xff] }
 0x72d   :  { %16739 = vmatprep.mubr.msk.f32.mxu0 %vm5373_vm1, %v23747_v49  ;;  %v26592_v49 = vld [vmem:[#allocation58_spill] sm:$0xff] }
 0x72e   :  { %16822 = vmatmul.mubr.msk.f32.gmra.mxu1 %vm5373_vm1, %v23849_v10 }
 0x72f   :  { %16824 = vmatprep.mubr.msk.f32.mxu1 %vm5373_vm1, %v23874_v22 }
 0x730   :  { %16740 = vmatmul.mubr.msk.f32.gmra.mxu0 %vm5373_vm1, %v23784_v27  ;;  %v26597_v27 = vld [vmem:[#allocation156_spill] sm:$0xff] }
 0x731   :  { %16742 = vmatprep.mubr.msk.f32.mxu0 %vm5373_vm1, %v23779_v53  ;;  %v26596_v53 = vld [vmem:[#allocation164_spill] sm:$0xff] }
 0x732   :  { %16825 = vmatmul.mubr.msk.f32.gmra.mxu1 %vm5373_vm1, %v26571_v26 }
 0x733   :  { %16827 = vmatprep.mubr.msk.f32.mxu1 %vm5373_vm1, %v26572_v11 }
 0x734   :  { %16743 = vmatmul.mubr.msk.f32.gmra.mxu0 %vm5373_vm1, %v26573_v55 }
 0x735   :  { %16745 = vmatprep.mubr.msk.f32.mxu0 %vm5373_vm1, %v26574_v5 }
 0x736   :  { %16828 = vmatmul.mubr.msk.f32.gmra.mxu1 %vm5373_vm1, %v26575_v52 }
 0x737   :  { %16830 = vmatprep.mubr.msk.f32.mxu1 %vm5373_vm1, %v26576_v2 }
 0x738   :  { %16746 = vmatmul.mubr.msk.f32.gmra.mxu0 %vm5373_vm1, %v26577_v17 }
 0x739   :  { %16748 = vmatprep.mubr.msk.f32.mxu0 %vm5373_vm1, %v26578_v30 }
 0x73a   :  { %16831 = vmatmul.mubr.msk.f32.gmra.mxu1 %vm5373_vm1, %v26579_v60 }
 0x73b   :  { %16833 = vmatprep.mubr.msk.f32.mxu1 %vm5373_vm1, %v26580_v39 }
 0x73c   :  { %16749 = vmatmul.mubr.msk.f32.gmra.mxu0 %vm5373_vm1, %v26581_v38 }
 0x73d   :  { %16751 = vmatprep.mubr.msk.f32.mxu0 %vm5373_vm1, %v26582_v18 }
 0x73e   :  { %16834 = vmatmul.mubr.msk.f32.gmra.mxu1 %vm5373_vm1, %v26583_v45 }
 0x73f   :  { %16836 = vmatprep.mubr.msk.f32.mxu1 %vm5373_vm1, %v23993_v51 }
 0x740   :  { %16752 = vmatmul.mubr.msk.f32.gmra.mxu0 %vm5373_vm1, %v26584_v0 }
 0x741   :  { %16754 = vmatprep.mubr.msk.f32.mxu0 %vm5373_vm1, %v26585_v43 }
 0x742   :  { %16837 = vmatmul.mubr.msk.f32.gmra.mxu1 %vm5373_vm1, %v24003_v4 }
 0x743   :  { %16839 = vmatprep.mubr.msk.f32.mxu1 %vm5373_vm1, %v24026_v8 }
 0x744   :  { %16755 = vmatmul.mubr.msk.f32.gmra.mxu0 %vm5373_vm1, %v26586_v24 }
 0x745   :  { %16757 = vmatprep.mubr.msk.f32.mxu0 %vm5373_vm1, %v26587_v28 }
 0x746   :  { %16840 = vmatmul.mubr.msk.f32.gmra.mxu1 %vm5373_vm1, %v26588_v42 }
 0x747   :  { %16842 = vmatprep.mubr.msk.f32.mxu1 %vm5373_vm1, %v24056_v54 }
 0x748   :  { %16758 = vmatmul.mubr.msk.f32.gmra.mxu0 %vm5373_vm1, %v26589_v63 }
 0x749   :  { %16760 = vmatprep.mubr.msk.f32.mxu0 %vm5373_vm1, %v26590_v61 }
 0x74a   :  { %16843 = vmatmul.mubr.msk.f32.gmra.mxu1 %vm5373_vm1, %v24063_v1 }
 0x74b   :  { %16845 = vmatprep.mubr.msk.f32.mxu1 %vm5373_vm1, %v24085_v41 }
 0x74c   :  { %16761 = vmatmul.mubr.msk.f32.gmra.mxu0 %vm5373_vm1, %v26591_v3 }
 0x74d   :  { %16763 = vmatprep.mubr.msk.f32.mxu0 %vm5373_vm1, %v26592_v49 }
 0x74e   :  { %16846 = vmatmul.mubr.msk.f32.gmra.mxu1 %vm5373_vm1, %v24090_v16 }
 0x74f   :  { %16848 = vmatprep.mubr.msk.f32.mxu1 %vm5373_vm1, %v24112_v37 }
 0x750   :  { %16764 = vmatmul.mubr.msk.f32.gmra.mxu0 %vm5373_vm1, %v26593_v59 }
 0x751   :  { %16766 = vmatprep.mubr.msk.f32.mxu0 %vm5373_vm1, %v26594_v7 }
 0x752   :  { %16849 = vmatmul.mubr.msk.f32.gmra.mxu1 %vm5373_vm1, %v24117_v56 }
 0x753   :  { %16851 = vmatprep.mubr.msk.f32.mxu1 %vm5373_vm1, %v24139_v44 }
 0x754   :  { %16767 = vmatmul.mubr.msk.f32.gmra.mxu0 %vm5373_vm1, %v26595_v33 }
 0x755   :  { %16769 = vmatprep.mubr.msk.f32.mxu0 %vm5373_vm1, %v26596_v53 }
 0x756   :  { %16852 = vmatmul.mubr.msk.f32.gmra.mxu1 %vm5373_vm1, %v24144_v12 }
 0x757   :  { %16854 = vmatprep.mubr.msk.f32.mxu1 %vm5373_vm1, %v24159_v31 }
 0x758   :  { %16770 = vmatmul.mubr.msk.f32.gmra.mxu0 %vm5373_vm1, %v26597_v27 }
 0x759   :  { %16772 = vmatprep.mubr.msk.f32.mxu0 %vm5373_vm1, %v24076_v62 }
 0x75a   :  { %16855 = vmatmul.mubr.msk.f32.gmra.mxu1 %vm5373_vm1, %v24162_v35 }
 0x75b   :  { %16857 = vmatprep.mubr.msk.f32.mxu1 %vm5373_vm1, %v24174_v58 }
 0x75c   :  { %16773 = vmatmul.mubr.msk.f32.gmra.mxu0 %vm5373_vm1, %v26598_v6 }
 0x75d   :  { %16775 = vmatprep.mubr.msk.f32.mxu0 %vm5373_vm1, %v24102_v19 }
 0x75e   :  { %16858 = vmatmul.mubr.msk.f32.gmra.mxu1 %vm5373_vm1, %v24177_v29 }
 0x760   :  { %16776 = vmatmul.mubr.msk.f32.gmra.mxu0 %vm5373_vm1, %v24133_v9 }
 0x761   :  { %16778 = vmatprep.mubr.msk.f32.mxu0 %vm5373_vm1, %v24121_v13 }
 0x764   :  { %16779 = vmatmul.mubr.msk.f32.gmra.mxu0 %vm5373_vm1, %v24154_v36 }
 0x77a   :  { %v16641_v40 = vpop.f32.mrf.mxu1 }
 0x77c   :  { %v10250_v21 = vpop.f32.mrf.mxu1 }
 0x77e   :  { %v16644_v34 = vpop.f32.mrf.mxu1 }
 0x780   :  { %v16562_v25 = vpop.f32.mrf.mxu0  ;;  %v10260_v10 = vpop.f32.mrf.mxu1 }
 0x781   :  { %v24335_v22 = vadd.f32 %v16641_v40, %v16562_v25 }
 0x782   :  { %v9891_v51 = vpop.f32.mrf.mxu0  ;;  %v16647_v4 = vpop.f32.mrf.mxu1 }
 0x783   :  { %v24337_v1 = vadd.f32 %v10250_v21, %v9891_v51 }
 0x784   :  { %v16565_v8 = vpop.f32.mrf.mxu0  ;;  %v10270_v37 = vpop.f32.mrf.mxu1 }
 0x785   :  { %v24339_v54 = vadd.f32 %v16644_v34, %v16565_v8 }
 0x786   :  { %v9901_v62 = vpop.f32.mrf.mxu0  ;;  %v16650_v41 = vpop.f32.mrf.mxu1 }
 0x787   :  { %v24341_v16 = vadd.f32 %v10260_v10, %v9901_v62 }
 0x788   :  { %v16568_v19 = vpop.f32.mrf.mxu0  ;;  %v10280_v56 = vpop.f32.mrf.mxu1 }
 0x789   :  { %v24343_v13 = vadd.f32 %v16647_v4, %v16568_v19 }
 0x78a   :  { %v9911_v23 = vpop.f32.mrf.mxu0  ;;  %v16653_v9 = vpop.f32.mrf.mxu1 }
 0x78b   :  { %v24345_v50 = vadd.f32 %v10270_v37, %v9911_v23 }
 0x78c   :  { %v16571_v44 = vpop.f32.mrf.mxu0  ;;  %v10290_v12 = vpop.f32.mrf.mxu1 }
 0x78d   :  { %v24347_v57 = vadd.f32 %v16650_v41, %v16571_v44 }
 0x78e   :  { %v9921_v14 = vpop.f32.mrf.mxu0  ;;  %v16656_v32 = vpop.f32.mrf.mxu1 }
 0x78f   :  { %v24349_v46 = vadd.f32 %v10280_v56, %v9921_v14 }
 0x790   :  { %v16574_v47 = vpop.f32.mrf.mxu0  ;;  %v10300_v36 = vpop.f32.mrf.mxu1 }
 0x791   :  { %v24351_v31 = vadd.f32 %v16653_v9, %v16574_v47 }
 0x792   :  { %v9931_v35 = vpop.f32.mrf.mxu0  ;;  %v16659_v15 = vpop.f32.mrf.mxu1 }
 0x793   :  { %v24353_v48 = vadd.f32 %v10290_v12, %v9931_v35 }
 0x794   :  { %v16577_v20 = vpop.f32.mrf.mxu0  ;;  %v10310_v58 = vpop.f32.mrf.mxu1 }
 0x795   :  { %v24355_v29 = vadd.f32 %v16656_v32, %v16577_v20 }
 0x796   :  { %v9941_v26 = vpop.f32.mrf.mxu0  ;;  %v16662_v11 = vpop.f32.mrf.mxu1 }
 0x797   :  { %v24357_v55 = vadd.f32 %v10300_v36, %v9941_v26 }
 0x798   :  { %v16580_v5 = vpop.f32.mrf.mxu0  ;;  %v10320_v52 = vpop.f32.mrf.mxu1 }
 0x799   :  { %v24359_v2 = vadd.f32 %v16659_v15, %v16580_v5 }
 0x79a   :  { %v9951_v17 = vpop.f32.mrf.mxu0  ;;  %v16665_v30 = vpop.f32.mrf.mxu1 }
 0x79b   :  { %v24361_v60 = vadd.f32 %v10310_v58, %v9951_v17 }
 0x79c   :  { %v16583_v39 = vpop.f32.mrf.mxu0  ;;  %v10330_v38 = vpop.f32.mrf.mxu1 }
 0x79d   :  { %v24363_v18 = vadd.f32 %v16662_v11, %v16583_v39 }
 0x79e   :  { %v9961_v45 = vpop.f32.mrf.mxu0  ;;  %v16668_v0 = vpop.f32.mrf.mxu1 }
 0x79f   :  { %v24365_v43 = vadd.f32 %v10320_v52, %v9961_v45 }
 0x7a0   :  { %v16586_v24 = vpop.f32.mrf.mxu0  ;;  %v10340_v28 = vpop.f32.mrf.mxu1 }
 0x7a1   :  { %v24367_v42 = vadd.f32 %v16665_v30, %v16586_v24 }
 0x7a2   :  { %v9971_v63 = vpop.f32.mrf.mxu0  ;;  %v16671_v61 = vpop.f32.mrf.mxu1 }
 0x7a3   :  { %v24369_v3 = vadd.f32 %v10330_v38, %v9971_v63 }
 0x7a4   :  { %v16589_v49 = vpop.f32.mrf.mxu0  ;;  %v10350_v59 = vpop.f32.mrf.mxu1 }
 0x7a5   :  { %v24371_v7 = vadd.f32 %v16668_v0, %v16589_v49 }
 0x7a6   :  { %v9981_v33 = vpop.f32.mrf.mxu0  ;;  %v16674_v53 = vpop.f32.mrf.mxu1 }
 0x7a7   :  { %v24373_v27 = vadd.f32 %v10340_v28, %v9981_v33 }
 0x7a8   :  { %v16592_v6 = vpop.f32.mrf.mxu0  ;;  %v10360_v40 = vpop.f32.mrf.mxu1 }
 0x7a9   :  { %v24375_v21 = vadd.f32 %v16671_v61, %v16592_v6 }
 0x7aa   :  { %v9991_v34 = vpop.f32.mrf.mxu0  ;;  %v16677_v25 = vpop.f32.mrf.mxu1 }
 0x7ab   :  { %v24377_v10 = vadd.f32 %v10350_v59, %v9991_v34 }
 0x7ac   :  { %v16595_v51 = vpop.f32.mrf.mxu0  ;;  %v10370_v4 = vpop.f32.mrf.mxu1 }
 0x7ad   :  { %v24379_v8 = vadd.f32 %v16674_v53, %v16595_v51 }
 0x7ae   :  { %v10001_v37 = vpop.f32.mrf.mxu0  ;;  %v16680_v62 = vpop.f32.mrf.mxu1 }
 0x7af   :  { %v24381_v41 = vadd.f32 %v10360_v40, %v10001_v37 }
 0x7b0   :  { %v16598_v19 = vpop.f32.mrf.mxu0  ;;  %v10380_v56 = vpop.f32.mrf.mxu1 }
 0x7b1   :  { %v24383_v23 = vadd.f32 %v16677_v25, %v16598_v19 }
 0x7b2   :  { %v10011_v9 = vpop.f32.mrf.mxu0  ;;  %v16683_v44 = vpop.f32.mrf.mxu1 }
 0x7b3   :  { %v24385_v12 = vadd.f32 %v10370_v4, %v10011_v9 }
 0x7b4   :  { %v16601_v14 = vpop.f32.mrf.mxu0  ;;  %v10390_v32 = vpop.f32.mrf.mxu1 }
 0x7b5   :  { %v24387_v47 = vadd.f32 %v16680_v62, %v16601_v14 }
 0x7b6   :  { %v10021_v36 = vpop.f32.mrf.mxu0  ;;  %v16686_v35 = vpop.f32.mrf.mxu1 }
 0x7b7   :  { %v24389_v15 = vadd.f32 %v10380_v56, %v10021_v36 }
 0x7b8   :  { %v16604_v20 = vpop.f32.mrf.mxu0  ;;  %v10400_v58 = vpop.f32.mrf.mxu1 }
 0x7b9   :  { %v24391_v26 = vadd.f32 %v16683_v44, %v16604_v20 }
 0x7ba   :  { %v10031_v11 = vpop.f32.mrf.mxu0  ;;  %v16689_v5 = vpop.f32.mrf.mxu1 }
 0x7bb   :  { %v24393_v52 = vadd.f32 %v10390_v32, %v10031_v11 }
 0x7bc   :  { %v16607_v17 = vpop.f32.mrf.mxu0  ;;  %v10410_v30 = vpop.f32.mrf.mxu1 }
 0x7bd   :  { %v24395_v39 = vadd.f32 %v16686_v35, %v16607_v17 }
 0x7be   :  { %v10041_v38 = vpop.f32.mrf.mxu0  ;;  %v16692_v45 = vpop.f32.mrf.mxu1 }
 0x7bf   :  { %26599 = vst [vmem:[#allocation155_spill] sm:$0xff] %v24395_v39  ;;  %v24397_v0 = vadd.f32 %v10400_v58, %v10041_v38 }
 0x7c0   :  { %v16610_v24 = vpop.f32.mrf.mxu0  ;;  %v10420_v28 = vpop.f32.mrf.mxu1 }
 0x7c1   :  { %26600 = vst [vmem:[#allocation168_spill] sm:$0xff] %v24397_v0  ;;  %v24399_v63 = vadd.f32 %v16689_v5, %v16610_v24 }
 0x7c2   :  { %v10051_v61 = vpop.f32.mrf.mxu0  ;;  %v16695_v49 = vpop.f32.mrf.mxu1 }
 0x7c3   :  { %26601 = vst [vmem:[#allocation194_spill] sm:$0xff] %v24399_v63  ;;  %v24401_v59 = vadd.f32 %v10410_v30, %v10051_v61 }
 0x7c4   :  { %v16613_v33 = vpop.f32.mrf.mxu0  ;;  %v10430_v53 = vpop.f32.mrf.mxu1 }
 0x7c5   :  { %26602 = vst [vmem:[#allocation55_spill] sm:$0xff] %v24401_v59  ;;  %v24403_v6 = vadd.f32 %v16692_v45, %v16613_v33 }
 0x7c6   :  { %v10061_v40 = vpop.f32.mrf.mxu0  ;;  %v16698_v34 = vpop.f32.mrf.mxu1 }
 0x7c7   :  { %26603 = vst [vmem:[#allocation191_spill] sm:$0xff] %v24403_v6  ;;  %v24405_v25 = vadd.f32 %v10420_v28, %v10061_v40 }
 0x7c8   :  { %v16616_v51 = vpop.f32.mrf.mxu0  ;;  %v10440_v4 = vpop.f32.mrf.mxu1 }
 0x7c9   :  { %26604 = vst [vmem:[#allocation172_spill] sm:$0xff] %v24405_v25  ;;  %v24407_v37 = vadd.f32 %v16695_v49, %v16616_v51 }
 0x7ca   :  { %v10071_v62 = vpop.f32.mrf.mxu0  ;;  %v16701_v19 = vpop.f32.mrf.mxu1 }
 0x7cb   :  { %26605 = vst [vmem:[#allocation161_spill] sm:$0xff] %v24407_v37  ;;  %v24409_v56 = vadd.f32 %v10430_v53, %v10071_v62 }
 0x7cc   :  { %v16619_v9 = vpop.f32.mrf.mxu0  ;;  %v10450_v44 = vpop.f32.mrf.mxu1 }
 0x7cd   :  { %26606 = vst [vmem:[#allocation312_spill] sm:$0xff] %v24409_v56  ;;  %v24411_v14 = vadd.f32 %v16698_v34, %v16619_v9 }
 0x7ce   :  { %v10081_v32 = vpop.f32.mrf.mxu0  ;;  %v16799_v36 = vpop.f32.mrf.mxu1 }
 0x7cf   :  { %26607 = vst [vmem:[#allocation176_spill] sm:$0xff] %v24411_v14  ;;  %v24413_v35 = vadd.f32 %v10440_v4, %v10081_v32 }
 0x7d0   :  { %v16622_v20 = vpop.f32.mrf.mxu0  ;;  %v10881_v58 = vpop.f32.mrf.mxu1 }
 0x7d1   :  { %26608 = vst [vmem:[#allocation196_spill] sm:$0xff] %v24413_v35  ;;  %v24415_v11 = vadd.f32 %v16701_v19, %v16622_v20 }
 0x7d2   :  { %v10091_v5 = vpop.f32.mrf.mxu0  ;;  %v16802_v17 = vpop.f32.mrf.mxu1 }
 0x7d3   :  { %26609 = vst [vmem:[#allocation14_spill] sm:$0xff] %v24415_v11  ;;  %v24417_v30 = vadd.f32 %v10450_v44, %v10091_v5 }
 0x7d4   :  { %v16720_v38 = vpop.f32.mrf.mxu0  ;;  %v10891_v45 = vpop.f32.mrf.mxu1 }
 0x7d5   :  { %26610 = vst [vmem:[#allocation201_spill] sm:$0xff] %v24417_v30  ;;  %v10752_v24 = vadd.f32 %v16720_v38, %v24335_v22 }
 0x7d6   :  { %v10542_v28 = vpop.f32.mrf.mxu0  ;;  %v16805_v61 = vpop.f32.mrf.mxu1 }
 0x7d7   :  { %v11091_v49 = vadd.f32 %v16799_v36, %v10752_v24  ;;  %v10751_v33 = vadd.f32 %v10542_v28, %v24337_v1 }
 0x7d8   :  { %v16723_v53 = vpop.f32.mrf.mxu0  ;;  %v10901_v40 = vpop.f32.mrf.mxu1 }
 0x7d9   :  { %v11090_v34 = vadd.f32 %v10881_v58, %v10751_v33  ;;  %v10754_v51 = vadd.f32 %v16723_v53, %v24339_v54 }
 0x7da   :  { %v10552_v4 = vpop.f32.mrf.mxu0  ;;  %v24422_v62 = vpop.f32.mrf.mxu1 }
 0x7db   :  { %v11093_v19 = vadd.f32 %v16802_v17, %v10754_v51  ;;  %v10753_v9 = vadd.f32 %v10552_v4, %v24341_v16 }
 0x7dc   :  { %v16726_v44 = vpop.f32.mrf.mxu0  ;;  %v10911_v32 = vpop.f32.mrf.mxu1 }
 0x7dd   :  { %v11092_v20 = vadd.f32 %v10891_v45, %v10753_v9  ;;  %v10756_v22 = vadd.f32 %v16726_v44, %v24343_v13  ;;  %v24434_v13 = vld [vmem:[%s25098_s6] ss:$0 sm:$0xff] }
 0x7de   :  { %v10562_v5 = vpop.f32.mrf.mxu0  ;;  %v16811_v36 = vpop.f32.mrf.mxu1  ;;  %v11140_v9 = vadd.f32 %v24434_v13, %v11091_v49 }
 0x7df   :  { %v10755_v1 = vadd.f32 %v10562_v5, %v24345_v50  ;;  %v11095_v38 = vadd.f32 %v16805_v61, %v10756_v22  ;;  %v11139_v22 = vadd.f32 %v24434_v13, %v11090_v34  ;;  %v11141_v25 = vadd.f32 %v24434_v13, %v11092_v20 }
 0x7e0   :  { %v16729_v24 = vpop.f32.mrf.mxu0  ;;  %v10921_v58 = vpop.f32.mrf.mxu1  ;;  %v14327_v6 = vmul.f32 -1.442695, %v11140_v9 }
 0x7e1   :  { %v11094_v28 = vadd.f32 %v10901_v40, %v10755_v1  ;;  %v11142_v1 = vadd.f32 %v24434_v13, %v11093_v19  ;;  %v14326_v63 = vmul.f32 -1.442695, %v11139_v22  ;;  %v14328_v34 = vmul.f32 -1.442695, %v11141_v25 }
 0x7e2   :  { %v10572_v54 = vpop.f32.mrf.mxu0  ;;  %v16814_v33 = vpop.f32.mrf.mxu1  ;;  %17555 = vpow2.f32 %v14327_v6  ;;  %v11144_v0 = vadd.f32 %v24434_v13, %v11095_v38 }
 0x7e3   :  { %v10757_v14 = vadd.f32 %v10572_v54, %v24349_v46  ;;  %v14329_v37 = vmul.f32 -1.442695, %v11142_v1  ;;  %v11143_v39 = vadd.f32 %v24434_v13, %v11094_v28  ;;  %17557 = vpow2.f32 %v14326_v63 }
 0x7e4   :  { %v16732_v53 = vpop.f32.mrf.mxu0  ;;  %v10931_v30 = vpop.f32.mrf.mxu1  ;;  %v14331_v25 = vmul.f32 -1.442695, %v11144_v0 }
 0x7e5   :  { %v10760_v19 = vadd.f32 %v16732_v53, %v24351_v31  ;;  %v11096_v46 = vadd.f32 %v10911_v32, %v10757_v14  ;;  %17559 = vpow2.f32 %v14329_v37  ;;  %v14330_v31 = vmul.f32 -1.442695, %v11143_v39 }
 0x7e6   :  { %v10582_v17 = vpop.f32.mrf.mxu0  ;;  %v24427_v51 = vpop.f32.mrf.mxu1  ;;  %17561 = vpow2.f32 %v14328_v34 }
 0x7e7   :  { %v10759_v9 = vadd.f32 %v10582_v17, %v24353_v48  ;;  %v11145_v48 = vadd.f32 %v24434_v13, %v11096_v46  ;;  %17563 = vpow2.f32 %v14331_v25 }
 0x7e8   :  { %v16735_v16 = vpop.f32.mrf.mxu0  ;;  %v24429_v4 = vpop.f32.mrf.mxu1  ;;  %17565 = vpow2.f32 %v14330_v31 }
 0x7e9   :  { %v11098_v38 = vadd.f32 %v10921_v58, %v10759_v9  ;;  %v10762_v28 = vadd.f32 %v16735_v16, %v24355_v29 }
 0x7ea   :  { %v10592_v45 = vpop.f32.mrf.mxu0  ;;  %v24436_v61 = vpop.f32.mrf.mxu1 }
 0x7eb   :  { %v11147_v63 = vadd.f32 %v24434_v13, %v11098_v38  ;;  %v10761_v37 = vadd.f32 %v10592_v45, %v24357_v55 }
 0x7ec   :  { %v16738_v50 = vpop.f32.mrf.mxu0  ;;  %v24440_v5 = vpop.f32.mrf.mxu1 }
 0x7ed   :  { %v10764_v39 = vadd.f32 %v16738_v50, %v24359_v2  ;;  %v14334_v32 = vmul.f32 -1.442695, %v11147_v63 }
 0x7ee   :  { %v10602_v40 = vpop.f32.mrf.mxu0  ;;  %v16823_v59 = vpop.f32.mrf.mxu1 }
 0x7ef   :  { %v17556_v29 = vpop.eup %17555 }
 0x7f0   :  { %v16741_v44 = vpop.f32.mrf.mxu0  ;;  %v10961_v54 = vpop.f32.mrf.mxu1  ;;  %v11308_v55 = vadd.f32 1.0, %v17556_v29 }
 0x7f1   :  { %v17558_v58 = vpop.eup %17557  ;;  %v10766_v50 = vadd.f32 %v16741_v44, %v24363_v18 }
 0x7f2   :  { %v24443_v11 = vpop.f32.mrf.mxu0  ;;  %v17560_v17 = vpop.eup %17559  ;;  %v11307_v1 = vadd.f32 1.0, %v17558_v58 }
 0x7f3   :  { %v17562_v16 = vpop.eup %17561  ;;  %v11105_v9 = vadd.f32 %v24436_v61, %v10766_v50 }
 0x7f4   :  { %v16744_v35 = vpop.f32.mrf.mxu0  ;;  %v17564_v34 = vpop.eup %17563 }
 0x7f5   :  { %v10768_v49 = vadd.f32 %v16744_v35, %v24367_v42  ;;  %v10758_v42 = vadd.f32 %v16729_v24, %v24347_v57  ;;  %v11099_v35 = vadd.f32 %v16811_v36, %v10760_v19  ;;  %v11101_v57 = vadd.f32 %v16814_v33, %v10762_v28 }
 0x7f6   :  { %v10622_v56 = vpop.f32.mrf.mxu0  ;;  %v10763_v24 = vadd.f32 %v10602_v40, %v24361_v60  ;;  %v11103_v33 = vadd.f32 %v24427_v51, %v10764_v39  ;;  %v10765_v51 = vadd.f32 %v24443_v11, %v24365_v43  ;;  %v11309_v40 = vadd.f32 1.0, %v17562_v16 }
 0x7f7   :  { %v24452_v20 = vadd.f32 %v16823_v59, %v10768_v49  ;;  %v10767_v22 = vadd.f32 %v10622_v56, %v24369_v3  ;;  %v11097_v59 = vadd.f32 %v24422_v62, %v10758_v42  ;;  %v11148_v3 = vadd.f32 %v24434_v13, %v11099_v35 }
 0x7f8   :  { %v14332_v56 = vmul.f32 -1.442695, %v11145_v48  ;;  %v11150_v36 = vadd.f32 %v24434_v13, %v11101_v57  ;;  %v11100_v62 = vadd.f32 %v10931_v30, %v10761_v37  ;;  %v11102_v30 = vadd.f32 %v24429_v4, %v10763_v24 }
 0x7f9   :  { %v24456_v6 = vadd.f32 %v10961_v54, %v10767_v22  ;;  %v11146_v0 = vadd.f32 %v24434_v13, %v11097_v59  ;;  %v14335_v14 = vmul.f32 -1.442695, %v11148_v3  ;;  %v11310_v49 = vadd.f32 1.0, %v17560_v17  ;;  %v17566_v22 = vpop.eup %17565 }
 0x7fa   :  { %17567 = vpow2.f32 %v14332_v56  ;;  %v14337_v45 = vmul.f32 -1.442695, %v11150_v36  ;;  %v11149_v2 = vadd.f32 %v24434_v13, %v11100_v62  ;;  %v11152_v60 = vadd.f32 %v24434_v13, %v11103_v33 }
 0x7fb   :  { %v14333_v53 = vmul.f32 -1.442695, %v11146_v0  ;;  %17569 = vpow2.f32 %v14335_v14  ;;  %v11151_v18 = vadd.f32 %v24434_v13, %v11102_v30  ;;  %v11104_v44 = vadd.f32 %v24440_v5, %v10765_v51 }
 0x7fc   :  { %17571 = vpow2.f32 %v14334_v32  ;;  %v14336_v19 = vmul.f32 -1.442695, %v11149_v2  ;;  %v14339_v4 = vmul.f32 -1.442695, %v11152_v60  ;;  %v11312_v46 = vadd.f32 1.0, %v17564_v34 }
 0x7fd   :  { %17573 = vpow2.f32 %v14333_v53  ;;  %v11311_v54 = vadd.f32 1.0, %v17566_v22  ;;  %v11154_v43 = vadd.f32 %v24434_v13, %v11105_v9  ;;  %v14338_v11 = vmul.f32 -1.442695, %v11151_v18 }
 0x7fe   :  { %17575 = vrcp.f32 %v11308_v55  ;;  %v11153_v25 = vadd.f32 %v24434_v13, %v11104_v44 }
 0x7ff   :  { %17577 = vpow2.f32 %v14337_v45  ;;  %v14341_v35 = vmul.f32 -1.442695, %v11154_v43 }
 0x800   :  { %17579 = vrcp.f32 %v11307_v1  ;;  %v14340_v28 = vmul.f32 -1.442695, %v11153_v25 }
 0x801   :  { %17581 = vrcp.f32 %v11310_v49  ;;  %v24480_v49 = vpop.f32.mrf.mxu0 }
 0x802   :  { %17583 = vrcp.f32 %v11309_v40 }
 0x803   :  { %17585 = vpow2.f32 %v14336_v19  ;;  %v24482_v18 = vpop.f32.mrf.mxu0 }
 0x804   :  { %17587 = vpow2.f32 %v14339_v4 }
 0x805   :  { %17589 = vrcp.f32 %v11312_v46 }
 0x806   :  { %17591 = vrcp.f32 %v11311_v54  ;;  %v16826_v54 = vpop.f32.mrf.mxu1 }
 0x807   :  { %v17568_v42 = vpop.eup %17567  ;;  %17593 = vpow2.f32 %v14338_v11 }
 0x808   :  { %v17570_v61 = vpop.eup %17569  ;;  %v11313_v38 = vadd.f32 1.0, %v17568_v42  ;;  %17595 = vpow2.f32 %v14341_v35 }
 0x809   :  { %v17572_v31 = vpop.eup %17571  ;;  %v11316_v48 = vadd.f32 1.0, %v17570_v61  ;;  %v24484_v61 = vpop.f32.mrf.mxu0 }
 0x80a   :  { %v17574_v5 = vpop.eup %17573  ;;  %v11315_v3 = vadd.f32 1.0, %v17572_v31  ;;  %17597 = vrcp.f32 %v11313_v38 }
 0x80b   :  { %v17576_v59 = vpop.eup %17575  ;;  %v11314_v37 = vadd.f32 1.0, %v17574_v5  ;;  %17599 = vpow2.f32 %v14340_v28  ;;  %v24486_v5 = vpop.f32.mrf.mxu1 }
 0x80c   :  { %v17578_v63 = vpop.eup %17577  ;;  %v14369_v0 = vmul.f32 -1.442695, %v17576_v59  ;;  %17601 = vrcp.f32 %v11316_v48 }
 0x80d   :  { %v17580_v57 = vpop.eup %17579  ;;  %17603 = vrcp.f32 %v11315_v3  ;;  %v11318_v14 = vadd.f32 1.0, %v17578_v63  ;;  %v24488_v63 = vpop.f32.mrf.mxu0 }
 0x80e   :  { %v17582_v56 = vpop.eup %17581  ;;  %v14368_v32 = vmul.f32 -1.442695, %v17580_v57  ;;  %17605 = vrcp.f32 %v11314_v37 }
 0x80f   :  { %v17584_v39 = vpop.eup %17583  ;;  %v14371_v36 = vmul.f32 -1.442695, %v17582_v56  ;;  %17607 = vpow2.f32 %v14369_v0  ;;  %v24490_v0 = vpop.f32.mrf.mxu1 }
 0x810   :  { %v17586_v29 = vpop.eup %17585  ;;  %v14370_v24 = vmul.f32 -1.442695, %v17584_v39  ;;  %17609 = vrcp.f32 %v11318_v14 }
 0x811   :  { %v17588_v62 = vpop.eup %17587  ;;  %v11317_v53 = vadd.f32 1.0, %v17586_v29  ;;  %17611 = vpow2.f32 %v14368_v32  ;;  %v16753_v32 = vpop.f32.mrf.mxu0 }
 0x812   :  { %v17590_v58 = vpop.eup %17589  ;;  %17613 = vpow2.f32 %v14371_v36  ;;  %v11320_v55 = vadd.f32 1.0, %v17588_v62 }
 0x813   :  { %v17592_v33 = vpop.eup %17591  ;;  %17615 = vpow2.f32 %v14370_v24  ;;  %v14373_v16 = vmul.f32 -1.442695, %v17590_v58  ;;  %v24492_v58 = vpop.f32.mrf.mxu1 }
 0x814   :  { %v17594_v17 = vpop.eup %17593  ;;  %v14372_v45 = vmul.f32 -1.442695, %v17592_v33  ;;  %17617 = vrcp.f32 %v11317_v53 }
 0x815   :  { %v17596_v2 = vpop.eup %17595  ;;  %v11319_v50 = vadd.f32 1.0, %v17594_v17  ;;  %17619 = vrcp.f32 %v11320_v55  ;;  %v24494_v17 = vpop.f32.mrf.mxu0 }
 0x816   :  { %17621 = vpow2.f32 %v14373_v16  ;;  %v11322_v51 = vadd.f32 1.0, %v17596_v2 }
 0x817   :  { %v17598_v1 = vpop.eup %17597  ;;  %17623 = vpow2.f32 %v14372_v45 }
 0x818   :  { %v17600_v30 = vpop.eup %17599  ;;  %v14374_v34 = vmul.f32 -1.442695, %v17598_v1  ;;  %17625 = vrcp.f32 %v11319_v50  ;;  %v10770_v50 = vadd.f32 %v24480_v49, %v24371_v7  ;;  %v16832_v1 = vpop.f32.mrf.mxu1  ;;  %v10774_v7 = vadd.f32 %v16753_v32, %v24379_v8 }
 0x819   :  { %v17602_v60 = vpop.eup %17601  ;;  %v11321_v19 = vadd.f32 1.0, %v17600_v30  ;;  %17627 = vrcp.f32 %v11322_v51 }
 0x81a   :  { %v17604_v40 = vpop.eup %17603  ;;  %v14377_v22 = vmul.f32 -1.442695, %v17602_v60  ;;  %17629 = vpow2.f32 %v14374_v34 }
 0x81b   :  { %v17606_v9 = vpop.eup %17605  ;;  %v14376_v44 = vmul.f32 -1.442695, %v17604_v40  ;;  %17631 = vrcp.f32 %v11321_v19  ;;  %v24498_v40 = vpop.f32.mrf.mxu0 }
 0x81c   :  { %v17608_v4 = vpop.eup %17607  ;;  %v14375_v11 = vmul.f32 -1.442695, %v17606_v9  ;;  %17633 = vpow2.f32 %v14377_v22  ;;  %v11109_v22 = vadd.f32 %v16826_v54, %v10770_v50 }
 0x81d   :  { %v17610_v46 = vpop.eup %17609  ;;  %v11560_v25 = vadd.f32 1.0, %v17608_v4  ;;  %17635 = vpow2.f32 %v14376_v44  ;;  %v24500_v4 = vpop.f32.mrf.mxu1 }
 0x81e   :  { %v17612_v43 = vpop.eup %17611  ;;  %v14379_v31 = vmul.f32 -1.442695, %v17610_v46  ;;  %17637 = vpow2.f32 %v14375_v11  ;;  %v24503_v49 = vpop.f32.mrf.mxu0 }
 0x81f   :  { %v17614_v42 = vpop.eup %17613  ;;  %v11559_v28 = vadd.f32 1.0, %v17612_v43  ;;  %17639 = vrcp.f32 %v11560_v25  ;;  %v16835_v54 = vpop.f32.mrf.mxu1 }
 0x820   :  { %v17616_v35 = vpop.eup %17615  ;;  %v11562_v48 = vadd.f32 1.0, %v17614_v42  ;;  %17641 = vpow2.f32 %v14379_v31 }
 0x821   :  { %v17618_v38 = vpop.eup %17617  ;;  %v11561_v3 = vadd.f32 1.0, %v17616_v35  ;;  %17643 = vrcp.f32 %v11559_v28  ;;  %v11001_v32 = vpop.f32.mrf.mxu1 }
 0x822   :  { %v17620_v59 = vpop.eup %17619  ;;  %v14378_v37 = vmul.f32 -1.442695, %v17618_v38  ;;  %17645 = vrcp.f32 %v11562_v48  ;;  %v11158_v38 = vadd.f32 %v24434_v13, %v11109_v22 }
 0x823   :  { %v17622_v57 = vpop.eup %17621  ;;  %v14381_v14 = vmul.f32 -1.442695, %v17620_v59  ;;  %17647 = vrcp.f32 %v11561_v3  ;;  %v11113_v3 = vadd.f32 %v16832_v1, %v10774_v7  ;;  %v10773_v1 = vadd.f32 %v24494_v17, %v24381_v41 }
 0x824   :  { %v17624_v56 = vpop.eup %17623  ;;  %v11564_v29 = vadd.f32 1.0, %v17622_v57  ;;  %17649 = vpow2.f32 %v14378_v37  ;;  %v16759_v57 = vpop.f32.mrf.mxu0 }
 0x825   :  { %v17626_v39 = vpop.eup %17625  ;;  %v11563_v36 = vadd.f32 1.0, %v17624_v56  ;;  %17651 = vpow2.f32 %v14381_v14  ;;  %v10769_v56 = vadd.f32 %v24482_v18, %v24373_v27  ;;  %v14345_v14 = vmul.f32 -1.442695, %v11158_v38 }
 0x826   :  { %v17628_v62 = vpop.eup %17627  ;;  %v14380_v24 = vmul.f32 -1.442695, %v17626_v39  ;;  %17653 = vrcp.f32 %v11564_v29  ;;  %v10772_v29 = vadd.f32 %v24484_v61, %v24375_v21  ;;  %v10771_v61 = vadd.f32 %v24488_v63, %v24377_v10 }
 0x827   :  { %v17630_v53 = vpop.eup %17629  ;;  %17655 = vrcp.f32 %v11563_v36  ;;  %v14383_v16 = vmul.f32 -1.442695, %v17628_v62  ;;  %v11108_v27 = vadd.f32 %v24486_v5, %v10769_v56  ;;  %v10776_v5 = vadd.f32 %v24498_v40, %v24383_v23 }
 0x828   :  { %v17632_v33 = vpop.eup %17631  ;;  %v11565_v2 = vadd.f32 1.0, %v17630_v53  ;;  %17657 = vpow2.f32 %v14380_v24  ;;  %v11156_v24 = vadd.f32 %v24434_v13, %v24452_v20  ;;  %v11111_v21 = vadd.f32 %v24490_v0, %v10772_v29 }
 0x829   :  { %v17634_v55 = vpop.eup %17633  ;;  %v14382_v30 = vmul.f32 -1.442695, %v17632_v33  ;;  %17659 = vpow2.f32 %v14383_v16  ;;  %v11162_v33 = vadd.f32 %v24434_v13, %v11113_v3  ;;  %v11155_v10 = vadd.f32 %v24434_v13, %v24456_v6 }
 0x82a   :  { %v17636_v45 = vpop.eup %17635  ;;  %v11568_v51 = vadd.f32 1.0, %v17634_v55  ;;  %17661 = vrcp.f32 %v11565_v2  ;;  %v10672_v55 = vpop.f32.mrf.mxu0  ;;  %v14343_v20 = vmul.f32 -1.442695, %v11156_v24  ;;  %v11157_v63 = vadd.f32 %v24434_v13, %v11108_v27 }
 0x82b   :  { %v17638_v60 = vpop.eup %17637  ;;  %v11567_v19 = vadd.f32 1.0, %v17636_v45  ;;  %17663 = vpow2.f32 %v14382_v30  ;;  %v16838_v2 = vpop.f32.mrf.mxu1  ;;  %v11160_v41 = vadd.f32 %v24434_v13, %v11111_v21  ;;  %v11110_v17 = vadd.f32 %v24492_v58, %v10771_v61 }
 0x82c   :  { %v17640_v34 = vpop.eup %17639  ;;  %v11566_v46 = vadd.f32 1.0, %v17638_v60  ;;  %17665 = vrcp.f32 %v11568_v51  ;;  %v14349_v60 = vmul.f32 -1.442695, %v11162_v33  ;;  %v16762_v51 = vpop.f32.mrf.mxu0  ;;  %v11112_v23 = vadd.f32 %v24500_v4, %v10773_v1 }
 0x82d   :  { %v17642_v9 = vpop.eup %17641  ;;  %v14411_v11 = vmul.f32 -1.442695, %v17640_v34  ;;  %17667 = vrcp.f32 %v11567_v19  ;;  %v11011_v22 = vpop.f32.mrf.mxu1  ;;  %v10775_v40 = vadd.f32 %v24503_v49, %v24385_v12  ;;  %v14342_v58 = vmul.f32 -1.442695, %v11155_v10 }
 0x82e   :  { %v17644_v44 = vpop.eup %17643  ;;  %v11570_v25 = vadd.f32 1.0, %v17642_v9  ;;  %17669 = vrcp.f32 %v11566_v46  ;;  %v10682_v7 = vpop.f32.mrf.mxu0  ;;  %v14344_v4 = vmul.f32 -1.442695, %v11157_v63  ;;  %v11159_v12 = vadd.f32 %v24434_v13, %v11110_v17 }
 0x82f   :  { %v17646_v43 = vpop.eup %17645  ;;  %v14410_v31 = vmul.f32 -1.442695, %v17644_v44  ;;  %17671 = vpow2.f32 %v14411_v11  ;;  %v10778_v11 = vadd.f32 %v16759_v57, %v24387_v47  ;;  %v16841_v49 = vpop.f32.mrf.mxu1  ;;  %v10780_v38 = vadd.f32 %v16762_v51, %v24391_v26  ;;  %v26611_v51 = vld [vmem:[#allocation155_spill] sm:$0xff] }
 0x830   :  { %v17648_v42 = vpop.eup %17647  ;;  %v14413_v28 = vmul.f32 -1.442695, %v17646_v43  ;;  %17673 = vrcp.f32 %v11570_v25  ;;  %v11115_v43 = vadd.f32 %v16835_v54, %v10776_v5  ;;  %v11161_v47 = vadd.f32 %v24434_v13, %v11112_v23  ;;  %v16765_v61 = vpop.f32.mrf.mxu0 }
 0x831   :  { %v17650_v35 = vpop.eup %17649  ;;  %v14412_v59 = vmul.f32 -1.442695, %v17648_v42  ;;  %17675 = vpow2.f32 %v14410_v31  ;;  %v11114_v54 = vadd.f32 %v11001_v32, %v10775_v40  ;;  %v11117_v57 = vadd.f32 %v16838_v2, %v10778_v11 }
 0x832   :  { %v17652_v48 = vpop.eup %17651  ;;  %v11569_v8 = vadd.f32 1.0, %v17650_v35  ;;  %17677 = vpow2.f32 %v14413_v28  ;;  %v10777_v35 = vadd.f32 %v10672_v55, %v24389_v15  ;;  %v14347_v15 = vmul.f32 -1.442695, %v11160_v41  ;;  %v10692_v63 = vpop.f32.mrf.mxu0 }
 0x833   :  { %v17654_v37 = vpop.eup %17653  ;;  %v11572_v62 = vadd.f32 1.0, %v17652_v48  ;;  %17679 = vpow2.f32 %v14412_v59  ;;  %v10779_v48 = vadd.f32 %v10682_v7, %v24393_v52  ;;  %v11164_v3 = vadd.f32 %v24434_v13, %v11115_v43 }
 0x834   :  { %v17656_v39 = vpop.eup %17655  ;;  %v14415_v53 = vmul.f32 -1.442695, %v17654_v37  ;;  %17681 = vrcp.f32 %v11569_v8  ;;  %v11116_v26 = vadd.f32 %v11011_v22, %v10777_v35  ;;  %v11119_v29 = vadd.f32 %v16841_v49, %v10780_v38 }
 0x835   :  { %v17658_v36 = vpop.eup %17657  ;;  %v14414_v16 = vmul.f32 -1.442695, %v17656_v39  ;;  %17683 = vpow2.f32 %v14345_v14  ;;  %v14346_v39 = vmul.f32 -1.442695, %v11159_v12  ;;  %v11021_v14 = vpop.f32.mrf.mxu1  ;;  %v14348_v52 = vmul.f32 -1.442695, %v11161_v47 }
 0x836   :  { %v17660_v18 = vpop.eup %17659  ;;  %v11571_v45 = vadd.f32 1.0, %v17658_v36  ;;  %17685 = vrcp.f32 %v11572_v62  ;;  %v11163_v36 = vadd.f32 %v24434_v13, %v11114_v54  ;;  %v11118_v62 = vadd.f32 %v11021_v14, %v10779_v48 }
 0x837   :  { %v17662_v50 = vpop.eup %17661  ;;  %17687 = vpow2.f32 %v14415_v53  ;;  %v11574_v0 = vadd.f32 1.0, %v17660_v18  ;;  %v14351_v53 = vmul.f32 -1.442695, %v11164_v3  ;;  %v11166_v33 = vadd.f32 %v24434_v13, %v11117_v57  ;;  %v16844_v22 = vpop.f32.mrf.mxu1 }
 0x838   :  { %v17664_v30 = vpop.eup %17663  ;;  %17689 = vpow2.f32 %v14414_v16  ;;  %v14416_v9 = vmul.f32 -1.442695, %v17662_v50  ;;  %v11165_v27 = vadd.f32 %v24434_v13, %v11116_v26  ;;  %v11168_v21 = vadd.f32 %v24434_v13, %v11119_v29 }
 0x839   :  { %v17666_v34 = vpop.eup %17665  ;;  %17691 = vrcp.f32 %v11571_v45  ;;  %v11573_v44 = vadd.f32 1.0, %v17664_v30  ;;  %v14350_v50 = vmul.f32 -1.442695, %v11163_v36  ;;  %v14353_v30 = vmul.f32 -1.442695, %v11166_v33 }
 0x83a   :  { %v17668_v19 = vpop.eup %17667  ;;  %17693 = vpow2.f32 %v14343_v20  ;;  %v14419_v6 = vmul.f32 -1.442695, %v17666_v34  ;;  %v11167_v20 = vadd.f32 %v24434_v13, %v11118_v62  ;;  %v14352_v5 = vmul.f32 -1.442695, %v11165_v27 }
 0x83b   :  { %v24529_v46 = vpop.eup %17669  ;;  %17695 = vpow2.f32 %v14349_v60  ;;  %v14418_v25 = vmul.f32 -1.442695, %v17668_v19  ;;  %v10782_v34 = vadd.f32 %v16765_v61, %v26611_v51  ;;  %v14355_v10 = vmul.f32 -1.442695, %v11168_v21 }
 0x83c   :  { %v24532_v42 = vpop.eup %17671  ;;  %17697 = vrcp.f32 %v11574_v0 }
 0x83d   :  { %v17674_v31 = vpop.eup %17673  ;;  %17699 = vpow2.f32 %v14416_v9  ;;  %v14354_v9 = vmul.f32 -1.442695, %v11167_v20  ;;  %v11121_v40 = vadd.f32 %v16844_v22, %v10782_v34 }
 0x83e   :  { %v24537_v28 = vpop.eup %17675  ;;  %17701 = vrcp.f32 %v11573_v44  ;;  %v14421_v8 = vmul.f32 -1.442695, %v17674_v31 }
 0x83f   :  { %v24541_v59 = vpop.eup %17677  ;;  %17703 = vpow2.f32 %v14419_v6  ;;  %v26612_v6 = vld [vmem:[#allocation168_spill] sm:$0xff]  ;;  %v11170_v38 = vadd.f32 %v24434_v13, %v11121_v40 }
 0x840   :  { %v24544_v37 = vpop.eup %17679  ;;  %17705 = vpow2.f32 %v14418_v25  ;;  %v10781_v43 = vadd.f32 %v10692_v63, %v26612_v6 }
 0x841   :  { %v17682_v56 = vpop.eup %17681  ;;  %17707 = vpow2.f32 %v14342_v58 }
 0x842   :  { %v17684_v32 = vpop.eup %17683  ;;  %17709 = vpow2.f32 %v14344_v4  ;;  %v14420_v16 = vmul.f32 -1.442695, %v17682_v56  ;;  %v11031_v4 = vpop.f32.mrf.mxu1  ;;  %v14357_v56 = vmul.f32 -1.442695, %v11170_v38 }
 0x843   :  { %v17686_v24 = vpop.eup %17685  ;;  %17711 = vpow2.f32 %v14347_v15  ;;  %v11326_v45 = vadd.f32 1.0, %v17684_v32  ;;  %v11120_v47 = vadd.f32 %v11031_v4, %v10781_v43 }
 0x844   :  { %v17688_v55 = vpop.eup %17687  ;;  %17713 = vpow2.f32 %v14421_v8  ;;  %v14423_v23 = vmul.f32 -1.442695, %v17686_v24 }
 0x845   :  { %v24549_v18 = vpop.eup %17689  ;;  %17715 = vpow2.f32 %v14346_v39  ;;  %v11816_v7 = vadd.f32 1.0, %v17688_v55  ;;  %v11169_v39 = vadd.f32 %v24434_v13, %v11120_v47 }
 0x846   :  { %v17692_v2 = vpop.eup %17691  ;;  %17717 = vpow2.f32 %v14348_v52 }
 0x847   :  { %v17694_v1 = vpop.eup %17693  ;;  %17719 = vpow2.f32 %v14351_v53  ;;  %v14422_v58 = vmul.f32 -1.442695, %v17692_v2  ;;  %v14356_v53 = vmul.f32 -1.442695, %v11169_v39 }
 0x848   :  { %v17696_v60 = vpop.eup %17695  ;;  %17721 = vpow2.f32 %v14420_v16  ;;  %v11324_v31 = vadd.f32 1.0, %v17694_v1 }
 0x849   :  { %v24554_v0 = vpop.eup %17697  ;;  %17723 = vrcp.f32 %v11326_v45  ;;  %v11330_v17 = vadd.f32 1.0, %v17696_v60 }
 0x84a   :  { %v17700_v19 = vpop.eup %17699  ;;  %17725 = vpow2.f32 %v14350_v50 }
 0x84b   :  { %v24556_v41 = vpop.eup %17701  ;;  %17727 = vpow2.f32 %v14353_v30  ;;  %v11817_v49 = vadd.f32 1.0, %v17700_v19 }
 0x84c   :  { %v24558_v44 = vpop.eup %17703  ;;  %17729 = vpow2.f32 %v14352_v5  ;;  %v24573_v5 = vpop.f32.mrf.mxu0  ;;  %v14424_v34 = vmul.f32 -1.442695, %v24556_v41 }
 0x84d   :  { %v24561_v11 = vpop.eup %17705  ;;  %17731 = vpow2.f32 %v14355_v10  ;;  %v11820_v63 = vadd.f32 1.0, %v24558_v44 }
 0x84e   :  { %v17708_v25 = vpop.eup %17707  ;;  %17733 = vpow2.f32 %v14354_v9  ;;  %v11819_v9 = vadd.f32 1.0, %v24561_v11 }
 0x84f   :  { %v17710_v35 = vpop.eup %17709  ;;  %17735 = vrcp.f32 %v11330_v17  ;;  %v11323_v48 = vadd.f32 1.0, %v17708_v25 }
 0x850   :  { %v17712_v12 = vpop.eup %17711  ;;  %17737 = vpow2.f32 %v14423_v23  ;;  %v11325_v3 = vadd.f32 1.0, %v17710_v35  ;;  %v24580_v23 = vpop.f32.mrf.mxu0 }
 0x851   :  { %v17714_v54 = vpop.eup %17713  ;;  %17739 = vrcp.f32 %v11816_v7  ;;  %v11328_v8 = vadd.f32 1.0, %v17712_v12  ;;  %v24582_v7 = vpop.f32.mrf.mxu1 }
 0x852   :  { %v17716_v15 = vpop.eup %17715  ;;  %17741 = vpow2.f32 %v14422_v58  ;;  %v11822_v22 = vadd.f32 1.0, %v17714_v54  ;;  %v24584_v35 = vpop.f32.mrf.mxu0 }
 0x853   :  { %v17718_v57 = vpop.eup %17717  ;;  %17743 = vrcp.f32 %v11324_v31  ;;  %v11327_v29 = vadd.f32 1.0, %v17716_v15  ;;  %v24586_v38 = vpop.f32.mrf.mxu1 }
 0x854   :  { %v17720_v26 = vpop.eup %17719  ;;  %17745 = vrcp.f32 %v11817_v49  ;;  %v11329_v52 = vadd.f32 1.0, %v17718_v57 }
 0x855   :  { %v24565_v14 = vpop.eup %17721  ;;  %17747 = vrcp.f32 %v11323_v48  ;;  %v11332_v62 = vadd.f32 1.0, %v17720_v26  ;;  %v24590_v39 = vpop.f32.mrf.mxu1 }
 0x856   :  { %v17724_v32 = vpop.eup %17723  ;;  %17749 = vrcp.f32 %v11325_v3  ;;  %v24588_v3 = vpop.f32.mrf.mxu0 }
 0x857   :  { %v17726_v36 = vpop.eup %17725  ;;  %17751 = vrcp.f32 %v11328_v8  ;;  %v14387_v55 = vmul.f32 -1.442695, %v17724_v32 }
 0x858   :  { %v17728_v24 = vpop.eup %17727  ;;  %17753 = vpow2.f32 %v14357_v56  ;;  %v11331_v27 = vadd.f32 1.0, %v17726_v36 }
 0x859   :  { %v17730_v33 = vpop.eup %17729  ;;  %17755 = vrcp.f32 %v11327_v29  ;;  %v11334_v45 = vadd.f32 1.0, %v17728_v24 }
 0x85a   :  { %v17732_v16 = vpop.eup %17731  ;;  %17757 = vrcp.f32 %v11329_v52  ;;  %v11333_v61 = vadd.f32 1.0, %v17730_v33 }
 0x85b   :  { %v17734_v13 = vpop.eup %17733  ;;  %17759 = vrcp.f32 %v11332_v62  ;;  %v11336_v50 = vadd.f32 1.0, %v17732_v16  ;;  %v16774_v62 = vpop.f32.mrf.mxu0 }
 0x85c   :  { %v17736_v21 = vpop.eup %17735  ;;  %17761 = vpow2.f32 %v14356_v53  ;;  %v11335_v1 = vadd.f32 1.0, %v17734_v13  ;;  %v24592_v16 = vpop.f32.mrf.mxu1 }
 0x85d   :  { %v24567_v2 = vpop.eup %17737  ;;  %17763 = vpow2.f32 %v14387_v55  ;;  %v14391_v60 = vmul.f32 -1.442695, %v17736_v21 }
 0x85e   :  { %v24569_v20 = vpop.eup %17739  ;;  %17765 = vrcp.f32 %v11331_v27 }
 0x85f   :  { %v24571_v30 = vpop.eup %17741  ;;  %17767 = vrcp.f32 %v11334_v45 }
 0x860   :  { %v17744_v51 = vpop.eup %17743  ;;  %17769 = vrcp.f32 %v11333_v61  ;;  %v10722_v61 = vpop.f32.mrf.mxu0 }
 0x861   :  { %v24576_v10 = vpop.eup %17745  ;;  %17771 = vrcp.f32 %v11336_v50  ;;  %v14385_v6 = vmul.f32 -1.442695, %v17744_v51  ;;  %v11824_v51 = vadd.f32 1.0, %v24567_v2 }
 0x862   :  { %v17748_v19 = vpop.eup %17747  ;;  %17773 = vrcp.f32 %v11335_v1  ;;  %v11821_v1 = vadd.f32 1.0, %v24565_v14 }
 0x863   :  { %v17750_v17 = vpop.eup %17749  ;;  %17775 = vpow2.f32 %v14391_v60  ;;  %v14384_v41 = vmul.f32 -1.442695, %v17748_v19  ;;  %v11823_v19 = vadd.f32 1.0, %v24571_v30 }
 0x864   :  { %v17752_v40 = vpop.eup %17751  ;;  %17777 = vpow2.f32 %v14424_v34  ;;  %v14386_v44 = vmul.f32 -1.442695, %v17750_v17  ;;  %v16853_v34 = vpop.f32.mrf.mxu1 }
 0x865   :  { %v17754_v43 = vpop.eup %17753  ;;  %17779 = vrcp.f32 %v11820_v63  ;;  %v14389_v11 = vmul.f32 -1.442695, %v17752_v40 }
 0x866   :  { %v17756_v25 = vpop.eup %17755  ;;  %17781 = vrcp.f32 %v11819_v9  ;;  %v11338_v4 = vadd.f32 1.0, %v17754_v43 }
 0x867   :  { %v17758_v58 = vpop.eup %17757  ;;  %17783 = vrcp.f32 %v11822_v22  ;;  %v14388_v49 = vmul.f32 -1.442695, %v17756_v25  ;;  %v16777_v22 = vpop.f32.mrf.mxu0 }
 0x868   :  { %v17760_v31 = vpop.eup %17759  ;;  %17785 = vpow2.f32 %v14385_v6  ;;  %v14390_v54 = vmul.f32 -1.442695, %v17758_v58 }
 0x869   :  { %v17762_v12 = vpop.eup %17761  ;;  %17787 = vpow2.f32 %v14384_v41  ;;  %v14393_v15 = vmul.f32 -1.442695, %v17760_v31  ;;  %v11061_v41 = vpop.f32.mrf.mxu1 }
 0x86a   :  { %v17764_v47 = vpop.eup %17763  ;;  %17789 = vpow2.f32 %v14386_v44  ;;  %v11337_v8 = vadd.f32 1.0, %v17762_v12 }
 0x86b   :  { %v17766_v48 = vpop.eup %17765  ;;  %17791 = vpow2.f32 %v14389_v11  ;;  %v11578_v56 = vadd.f32 1.0, %v17764_v47  ;;  %v10732_v11 = vpop.f32.mrf.mxu0 }
 0x86c   :  { %v17768_v57 = vpop.eup %17767  ;;  %17793 = vrcp.f32 %v11338_v4  ;;  %v14392_v32 = vmul.f32 -1.442695, %v17766_v48  ;;  %v26613_v4 = vld [vmem:[#allocation312_spill] sm:$0xff]  ;;  %v26614_v48 = vld [vmem:[#allocation161_spill] sm:$0xff] }
 0x86d   :  { %v17770_v26 = vpop.eup %17769  ;;  %17795 = vpow2.f32 %v14388_v49  ;;  %v14395_v36 = vmul.f32 -1.442695, %v17768_v57  ;;  %v10787_v12 = vadd.f32 %v10722_v61, %v26613_v4  ;;  %v26619_v61 = vld [vmem:[#allocation172_spill] sm:$0xff] }
 0x86e   :  { %v17772_v29 = vpop.eup %17771  ;;  %17797 = vpow2.f32 %v14390_v54  ;;  %v14394_v53 = vmul.f32 -1.442695, %v17770_v26  ;;  %v16856_v54 = vpop.f32.mrf.mxu1  ;;  %v26615_v26 = vld [vmem:[#allocation55_spill] sm:$0xff] }
 0x86f   :  { %v17774_v52 = vpop.eup %17773  ;;  %17799 = vpow2.f32 %v14393_v15  ;;  %v14397_v55 = vmul.f32 -1.442695, %v17772_v29  ;;  %v10788_v15 = vadd.f32 %v16774_v62, %v26614_v48  ;;  %v26616_v29 = vld [vmem:[#allocation176_spill] sm:$0xff]  ;;  %v26622_v48 = vld [vmem:[#allocation201_spill] sm:$0xff] }
 0x870   :  { %v17776_v24 = vpop.eup %17775  ;;  %17801 = vrcp.f32 %v11337_v8  ;;  %v14396_v13 = vmul.f32 -1.442695, %v17774_v52 }
 0x871   :  { %v17778_v33 = vpop.eup %17777  ;;  %17803 = vrcp.f32 %v11578_v56  ;;  %v11582_v21 = vadd.f32 1.0, %v17776_v24  ;;  %v10783_v56 = vadd.f32 %v24580_v23, %v26615_v26  ;;  %v26617_v24 = vld [vmem:[#allocation194_spill] sm:$0xff] }
 0x872   :  { %v24594_v27 = vpop.eup %17779  ;;  %17805 = vpow2.f32 %v14392_v32  ;;  %v11825_v17 = vadd.f32 1.0, %v17778_v33  ;;  %v10790_v32 = vadd.f32 %v16777_v22, %v26616_v29  ;;  %v26618_v33 = vld [vmem:[#allocation196_spill] sm:$0xff] }
 0x873   :  { %v24596_v45 = vpop.eup %17781  ;;  %17807 = vpow2.f32 %v14395_v36 }
 0x874   :  { %v24598_v50 = vpop.eup %17783  ;;  %17809 = vpow2.f32 %v14394_v53  ;;  %v10784_v53 = vadd.f32 %v24573_v5, %v26617_v24 }
 0x875   :  { %v17786_v60 = vpop.eup %17785  ;;  %17811 = vpow2.f32 %v14397_v55  ;;  %v10789_v55 = vadd.f32 %v10732_v11, %v26618_v33 }
 0x876   :  { %v17788_v63 = vpop.eup %17787  ;;  %17813 = vpow2.f32 %v14396_v13  ;;  %v11576_v6 = vadd.f32 1.0, %v17786_v60  ;;  %v16780_v13 = vpop.f32.mrf.mxu0  ;;  %v11126_v60 = vadd.f32 %v11061_v41, %v10787_v12 }
 0x877   :  { %v17790_v9 = vpop.eup %17789  ;;  %17815 = vrcp.f32 %v11582_v21  ;;  %v11575_v14 = vadd.f32 1.0, %v17788_v63  ;;  %v26620_v63 = vld [vmem:[#allocation191_spill] sm:$0xff] }
 0x878   :  { %v17792_v40 = vpop.eup %17791  ;;  %17817 = vrcp.f32 %v11821_v1  ;;  %v11577_v2 = vadd.f32 1.0, %v17790_v9  ;;  %v10785_v1 = vadd.f32 %v24588_v3, %v26619_v61  ;;  %v11127_v9 = vadd.f32 %v16853_v34, %v10788_v15  ;;  %v26621_v3 = vld [vmem:[#allocation14_spill] sm:$0xff]  ;;  %v18073_v34 = vld [vmem:[%s25098_s6] ss:$0 sm:$0xff]  ;;  %s18097_s6 = smov 127  }
 0x879   :  { %v17794_v43 = vpop.eup %17793  ;;  %17819 = vrcp.f32 %v11824_v51  ;;  %v11580_v58 = vadd.f32 1.0, %v17792_v40  ;;  %v11122_v40 = vadd.f32 %v24586_v38, %v10783_v56  ;;  %v10792_v41 = vadd.f32 %v16780_v13, %v26621_v3 }
 0x87a   :  { %v17796_v25 = vpop.eup %17795  ;;  %17821 = vrcp.f32 %v11823_v19  ;;  %v14399_v31 = vmul.f32 -1.442695, %v17794_v43  ;;  %v10786_v19 = vadd.f32 %v24584_v35, %v26620_v63  ;;  %v11124_v35 = vadd.f32 %v24592_v16, %v10785_v1 }
 0x87b   :  { %v17798_v44 = vpop.eup %17797  ;;  %17823 = vrcp.f32 %v11825_v17  ;;  %v11579_v47 = vadd.f32 1.0, %v17796_v25  ;;  %v11071_v17 = vpop.f32.mrf.mxu1  ;;  %v11175_v11 = vadd.f32 %v18073_v34, %v11126_v60  ;;  %v11176_v4 = vadd.f32 %v18073_v34, %v11127_v9 }
 0x87c   :  { %v17800_v30 = vpop.eup %17799  ;;  %17825 = vrcp.f32 %v11576_v6  ;;  %v11581_v8 = vadd.f32 1.0, %v17798_v44  ;;  %v11129_v6 = vadd.f32 %v16856_v54, %v10790_v32  ;;  %v11128_v25 = vadd.f32 %v11071_v17, %v10789_v55 }
 0x87d   :  { %v17802_v49 = vpop.eup %17801  ;;  %17827 = vrcp.f32 %v11575_v14  ;;  %v11584_v36 = vadd.f32 1.0, %v17800_v30  ;;  %v16859_v12 = vpop.f32.mrf.mxu1  ;;  %v11173_v29 = vadd.f32 %v18073_v34, %v11124_v35  ;;  %v14363_v24 = vmul.f32 -1.442695, %v11176_v4 }
 0x87e   :  { %v17804_v57 = vpop.eup %17803  ;;  %17829 = vrcp.f32 %v11577_v2  ;;  %v14398_v62 = vmul.f32 -1.442695, %v17802_v49  ;;  %v10742_v2 = vpop.f32.mrf.mxu0  ;;  %v11178_v54 = vadd.f32 %v18073_v34, %v11129_v6  ;;  %v11131_v26 = vadd.f32 %v16859_v12, %v10792_v41 }
 0x87f   :  { %v17806_v52 = vpop.eup %17805  ;;  %17831 = vrcp.f32 %v11580_v58  ;;  %v14429_v23 = vmul.f32 -1.442695, %v17804_v57  ;;  %v10791_v16 = vadd.f32 %v10742_v2, %v26622_v48  ;;  %v11081_v33 = vpop.f32.mrf.mxu1  ;;  %v11171_v13 = vadd.f32 %v18073_v34, %v11122_v40 }
 0x880   :  { %v17808_v21 = vpop.eup %17807  ;;  %17833 = vpow2.f32 %v14399_v31  ;;  %v11583_v5 = vadd.f32 1.0, %v17806_v52  ;;  %v11125_v31 = vadd.f32 %v24590_v39, %v10786_v19  ;;  %v14362_v39 = vmul.f32 -1.442695, %v11175_v11 }
 0x881   :  { %v17810_v51 = vpop.eup %17809  ;;  %17835 = vrcp.f32 %v11579_v47  ;;  %v11586_v14 = vadd.f32 1.0, %v17808_v21  ;;  %v11123_v52 = vadd.f32 %v24582_v7, %v10784_v53  ;;  %v14365_v21 = vmul.f32 -1.442695, %v11178_v54 }
 0x882   :  { %v17812_v22 = vpop.eup %17811  ;;  %17837 = vrcp.f32 %v11581_v8  ;;  %v11585_v58 = vadd.f32 1.0, %v17810_v51  ;;  %v11177_v8 = vadd.f32 %v18073_v34, %v11128_v25  ;;  %v11180_v60 = vadd.f32 %v18073_v34, %v11131_v26 }
 0x883   :  { %v17814_v43 = vpop.eup %17813  ;;  %17839 = vrcp.f32 %v11584_v36  ;;  %v11588_v38 = vadd.f32 1.0, %v17812_v22  ;;  %v11174_v36 = vadd.f32 %v18073_v34, %v11125_v31  ;;  %v11172_v7 = vadd.f32 %v18073_v34, %v11123_v52 }
 0x884   :  { %v17816_v44 = vpop.eup %17815  ;;  %17841 = vpow2.f32 %v14398_v62  ;;  %v11587_v47 = vadd.f32 1.0, %v17814_v43  ;;  %v11130_v62 = vadd.f32 %v11081_v33, %v10791_v16  ;;  %v14364_v1 = vmul.f32 -1.442695, %v11177_v8 }
 0x885   :  { %v24621_v30 = vpop.eup %17817  ;;  %17843 = vpow2.f32 %v14429_v23  ;;  %v14433_v57 = vmul.f32 -1.442695, %v17816_v44  ;;  %v14360_v23 = vmul.f32 -1.442695, %v11173_v29  ;;  %v14361_v53 = vmul.f32 -1.442695, %v11174_v36 }
 0x886   :  { %v24624_v49 = vpop.eup %17819  ;;  %17845 = vrcp.f32 %v11583_v5  ;;  %v14358_v9 = vmul.f32 -1.442695, %v11171_v13  ;;  %v11179_v17 = vadd.f32 %v18073_v34, %v11130_v62  ;;  %v14367_v5 = vmul.f32 -1.442695, %v11180_v60 }
 0x887   :  { %v24627_v15 = vpop.eup %17821  ;;  %17847 = vrcp.f32 %v11586_v14  ;;  %v14359_v14 = vmul.f32 -1.442695, %v11172_v7 }
 0x888   :  { %v24629_v56 = vpop.eup %17823  ;;  %17849 = vrcp.f32 %v11585_v58  ;;  %v14366_v3 = vmul.f32 -1.442695, %v11179_v17  ;;  %v14417_v58 = vmul.f32 -1.442695, %v24529_v46 }
 0x889   :  { %v24631_v32 = vpop.eup %17825  ;;  %17851 = vrcp.f32 %v11588_v38  ;;  %v14425_v38 = vmul.f32 -1.442695, %v24554_v0 }
 0x88a   :  { %v24634_v55 = vpop.eup %17827  ;;  %17853 = vrcp.f32 %v11587_v47 }
 0x88b   :  { %v24636_v61 = vpop.eup %17829  ;;  %17855 = vpow2.f32 %v14433_v57 }
 0x88c   :  { %v24638_v51 = vpop.eup %17831  ;;  %17857 = vpow2.f32 %v14362_v39 }
 0x88d   :  { %v17834_v63 = vpop.eup %17833  ;;  %17859 = vpow2.f32 %v14363_v24 }
 0x88e   :  { %v24640_v19 = vpop.eup %17835  ;;  %17861 = vpow2.f32 %v14365_v21  ;;  %v11590_v6 = vadd.f32 1.0, %v17834_v63 }
 0x88f   :  { %v24642_v22 = vpop.eup %17837  ;;  %17863 = vpow2.f32 %v14364_v1 }
 0x890   :  { %v17840_v40 = vpop.eup %17839  ;;  %17865 = vpow2.f32 %v14360_v23 }
 0x891   :  { %v17842_v43 = vpop.eup %17841  ;;  %17867 = vpow2.f32 %v14361_v53  ;;  %v14435_v2 = vmul.f32 -1.442695, %v17840_v40 }
 0x892   :  { %v24644_v25 = vpop.eup %17843  ;;  %17869 = vpow2.f32 %v14358_v9  ;;  %v11589_v34 = vadd.f32 1.0, %v17842_v43 }
 0x893   :  { %v17846_v41 = vpop.eup %17845  ;;  %17871 = vpow2.f32 %v14367_v5 }
 0x894   :  { %v17848_v44 = vpop.eup %17847  ;;  %17873 = vrcp.f32 %v11590_v6  ;;  %v14434_v4 = vmul.f32 -1.442695, %v17846_v41 }
 0x895   :  { %v17850_v35 = vpop.eup %17849  ;;  %17875 = vpow2.f32 %v14359_v14  ;;  %v14437_v47 = vmul.f32 -1.442695, %v17848_v44 }
 0x896   :  { %v17852_v11 = vpop.eup %17851  ;;  %17877 = vpow2.f32 %v14366_v3  ;;  %v14436_v48 = vmul.f32 -1.442695, %v17850_v35 }
 0x897   :  { %v17854_v31 = vpop.eup %17853  ;;  %17879 = vpow2.f32 %v14435_v2  ;;  %v14439_v36 = vmul.f32 -1.442695, %v17852_v11 }
 0x898   :  { %v17856_v12 = vpop.eup %17855  ;;  %17881 = vpow2.f32 %v14417_v58  ;;  %v14438_v43 = vmul.f32 -1.442695, %v17854_v31 }
 0x899   :  { %v17858_v54 = vpop.eup %17857  ;;  %17883 = vrcp.f32 %v11589_v34  ;;  %v11834_v3 = vadd.f32 1.0, %v17856_v12 }
 0x89a   :  { %v17860_v16 = vpop.eup %17859  ;;  %17885 = vpow2.f32 %v14425_v38  ;;  %v11343_v8 = vadd.f32 1.0, %v17858_v54 }
 0x89b   :  { %v17862_v57 = vpop.eup %17861  ;;  %17887 = vpow2.f32 %v14434_v4  ;;  %v11344_v0 = vadd.f32 1.0, %v17860_v16 }
 0x89c   :  { %v17864_v46 = vpop.eup %17863  ;;  %17889 = vpow2.f32 %v14437_v47  ;;  %v11346_v26 = vadd.f32 1.0, %v17862_v57 }
 0x89d   :  { %v17866_v29 = vpop.eup %17865  ;;  %17891 = vpow2.f32 %v14436_v48  ;;  %v11345_v39 = vadd.f32 1.0, %v17864_v46 }
 0x89e   :  { %v17868_v52 = vpop.eup %17867  ;;  %17893 = vrcp.f32 %v11346_v26  ;;  %v11341_v13 = vadd.f32 1.0, %v17866_v29 }
 0x89f   :  { %v17870_v24 = vpop.eup %17869  ;;  %17895 = vrcp.f32 %v11345_v39  ;;  %v11342_v62 = vadd.f32 1.0, %v17868_v52  ;;  %v14432_v39 = vmul.f32 -1.442695, %v24642_v22  ;;  %v14431_v22 = vmul.f32 -1.442695, %v24638_v51 }
 0x8a0   :  { %v17872_v33 = vpop.eup %17871  ;;  %17897 = vrcp.f32 %v11343_v8  ;;  %v11339_v63 = vadd.f32 1.0, %v17870_v24  ;;  %v14430_v51 = vmul.f32 -1.442695, %v24640_v19 }
 0x8a1   :  { %v17874_v21 = vpop.eup %17873  ;;  %17899 = vrcp.f32 %v11344_v0  ;;  %v11348_v1 = vadd.f32 1.0, %v17872_v33 }
 0x8a2   :  { %v17876_v60 = vpop.eup %17875  ;;  %17901 = vpow2.f32 %v14439_v36  ;;  %v14441_v44 = vmul.f32 -1.442695, %v17874_v21 }
 0x8a3   :  { %v17878_v23 = vpop.eup %17877  ;;  %17903 = vrcp.f32 %v11348_v1  ;;  %v11340_v17 = vadd.f32 1.0, %v17876_v60 }
 0x8a4   :  { %v17880_v7 = vpop.eup %17879  ;;  %17905 = vrcp.f32 %v11341_v13  ;;  %v11347_v53 = vadd.f32 1.0, %v17878_v23 }
 0x8a5   :  { %v17882_v9 = vpop.eup %17881  ;;  %17907 = vrcp.f32 %v11342_v62  ;;  %v11836_v11 = vadd.f32 1.0, %v17880_v7 }
 0x8a6   :  { %v17884_v5 = vpop.eup %17883  ;;  %17909 = vrcp.f32 %v11347_v53  ;;  %v11818_v40 = vadd.f32 1.0, %v17882_v9 }
 0x8a7   :  { %v17886_v6 = vpop.eup %17885  ;;  %17911 = vrcp.f32 %v11339_v63  ;;  %v14440_v35 = vmul.f32 -1.442695, %v17884_v5 }
 0x8a8   :  { %v17888_v14 = vpop.eup %17887  ;;  %17913 = vrcp.f32 %v11818_v40  ;;  %v11826_v41 = vadd.f32 1.0, %v17886_v6 }
 0x8a9   :  { %v17890_v2 = vpop.eup %17889  ;;  %17915 = vrcp.f32 %v11340_v17  ;;  %v11835_v48 = vadd.f32 1.0, %v17888_v14 }
 0x8aa   :  { %v17892_v58 = vpop.eup %17891  ;;  %17917 = vrcp.f32 %v11826_v41  ;;  %v11838_v13 = vadd.f32 1.0, %v17890_v2 }
 0x8ab   :  { %v17894_v34 = vpop.eup %17893  ;;  %17919 = vpow2.f32 %v14438_v43  ;;  %v11837_v7 = vadd.f32 1.0, %v17892_v58 }
 0x8ac   :  { %v17896_v38 = vpop.eup %17895  ;;  %17921 = vrcp.f32 %v11834_v3  ;;  %v14407_v47 = vmul.f32 -1.442695, %v17894_v34 }
 0x8ad   :  { %v17898_v4 = vpop.eup %17897  ;;  %17923 = vpow2.f32 %v14441_v44  ;;  %v14406_v31 = vmul.f32 -1.442695, %v17896_v38  ;;  %v14428_v38 = vmul.f32 -1.442695, %v24636_v61  ;;  %v14427_v61 = vmul.f32 -1.442695, %v24631_v32 }
 0x8ae   :  { %v17900_v54 = vpop.eup %17899  ;;  %17925 = vpow2.f32 %v14440_v35  ;;  %v14404_v57 = vmul.f32 -1.442695, %v17898_v4  ;;  %v14426_v32 = vmul.f32 -1.442695, %v24634_v55  ;;  %v11815_v55 = vadd.f32 1.0, %v24549_v18 }
 0x8af   :  { %v17902_v12 = vpop.eup %17901  ;;  %17927 = vrcp.f32 %v11836_v11  ;;  %v14405_v8 = vmul.f32 -1.442695, %v17900_v54 }
 0x8b0   :  { %v17904_v16 = vpop.eup %17903  ;;  %17929 = vpow2.f32 %v14406_v31  ;;  %v11840_v40 = vadd.f32 1.0, %v17902_v12 }
 0x8b1   :  { %v17906_v46 = vpop.eup %17905  ;;  %17931 = vpow2.f32 %v14407_v47  ;;  %v14409_v26 = vmul.f32 -1.442695, %v17904_v16 }
 0x8b2   :  { %v17908_v29 = vpop.eup %17907  ;;  %17933 = vrcp.f32 %v11835_v48  ;;  %v14402_v36 = vmul.f32 -1.442695, %v17906_v46 }
 0x8b3   :  { %v17910_v0 = vpop.eup %17909  ;;  %17935 = vpow2.f32 %v14409_v26  ;;  %v14403_v62 = vmul.f32 -1.442695, %v17908_v29 }
 0x8b4   :  { %v17912_v52 = vpop.eup %17911  ;;  %17937 = vpow2.f32 %v14404_v57  ;;  %v14408_v24 = vmul.f32 -1.442695, %v17910_v0 }
 0x8b5   :  { %v24649_v33 = vpop.eup %17913  ;;  %17939 = vpow2.f32 %v14405_v8  ;;  %v14400_v23 = vmul.f32 -1.442695, %v17912_v52 }
 0x8b6   :  { %v17916_v21 = vpop.eup %17915  ;;  %17941 = vpow2.f32 %v14408_v24  ;;  %12006 = vrot.lane.b32.xlu1 %v24649_v33, %s18097_s6 }
 0x8b7   :  { %v24653_v1 = vpop.eup %17917  ;;  %17943 = vpow2.f32 %v14432_v39  ;;  %v14401_v9 = vmul.f32 -1.442695, %v17916_v21 }
 0x8b8   :  { %v17920_v60 = vpop.eup %17919  ;;  %17945 = vpow2.f32 %v14402_v36  ;;  %12022 = vrot.lane.b32.xlu0 %v24653_v1, %s18097_s6 }
 0x8b9   :  { %v24658_v63 = vpop.eup %17921  ;;  %17947 = vrcp.f32 %v11838_v13  ;;  %v11839_v43 = vadd.f32 1.0, %v17920_v60 }
 0x8ba   :  { %v17924_v53 = vpop.eup %17923  ;;  %17949 = vpow2.f32 %v14403_v62  ;;  %12010 = vrot.lane.b32.xlu1 %v24594_v27, %s18097_s6 }
 0x8bb   :  { %v17926_v17 = vpop.eup %17925  ;;  %17951 = vpow2.f32 %v14431_v22  ;;  %v11842_v48 = vadd.f32 1.0, %v17924_v53 }
 0x8bc   :  { %v24663_v5 = vpop.eup %17927  ;;  %17953 = vpow2.f32 %v14400_v23  ;;  %12038 = vrot.lane.b32.xlu0 %v24658_v63, %s18097_s6  ;;  %v11841_v3 = vadd.f32 1.0, %v17926_v17 }
 0x8bd   :  { %v17930_v6 = vpop.eup %17929  ;;  %17955 = vrcp.f32 %v11837_v7 }
 0x8be   :  { %v17932_v14 = vpop.eup %17931  ;;  %17957 = vpow2.f32 %v14401_v9  ;;  %12008 = vrot.lane.b32.xlu1 %v24596_v45, %s18097_s6  ;;  %v11597_v2 = vadd.f32 1.0, %v17930_v6 }
 0x8bf   :  { %v24669_v41 = vpop.eup %17933  ;;  %17959 = vpow2.f32 %v14430_v51  ;;  %v11598_v58 = vadd.f32 1.0, %v17932_v14 }
 0x8c0   :  { %v17936_v19 = vpop.eup %17935  ;;  %17961 = vrcp.f32 %v11840_v40  ;;  %12042 = vrot.lane.b32.xlu0 %v24663_v5, %s18097_s6  ;;  %v11814_v40 = vadd.f32 1.0, %v24541_v59 }
 0x8c1   :  { %v17938_v44 = vpop.eup %17937  ;;  %17963 = vrcp.f32 %v11839_v43  ;;  %v11600_v35 = vadd.f32 1.0, %v17936_v19 }
 0x8c2   :  { %v17940_v34 = vpop.eup %17939  ;;  %17965 = vrcp.f32 %v11841_v3  ;;  %12014 = vrot.lane.b32.xlu1 %v24598_v50, %s18097_s6  ;;  %v11595_v47 = vadd.f32 1.0, %v17938_v44  ;;  %v11830_v3 = vadd.f32 1.0, %v24644_v25  ;;  %v11813_v44 = vadd.f32 1.0, %v24544_v37 }
 0x8c3   :  { %v17942_v11 = vpop.eup %17941  ;;  %17967 = vrcp.f32 %v11600_v35  ;;  %v11596_v16 = vadd.f32 1.0, %v17940_v34 }
 0x8c4   :  { %v17944_v4 = vpop.eup %17943  ;;  %17969 = vrcp.f32 %v11597_v2  ;;  %v11599_v31 = vadd.f32 1.0, %v17942_v11  ;;  %12040 = vrot.lane.b32.xlu0 %v24669_v41, %s18097_s6 }
 0x8c5   :  { %v17946_v54 = vpop.eup %17945  ;;  %17971 = vrcp.f32 %v11598_v58  ;;  %v11833_v29 = vadd.f32 1.0, %v17944_v4 }
 0x8c6   :  { %v24678_v12 = vpop.eup %17947  ;;  %17973 = vrcp.f32 %v11599_v31  ;;  %12012 = vrot.lane.b32.xlu1 %v24621_v30, %s18097_s6  ;;  %v11593_v8 = vadd.f32 1.0, %v17946_v54 }
 0x8c7   :  { %v17950_v57 = vpop.eup %17949  ;;  %17975 = vpow2.f32 %v14428_v38 }
 0x8c8   :  { %v17952_v46 = vpop.eup %17951  ;;  %17977 = vrcp.f32 %v11595_v47  ;;  %12046 = vrot.lane.b32.xlu0 %v24678_v12, %s18097_s6  ;;  %v11594_v39 = vadd.f32 1.0, %v17950_v57  ;;  %v11812_v47 = vadd.f32 1.0, %v24532_v42  ;;  %v11811_v42 = vadd.f32 1.0, %v24537_v28 }
 0x8c9   :  { %v17954_v26 = vpop.eup %17953  ;;  %17979 = vrcp.f32 %v11842_v48  ;;  %v11832_v21 = vadd.f32 1.0, %v17952_v46 }
 0x8ca   :  { %v24685_v0 = vpop.eup %17955  ;;  %17981 = vrcp.f32 %v11596_v16  ;;  %12018 = vrot.lane.b32.xlu1 %v24624_v49, %s18097_s6  ;;  %v11591_v24 = vadd.f32 1.0, %v17954_v26 }
 0x8cb   :  { %v17958_v52 = vpop.eup %17957  ;;  %17983 = vpow2.f32 %v14427_v61 }
 0x8cc   :  { %v17960_v36 = vpop.eup %17959  ;;  %17985 = vrcp.f32 %v11593_v8  ;;  %12044 = vrot.lane.b32.xlu0 %v24685_v0, %s18097_s6  ;;  %v11592_v22 = vadd.f32 1.0, %v17958_v52 }
 0x8cd   :  { %v24692_v13 = vpop.eup %17961  ;;  %17987 = vrcp.f32 %v11833_v29  ;;  %v11831_v7 = vadd.f32 1.0, %v17960_v36 }
 0x8ce   :  { %v24694_v62 = vpop.eup %17963  ;;  %17989 = vrcp.f32 %v11594_v39  ;;  %12016 = vrot.lane.b32.xlu1 %v24627_v15, %s18097_s6 }
 0x8cf   :  { %v24698_v60 = vpop.eup %17965  ;;  %17991 = vpow2.f32 %v14426_v32 }
 0x8d0   :  { %v17968_v23 = vpop.eup %17967  ;;  %17993 = vrcp.f32 %v11591_v24  ;;  %12050 = vrot.lane.b32.xlu0 %v24692_v13, %s18097_s6 }
 0x8d1   :  { %v17970_v53 = vpop.eup %17969  ;;  %17995 = vrcp.f32 %v11832_v21  ;;  %v14451_v9 = vmul.f32 -1.442695, %v17968_v23 }
 0x8d2   :  { %v17972_v17 = vpop.eup %17971  ;;  %17997 = vrcp.f32 %v11592_v22  ;;  %12020 = vrot.lane.b32.xlu1 %v24629_v56, %s18097_s6  ;;  %v14448_v6 = vmul.f32 -1.442695, %v17970_v53 }
 0x8d3   :  { %v17974_v51 = vpop.eup %17973  ;;  %17999 = vrcp.f32 %v11815_v55  ;;  %v14449_v2 = vmul.f32 -1.442695, %v17972_v17 }
 0x8d4   :  { %v17976_v18 = vpop.eup %17975  ;;  %18001 = vrcp.f32 %v11831_v7  ;;  %v14450_v43 = vmul.f32 -1.442695, %v17974_v51  ;;  %12048 = vrot.lane.b32.xlu0 %v24694_v62, %s18097_s6 }
 0x8d5   :  { %v17978_v14 = vpop.eup %17977  ;;  %18003 = vpow2.f32 %v14451_v9  ;;  %v11829_v25 = vadd.f32 1.0, %v17976_v18 }
 0x8d6   :  { %v24709_v19 = vpop.eup %17979  ;;  %18005 = vpow2.f32 %v14450_v43  ;;  %12052 = vrot.lane.b32.xlu1 %v24698_v60, %s18097_s6  ;;  %v14446_v35 = vmul.f32 -1.442695, %v17978_v14 }
 0x8d7   :  { %v17982_v59 = vpop.eup %17981  ;;  %18007 = vrcp.f32 %v11814_v40 }
 0x8d8   :  { %v17984_v58 = vpop.eup %17983  ;;  %18009 = vpow2.f32 %v14448_v6  ;;  %12054 = vrot.lane.b32.xlu0 %v24709_v19, %s18097_s6  ;;  %v14447_v38 = vmul.f32 -1.442695, %v17982_v59 }
 0x8d9   :  { %v17986_v34 = vpop.eup %17985  ;;  %18011 = vrcp.f32 %v11830_v3  ;;  %v11828_v48 = vadd.f32 1.0, %v17984_v58 }
 0x8da   :  { %v24716_v11 = vpop.eup %17987  ;;  %18013 = vpow2.f32 %v14449_v2  ;;  %12004 = vrot.lane.b32.xlu1 %v24576_v10, %s18097_s6  ;;  %v14444_v31 = vmul.f32 -1.442695, %v17986_v34 }
 0x8db   :  { %v17990_v4 = vpop.eup %17989  ;;  %18015 = vrcp.f32 %v11813_v44  ;;  %v14453_v44 = vld [vmem:[%s25099_s7 + $0x38] sm:$0xff] }
 0x8dc   :  { %v17992_v37 = vpop.eup %17991  ;;  %18017 = vpow2.f32 %v14446_v35  ;;  %12036 = vrot.lane.b32.xlu0 %v24716_v11, %s18097_s6  ;;  %v14445_v57 = vmul.f32 -1.442695, %v17990_v4  ;;  %12189 = vmatprep.mubr.f32.mxu0 %v14453_v44 }
 0x8dd   :  { %v17994_v54 = vpop.eup %17993  ;;  %18019 = vrcp.f32 %v11829_v25  ;;  %v11827_v29 = vadd.f32 1.0, %v17992_v37 }
 0x8de   :  { %v24723_v16 = vpop.eup %17995  ;;  %18021 = vpow2.f32 %v14447_v38  ;;  %12002 = vrot.lane.b32.xlu1 %v24569_v20, %s18097_s6  ;;  %v14442_v8 = vmul.f32 -1.442695, %v17994_v54 }
 0x8df   :  { %v17998_v61 = vpop.eup %17997  ;;  %18023 = vrcp.f32 %v11812_v47 }
 0x8e0   :  { %v24728_v46 = vpop.eup %17999  ;;  %18025 = vpow2.f32 %v14444_v31  ;;  %12034 = vrot.lane.b32.xlu0 %v24723_v16, %s18097_s6  ;;  %v14443_v52 = vmul.f32 -1.442695, %v17998_v61 }
 0x8e1   :  { %v24732_v26 = vpop.eup %18001  ;;  %18027 = vrcp.f32 %v11828_v48 }
 0x8e2   :  { %v18004_v39 = vpop.eup %18003  ;;  %18029 = vpow2.f32 %v14445_v57  ;;  %12000 = vrot.lane.b32.xlu1 %v24728_v46, %s18097_s6 }
 0x8e3   :  { %v18006_v32 = vpop.eup %18005  ;;  %18031 = vrcp.f32 %v11811_v42  ;;  %v11852_v22 = vadd.f32 1.0, %v18004_v39 }
 0x8e4   :  { %v24736_v28 = vpop.eup %18007  ;;  %18033 = vpow2.f32 %v14442_v8  ;;  %v11851_v36 = vadd.f32 1.0, %v18006_v32  ;;  %12032 = vrot.lane.b32.xlu0 %v24732_v26, %s18097_s6 }
 0x8e5   :  { %v18010_v24 = vpop.eup %18009  ;;  %18035 = vrcp.f32 %v11827_v29 }
 0x8e6   :  { %v24740_v21 = vpop.eup %18011  ;;  %18037 = vpow2.f32 %v14443_v52  ;;  %11998 = vrot.lane.b32.xlu1 %v24736_v28, %s18097_s6  ;;  %v11849_v7 = vadd.f32 1.0, %v18010_v24 }
 0x8e7   :  { %v18014_v55 = vpop.eup %18013  ;;  %18039 = vrcp.f32 %v11851_v36 }
 0x8e8   :  { %v24744_v23 = vpop.eup %18015  ;;  %12030 = vrot.lane.b32.xlu0 %v24740_v21, %s18097_s6  ;;  %v11850_v17 = vadd.f32 1.0, %v18014_v55  ;;  %18041 = vrcp.f32 %v11852_v22 }
 0x8e9   :  { %v18018_v53 = vpop.eup %18017  ;;  %18043 = vrcp.f32 %v11849_v7 }
 0x8ea   :  { %v24748_v9 = vpop.eup %18019  ;;  %11996 = vrot.lane.b32.xlu1 %v24744_v23, %s18097_s6  ;;  %v11847_v18 = vadd.f32 1.0, %v18018_v53  ;;  %18045 = vrcp.f32 %v11850_v17 }
 0x8eb   :  { %v18022_v51 = vpop.eup %18021 }
 0x8ec   :  { %v24752_v40 = vpop.eup %18023  ;;  %12028 = vrot.lane.b32.xlu0 %v24748_v9, %s18097_s6  ;;  %v11848_v14 = vadd.f32 1.0, %v18022_v51  ;;  %18047 = vrcp.f32 %v11847_v18 }
 0x8ed   :  { %v18026_v6 = vpop.eup %18025 }
 0x8ee   :  { %v24756_v43 = vpop.eup %18027  ;;  %11994 = vrot.lane.b32.xlu1 %v24752_v40, %s18097_s6  ;;  %v11845_v59 = vadd.f32 1.0, %v18026_v6  ;;  %18049 = vrcp.f32 %v11848_v14 }
 0x8ef   :  { %v18030_v3 = vpop.eup %18029 }
 0x8f0   :  { %v24760_v2 = vpop.eup %18031  ;;  %12026 = vrot.lane.b32.xlu0 %v24756_v43, %s18097_s6  ;;  %v11846_v34 = vadd.f32 1.0, %v18030_v3  ;;  %18051 = vrcp.f32 %v11845_v59 }
 0x8f1   :  { %v18034_v58 = vpop.eup %18033 }
 0x8f2   :  { %v24767_v35 = vpop.eup %18035  ;;  %11992 = vrot.lane.b32.xlu1 %v24760_v2, %s18097_s6  ;;  %v11843_v38 = vadd.f32 1.0, %v18034_v58  ;;  %18053 = vrcp.f32 %v11846_v34 }
 0x8f3   :  { %v18038_v25 = vpop.eup %18037 }
 0x8f4   :  { %12024 = vrot.lane.b32.xlu0 %v24767_v35, %s18097_s6  ;;  %v24773_v4 = vpop.eup %18039  ;;  %v11844_v47 = vadd.f32 1.0, %v18038_v25  ;;  %18055 = vrcp.f32 %v11843_v38 }
 0x8f5   :  { %v24777_v37 = vpop.eup %18041 }
 0x8f6   :  { %12072 = vrot.lane.b32.xlu1 %v24773_v4, %s18097_s6  ;;  %v24781_v31 = vpop.eup %18043  ;;  %18057 = vrcp.f32 %v11844_v47 }
 0x8f7   :  { %v24785_v54 = vpop.eup %18045 }
 0x8f8   :  { %12074 = vrot.lane.b32.xlu0 %v24777_v37, %s18097_s6 }
 0x8f9   :  { %v24789_v48 = vpop.eup %18047 }
 0x8fa   :  { %12068 = vrot.lane.b32.xlu1 %v24781_v31, %s18097_s6 }
 0x8fb   :  { %v24793_v57 = vpop.eup %18049 }
 0x8fc   :  { %12070 = vrot.lane.b32.xlu0 %v24785_v54, %s18097_s6 }
 0x8fd   :  { %v24797_v61 = vpop.eup %18051 }
 0x8fe   :  { %12064 = vrot.lane.b32.xlu1 %v24789_v48, %s18097_s6  ;;  %26623 = vst [vmem:[#allocation199_spill] sm:$0xff] %v24797_v61 }
 0x8ff   :  { %v24801_v42 = vpop.eup %18053 }
 0x900   :  { %12066 = vrot.lane.b32.xlu0 %v24793_v57, %s18097_s6 }
 0x901   :  { %v24805_v8 = vpop.eup %18055 }
 0x902   :  { %12060 = vrot.lane.b32.xlu1 %v24797_v61, %s18097_s6  ;;  %26624 = vst [vmem:[#allocation182_spill] sm:$0xff] %v24805_v8 }
 0x903   :  { %v24809_v29 = vpop.eup %18057 }
 0x904   :  { %12062 = vrot.lane.b32.xlu0 %v24801_v42, %s18097_s6  ;;  %26625 = vst [vmem:[#allocation173_spill] sm:$0xff] %v24809_v29 }
 0x906   :  { %12056 = vrot.lane.b32.xlu1 %v24805_v8, %s18097_s6 }
 0x908   :  { %12058 = vrot.lane.b32.xlu0 %v24809_v29, %s18097_s6 }
 0x928   :  { %v12007_v39 = vpop.permute.xlu1 %12006 }
 0x92a   :  { %v12023_v52 = vpop.permute.xlu0 %12022 }
 0x92c   :  { %v12011_v32 = vpop.permute.xlu1 %12010 }
 0x92e   :  { %v12039_v36 = vpop.permute.xlu0 %12038 }
 0x930   :  { %v12009_v24 = vpop.permute.xlu1 %12008 }
 0x932   :  { %v12043_v22 = vpop.permute.xlu0 %12042 }
 0x934   :  { %v12015_v55 = vpop.permute.xlu1 %12014 }
 0x936   :  { %v12041_v7 = vpop.permute.xlu0 %12040 }
 0x938   :  { %v12013_v53 = vpop.permute.xlu1 %12012 }
 0x93a   :  { %v12047_v17 = vpop.permute.xlu0 %12046 }
 0x93c   :  { %v12019_v51 = vpop.permute.xlu1 %12018 }
 0x93e   :  { %v12045_v18 = vpop.permute.xlu0 %12044 }
 0x940   :  { %v12017_v6 = vpop.permute.xlu1 %12016 }
 0x942   :  { %v12051_v14 = vpop.permute.xlu0 %12050 }
 0x944   :  { %v12021_v3 = vpop.permute.xlu1 %12020 }
 0x946   :  { %v12049_v59 = vpop.permute.xlu0 %12048 }
 0x948   :  { %v12053_v44 = vpop.permute.xlu1 %12052 }
 0x94a   :  { %v12055_v58 = vpop.permute.xlu0 %12054 }
 0x94b   :  { %15334 = vmatprep.subr.mxu0 %v12055_v58 }
 0x94c   :  { %v12005_v34 = vpop.permute.xlu1 %12004  ;;  %15335 = vmatpush3.msra.mxu0 %v12023_v52 }
 0x94d   :  { %15336 = vmatprep.subr.mxu0 %v12053_v44 }
 0x94e   :  { %v12037_v25 = vpop.permute.xlu0 %12036  ;;  %15337 = vmatpush3.msra.mxu0 %v12021_v3 }
 0x94f   :  { %15338 = vmatprep.subr.mxu0 %v12051_v14 }
 0x950   :  { %v12003_v38 = vpop.permute.xlu1 %12002  ;;  %15339 = vmatpush3.msra.mxu0 %v12019_v51 }
 0x951   :  { %15340 = vmatprep.subr.mxu0 %v12049_v59 }
 0x952   :  { %v12035_v47 = vpop.permute.xlu0 %12034  ;;  %15341 = vmatpush3.msra.mxu0 %v12017_v6 }
 0x953   :  { %15342 = vmatprep.subr.mxu0 %v12047_v17 }
 0x954   :  { %v12001_v8 = vpop.permute.xlu1 %12000  ;;  %15343 = vmatpush3.msra.mxu0 %v12015_v55 }
 0x955   :  { %15344 = vmatprep.subr.mxu0 %v12045_v18 }
 0x956   :  { %v12033_v29 = vpop.permute.xlu0 %12032  ;;  %15345 = vmatpush3.msra.mxu0 %v12013_v53 }
 0x957   :  { %15346 = vmatprep.subr.mxu0 %v12043_v22  ;;  %v14454_v22 = vld [vmem:[%s25099_s7 + $0x40] sm:$0xff] }
 0x958   :  { %v11999_v61 = vpop.permute.xlu1 %11998  ;;  %15347 = vmatpush3.msra.mxu0 %v12011_v32 }
 0x959   :  { %15348 = vmatprep.subr.mxu0 %v12041_v7 }
 0x95a   :  { %v12031_v52 = vpop.permute.xlu0 %12030  ;;  %15349 = vmatpush3.msra.mxu0 %v12009_v24 }
 0x95b   :  { %15350 = vmatprep.subr.mxu0 %v12039_v36  ;;  %v14455_v36 = vld [vmem:[%s25099_s7 + $0x48] sm:$0xf] }
 0x95c   :  { %v11997_v3 = vpop.permute.xlu1 %11996  ;;  %15351 = vmatpush3.msra.mxu0 %v12007_v39  ;;  %v14452_v39 = vld [vmem:[%s25099_s7 + $0x30] sm:$0xff] }
 0x95d   :  { %15352 = vmatprep.subr.mxu0 %v12037_v25  ;;  %v11938_v25 = vld [vmem:[%s25099_s7 + $0x8] sm:$0xff] }
 0x95e   :  { %v12029_v51 = vpop.permute.xlu0 %12028  ;;  %15353 = vmatpush3.msra.mxu0 %v12005_v34  ;;  %v14457_v34 = vld [vmem:[%s25099_s7 + $0x58] sm:$0xf] }
 0x95f   :  { %15354 = vmatprep.subr.mxu0 %v12035_v47  ;;  %v12441_v47 = vld [vmem:[%s25101_s9 + $0x60] sm:$0xff] }
 0x960   :  { %v11995_v6 = vpop.permute.xlu1 %11994  ;;  %15355 = vmatpush3.msra.mxu0 %v12003_v38  ;;  %v12440_v38 = vld [vmem:[%s25101_s9 + $0x58] sm:$0xff] }
 0x961   :  { %15356 = vmatprep.subr.mxu0 %v12033_v29  ;;  %v14456_v29 = vld [vmem:[%s25099_s7 + $0x50] sm:$0xf] }
 0x962   :  { %v12027_v55 = vpop.permute.xlu0 %12026  ;;  %15357 = vmatpush3.msra.mxu0 %v12001_v8 }
 0x963   :  { %15358 = vmatprep.subr.mxu0 %v12031_v52  ;;  %v12442_v52 = vld [vmem:[%s25101_s9 + $0x68] sm:$0xff] }
 0x964   :  { %v11993_v53 = vpop.permute.xlu1 %11992  ;;  %15359 = vmatpush3.msra.mxu0 %v11999_v61 }
 0x965   :  { %15360 = vmatprep.subr.mxu0 %v12029_v51  ;;  %v12444_v51 = vld [vmem:[%s25101_s9 + $0x78] sm:$0xff] }
 0x966   :  { %v12025_v32 = vpop.permute.xlu0 %12024  ;;  %15361 = vmatpush3.msra.mxu0 %v11997_v3  ;;  %v12443_v3 = vld [vmem:[%s25101_s9 + $0x70] sm:$0xff] }
 0x967   :  { %15362 = vmatprep.subr.mxu0 %v12027_v55  ;;  %v24978_v55 = vld [vmem:[%s25104_s12] sm:$0x3] }
 0x968   :  { %v12073_v24 = vpop.permute.xlu1 %12072  ;;  %15363 = vmatpush3.msra.mxu0 %v11995_v6  ;;  %v18098_v6 = vmov 0.0  }
 0x969   :  { %15364 = vmatprep.subr.mxu0 %v12025_v32 }
 0x96a   :  { %15365 = vmatpush3.msra.mxu0 %v11993_v53  ;;  %v12075_v8 = vpop.permute.xlu0 %12074 }
 0x96b   :  { %12190 = vmatmul.mubr.f32.vlgmr.msra.gmra.mxu0 %v14452_v39  ;;  %16860 = vmatprep.subr.mxu0 %v12075_v8 }
 0x96c   :  { %v12069_v61 = vpop.permute.xlu1 %12068  ;;  %16861 = vmatpush3.msra.mxu0 %v12075_v8  ;;  %12194 = vmatprep.mubr.f32.mxu0 %v14456_v29 }
 0x96d   :  { %16862 = vmatprep.subr.mxu0 %v12073_v24 }
 0x96e   :  { %v12071_v7 = vpop.permute.xlu0 %12070  ;;  %16863 = vmatpush3.msra.mxu0 %v12073_v24 }
 0x96f   :  { %16864 = vmatprep.subr.mxu0 %v12071_v7  ;;  %12195 = vmatmul.mubr.f32.gmra.mxu0 %v14455_v36 }
 0x970   :  { %v12065_v17 = vpop.permute.xlu1 %12064  ;;  %16865 = vmatpush3.msra.mxu0 %v12071_v7  ;;  %16880 = vmatprep.mubr.msk.f32.mxu0 %vm12118_vm3, %v14454_v22 }
 0x971   :  { %16866 = vmatprep.subr.mxu0 %v12069_v61 }
 0x972   :  { %v12067_v18 = vpop.permute.xlu0 %12066  ;;  %16867 = vmatpush3.msra.mxu0 %v12069_v61 }
 0x973   :  { %16868 = vmatprep.subr.mxu0 %v12067_v18 }
 0x974   :  { %16869 = vmatpush3.msra.mxu0 %v12067_v18  ;;  %v12061_v14 = vpop.permute.xlu1 %12060 }
 0x975   :  { %16870 = vmatprep.subr.mxu0 %v12065_v17 }
 0x976   :  { %v12063_v59 = vpop.permute.xlu0 %12062  ;;  %16871 = vmatpush3.msra.mxu0 %v12065_v17 }
 0x977   :  { %16872 = vmatprep.subr.mxu0 %v12063_v59 }
 0x978   :  { %16873 = vmatpush3.msra.mxu0 %v12063_v59  ;;  %v12057_v58 = vpop.permute.xlu1 %12056 }
 0x979   :  { %16874 = vmatprep.subr.mxu0 %v12061_v14 }
 0x97a   :  { %v12059_v44 = vpop.permute.xlu0 %12058  ;;  %16875 = vmatpush3.msra.mxu0 %v12061_v14 }
 0x97b   :  { %16876 = vmatprep.subr.mxu0 %v12059_v44 }
 0x97c   :  { %16877 = vmatpush3.msra.mxu0 %v12059_v44  ;;  %v12460_v44 = vld [vmem:[%s25102_s10 + $0x78] sm:$0xff] }
 0x97d   :  { %16878 = vmatprep.subr.mxu0 %v12057_v58 }
 0x97e   :  { %16879 = vmatpush3.msra.mxu0 %v12057_v58 }
 0x97f   :  { %16881 = vmatmul.mubr.msk.f32.vlgmr.msra.gmra.mxu0 %vm12118_vm3, %v14457_v34  ;;  %15384 = vmatprep.subr.mxu0 %v24709_v19  ;;  %v12459_v34 = vld [vmem:[%s25102_s10 + $0x70] sm:$0xff] }
 0x980   :  { %15385 = vmatpush3.msra.mxu0 %v24653_v1  ;;  %12343 = vmatprep.mubr.f32.mxu0 %v11938_v25 }
 0x981   :  { %15386 = vmatprep.subr.mxu0 %v24698_v60 }
 0x982   :  { %15387 = vmatpush3.msra.mxu0 %v24629_v56  ;;  %v12429_v56 = vld [vmem:[%s25101_s9] sm:$0xff] }
 0x983   :  { %15388 = vmatprep.subr.mxu0 %v24692_v13  ;;  %16908 = vmatprep.mubr.msk.f32.mxu1 %vm12463_vm4, %v12429_v56 }
 0x984   :  { %15389 = vmatpush3.msra.mxu0 %v24624_v49  ;;  %v11942_v49 = vld [vmem:[%s25099_s7 + $0x28] sm:$0xf] }
 0x985   :  { %15390 = vmatprep.subr.mxu0 %v24694_v62 }
 0x986   :  { %15391 = vmatpush3.msra.mxu0 %v24627_v15  ;;  %v26628_v15 = vld [vmem:[#allocation182_spill] sm:$0xff] }
 0x987   :  { %15392 = vmatprep.subr.mxu0 %v24678_v12 }
 0x988   :  { %15393 = vmatpush3.msra.mxu0 %v24598_v50  ;;  %v26626_v50 = vld [vmem:[#allocation199_spill] sm:$0xff] }
 0x989   :  { %15394 = vmatprep.subr.mxu0 %v24685_v0 }
 0x98a   :  { %15395 = vmatpush3.msra.mxu0 %v24621_v30  ;;  %v26627_v30 = vld [vmem:[#allocation173_spill] sm:$0xff] }
 0x98b   :  { %15396 = vmatprep.subr.mxu0 %v24663_v5 }
 0x98c   :  { %15397 = vmatpush3.msra.mxu0 %v24594_v27  ;;  %v11940_v27 = vld [vmem:[%s25099_s7 + $0x18] sm:$0xf] }
 0x98d   :  { %15398 = vmatprep.subr.mxu0 %v24669_v41 }
 0x98e   :  { %15399 = vmatpush3.msra.mxu0 %v24596_v45  ;;  %v11939_v45 = vld [vmem:[%s25099_s7 + $0x10] sm:$0xff] }
 0x98f   :  { %15400 = vmatprep.subr.mxu0 %v24658_v63 }
 0x990   :  { %15401 = vmatpush3.msra.mxu0 %v24649_v33 }
 0x991   :  { %15402 = vmatprep.subr.mxu0 %v24716_v11 }
 0x992   :  { %15403 = vmatpush3.msra.mxu0 %v24576_v10  ;;  %v11941_v10 = vld [vmem:[%s25099_s7 + $0x20] sm:$0xf] }
 0x993   :  { %15404 = vmatprep.subr.mxu0 %v24723_v16 }
 0x994   :  { %15405 = vmatpush3.msra.mxu0 %v24569_v20  ;;  %v11937_v20 = vld [vmem:[%s25099_s7] sm:$0xff] }
 0x995   :  { %15406 = vmatprep.subr.mxu0 %v24732_v26 }
 0x996   :  { %15407 = vmatpush3.msra.mxu0 %v24728_v46 }
 0x997   :  { %15408 = vmatprep.subr.mxu0 %v24740_v21  ;;  %v12427_v21 = vld [vmem:[%s25100_s8] sm:$0xff] }
 0x998   :  { %15409 = vmatpush3.msra.mxu0 %v24736_v28 }
 0x999   :  { %15410 = vmatprep.subr.mxu0 %v24748_v9 }
 0x99a   :  { %15411 = vmatpush3.msra.mxu0 %v24744_v23 }
 0x99b   :  { %15412 = vmatprep.subr.mxu0 %v24756_v43  ;;  %v12430_v43 = vld [vmem:[%s25101_s9 + $0x8] sm:$0xff] }
 0x99c   :  { %15413 = vmatpush3.msra.mxu0 %v24752_v40 }
 0x99d   :  { %15414 = vmatprep.subr.mxu0 %v24767_v35  ;;  %v12432_v35 = vld [vmem:[%s25101_s9 + $0x18] sm:$0xff] }
 0x99e   :  { %15415 = vmatpush3.msra.mxu0 %v24760_v2  ;;  %v12431_v2 = vld [vmem:[%s25101_s9 + $0x10] sm:$0xff] }
 0x99f   :  { %12344 = vmatmul.mubr.f32.vlgmr.msra.gmra.mxu0 %v11937_v20  ;;  %16883 = vmatprep.subr.mxu0 %v24777_v37  ;;  %v12458_v20 = vld [vmem:[%s25102_s10 + $0x68] sm:$0xff] }
 0x9a0   :  { %16884 = vmatpush3.msra.mxu0 %v24777_v37  ;;  %12348 = vmatprep.mubr.f32.mxu0 %v11941_v10  ;;  %v12434_v37 = vld [vmem:[%s25101_s9 + $0x28] sm:$0xff] }
 0x9a1   :  { %16885 = vmatprep.subr.mxu0 %v24773_v4 }
 0x9a2   :  { %16886 = vmatpush3.msra.mxu0 %v24773_v4  ;;  %v12433_v4 = vld [vmem:[%s25101_s9 + $0x20] sm:$0xff] }
 0x9a3   :  { %16887 = vmatprep.subr.mxu0 %v24785_v54  ;;  %12349 = vmatmul.mubr.f32.gmra.mxu0 %v11940_v27 }
 0x9a4   :  { %16888 = vmatpush3.msra.mxu0 %v24785_v54  ;;  %16903 = vmatprep.mubr.msk.f32.mxu0 %vm12118_vm3, %v11939_v45  ;;  %v12436_v54 = vld [vmem:[%s25101_s9 + $0x38] sm:$0xff]  ;;  %v12457_v45 = vld [vmem:[%s25102_s10 + $0x60] sm:$0xff] }
 0x9a5   :  { %16889 = vmatprep.subr.mxu0 %v24781_v31 }
 0x9a6   :  { %16890 = vmatpush3.msra.mxu0 %v24781_v31  ;;  %v12435_v31 = vld [vmem:[%s25101_s9 + $0x30] sm:$0xff] }
 0x9a7   :  { %16891 = vmatprep.subr.mxu0 %v24793_v57 }
 0x9a8   :  { %16892 = vmatpush3.msra.mxu0 %v24793_v57  ;;  %v12438_v57 = vld [vmem:[%s25101_s9 + $0x48] sm:$0xff] }
 0x9a9   :  { %16893 = vmatprep.subr.mxu0 %v24789_v48 }
 0x9aa   :  { %16894 = vmatpush3.msra.mxu0 %v24789_v48  ;;  %v12437_v48 = vld [vmem:[%s25101_s9 + $0x40] sm:$0xff] }
 0x9ab   :  { %16895 = vmatprep.subr.mxu0 %v24801_v42 }
 0x9ac   :  { %16896 = vmatpush3.msra.mxu0 %v24801_v42  ;;  %v12439_v42 = vld [vmem:[%s25101_s9 + $0x50] sm:$0xff] }
 0x9ad   :  { %16897 = vmatprep.subr.mxu0 %v26626_v50 }
 0x9ae   :  { %16898 = vmatpush3.msra.mxu0 %v26626_v50 }
 0x9af   :  { %16899 = vmatprep.subr.mxu0 %v26627_v30 }
 0x9b0   :  { %16900 = vmatpush3.msra.mxu0 %v26627_v30  ;;  %v12456_v30 = vld [vmem:[%s25102_s10 + $0x58] sm:$0xff] }
 0x9b1   :  { %16901 = vmatprep.subr.mxu0 %v26628_v15 }
 0x9b2   :  { %16902 = vmatpush3.msra.mxu0 %v26628_v15  ;;  %v12455_v15 = vld [vmem:[%s25102_s10 + $0x50] sm:$0xff] }
 0x9b3   :  { %16904 = vmatmul.mubr.msk.f32.vlgmr.msra.gmra.mxu0 %vm12118_vm3, %v11942_v49  ;;  %16932 = vmatprep.subr.mxu0 %v18098_v6 }
 0x9b4   :  { %16964 = vmatprep.mubr.msk.f32.mxu0 %vm18099_vm6, %v18098_v6 }
 0xa2b   :  { %v15366_v33 = vpop.f32.mrf.mxu0 }
 0xa2d   :  { %v15367_v1 = vpop.f32.mrf.mxu0 }
 0xa2e   :  { %v15368_v63 = vadd.f32 %v15367_v1, %v15366_v33  ;;  %v12454_v33 = vld [vmem:[%s25102_s10 + $0x48] sm:$0xff] }
 0xa2f   :  { %v15369_v5 = vpop.f32.mrf.mxu0 }
 0xa31   :  { %v15370_v41 = vpop.f32.mrf.mxu0 }
 0xa32   :  { %v12452_v41 = vld [vmem:[%s25102_s10 + $0x38] sm:$0xff] }
 0xa3f   :  { %v16882_v12 = vpop.f32.mrf.mxu0 }
 0xa41   :  { %v12265_v0 = vpop.f32.mrf.mxu0 }
 0xa42   :  { %v12266_v16 = vadd.f32 %v15368_v63, %v12265_v0  ;;  %v12453_v63 = vld [vmem:[%s25102_s10 + $0x40] sm:$0xff]  ;;  %v12451_v0 = vld [vmem:[%s25102_s10 + $0x30] sm:$0xff] }
 0xa5f   :  { %v15416_v13 = vpop.f32.mrf.mxu0 }
 0xa61   :  { %v15417_v62 = vpop.f32.mrf.mxu0 }
 0xa62   :  { %v15418_v11 = vadd.f32 %v15417_v62, %v15416_v13  ;;  %v12450_v62 = vld [vmem:[%s25102_s10 + $0x28] sm:$0xff] }
 0xa63   :  { %v15419_v60 = vpop.f32.mrf.mxu0 }
 0xa64   :  { %v12346_v26 = vadd.f32 %v15418_v11, %v12266_v16  ;;  %v12448_v16 = vld [vmem:[%s25102_s10 + $0x18] sm:$0xff] }
 0xa65   :  { %v15420_v19 = vpop.f32.mrf.mxu0 }
 0xa66   :  { %v12449_v19 = vld [vmem:[%s25102_s10 + $0x20] sm:$0xff] }
 0xa73   :  { %v16905_v46 = vpop.f32.mrf.mxu0 }
 0xa75   :  { %v12419_v28 = vpop.f32.mrf.mxu0 }
 0xa76   :  { %v12420_v23 = vadd.f32 %v12419_v28, %v12346_v26  ;;  %v12447_v26 = vld [vmem:[%s25102_s10 + $0x10] sm:$0xff] }
 0xa78   :  { %v12428_v9 = vadd.f32 %v12427_v21, %v12420_v23  ;;  %v12446_v21 = vld [vmem:[%s25102_s10 + $0x8] sm:$0xff] }
 0xa7a   :  { %v12462_v40 = vrot.slane %v12428_v9, 4  ;;  %v12445_v9 = vld [vmem:[%s25102_s10] sm:$0xff] }
 0xa7c   :  { %16906 = vmatprep.subr.msk.mxu1 %vm12512_vm5, %v12462_v40 }
 0xa7d   :  { %16907 = vmatpush3.msk.msra.mxu1 %vm12512_vm5, %v12462_v40 }
 0xa7e   :  { %16909 = vmatmul.mubr.msk.f32.vlgmr.msra.gmra.mxu1 %vm12463_vm4, %v12430_v43  ;;  %16967 = vmatprep.subr.mxu1 %v18098_v6 }
 0xa7f   :  { %16911 = vmatprep.mubr.msk.f32.mxu1 %vm12463_vm4, %v12431_v2  ;;  %16968 = vmatpush3.msk.msra.mxu1 %vm12512_vm5, %v24978_v55  ;;  %v12661_v2 = vld [vmem:[%s25103_s11] sm:$0x3] }
 0xa80   :  { %16977 = vmatprep.subr.mxu1 %v18098_v6 }
 0xa82   :  { %16912 = vmatmul.mubr.msk.f32.gmra.mxu1 %vm12463_vm4, %v12432_v35  ;;  %v14479_v35 = vld [vmem:[%s25105_s13 + $0x8] sm:$0x3] }
 0xa83   :  { %16914 = vmatprep.mubr.msk.f32.mxu1 %vm12463_vm4, %v12433_v4  ;;  %v14486_v4 = vld [vmem:[%s25105_s13 + $0x6] sm:$0x3] }
 0xa86   :  { %16915 = vmatmul.mubr.msk.f32.gmra.mxu1 %vm12463_vm4, %v12434_v37 }
 0xa87   :  { %16917 = vmatprep.mubr.msk.f32.mxu1 %vm12463_vm4, %v12435_v31 }
 0xa8a   :  { %16918 = vmatmul.mubr.msk.f32.gmra.mxu1 %vm12463_vm4, %v12436_v54  ;;  %v14482_v54 = vld [vmem:[%s25105_s13 + $0xa] sm:$0x3]  ;;  %s18100_s13 = smov 1  }
 0xa8b   :  { %16920 = vmatprep.mubr.msk.f32.mxu1 %vm12463_vm4, %v12437_v48 }
 0xa8e   :  { %16921 = vmatmul.mubr.msk.f32.gmra.mxu1 %vm12463_vm4, %v12438_v57  ;;  %v12733_v57 = vld [vmem:[%s25106_s14] sm:$0x3]  ;;  %s18101_s14 = smov [#allocation2]  }
 0xa8f   :  { %16923 = vmatprep.mubr.msk.f32.mxu1 %vm12463_vm4, %v12439_v42  ;;  %s13065_s1 = sshll.u32 %s18101_s14, 4  ;;  %s13066_s1 = int_to_ptr.vmem [resolvable:$true] %s13065_s1 }
 0xa90   :  { %s18074_s2 = scalar_lea.vmem %s13066_s1, 32  ;;  %p18079_p1 = scmp.lt.s32.totalorder %s13066_s1, %s13066_s1 }
 0xa91   :  { %p18075_p0 = scmp.ne.s32.totalorder %s13066_s1, %s18074_s2  ;;  %p18080_p2 = scmp.lt.s32.totalorder %s18074_s2, %s18074_s2 }
 0xa92   :  { %16924 = vmatmul.mubr.msk.f32.gmra.mxu1 %vm12463_vm4, %v12440_v38 }
 0xa93   :  { %16926 = vmatprep.mubr.msk.f32.mxu1 %vm12463_vm4, %v12441_v47  ;;  %p18081_p3 = por %p18080_p2, %p18079_p1 }
 0xa95   :  { %p18082_p4 = pnand %p18081_p3, %p18075_p0 }
 0xa96   :  { %16927 = vmatmul.mubr.msk.f32.gmra.mxu1 %vm12463_vm4, %v12442_v52 }
 0xa97   :  { %16929 = vmatprep.mubr.msk.f32.mxu1 %vm12463_vm4, %v12443_v3 }
 0xa9a   :  { %16930 = vmatmul.mubr.msk.f32.gmra.mxu1 %vm12463_vm4, %v12444_v51 }
 0xa9b   :  { %16969 = vmatprep.mubr.msk.f32.mxu1 %vm18099_vm6, %v18098_v6 }
 0xa9e   :  { %16970 = vmatmul.mubr.msk.f32.vlgmr.msra.gmra.mxu1 %vm12463_vm4, %v14479_v35 }
 0xa9f   :  { %16978 = vmatpush3.msk.msra.mxu1 %vm12512_vm5, %v24978_v55  ;;  %16979 = vmatprep.mubr.msk.f32.mxu1 %vm18099_vm6, %v18098_v6 }
 0xaa2   :  { %16980 = vmatmul.mubr.msk.f32.vlgmr.msra.gmra.mxu1 %vm12463_vm4, %v14486_v4 }
 0xb3e   :  { %v24985_v53 = vpop.f32.mrf.mxu1 }
 0xb3f   :  { %v12587_v40 = vadd.f32 %v24985_v53, %v12446_v21 }
 0xb40   :  { %v24987_v32 = vpop.f32.mrf.mxu1 }
 0xb41   :  { %v12582_v43 = vadd.f32 %v24987_v32, %v12445_v9 }
 0xb42   :  { %v16913_v24 = vpop.f32.mrf.mxu1 }
 0xb43   :  { %v12597_v28 = vadd.f32 %v16913_v24, %v12448_v16 }
 0xb44   :  { %v24989_v39 = vpop.f32.mrf.mxu1 }
 0xb45   :  { %v12592_v23 = vadd.f32 %v24989_v39, %v12447_v26 }
 0xb46   :  { %v16916_v29 = vpop.f32.mrf.mxu1 }
 0xb47   :  { %v12607_v11 = vadd.f32 %v16916_v29, %v12450_v62 }
 0xb48   :  { %v12601_v8 = vpop.f32.mrf.mxu1 }
 0xb49   :  { %v12602_v46 = vadd.f32 %v12601_v8, %v12449_v19 }
 0xb4a   :  { %v16919_v61 = vpop.f32.mrf.mxu1 }
 0xb4b   :  { %v12617_v13 = vadd.f32 %v16919_v61, %v12452_v41 }
 0xb4c   :  { %v12611_v36 = vpop.f32.mrf.mxu1 }
 0xb4d   :  { %v12612_v60 = vadd.f32 %v12611_v36, %v12451_v0 }
 0xb4e   :  { %v16922_v22 = vpop.f32.mrf.mxu1 }
 0xb4f   :  { %v12627_v5 = vadd.f32 %v16922_v22, %v12454_v33 }
 0xb50   :  { %v12621_v7 = vpop.f32.mrf.mxu1 }
 0xb51   :  { %v12622_v12 = vadd.f32 %v12621_v7, %v12453_v63 }
 0xb52   :  { %v16925_v17 = vpop.f32.mrf.mxu1 }
 0xb53   :  { %v12637_v56 = vadd.f32 %v16925_v17, %v12456_v30 }
 0xb54   :  { %v12631_v18 = vpop.f32.mrf.mxu1 }
 0xb55   :  { %v12632_v1 = vadd.f32 %v12631_v18, %v12455_v15 }
 0xb56   :  { %v16928_v14 = vpop.f32.mrf.mxu1 }
 0xb57   :  { %v12647_v50 = vadd.f32 %v16928_v14, %v12458_v20 }
 0xb58   :  { %v12641_v59 = vpop.f32.mrf.mxu1 }
 0xb59   :  { %v12642_v49 = vadd.f32 %v12641_v59, %v12457_v45 }
 0xb5a   :  { %v16931_v58 = vpop.f32.mrf.mxu1 }
 0xb5b   :  { %v12657_v25 = vadd.f32 %v16931_v58, %v12460_v44 }
 0xb5c   :  { %v12651_v10 = vpop.f32.mrf.mxu1 }
 0xb5d   :  { %v12652_v27 = vadd.f32 %v12651_v10, %v12459_v34  ;;  %16933 = vmatpush3.msra.mxu0 %v12657_v25 }
 0xb5e   :  { %16934 = vmatprep.subr.mxu0 %v18098_v6  ;;  %v12808_v42 = vpop.f32.mrf.mxu1 }
 0xb5f   :  { %16935 = vmatpush3.msra.mxu0 %v12652_v27  ;;  %v12812_v38 = vadd.f32 %v12808_v42, %v12733_v57 }
 0xb60   :  { %16936 = vmatprep.subr.mxu0 %v18098_v6  ;;  %v16971_v47 = vpop.f32.mrf.mxu1 }
 0xb61   :  { %16937 = vmatpush3.msra.mxu0 %v12647_v50 }
 0xb62   :  { %16938 = vmatprep.subr.mxu0 %v18098_v6  ;;  %v12969_v52 = vpop.f32.mrf.mxu1 }
 0xb63   :  { %16939 = vmatpush3.msra.mxu0 %v12642_v49  ;;  %v12973_v53 = vadd.f32 %v12969_v52, %v12733_v57 }
 0xb64   :  { %16940 = vmatprep.subr.mxu0 %v18098_v6  ;;  %v16981_v3 = vpop.f32.mrf.mxu1 }
 0xb65   :  { %16941 = vmatpush3.msra.mxu0 %v12637_v56 }
 0xb66   :  { %16942 = vmatprep.subr.mxu0 %v18098_v6 }
 0xb67   :  { %16943 = vmatpush3.msra.mxu0 %v12632_v1 }
 0xb68   :  { %16944 = vmatprep.subr.mxu0 %v18098_v6 }
 0xb69   :  { %16945 = vmatpush3.msra.mxu0 %v12627_v5 }
 0xb6a   :  { %16946 = vmatprep.subr.mxu0 %v18098_v6 }
 0xb6b   :  { %16947 = vmatpush3.msra.mxu0 %v12622_v12 }
 0xb6c   :  { %16948 = vmatprep.subr.mxu0 %v18098_v6 }
 0xb6d   :  { %16949 = vmatpush3.msra.mxu0 %v12617_v13 }
 0xb6e   :  { %16950 = vmatprep.subr.mxu0 %v18098_v6 }
 0xb6f   :  { %16951 = vmatpush3.msra.mxu0 %v12612_v60 }
 0xb70   :  { %16952 = vmatprep.subr.mxu0 %v18098_v6 }
 0xb71   :  { %16953 = vmatpush3.msra.mxu0 %v12607_v11 }
 0xb72   :  { %16954 = vmatprep.subr.mxu0 %v18098_v6 }
 0xb73   :  { %16955 = vmatpush3.msra.mxu0 %v12602_v46 }
 0xb74   :  { %16956 = vmatprep.subr.mxu0 %v18098_v6 }
 0xb75   :  { %16957 = vmatpush3.msra.mxu0 %v12597_v28 }
 0xb76   :  { %16958 = vmatprep.subr.mxu0 %v18098_v6 }
 0xb77   :  { %16959 = vmatpush3.msra.mxu0 %v12592_v23 }
 0xb78   :  { %16960 = vmatprep.subr.mxu0 %v18098_v6 }
 0xb79   :  { %16961 = vmatpush3.msra.mxu0 %v12587_v40 }
 0xb7a   :  { %16962 = vmatprep.subr.mxu0 %v18098_v6 }
 0xb7b   :  { %16963 = vmatpush3.msra.mxu0 %v12582_v43 }
 0xb7c   :  { %16965 = vmatmul.mubr.f32.vlgmr.msra.gmra.mxu0 %v12661_v2  ;;  %16972 = vmatprep.subr.mxu0 %v18098_v6 }
 0xb7d   :  { %16974 = vmatprep.mubr.msk.f32.mxu0 %vm18099_vm6, %v18098_v6 }
 0xc3c   :  { %v12728_v37 = vpop.f32.mrf.mxu0 }
 0xc3d   :  { %v12732_v31 = vadd.f32 %v12728_v37, %v24978_v55 }
 0xc3e   :  { %v16966_v48 = vpop.f32.mrf.mxu0 }
 0xc3f   :  { %16973 = vmatpush3.msk.msra.mxu0 %vm12512_vm5, %v12732_v31 }
 0xc40   :  { %16975 = vmatmul.mubr.msk.f32.vlgmr.msra.gmra.mxu0 %vm12463_vm4, %v14482_v54  ;;  %16982 = vmatprep.subr.mxu0 %v18098_v6 }
 0xc41   :  { %16983 = vmatpush3.msk.msra.mxu0 %vm12512_vm5, %v12732_v31  ;;  %16984 = vmatprep.mubr.msk.f32.mxu0 %vm18099_vm6, %v18098_v6 }
 0xc44   :  { %16985 = vmatmul.mubr.msk.f32.vlgmr.msra.gmra.mxu0 %vm12463_vm4, %v14479_v35 }
 0xd00   :  { %v12887_v51 = vpop.f32.mrf.mxu0 }
 0xd01   :  { %v12891_v55 = vadd.f32 %v12887_v51, %v12812_v38 }
 0xd02   :  { %v16976_v32 = vpop.f32.mrf.mxu0 }
 0xd03   :  { %v14485_v22 = vmul.f32 -1.442695, %v12891_v55 }
 0xd04   :  { %v13040_v24 = vpop.f32.mrf.mxu0 }
 0xd05   :  { %v13044_v39 = vadd.f32 %v13040_v24, %v12973_v53 }
 0xd06   :  { %v16986_v29 = vpop.f32.mrf.mxu0 }
 0xd07   :  { %v14491_v8 = vmul.f32 -1.442695, %v13044_v39 }
 0xd09   :  { %18059 = vpow2.f32 %v14491_v8 }
 0xd16   :  { %v18060_v6 = vpop.eup %18059 }
 0xd17   :  { %v13048_v61 = vadd.f32 1.0, %v18060_v6 }
 0xd19   :  { %18061 = vrcp.f32 %v13048_v61 }
 0xd1a   :  { %18063 = vpow2.f32 %v14485_v22 }
 0xd26   :  { %v18062_v36 = vpop.eup %18061 }
 0xd27   :  { %13052 = vrot.lane.b32.xlu0 %v18062_v36, %s18100_s13  ;;  %v18064_v7 = vpop.eup %18063 }
 0xd28   :  { %v12895_v17 = vadd.f32 1.0, %v18064_v7 }
 0xd2a   :  { %18065 = vrcp.f32 %v12895_v17 }
 0xd37   :  { %v18066_v18 = vpop.eup %18065 }
 0xd99   :  { %v13053_v14 = vpop.permute.xlu0 %13052 }
 0xd9a   :  { %v13056_v59 = vsel %vm13055_vm7, %v18066_v18, %v13053_v14 }
 0xd9b   :  { %13058 = vst.msk [vmem:[#allocation2] sm:$0x3] %vm13057_vm8, %v13056_v59 }
 0xd9c   :  { %18085 = shalt.err (!%p18082_p4)
}
 0xd9d   :  { %13068 = dma.vmem_to_hbm [thread:$0]  %s13066_s1, 32, %s25107_s15, [#allocation3]  }
 0xd9e   :  { %18094 = dma.done.wait [#allocation3], 32  }
 0xd9f   :  { %18095 = vsyncadd [#allocation3], 4294967264 }
 0xda0   :  { %13072 = vsyncpa [#allocation3], 1 }

</bundles_post_ra>
